<compile_context>
chip_gen: v7x
topology: tpu7x:2x2x1
jax: 0.10.0
libtpu: 0.0.40
codegen_flags: <defaults>
</compile_context>

<pallas_src>
import functools

import jax
import jax.numpy as jnp
from jax.experimental import pallas as pl
from jax.experimental.pallas import tpu as pltpu


# ---------------------------------------------------------------------------
# Pallas kernels
# ---------------------------------------------------------------------------
def _fc_kernel(x_ref, w_ref, b_ref, o_ref):
    # x: (B, K) @ w: (K, N) + b: (1, N) -> o: (B, N)
    o_ref[...] = (
        jnp.dot(x_ref[...], w_ref[...], preferred_element_type=jnp.float32)
        + b_ref[...]
    )


def _accumulate_deconv(x_ref, w_ref, o_ref, *, B, H, W):
    """Accumulate the 3 dy taps of the fused deconv into o_ref (raw output).

    x_ref: (B*(H+2)*W, 3*IC)  dx-shifted, zero-padded im2col rows
    w_ref: (3, 3*IC, 4*OC)    per-dy packed weight slabs
    o_ref row b*H*W + i*W + j holds output pixel (b, i, j); column
    (2a+bb)*OC + oc holds sub-pixel (a, bb), channel oc.
    """
    HW = H * W
    row_blk = (H + 2) * W
    for b in range(B):                       # static unroll (B is small)
        acc = None
        for dy in range(3):                  # static unroll over dy taps
            start = b * row_blk + dy * W
            xs = x_ref[start:start + HW, :]                      # (H*W, 3*IC)
            p = jnp.dot(xs, w_ref[dy], preferred_element_type=jnp.float32)
            acc = p if acc is None else acc + p
        o_ref[b * HW:(b + 1) * HW, :] = acc


def _group_reduce4(row, OC):
    # (1, 4*OC) -> (1, OC): sum the four sub-pixel column groups per channel.
    return (row[:, 0:OC] + row[:, OC:2 * OC]
            + row[:, 2 * OC:3 * OC] + row[:, 3 * OC:4 * OC])


def _tile4(row):
    # (1, OC) -> (1, 4*OC): replicate per-channel values to all sub-pixels.
    return jnp.concatenate([row, row, row, row], axis=1)


def _conv_bn_relu_kernel(x_ref, w_ref, gamma_ref, beta_ref, o_ref, *,
                         B, H, W, OC, eps):
    """Fused deconv (3 dy-tap matmuls) + BatchNorm(batch stats) + ReLU."""
    HW = H * W
    _accumulate_deconv(x_ref, w_ref, o_ref, B=B, H=H, W=W)
    y = o_ref[...]                                      # (B*H*W, 4*OC), f32

    inv_n = 1.0 / float(4 * B * HW)                     # B * 2H * 2W per chan
    colsum = jnp.sum(y, axis=0, keepdims=True)          # (1, 4*OC)
    mean = _tile4(_group_reduce4(colsum, OC) * inv_n)   # (1, 4*OC)
    d = y - mean
    colsq = jnp.sum(d * d, axis=0, keepdims=True)       # two-pass variance
    var = _group_reduce4(colsq, OC) * inv_n             # (1, OC)
    scale = _tile4(gamma_ref[...] * jax.lax.rsqrt(var + eps))
    shift = _tile4(beta_ref[...])
    o_ref[...] = jnp.maximum(d * scale + shift, 0.0)


def _conv_bias_kernel(x_ref, w_ref, b_ref, o_ref, *, B, H, W):
    """Final deconv: 3 dy-tap matmuls + bias (no BN / ReLU)."""
    _accumulate_deconv(x_ref, w_ref, o_ref, B=B, H=H, W=W)
    o_ref[...] = o_ref[...] + _tile4(b_ref[...])


# ---------------------------------------------------------------------------
# pallas_call wrapper: one grid step, every operand is a full VMEM block
# (total working set is < 2 MiB at these sizes).
# ---------------------------------------------------------------------------
def _full_block_call(kernel, inputs, out_shape):
    return pl.pallas_call(
        kernel,
        out_shape=out_shape,
        grid_spec=pltpu.PrefetchScalarGridSpec(
            num_scalar_prefetch=0,
            grid=(1,),
            in_specs=[
                pl.BlockSpec(a.shape, lambda i, nd=len(a.shape): (0,) * nd)
                for a in inputs
            ],
            out_specs=pl.BlockSpec(
                out_shape.shape, lambda i, nd=len(out_shape.shape): (0,) * nd
            ),
        ),
        compiler_params=pltpu.CompilerParams(
            dimension_semantics=("arbitrary",)
        ),
    )(*inputs)


# ---------------------------------------------------------------------------
# Layer wrappers (thin: only cheap layout glue lives here)
# ---------------------------------------------------------------------------
def fc_matmul_bias(x, w, b):
    M = x.shape[0]
    N = w.shape[1]
    return _full_block_call(
        _fc_kernel,
        [x.astype(jnp.float32), w, b],
        jax.ShapeDtypeStruct((M, N), jnp.float32),
    )


def _shifted_rows(x_nhwc):
    """(B, H, W, IC) -> (B*(H+2)*W, 3*IC).

    Zero-pad H and W by 1, concatenate the three dx-shifted width-W windows
    along channels; the dy shifts are taken in-kernel as static row slices.
    """
    B, H, W, IC = x_nhwc.shape
    xp = jnp.pad(x_nhwc.astype(jnp.float32), ((0, 0), (1, 1), (1, 1), (0, 0)))
    x3 = jnp.concatenate([xp[:, :, dx:dx + W, :] for dx in range(3)], axis=-1)
    return x3.reshape(B * (H + 2) * W, 3 * IC)


def _interleave_subpixels(y, B, H, W, OC):
    """(B*H*W, 4*OC) -> (B, 2H, 2W, OC); column (2a+bb)*OC+oc -> pixel (2i+a, 2j+bb)."""
    y = y.reshape(B, H, W, 2, 2, OC)
    y = jnp.transpose(y, (0, 1, 3, 2, 4, 5))
    return y.reshape(B, 2 * H, 2 * W, OC)


def conv_transpose_bn_relu(x_nhwc, layer, eps=1e-5):
    B, H, W, _ = x_nhwc.shape
    OC = layer["gamma2"].shape[1]
    X2 = _shifted_rows(x_nhwc)
    kernel = functools.partial(_conv_bn_relu_kernel, B=B, H=H, W=W, OC=OC, eps=eps)
    Y = _full_block_call(
        kernel,
        [X2, layer["w3"], layer["gamma2"], layer["beta2"]],
        jax.ShapeDtypeStruct((B * H * W, 4 * OC), jnp.float32),
    )
    return _interleave_subpixels(Y, B, H, W, OC)


def conv_transpose_bias(x_nhwc, layer):
    B, H, W, _ = x_nhwc.shape
    OC = layer["b2"].shape[1]
    X2 = _shifted_rows(x_nhwc)
    kernel = functools.partial(_conv_bias_kernel, B=B, H=H, W=W)
    Y = _full_block_call(
        kernel,
        [X2, layer["w3"], layer["b2"]],
        jax.ShapeDtypeStruct((B * H * W, 4 * OC), jnp.float32),
    )
    return _interleave_subpixels(Y, B, H, W, OC)


# ---------------------------------------------------------------------------
# One-time parameter preparation (hoisted out of the per-step forward)
# ---------------------------------------------------------------------------
def _pack_deconv_weight(w):
    """PyTorch ConvTranspose2d weight (IC, OC, 4, 4) -> (3, 3*IC, 4*OC).

    y[2i+a, 2j+bb, oc] = sum_{dy,dx in {0,1}, ic}
        xpad[i+dy+a, j+dx+bb, ic] * w[ic, oc, 3-a-2*dy, 3-bb-2*dx]
    Tap (dy2, dx2) = (a+dy, bb+dx) of the 3x3 union feeds output column block
    2a+bb; the unused taps of each sub-pixel stay zero.  Row blocks are grouped
    by dy2 so the kernel can accumulate one matmul per dy tap.
    """
    IC, OC = w.shape[0], w.shape[1]
    w9 = jnp.zeros((9 * IC, 4 * OC), jnp.float32)
    for a in range(2):
        for bb in range(2):
            for dy in range(2):
                for dx in range(2):
                    tap = (a + dy) * 3 + (bb + dx)
                    w9 = w9.at[
                        tap * IC:(tap + 1) * IC,
                        (2 * a + bb) * OC:(2 * a + bb + 1) * OC,
                    ].set(w[:, :, 3 - a - 2 * dy, 3 - bb - 2 * dx])
    return w9.reshape(3, 3 * IC, 4 * OC)


def prepare_params(params):
    """Pack weights once (outside the jitted forward)."""
    c8 = params["convs"][0]["w"].shape[0]
    in_dim, n_fc = params["fc_w"].shape
    # Permute FC columns from NCHW-view order (c, i, j) to NHWC order (i, j, c)
    # so the FC output is already NHWC-flat -> no transpose before conv1.
    fc_w = params["fc_w"].astype(jnp.float32).reshape(in_dim, c8, 4, 4)
    fc_w = jnp.transpose(fc_w, (0, 2, 3, 1)).reshape(in_dim, n_fc)
    fc_b = params["fc_b"].astype(jnp.float32).reshape(c8, 4, 4)
    fc_b = jnp.transpose(fc_b, (1, 2, 0)).reshape(1, n_fc)

    prepared = {"fc_w": fc_w, "fc_b": fc_b, "convs": []}
    n = len(params["convs"])
    for i, layer in enumerate(params["convs"]):
        oc = layer["w"].shape[1]
        entry = {"w3": _pack_deconv_weight(layer["w"].astype(jnp.float32))}
        if i < n - 1:
            # Conv bias dropped: it cancels exactly against the batch mean.
            entry["gamma2"] = layer["gamma"].astype(jnp.float32).reshape(1, oc)
            entry["beta2"] = layer["beta"].astype(jnp.float32).reshape(1, oc)
        else:
            entry["b2"] = layer["b"].astype(jnp.float32).reshape(1, oc)
        prepared["convs"].append(entry)
    return prepared


# ---------------------------------------------------------------------------
# Generator (Pallas) and pure-JAX reference
# ---------------------------------------------------------------------------
def generator_forward(prepared, noise_z, cond):
    x = jnp.concatenate([noise_z, cond], axis=1)                   # (B, in_dim)
    h = fc_matmul_bias(x, prepared["fc_w"], prepared["fc_b"])      # NHWC-flat
    B = x.shape[0]
    c8 = prepared["convs"][0]["w3"].shape[1] // 3
    h = h.reshape(B, 4, 4, c8)                                     # NHWC
    n = len(prepared["convs"])
    for i, layer in enumerate(prepared["convs"]):
        if i < n - 1:
            h = conv_transpose_bn_relu(h, layer)
        else:
            h = conv_transpose_bias(h, layer)
    return jnp.transpose(h, (0, 3, 1, 2))                          # NCHW logits


def reference_forward(params, noise_z, cond, eps=1e-5):
    x = jnp.concatenate([noise_z, cond], axis=1)
    h = x @ params["fc_w"] + params["fc_b"]
    B = x.shape[0]
    c8 = params["convs"][0]["w"].shape[0]
    h = h.reshape(B, c8, 4, 4)  # NCHW
    n = len(params["convs"])
    for i, layer in enumerate(params["convs"]):
        w = layer["w"]                                             # (IC, OC, 4, 4)
        rhs = jnp.transpose(w[:, :, ::-1, ::-1], (1, 0, 2, 3))     # OIHW, flipped
        h = jax.lax.conv_general_dilated(
            h, rhs, window_strides=(1, 1), padding=((2, 2), (2, 2)),
            lhs_dilation=(2, 2),
            dimension_numbers=("NCHW", "OIHW", "NCHW"))
        h = h + layer["b"][None, :, None, None]
        if i < n - 1:
            mean = jnp.mean(h, axis=(0, 2, 3), keepdims=True)
            var = jnp.mean((h - mean) ** 2, axis=(0, 2, 3), keepdims=True)
            h = (h - mean) * jax.lax.rsqrt(var + eps)
            h = h * layer["gamma"][None, :, None, None] + layer["beta"][None, :, None, None]
            h = jnp.maximum(h, 0.0)
    return h


def init_params(key, noise_dim, cond_dim, base_channels, out_channels):
    in_dim = noise_dim + cond_dim
    c8 = base_channels * 8
    keys = jax.random.split(key, 16)
    params = {
        "fc_w": jax.random.normal(keys[0], (in_dim, c8 * 4 * 4), jnp.float32) * 0.05,
        "fc_b": jax.random.normal(keys[1], (c8 * 4 * 4,), jnp.float32) * 0.05,
        "convs": [],
    }
    chans = [c8, base_channels * 4, base_channels * 2, base_channels, out_channels]
    k = 2
    for i in range(4):
        ic, oc = chans[i], chans[i + 1]
        layer = {
            "w": jax.random.normal(keys[k], (ic, oc, 4, 4), jnp.float32) * 0.05,
            "b": jax.random.normal(keys[k + 1], (oc,), jnp.float32) * 0.05,
        }
        k += 2
        if i < 3:  # BatchNorm affine params for the first three blocks
            layer["gamma"] = 1.0 + 0.1 * jax.random.normal(keys[k], (oc,), jnp.float32)
            layer["beta"] = 0.1 * jax.random.normal(keys[k + 1], (oc,), jnp.float32)
            k += 2
        params["convs"].append(layer)
    return params


if __name__ == "__main__":
    # Small shapes consistent with the module's constructor.
    noise_dim, cond_dim, base_channels, out_channels, batch = 16, 8, 8, 4, 2

    key = jax.random.PRNGKey(0)
    kp, kz, kc = jax.random.split(key, 3)
    params = init_params(kp, noise_dim, cond_dim, base_channels, out_channels)
    prepared = prepare_params(params)      # one-time weight packing, not per step
    noise_z = jax.random.normal(kz, (batch, noise_dim), jnp.float32)
    cond = jax.random.normal(kc, (batch, cond_dim), jnp.float32)

    fwd = jax.jit(generator_forward)
    out = jax.block_until_ready(fwd(prepared, noise_z, cond))
    ref = jax.block_until_ready(reference_forward(params, noise_z, cond))

    assert out.shape == (batch, out_channels, 64, 64), out.shape
    max_err = float(jnp.max(jnp.abs(out - ref)))
    assert jnp.allclose(out, ref, atol=1e-3, rtol=1e-3), max_err

    print("KERNEL_OK")
</pallas_src>

<mosaic_0001>
module attributes {stable_mosaic.version = 11 : i64} {
  func.func @_fc_kernel(%arg0: i32, %arg1: memref<2x24xf32, #tpu.memory_space<vmem>>, %arg2: memref<24x1024xf32, #tpu.memory_space<vmem>>, %arg3: memref<1x1024xf32, #tpu.memory_space<vmem>>, %arg4: memref<2x1024xf32, #tpu.memory_space<vmem>>) attributes {dimension_semantics = [#tpu.dimension_semantics<arbitrary>], iteration_bounds = array<i64: 1>, scalar_prefetch = 0 : i64, scratch_operands = 0 : i64, tpu.core_type = #tpu.core_type<tc>, window_params = [{pipeline_mode = #tpu.pipeline_mode<synchronous>, transform_indices = @transform_0, window_bounds = array<i64: 2, 24>}, {pipeline_mode = #tpu.pipeline_mode<synchronous>, transform_indices = @transform_1, window_bounds = array<i64: 24, 1024>}, {pipeline_mode = #tpu.pipeline_mode<synchronous>, transform_indices = @transform_2, window_bounds = array<i64: 1, 1024>}, {pipeline_mode = #tpu.pipeline_mode<synchronous>, transform_indices = @transform_3, window_bounds = array<i64: 2, 1024>}]} {
    %c0 = arith.constant 0 : index
    %c0_0 = arith.constant 0 : index
    %0 = vector.load %arg1[%c0, %c0_0] : memref<2x24xf32, #tpu.memory_space<vmem>>, vector<2x24xf32>
    %c0_1 = arith.constant 0 : index
    %c0_2 = arith.constant 0 : index
    %1 = vector.load %arg2[%c0_1, %c0_2] : memref<24x1024xf32, #tpu.memory_space<vmem>>, vector<24x1024xf32>
    %cst = arith.constant dense<0.000000e+00> : vector<2x1024xf32>
    %2 = tpu.matmul %0, %1, %cst {dimension_numbers = #tpu.dot_dimension_numbers<[1], [0], [0], [1], [0, 0, 1, 1], [], []>} : vector<2x24xf32>, vector<24x1024xf32>, vector<2x1024xf32> -> vector<2x1024xf32>
    %c0_3 = arith.constant 0 : index
    %c0_4 = arith.constant 0 : index
    %3 = vector.load %arg3[%c0_3, %c0_4] : memref<1x1024xf32, #tpu.memory_space<vmem>>, vector<1x1024xf32>
    %4 = vector.broadcast %3 : vector<1x1024xf32> to vector<2x1024xf32>
    %5 = arith.addf %2, %4 : vector<2x1024xf32>
    %c0_5 = arith.constant 0 : index
    %c0_6 = arith.constant 0 : index
    %6 = vector.load %arg4[%c0_5, %c0_6] : memref<2x1024xf32, #tpu.memory_space<vmem>>, vector<2x1024xf32>
    tpu.vector_store %arg4[%c0_5, %c0_6], %5 {strides = array<i32>} : memref<2x1024xf32, #tpu.memory_space<vmem>>, vector<2x1024xf32>,
    return
  }
  func.func @transform_0(%arg0: i32) -> (i32, i32) {
    %c0_i32 = arith.constant 0 : i32
    %c0_i32_0 = arith.constant 0 : i32
    %c0_i32_1 = arith.constant 0 : i32
    return %c0_i32, %c0_i32_0 : i32, i32
  }
  func.func @transform_1(%arg0: i32) -> (i32, i32) {
    %c0_i32 = arith.constant 0 : i32
    %c0_i32_0 = arith.constant 0 : i32
    %c0_i32_1 = arith.constant 0 : i32
    return %c0_i32, %c0_i32_0 : i32, i32
  }
  func.func @transform_2(%arg0: i32) -> (i32, i32) {
    %c0_i32 = arith.constant 0 : i32
    %c0_i32_0 = arith.constant 0 : i32
    %c0_i32_1 = arith.constant 0 : i32
    return %c0_i32, %c0_i32_0 : i32, i32
  }
  func.func @transform_3(%arg0: i32) -> (i32, i32) {
    %c0_i32 = arith.constant 0 : i32
    %c0_i32_0 = arith.constant 0 : i32
    %c0_i32_1 = arith.constant 0 : i32
    return %c0_i32, %c0_i32_0 : i32, i32
  }
}

module attributes {stable_mosaic.version = 11 : i64} {
  func.func @_conv_bn_relu_kernel(%arg0: i32, %arg1: memref<48x192xf32, #tpu.memory_space<vmem>>, %arg2: memref<3x192x128xf32, #tpu.memory_space<vmem>>, %arg3: memref<1x32xf32, #tpu.memory_space<vmem>>, %arg4: memref<1x32xf32, #tpu.memory_space<vmem>>, %arg5: memref<32x128xf32, #tpu.memory_space<vmem>>) attributes {dimension_semantics = [#tpu.dimension_semantics<arbitrary>], iteration_bounds = array<i64: 1>, scalar_prefetch = 0 : i64, scratch_operands = 0 : i64, tpu.core_type = #tpu.core_type<tc>, window_params = [{pipeline_mode = #tpu.pipeline_mode<synchronous>, transform_indices = @transform_0, window_bounds = array<i64: 48, 192>}, {pipeline_mode = #tpu.pipeline_mode<synchronous>, transform_indices = @transform_1, window_bounds = array<i64: 3, 192, 128>}, {pipeline_mode = #tpu.pipeline_mode<synchronous>, transform_indices = @transform_2, window_bounds = array<i64: 1, 32>}, {pipeline_mode = #tpu.pipeline_mode<synchronous>, transform_indices = @transform_3, window_bounds = array<i64: 1, 32>}, {pipeline_mode = #tpu.pipeline_mode<synchronous>, transform_indices = @transform_4, window_bounds = array<i64: 32, 128>}]} {
    %c0 = arith.constant 0 : index
    %c0_0 = arith.constant 0 : index
    %0 = vector.load %arg1[%c0, %c0_0] : memref<48x192xf32, #tpu.memory_space<vmem>>, vector<16x192xf32>
    %c0_1 = arith.constant 0 : index
    %c0_2 = arith.constant 0 : index
    %c0_3 = arith.constant 0 : index
    %1 = vector.load %arg2[%c0_1, %c0_2, %c0_3] : memref<3x192x128xf32, #tpu.memory_space<vmem>>, vector<1x192x128xf32>
    %2 = vector.shape_cast %1 : vector<1x192x128xf32> to vector<192x128xf32>
    %cst = arith.constant dense<0.000000e+00> : vector<16x128xf32>
    %3 = tpu.matmul %0, %2, %cst {dimension_numbers = #tpu.dot_dimension_numbers<[1], [0], [0], [1], [0, 0, 1, 1], [], []>} : vector<16x192xf32>, vector<192x128xf32>, vector<16x128xf32> -> vector<16x128xf32>
    %c4 = arith.constant 4 : index
    %c0_4 = arith.constant 0 : index
    %4 = vector.load %arg1[%c4, %c0_4] : memref<48x192xf32, #tpu.memory_space<vmem>>, vector<16x192xf32>
    %c1 = arith.constant 1 : index
    %c0_5 = arith.constant 0 : index
    %c0_6 = arith.constant 0 : index
    %5 = vector.load %arg2[%c1, %c0_5, %c0_6] : memref<3x192x128xf32, #tpu.memory_space<vmem>>, vector<1x192x128xf32>
    %6 = vector.shape_cast %5 : vector<1x192x128xf32> to vector<192x128xf32>
    %cst_7 = arith.constant dense<0.000000e+00> : vector<16x128xf32>
    %7 = tpu.matmul %4, %6, %cst_7 {dimension_numbers = #tpu.dot_dimension_numbers<[1], [0], [0], [1], [0, 0, 1, 1], [], []>} : vector<16x192xf32>, vector<192x128xf32>, vector<16x128xf32> -> vector<16x128xf32>
    %8 = arith.addf %3, %7 : vector<16x128xf32>
    %c8 = arith.constant 8 : index
    %c0_8 = arith.constant 0 : index
    %9 = vector.load %arg1[%c8, %c0_8] : memref<48x192xf32, #tpu.memory_space<vmem>>, vector<16x192xf32>
    %c2 = arith.constant 2 : index
    %c0_9 = arith.constant 0 : index
    %c0_10 = arith.constant 0 : index
    %10 = vector.load %arg2[%c2, %c0_9, %c0_10] : memref<3x192x128xf32, #tpu.memory_space<vmem>>, vector<1x192x128xf32>
    %11 = vector.shape_cast %10 : vector<1x192x128xf32> to vector<192x128xf32>
    %cst_11 = arith.constant dense<0.000000e+00> : vector<16x128xf32>
    %12 = tpu.matmul %9, %11, %cst_11 {dimension_numbers = #tpu.dot_dimension_numbers<[1], [0], [0], [1], [0, 0, 1, 1], [], []>} : vector<16x192xf32>, vector<192x128xf32>, vector<16x128xf32> -> vector<16x128xf32>
    %13 = arith.addf %8, %12 : vector<16x128xf32>
    %c0_12 = arith.constant 0 : index
    %c0_13 = arith.constant 0 : index
    %14 = vector.load %arg5[%c0_12, %c0_13] : memref<32x128xf32, #tpu.memory_space<vmem>>, vector<16x128xf32>
    tpu.vector_store %arg5[%c0_12, %c0_13], %13 {strides = array<i32>} : memref<32x128xf32, #tpu.memory_space<vmem>>, vector<16x128xf32>,
    %c24 = arith.constant 24 : index
    %c0_14 = arith.constant 0 : index
    %15 = vector.load %arg1[%c24, %c0_14] : memref<48x192xf32, #tpu.memory_space<vmem>>, vector<16x192xf32>
    %c0_15 = arith.constant 0 : index
    %c0_16 = arith.constant 0 : index
    %c0_17 = arith.constant 0 : index
    %16 = vector.load %arg2[%c0_15, %c0_16, %c0_17] : memref<3x192x128xf32, #tpu.memory_space<vmem>>, vector<1x192x128xf32>
    %17 = vector.shape_cast %16 : vector<1x192x128xf32> to vector<192x128xf32>
    %cst_18 = arith.constant dense<0.000000e+00> : vector<16x128xf32>
    %18 = tpu.matmul %15, %17, %cst_18 {dimension_numbers = #tpu.dot_dimension_numbers<[1], [0], [0], [1], [0, 0, 1, 1], [], []>} : vector<16x192xf32>, vector<192x128xf32>, vector<16x128xf32> -> vector<16x128xf32>
    %c28 = arith.constant 28 : index
    %c0_19 = arith.constant 0 : index
    %19 = vector.load %arg1[%c28, %c0_19] : memref<48x192xf32, #tpu.memory_space<vmem>>, vector<16x192xf32>
    %c1_20 = arith.constant 1 : index
    %c0_21 = arith.constant 0 : index
    %c0_22 = arith.constant 0 : index
    %20 = vector.load %arg2[%c1_20, %c0_21, %c0_22] : memref<3x192x128xf32, #tpu.memory_space<vmem>>, vector<1x192x128xf32>
    %21 = vector.shape_cast %20 : vector<1x192x128xf32> to vector<192x128xf32>
    %cst_23 = arith.constant dense<0.000000e+00> : vector<16x128xf32>
    %22 = tpu.matmul %19, %21, %cst_23 {dimension_numbers = #tpu.dot_dimension_numbers<[1], [0], [0], [1], [0, 0, 1, 1], [], []>} : vector<16x192xf32>, vector<192x128xf32>, vector<16x128xf32> -> vector<16x128xf32>
    %23 = arith.addf %18, %22 : vector<16x128xf32>
    %c32 = arith.constant 32 : index
    %c0_24 = arith.constant 0 : index
    %24 = vector.load %arg1[%c32, %c0_24] : memref<48x192xf32, #tpu.memory_space<vmem>>, vector<16x192xf32>
    %c2_25 = arith.constant 2 : index
    %c0_26 = arith.constant 0 : index
    %c0_27 = arith.constant 0 : index
    %25 = vector.load %arg2[%c2_25, %c0_26, %c0_27] : memref<3x192x128xf32, #tpu.memory_space<vmem>>, vector<1x192x128xf32>
    %26 = vector.shape_cast %25 : vector<1x192x128xf32> to vector<192x128xf32>
    %cst_28 = arith.constant dense<0.000000e+00> : vector<16x128xf32>
    %27 = tpu.matmul %24, %26, %cst_28 {dimension_numbers = #tpu.dot_dimension_numbers<[1], [0], [0], [1], [0, 0, 1, 1], [], []>} : vector<16x192xf32>, vector<192x128xf32>, vector<16x128xf32> -> vector<16x128xf32>
    %28 = arith.addf %23, %27 : vector<16x128xf32>
    %c16 = arith.constant 16 : index
    %c0_29 = arith.constant 0 : index
    %29 = vector.load %arg5[%c16, %c0_29] : memref<32x128xf32, #tpu.memory_space<vmem>>, vector<16x128xf32>
    tpu.vector_store %arg5[%c16, %c0_29], %28 {strides = array<i32>} : memref<32x128xf32, #tpu.memory_space<vmem>>, vector<16x128xf32>,
    %c0_30 = arith.constant 0 : index
    %c0_31 = arith.constant 0 : index
    %30 = vector.load %arg5[%c0_30, %c0_31] : memref<32x128xf32, #tpu.memory_space<vmem>>, vector<32x128xf32>
    %cst_32 = arith.constant dense<0.000000e+00> : vector<128xf32>
    %31 = vector.multi_reduction <add>, %30, %cst_32 [0] : vector<32x128xf32> to vector<128xf32>
    %32 = vector.shape_cast %31 : vector<128xf32> to vector<1x128xf32>
    %33 = vector.extract_strided_slice %32 {offsets = [0, 0], sizes = [1, 32], strides = [1, 1]} : vector<1x128xf32> to vector<1x32xf32>
    %34 = vector.extract_strided_slice %32 {offsets = [0, 32], sizes = [1, 32], strides = [1, 1]} : vector<1x128xf32> to vector<1x32xf32>
    %35 = arith.addf %33, %34 : vector<1x32xf32>
    %36 = vector.extract_strided_slice %32 {offsets = [0, 64], sizes = [1, 32], strides = [1, 1]} : vector<1x128xf32> to vector<1x32xf32>
    %37 = arith.addf %35, %36 : vector<1x32xf32>
    %38 = vector.extract_strided_slice %32 {offsets = [0, 96], sizes = [1, 32], strides = [1, 1]} : vector<1x128xf32> to vector<1x32xf32>
    %39 = arith.addf %37, %38 : vector<1x32xf32>
    %cst_33 = arith.constant 7.812500e-03 : f32
    %40 = vector.broadcast %cst_33 : f32 to vector<1x32xf32>
    %41 = arith.mulf %39, %40 : vector<1x32xf32>
    %42 = tpu.concatenate %41, %41, %41, %41 in 1 : vector<1x32xf32>, vector<1x32xf32>, vector<1x32xf32>, vector<1x32xf32> -> vector<1x128xf32>
    %43 = vector.broadcast %42 : vector<1x128xf32> to vector<32x128xf32>
    %44 = arith.subf %30, %43 : vector<32x128xf32>
    %45 = arith.mulf %44, %44 : vector<32x128xf32>
    %cst_34 = arith.constant dense<0.000000e+00> : vector<128xf32>
    %46 = vector.multi_reduction <add>, %45, %cst_34 [0] : vector<32x128xf32> to vector<128xf32>
    %47 = vector.shape_cast %46 : vector<128xf32> to vector<1x128xf32>
    %48 = vector.extract_strided_slice %47 {offsets = [0, 0], sizes = [1, 32], strides = [1, 1]} : vector<1x128xf32> to vector<1x32xf32>
    %49 = vector.extract_strided_slice %47 {offsets = [0, 32], sizes = [1, 32], strides = [1, 1]} : vector<1x128xf32> to vector<1x32xf32>
    %50 = arith.addf %48, %49 : vector<1x32xf32>
    %51 = vector.extract_strided_slice %47 {offsets = [0, 64], sizes = [1, 32], strides = [1, 1]} : vector<1x128xf32> to vector<1x32xf32>
    %52 = arith.addf %50, %51 : vector<1x32xf32>
    %53 = vector.extract_strided_slice %47 {offsets = [0, 96], sizes = [1, 32], strides = [1, 1]} : vector<1x128xf32> to vector<1x32xf32>
    %54 = arith.addf %52, %53 : vector<1x32xf32>
    %cst_35 = arith.constant 7.812500e-03 : f32
    %55 = vector.broadcast %cst_35 : f32 to vector<1x32xf32>
    %56 = arith.mulf %54, %55 : vector<1x32xf32>
    %c0_36 = arith.constant 0 : index
    %c0_37 = arith.constant 0 : index
    %57 = vector.load %arg3[%c0_36, %c0_37] : memref<1x32xf32, #tpu.memory_space<vmem>>, vector<1x32xf32>
    %cst_38 = arith.constant 9.99999974E-6 : f32
    %58 = vector.broadcast %cst_38 : f32 to vector<1x32xf32>
    %59 = arith.addf %56, %58 : vector<1x32xf32>
    %60 = math.rsqrt %59 : vector<1x32xf32>
    %61 = arith.mulf %57, %60 : vector<1x32xf32>
    %62 = tpu.concatenate %61, %61, %61, %61 in 1 : vector<1x32xf32>, vector<1x32xf32>, vector<1x32xf32>, vector<1x32xf32> -> vector<1x128xf32>
    %c0_39 = arith.constant 0 : index
    %c0_40 = arith.constant 0 : index
    %63 = vector.load %arg4[%c0_39, %c0_40] : memref<1x32xf32, #tpu.memory_space<vmem>>, vector<1x32xf32>
    %64 = tpu.concatenate %63, %63, %63, %63 in 1 : vector<1x32xf32>, vector<1x32xf32>, vector<1x32xf32>, vector<1x32xf32> -> vector<1x128xf32>
    %65 = vector.broadcast %62 : vector<1x128xf32> to vector<32x128xf32>
    %66 = arith.mulf %44, %65 : vector<32x128xf32>
    %67 = vector.broadcast %64 : vector<1x128xf32> to vector<32x128xf32>
    %68 = arith.addf %66, %67 : vector<32x128xf32>
    %cst_41 = arith.constant 0.000000e+00 : f32
    %69 = vector.broadcast %cst_41 : f32 to vector<32x128xf32>
    %70 = arith.maximumf %68, %69 : vector<32x128xf32>
    %c0_42 = arith.constant 0 : index
    %c0_43 = arith.constant 0 : index
    %71 = vector.load %arg5[%c0_42, %c0_43] : memref<32x128xf32, #tpu.memory_space<vmem>>, vector<32x128xf32>
    tpu.vector_store %arg5[%c0_42, %c0_43], %70 {strides = array<i32>} : memref<32x128xf32, #tpu.memory_space<vmem>>, vector<32x128xf32>,
    return
  }
  func.func @transform_0(%arg0: i32) -> (i32, i32) {
    %c0_i32 = arith.constant 0 : i32
    %c0_i32_0 = arith.constant 0 : i32
    %c0_i32_1 = arith.constant 0 : i32
    return %c0_i32, %c0_i32_0 : i32, i32
  }
  func.func @transform_1(%arg0: i32) -> (i32, i32, i32) {
    %c0_i32 = arith.constant 0 : i32
    %c0_i32_0 = arith.constant 0 : i32
    %c0_i32_1 = arith.constant 0 : i32
    %c0_i32_2 = arith.constant 0 : i32
    return %c0_i32, %c0_i32_0, %c0_i32_1 : i32, i32, i32
  }
  func.func @transform_2(%arg0: i32) -> (i32, i32) {
    %c0_i32 = arith.constant 0 : i32
    %c0_i32_0 = arith.constant 0 : i32
    %c0_i32_1 = arith.constant 0 : i32
    return %c0_i32, %c0_i32_0 : i32, i32
  }
  func.func @transform_3(%arg0: i32) -> (i32, i32) {
    %c0_i32 = arith.constant 0 : i32
    %c0_i32_0 = arith.constant 0 : i32
    %c0_i32_1 = arith.constant 0 : i32
    return %c0_i32, %c0_i32_0 : i32, i32
  }
  func.func @transform_4(%arg0: i32) -> (i32, i32) {
    %c0_i32 = arith.constant 0 : i32
    %c0_i32_0 = arith.constant 0 : i32
    %c0_i32_1 = arith.constant 0 : i32
    return %c0_i32, %c0_i32_0 : i32, i32
  }
}

module attributes {stable_mosaic.version = 11 : i64} {
  func.func @_conv_bn_relu_kernel(%arg0: i32, %arg1: memref<160x96xf32, #tpu.memory_space<vmem>>, %arg2: memref<3x96x64xf32, #tpu.memory_space<vmem>>, %arg3: memref<1x16xf32, #tpu.memory_space<vmem>>, %arg4: memref<1x16xf32, #tpu.memory_space<vmem>>, %arg5: memref<128x64xf32, #tpu.memory_space<vmem>>) attributes {dimension_semantics = [#tpu.dimension_semantics<arbitrary>], iteration_bounds = array<i64: 1>, scalar_prefetch = 0 : i64, scratch_operands = 0 : i64, tpu.core_type = #tpu.core_type<tc>, window_params = [{pipeline_mode = #tpu.pipeline_mode<synchronous>, transform_indices = @transform_0, window_bounds = array<i64: 160, 96>}, {pipeline_mode = #tpu.pipeline_mode<synchronous>, transform_indices = @transform_1, window_bounds = array<i64: 3, 96, 64>}, {pipeline_mode = #tpu.pipeline_mode<synchronous>, transform_indices = @transform_2, window_bounds = array<i64: 1, 16>}, {pipeline_mode = #tpu.pipeline_mode<synchronous>, transform_indices = @transform_3, window_bounds = array<i64: 1, 16>}, {pipeline_mode = #tpu.pipeline_mode<synchronous>, transform_indices = @transform_4, window_bounds = array<i64: 128, 64>}]} {
    %c0 = arith.constant 0 : index
    %c0_0 = arith.constant 0 : index
    %0 = vector.load %arg1[%c0, %c0_0] : memref<160x96xf32, #tpu.memory_space<vmem>>, vector<64x96xf32>
    %c0_1 = arith.constant 0 : index
    %c0_2 = arith.constant 0 : index
    %c0_3 = arith.constant 0 : index
    %1 = vector.load %arg2[%c0_1, %c0_2, %c0_3] : memref<3x96x64xf32, #tpu.memory_space<vmem>>, vector<1x96x64xf32>
    %2 = vector.shape_cast %1 : vector<1x96x64xf32> to vector<96x64xf32>
    %cst = arith.constant dense<0.000000e+00> : vector<64x64xf32>
    %3 = tpu.matmul %0, %2, %cst {dimension_numbers = #tpu.dot_dimension_numbers<[1], [0], [0], [1], [0, 0, 1, 1], [], []>} : vector<64x96xf32>, vector<96x64xf32>, vector<64x64xf32> -> vector<64x64xf32>
    %c8 = arith.constant 8 : index
    %c0_4 = arith.constant 0 : index
    %4 = vector.load %arg1[%c8, %c0_4] : memref<160x96xf32, #tpu.memory_space<vmem>>, vector<64x96xf32>
    %c1 = arith.constant 1 : index
    %c0_5 = arith.constant 0 : index
    %c0_6 = arith.constant 0 : index
    %5 = vector.load %arg2[%c1, %c0_5, %c0_6] : memref<3x96x64xf32, #tpu.memory_space<vmem>>, vector<1x96x64xf32>
    %6 = vector.shape_cast %5 : vector<1x96x64xf32> to vector<96x64xf32>
    %cst_7 = arith.constant dense<0.000000e+00> : vector<64x64xf32>
    %7 = tpu.matmul %4, %6, %cst_7 {dimension_numbers = #tpu.dot_dimension_numbers<[1], [0], [0], [1], [0, 0, 1, 1], [], []>} : vector<64x96xf32>, vector<96x64xf32>, vector<64x64xf32> -> vector<64x64xf32>
    %8 = arith.addf %3, %7 : vector<64x64xf32>
    %c16 = arith.constant 16 : index
    %c0_8 = arith.constant 0 : index
    %9 = vector.load %arg1[%c16, %c0_8] : memref<160x96xf32, #tpu.memory_space<vmem>>, vector<64x96xf32>
    %c2 = arith.constant 2 : index
    %c0_9 = arith.constant 0 : index
    %c0_10 = arith.constant 0 : index
    %10 = vector.load %arg2[%c2, %c0_9, %c0_10] : memref<3x96x64xf32, #tpu.memory_space<vmem>>, vector<1x96x64xf32>
    %11 = vector.shape_cast %10 : vector<1x96x64xf32> to vector<96x64xf32>
    %cst_11 = arith.constant dense<0.000000e+00> : vector<64x64xf32>
    %12 = tpu.matmul %9, %11, %cst_11 {dimension_numbers = #tpu.dot_dimension_numbers<[1], [0], [0], [1], [0, 0, 1, 1], [], []>} : vector<64x96xf32>, vector<96x64xf32>, vector<64x64xf32> -> vector<64x64xf32>
    %13 = arith.addf %8, %12 : vector<64x64xf32>
    %c0_12 = arith.constant 0 : index
    %c0_13 = arith.constant 0 : index
    %14 = vector.load %arg5[%c0_12, %c0_13] : memref<128x64xf32, #tpu.memory_space<vmem>>, vector<64x64xf32>
    tpu.vector_store %arg5[%c0_12, %c0_13], %13 {strides = array<i32>} : memref<128x64xf32, #tpu.memory_space<vmem>>, vector<64x64xf32>,
    %c80 = arith.constant 80 : index
    %c0_14 = arith.constant 0 : index
    %15 = vector.load %arg1[%c80, %c0_14] : memref<160x96xf32, #tpu.memory_space<vmem>>, vector<64x96xf32>
    %c0_15 = arith.constant 0 : index
    %c0_16 = arith.constant 0 : index
    %c0_17 = arith.constant 0 : index
    %16 = vector.load %arg2[%c0_15, %c0_16, %c0_17] : memref<3x96x64xf32, #tpu.memory_space<vmem>>, vector<1x96x64xf32>
    %17 = vector.shape_cast %16 : vector<1x96x64xf32> to vector<96x64xf32>
    %cst_18 = arith.constant dense<0.000000e+00> : vector<64x64xf32>
    %18 = tpu.matmul %15, %17, %cst_18 {dimension_numbers = #tpu.dot_dimension_numbers<[1], [0], [0], [1], [0, 0, 1, 1], [], []>} : vector<64x96xf32>, vector<96x64xf32>, vector<64x64xf32> -> vector<64x64xf32>
    %c88 = arith.constant 88 : index
    %c0_19 = arith.constant 0 : index
    %19 = vector.load %arg1[%c88, %c0_19] : memref<160x96xf32, #tpu.memory_space<vmem>>, vector<64x96xf32>
    %c1_20 = arith.constant 1 : index
    %c0_21 = arith.constant 0 : index
    %c0_22 = arith.constant 0 : index
    %20 = vector.load %arg2[%c1_20, %c0_21, %c0_22] : memref<3x96x64xf32, #tpu.memory_space<vmem>>, vector<1x96x64xf32>
    %21 = vector.shape_cast %20 : vector<1x96x64xf32> to vector<96x64xf32>
    %cst_23 = arith.constant dense<0.000000e+00> : vector<64x64xf32>
    %22 = tpu.matmul %19, %21, %cst_23 {dimension_numbers = #tpu.dot_dimension_numbers<[1], [0], [0], [1], [0, 0, 1, 1], [], []>} : vector<64x96xf32>, vector<96x64xf32>, vector<64x64xf32> -> vector<64x64xf32>
    %23 = arith.addf %18, %22 : vector<64x64xf32>
    %c96 = arith.constant 96 : index
    %c0_24 = arith.constant 0 : index
    %24 = vector.load %arg1[%c96, %c0_24] : memref<160x96xf32, #tpu.memory_space<vmem>>, vector<64x96xf32>
    %c2_25 = arith.constant 2 : index
    %c0_26 = arith.constant 0 : index
    %c0_27 = arith.constant 0 : index
    %25 = vector.load %arg2[%c2_25, %c0_26, %c0_27] : memref<3x96x64xf32, #tpu.memory_space<vmem>>, vector<1x96x64xf32>
    %26 = vector.shape_cast %25 : vector<1x96x64xf32> to vector<96x64xf32>
    %cst_28 = arith.constant dense<0.000000e+00> : vector<64x64xf32>
    %27 = tpu.matmul %24, %26, %cst_28 {dimension_numbers = #tpu.dot_dimension_numbers<[1], [0], [0], [1], [0, 0, 1, 1], [], []>} : vector<64x96xf32>, vector<96x64xf32>, vector<64x64xf32> -> vector<64x64xf32>
    %28 = arith.addf %23, %27 : vector<64x64xf32>
    %c64 = arith.constant 64 : index
    %c0_29 = arith.constant 0 : index
    %29 = vector.load %arg5[%c64, %c0_29] : memref<128x64xf32, #tpu.memory_space<vmem>>, vector<64x64xf32>
    tpu.vector_store %arg5[%c64, %c0_29], %28 {strides = array<i32>} : memref<128x64xf32, #tpu.memory_space<vmem>>, vector<64x64xf32>,
    %c0_30 = arith.constant 0 : index
    %c0_31 = arith.constant 0 : index
    %30 = vector.load %arg5[%c0_30, %c0_31] : memref<128x64xf32, #tpu.memory_space<vmem>>, vector<128x64xf32>
    %cst_32 = arith.constant dense<0.000000e+00> : vector<64xf32>
    %31 = vector.multi_reduction <add>, %30, %cst_32 [0] : vector<128x64xf32> to vector<64xf32>
    %32 = vector.shape_cast %31 : vector<64xf32> to vector<1x64xf32>
    %33 = vector.extract_strided_slice %32 {offsets = [0, 0], sizes = [1, 16], strides = [1, 1]} : vector<1x64xf32> to vector<1x16xf32>
    %34 = vector.extract_strided_slice %32 {offsets = [0, 16], sizes = [1, 16], strides = [1, 1]} : vector<1x64xf32> to vector<1x16xf32>
    %35 = arith.addf %33, %34 : vector<1x16xf32>
    %36 = vector.extract_strided_slice %32 {offsets = [0, 32], sizes = [1, 16], strides = [1, 1]} : vector<1x64xf32> to vector<1x16xf32>
    %37 = arith.addf %35, %36 : vector<1x16xf32>
    %38 = vector.extract_strided_slice %32 {offsets = [0, 48], sizes = [1, 16], strides = [1, 1]} : vector<1x64xf32> to vector<1x16xf32>
    %39 = arith.addf %37, %38 : vector<1x16xf32>
    %cst_33 = arith.constant 0.001953125 : f32
    %40 = vector.broadcast %cst_33 : f32 to vector<1x16xf32>
    %41 = arith.mulf %39, %40 : vector<1x16xf32>
    %42 = tpu.concatenate %41, %41, %41, %41 in 1 : vector<1x16xf32>, vector<1x16xf32>, vector<1x16xf32>, vector<1x16xf32> -> vector<1x64xf32>
    %43 = vector.broadcast %42 : vector<1x64xf32> to vector<128x64xf32>
    %44 = arith.subf %30, %43 : vector<128x64xf32>
    %45 = arith.mulf %44, %44 : vector<128x64xf32>
    %cst_34 = arith.constant dense<0.000000e+00> : vector<64xf32>
    %46 = vector.multi_reduction <add>, %45, %cst_34 [0] : vector<128x64xf32> to vector<64xf32>
    %47 = vector.shape_cast %46 : vector<64xf32> to vector<1x64xf32>
    %48 = vector.extract_strided_slice %47 {offsets = [0, 0], sizes = [1, 16], strides = [1, 1]} : vector<1x64xf32> to vector<1x16xf32>
    %49 = vector.extract_strided_slice %47 {offsets = [0, 16], sizes = [1, 16], strides = [1, 1]} : vector<1x64xf32> to vector<1x16xf32>
    %50 = arith.addf %48, %49 : vector<1x16xf32>
    %51 = vector.extract_strided_slice %47 {offsets = [0, 32], sizes = [1, 16], strides = [1, 1]} : vector<1x64xf32> to vector<1x16xf32>
    %52 = arith.addf %50, %51 : vector<1x16xf32>
    %53 = vector.extract_strided_slice %47 {offsets = [0, 48], sizes = [1, 16], strides = [1, 1]} : vector<1x64xf32> to vector<1x16xf32>
    %54 = arith.addf %52, %53 : vector<1x16xf32>
    %cst_35 = arith.constant 0.001953125 : f32
    %55 = vector.broadcast %cst_35 : f32 to vector<1x16xf32>
    %56 = arith.mulf %54, %55 : vector<1x16xf32>
    %c0_36 = arith.constant 0 : index
    %c0_37 = arith.constant 0 : index
    %57 = vector.load %arg3[%c0_36, %c0_37] : memref<1x16xf32, #tpu.memory_space<vmem>>, vector<1x16xf32>
    %cst_38 = arith.constant 9.99999974E-6 : f32
    %58 = vector.broadcast %cst_38 : f32 to vector<1x16xf32>
    %59 = arith.addf %56, %58 : vector<1x16xf32>
    %60 = math.rsqrt %59 : vector<1x16xf32>
    %61 = arith.mulf %57, %60 : vector<1x16xf32>
    %62 = tpu.concatenate %61, %61, %61, %61 in 1 : vector<1x16xf32>, vector<1x16xf32>, vector<1x16xf32>, vector<1x16xf32> -> vector<1x64xf32>
    %c0_39 = arith.constant 0 : index
    %c0_40 = arith.constant 0 : index
    %63 = vector.load %arg4[%c0_39, %c0_40] : memref<1x16xf32, #tpu.memory_space<vmem>>, vector<1x16xf32>
    %64 = tpu.concatenate %63, %63, %63, %63 in 1 : vector<1x16xf32>, vector<1x16xf32>, vector<1x16xf32>, vector<1x16xf32> -> vector<1x64xf32>
    %65 = vector.broadcast %62 : vector<1x64xf32> to vector<128x64xf32>
    %66 = arith.mulf %44, %65 : vector<128x64xf32>
    %67 = vector.broadcast %64 : vector<1x64xf32> to vector<128x64xf32>
    %68 = arith.addf %66, %67 : vector<128x64xf32>
    %cst_41 = arith.constant 0.000000e+00 : f32
    %69 = vector.broadcast %cst_41 : f32 to vector<128x64xf32>
    %70 = arith.maximumf %68, %69 : vector<128x64xf32>
    %c0_42 = arith.constant 0 : index
    %c0_43 = arith.constant 0 : index
    %71 = vector.load %arg5[%c0_42, %c0_43] : memref<128x64xf32, #tpu.memory_space<vmem>>, vector<128x64xf32>
    tpu.vector_store %arg5[%c0_42, %c0_43], %70 {strides = array<i32>} : memref<128x64xf32, #tpu.memory_space<vmem>>, vector<128x64xf32>,
    return
  }
  func.func @transform_0(%arg0: i32) -> (i32, i32) {
    %c0_i32 = arith.constant 0 : i32
    %c0_i32_0 = arith.constant 0 : i32
    %c0_i32_1 = arith.constant 0 : i32
    return %c0_i32, %c0_i32_0 : i32, i32
  }
  func.func @transform_1(%arg0: i32) -> (i32, i32, i32) {
    %c0_i32 = arith.constant 0 : i32
    %c0_i32_0 = arith.constant 0 : i32
    %c0_i32_1 = arith.constant 0 : i32
    %c0_i32_2 = arith.constant 0 : i32
    return %c0_i32, %c0_i32_0, %c0_i32_1 : i32, i32, i32
  }
  func.func @transform_2(%arg0: i32) -> (i32, i32) {
    %c0_i32 = arith.constant 0 : i32
    %c0_i32_0 = arith.constant 0 : i32
    %c0_i32_1 = arith.constant 0 : i32
    return %c0_i32, %c0_i32_0 : i32, i32
  }
  func.func @transform_3(%arg0: i32) -> (i32, i32) {
    %c0_i32 = arith.constant 0 : i32
    %c0_i32_0 = arith.constant 0 : i32
    %c0_i32_1 = arith.constant 0 : i32
    return %c0_i32, %c0_i32_0 : i32, i32
  }
  func.func @transform_4(%arg0: i32) -> (i32, i32) {
    %c0_i32 = arith.constant 0 : i32
    %c0_i32_0 = arith.constant 0 : i32
    %c0_i32_1 = arith.constant 0 : i32
    return %c0_i32, %c0_i32_0 : i32, i32
  }
}

module attributes {stable_mosaic.version = 11 : i64} {
  func.func @_conv_bn_relu_kernel(%arg0: i32, %arg1: memref<576x48xf32, #tpu.memory_space<vmem>>, %arg2: memref<3x48x32xf32, #tpu.memory_space<vmem>>, %arg3: memref<1x8xf32, #tpu.memory_space<vmem>>, %arg4: memref<1x8xf32, #tpu.memory_space<vmem>>, %arg5: memref<512x32xf32, #tpu.memory_space<vmem>>) attributes {dimension_semantics = [#tpu.dimension_semantics<arbitrary>], iteration_bounds = array<i64: 1>, scalar_prefetch = 0 : i64, scratch_operands = 0 : i64, tpu.core_type = #tpu.core_type<tc>, window_params = [{pipeline_mode = #tpu.pipeline_mode<synchronous>, transform_indices = @transform_0, window_bounds = array<i64: 576, 48>}, {pipeline_mode = #tpu.pipeline_mode<synchronous>, transform_indices = @transform_1, window_bounds = array<i64: 3, 48, 32>}, {pipeline_mode = #tpu.pipeline_mode<synchronous>, transform_indices = @transform_2, window_bounds = array<i64: 1, 8>}, {pipeline_mode = #tpu.pipeline_mode<synchronous>, transform_indices = @transform_3, window_bounds = array<i64: 1, 8>}, {pipeline_mode = #tpu.pipeline_mode<synchronous>, transform_indices = @transform_4, window_bounds = array<i64: 512, 32>}]} {
    %c0 = arith.constant 0 : index
    %c0_0 = arith.constant 0 : index
    %0 = vector.load %arg1[%c0, %c0_0] : memref<576x48xf32, #tpu.memory_space<vmem>>, vector<256x48xf32>
    %c0_1 = arith.constant 0 : index
    %c0_2 = arith.constant 0 : index
    %c0_3 = arith.constant 0 : index
    %1 = vector.load %arg2[%c0_1, %c0_2, %c0_3] : memref<3x48x32xf32, #tpu.memory_space<vmem>>, vector<1x48x32xf32>
    %2 = vector.shape_cast %1 : vector<1x48x32xf32> to vector<48x32xf32>
    %cst = arith.constant dense<0.000000e+00> : vector<256x32xf32>
    %3 = tpu.matmul %0, %2, %cst {dimension_numbers = #tpu.dot_dimension_numbers<[1], [0], [0], [1], [0, 0, 1, 1], [], []>} : vector<256x48xf32>, vector<48x32xf32>, vector<256x32xf32> -> vector<256x32xf32>
    %c16 = arith.constant 16 : index
    %c0_4 = arith.constant 0 : index
    %4 = vector.load %arg1[%c16, %c0_4] : memref<576x48xf32, #tpu.memory_space<vmem>>, vector<256x48xf32>
    %c1 = arith.constant 1 : index
    %c0_5 = arith.constant 0 : index
    %c0_6 = arith.constant 0 : index
    %5 = vector.load %arg2[%c1, %c0_5, %c0_6] : memref<3x48x32xf32, #tpu.memory_space<vmem>>, vector<1x48x32xf32>
    %6 = vector.shape_cast %5 : vector<1x48x32xf32> to vector<48x32xf32>
    %cst_7 = arith.constant dense<0.000000e+00> : vector<256x32xf32>
    %7 = tpu.matmul %4, %6, %cst_7 {dimension_numbers = #tpu.dot_dimension_numbers<[1], [0], [0], [1], [0, 0, 1, 1], [], []>} : vector<256x48xf32>, vector<48x32xf32>, vector<256x32xf32> -> vector<256x32xf32>
    %8 = arith.addf %3, %7 : vector<256x32xf32>
    %c32 = arith.constant 32 : index
    %c0_8 = arith.constant 0 : index
    %9 = vector.load %arg1[%c32, %c0_8] : memref<576x48xf32, #tpu.memory_space<vmem>>, vector<256x48xf32>
    %c2 = arith.constant 2 : index
    %c0_9 = arith.constant 0 : index
    %c0_10 = arith.constant 0 : index
    %10 = vector.load %arg2[%c2, %c0_9, %c0_10] : memref<3x48x32xf32, #tpu.memory_space<vmem>>, vector<1x48x32xf32>
    %11 = vector.shape_cast %10 : vector<1x48x32xf32> to vector<48x32xf32>
    %cst_11 = arith.constant dense<0.000000e+00> : vector<256x32xf32>
    %12 = tpu.matmul %9, %11, %cst_11 {dimension_numbers = #tpu.dot_dimension_numbers<[1], [0], [0], [1], [0, 0, 1, 1], [], []>} : vector<256x48xf32>, vector<48x32xf32>, vector<256x32xf32> -> vector<256x32xf32>
    %13 = arith.addf %8, %12 : vector<256x32xf32>
    %c0_12 = arith.constant 0 : index
    %c0_13 = arith.constant 0 : index
    %14 = vector.load %arg5[%c0_12, %c0_13] : memref<512x32xf32, #tpu.memory_space<vmem>>, vector<256x32xf32>
    tpu.vector_store %arg5[%c0_12, %c0_13], %13 {strides = array<i32>} : memref<512x32xf32, #tpu.memory_space<vmem>>, vector<256x32xf32>,
    %c288 = arith.constant 288 : index
    %c0_14 = arith.constant 0 : index
    %15 = vector.load %arg1[%c288, %c0_14] : memref<576x48xf32, #tpu.memory_space<vmem>>, vector<256x48xf32>
    %c0_15 = arith.constant 0 : index
    %c0_16 = arith.constant 0 : index
    %c0_17 = arith.constant 0 : index
    %16 = vector.load %arg2[%c0_15, %c0_16, %c0_17] : memref<3x48x32xf32, #tpu.memory_space<vmem>>, vector<1x48x32xf32>
    %17 = vector.shape_cast %16 : vector<1x48x32xf32> to vector<48x32xf32>
    %cst_18 = arith.constant dense<0.000000e+00> : vector<256x32xf32>
    %18 = tpu.matmul %15, %17, %cst_18 {dimension_numbers = #tpu.dot_dimension_numbers<[1], [0], [0], [1], [0, 0, 1, 1], [], []>} : vector<256x48xf32>, vector<48x32xf32>, vector<256x32xf32> -> vector<256x32xf32>
    %c304 = arith.constant 304 : index
    %c0_19 = arith.constant 0 : index
    %19 = vector.load %arg1[%c304, %c0_19] : memref<576x48xf32, #tpu.memory_space<vmem>>, vector<256x48xf32>
    %c1_20 = arith.constant 1 : index
    %c0_21 = arith.constant 0 : index
    %c0_22 = arith.constant 0 : index
    %20 = vector.load %arg2[%c1_20, %c0_21, %c0_22] : memref<3x48x32xf32, #tpu.memory_space<vmem>>, vector<1x48x32xf32>
    %21 = vector.shape_cast %20 : vector<1x48x32xf32> to vector<48x32xf32>
    %cst_23 = arith.constant dense<0.000000e+00> : vector<256x32xf32>
    %22 = tpu.matmul %19, %21, %cst_23 {dimension_numbers = #tpu.dot_dimension_numbers<[1], [0], [0], [1], [0, 0, 1, 1], [], []>} : vector<256x48xf32>, vector<48x32xf32>, vector<256x32xf32> -> vector<256x32xf32>
    %23 = arith.addf %18, %22 : vector<256x32xf32>
    %c320 = arith.constant 320 : index
    %c0_24 = arith.constant 0 : index
    %24 = vector.load %arg1[%c320, %c0_24] : memref<576x48xf32, #tpu.memory_space<vmem>>, vector<256x48xf32>
    %c2_25 = arith.constant 2 : index
    %c0_26 = arith.constant 0 : index
    %c0_27 = arith.constant 0 : index
    %25 = vector.load %arg2[%c2_25, %c0_26, %c0_27] : memref<3x48x32xf32, #tpu.memory_space<vmem>>, vector<1x48x32xf32>
    %26 = vector.shape_cast %25 : vector<1x48x32xf32> to vector<48x32xf32>
    %cst_28 = arith.constant dense<0.000000e+00> : vector<256x32xf32>
    %27 = tpu.matmul %24, %26, %cst_28 {dimension_numbers = #tpu.dot_dimension_numbers<[1], [0], [0], [1], [0, 0, 1, 1], [], []>} : vector<256x48xf32>, vector<48x32xf32>, vector<256x32xf32> -> vector<256x32xf32>
    %28 = arith.addf %23, %27 : vector<256x32xf32>
    %c256 = arith.constant 256 : index
    %c0_29 = arith.constant 0 : index
    %29 = vector.load %arg5[%c256, %c0_29] : memref<512x32xf32, #tpu.memory_space<vmem>>, vector<256x32xf32>
    tpu.vector_store %arg5[%c256, %c0_29], %28 {strides = array<i32>} : memref<512x32xf32, #tpu.memory_space<vmem>>, vector<256x32xf32>,
    %c0_30 = arith.constant 0 : index
    %c0_31 = arith.constant 0 : index
    %30 = vector.load %arg5[%c0_30, %c0_31] : memref<512x32xf32, #tpu.memory_space<vmem>>, vector<512x32xf32>
    %cst_32 = arith.constant dense<0.000000e+00> : vector<32xf32>
    %31 = vector.multi_reduction <add>, %30, %cst_32 [0] : vector<512x32xf32> to vector<32xf32>
    %32 = vector.shape_cast %31 : vector<32xf32> to vector<1x32xf32>
    %33 = vector.extract_strided_slice %32 {offsets = [0, 0], sizes = [1, 8], strides = [1, 1]} : vector<1x32xf32> to vector<1x8xf32>
    %34 = vector.extract_strided_slice %32 {offsets = [0, 8], sizes = [1, 8], strides = [1, 1]} : vector<1x32xf32> to vector<1x8xf32>
    %35 = arith.addf %33, %34 : vector<1x8xf32>
    %36 = vector.extract_strided_slice %32 {offsets = [0, 16], sizes = [1, 8], strides = [1, 1]} : vector<1x32xf32> to vector<1x8xf32>
    %37 = arith.addf %35, %36 : vector<1x8xf32>
    %38 = vector.extract_strided_slice %32 {offsets = [0, 24], sizes = [1, 8], strides = [1, 1]} : vector<1x32xf32> to vector<1x8xf32>
    %39 = arith.addf %37, %38 : vector<1x8xf32>
    %cst_33 = arith.constant 4.8828125E-4 : f32
    %40 = vector.broadcast %cst_33 : f32 to vector<1x8xf32>
    %41 = arith.mulf %39, %40 : vector<1x8xf32>
    %42 = tpu.concatenate %41, %41, %41, %41 in 1 : vector<1x8xf32>, vector<1x8xf32>, vector<1x8xf32>, vector<1x8xf32> -> vector<1x32xf32>
    %43 = vector.broadcast %42 : vector<1x32xf32> to vector<512x32xf32>
    %44 = arith.subf %30, %43 : vector<512x32xf32>
    %45 = arith.mulf %44, %44 : vector<512x32xf32>
    %cst_34 = arith.constant dense<0.000000e+00> : vector<32xf32>
    %46 = vector.multi_reduction <add>, %45, %cst_34 [0] : vector<512x32xf32> to vector<32xf32>
    %47 = vector.shape_cast %46 : vector<32xf32> to vector<1x32xf32>
    %48 = vector.extract_strided_slice %47 {offsets = [0, 0], sizes = [1, 8], strides = [1, 1]} : vector<1x32xf32> to vector<1x8xf32>
    %49 = vector.extract_strided_slice %47 {offsets = [0, 8], sizes = [1, 8], strides = [1, 1]} : vector<1x32xf32> to vector<1x8xf32>
    %50 = arith.addf %48, %49 : vector<1x8xf32>
    %51 = vector.extract_strided_slice %47 {offsets = [0, 16], sizes = [1, 8], strides = [1, 1]} : vector<1x32xf32> to vector<1x8xf32>
    %52 = arith.addf %50, %51 : vector<1x8xf32>
    %53 = vector.extract_strided_slice %47 {offsets = [0, 24], sizes = [1, 8], strides = [1, 1]} : vector<1x32xf32> to vector<1x8xf32>
    %54 = arith.addf %52, %53 : vector<1x8xf32>
    %cst_35 = arith.constant 4.8828125E-4 : f32
    %55 = vector.broadcast %cst_35 : f32 to vector<1x8xf32>
    %56 = arith.mulf %54, %55 : vector<1x8xf32>
    %c0_36 = arith.constant 0 : index
    %c0_37 = arith.constant 0 : index
    %57 = vector.load %arg3[%c0_36, %c0_37] : memref<1x8xf32, #tpu.memory_space<vmem>>, vector<1x8xf32>
    %cst_38 = arith.constant 9.99999974E-6 : f32
    %58 = vector.broadcast %cst_38 : f32 to vector<1x8xf32>
    %59 = arith.addf %56, %58 : vector<1x8xf32>
    %60 = math.rsqrt %59 : vector<1x8xf32>
    %61 = arith.mulf %57, %60 : vector<1x8xf32>
    %62 = tpu.concatenate %61, %61, %61, %61 in 1 : vector<1x8xf32>, vector<1x8xf32>, vector<1x8xf32>, vector<1x8xf32> -> vector<1x32xf32>
    %c0_39 = arith.constant 0 : index
    %c0_40 = arith.constant 0 : index
    %63 = vector.load %arg4[%c0_39, %c0_40] : memref<1x8xf32, #tpu.memory_space<vmem>>, vector<1x8xf32>
    %64 = tpu.concatenate %63, %63, %63, %63 in 1 : vector<1x8xf32>, vector<1x8xf32>, vector<1x8xf32>, vector<1x8xf32> -> vector<1x32xf32>
    %65 = vector.broadcast %62 : vector<1x32xf32> to vector<512x32xf32>
    %66 = arith.mulf %44, %65 : vector<512x32xf32>
    %67 = vector.broadcast %64 : vector<1x32xf32> to vector<512x32xf32>
    %68 = arith.addf %66, %67 : vector<512x32xf32>
    %cst_41 = arith.constant 0.000000e+00 : f32
    %69 = vector.broadcast %cst_41 : f32 to vector<512x32xf32>
    %70 = arith.maximumf %68, %69 : vector<512x32xf32>
    %c0_42 = arith.constant 0 : index
    %c0_43 = arith.constant 0 : index
    %71 = vector.load %arg5[%c0_42, %c0_43] : memref<512x32xf32, #tpu.memory_space<vmem>>, vector<512x32xf32>
    tpu.vector_store %arg5[%c0_42, %c0_43], %70 {strides = array<i32>} : memref<512x32xf32, #tpu.memory_space<vmem>>, vector<512x32xf32>,
    return
  }
  func.func @transform_0(%arg0: i32) -> (i32, i32) {
    %c0_i32 = arith.constant 0 : i32
    %c0_i32_0 = arith.constant 0 : i32
    %c0_i32_1 = arith.constant 0 : i32
    return %c0_i32, %c0_i32_0 : i32, i32
  }
  func.func @transform_1(%arg0: i32) -> (i32, i32, i32) {
    %c0_i32 = arith.constant 0 : i32
    %c0_i32_0 = arith.constant 0 : i32
    %c0_i32_1 = arith.constant 0 : i32
    %c0_i32_2 = arith.constant 0 : i32
    return %c0_i32, %c0_i32_0, %c0_i32_1 : i32, i32, i32
  }
  func.func @transform_2(%arg0: i32) -> (i32, i32) {
    %c0_i32 = arith.constant 0 : i32
    %c0_i32_0 = arith.constant 0 : i32
    %c0_i32_1 = arith.constant 0 : i32
    return %c0_i32, %c0_i32_0 : i32, i32
  }
  func.func @transform_3(%arg0: i32) -> (i32, i32) {
    %c0_i32 = arith.constant 0 : i32
    %c0_i32_0 = arith.constant 0 : i32
    %c0_i32_1 = arith.constant 0 : i32
    return %c0_i32, %c0_i32_0 : i32, i32
  }
  func.func @transform_4(%arg0: i32) -> (i32, i32) {
    %c0_i32 = arith.constant 0 : i32
    %c0_i32_0 = arith.constant 0 : i32
    %c0_i32_1 = arith.constant 0 : i32
    return %c0_i32, %c0_i32_0 : i32, i32
  }
}

module attributes {stable_mosaic.version = 11 : i64} {
  func.func @_conv_bias_kernel(%arg0: i32, %arg1: memref<2176x24xf32, #tpu.memory_space<vmem>>, %arg2: memref<3x24x16xf32, #tpu.memory_space<vmem>>, %arg3: memref<1x4xf32, #tpu.memory_space<vmem>>, %arg4: memref<2048x16xf32, #tpu.memory_space<vmem>>) attributes {dimension_semantics = [#tpu.dimension_semantics<arbitrary>], iteration_bounds = array<i64: 1>, scalar_prefetch = 0 : i64, scratch_operands = 0 : i64, tpu.core_type = #tpu.core_type<tc>, window_params = [{pipeline_mode = #tpu.pipeline_mode<synchronous>, transform_indices = @transform_0, window_bounds = array<i64: 2176, 24>}, {pipeline_mode = #tpu.pipeline_mode<synchronous>, transform_indices = @transform_1, window_bounds = array<i64: 3, 24, 16>}, {pipeline_mode = #tpu.pipeline_mode<synchronous>, transform_indices = @transform_2, window_bounds = array<i64: 1, 4>}, {pipeline_mode = #tpu.pipeline_mode<synchronous>, transform_indices = @transform_3, window_bounds = array<i64: 2048, 16>}]} {
    %c0 = arith.constant 0 : index
    %c0_0 = arith.constant 0 : index
    %0 = vector.load %arg1[%c0, %c0_0] : memref<2176x24xf32, #tpu.memory_space<vmem>>, vector<1024x24xf32>
    %c0_1 = arith.constant 0 : index
    %c0_2 = arith.constant 0 : index
    %c0_3 = arith.constant 0 : index
    %1 = vector.load %arg2[%c0_1, %c0_2, %c0_3] : memref<3x24x16xf32, #tpu.memory_space<vmem>>, vector<1x24x16xf32>
    %2 = vector.shape_cast %1 : vector<1x24x16xf32> to vector<24x16xf32>
    %cst = arith.constant dense<0.000000e+00> : vector<1024x16xf32>
    %3 = tpu.matmul %0, %2, %cst {dimension_numbers = #tpu.dot_dimension_numbers<[1], [0], [0], [1], [0, 0, 1, 1], [], []>} : vector<1024x24xf32>, vector<24x16xf32>, vector<1024x16xf32> -> vector<1024x16xf32>
    %c32 = arith.constant 32 : index
    %c0_4 = arith.constant 0 : index
    %4 = vector.load %arg1[%c32, %c0_4] : memref<2176x24xf32, #tpu.memory_space<vmem>>, vector<1024x24xf32>
    %c1 = arith.constant 1 : index
    %c0_5 = arith.constant 0 : index
    %c0_6 = arith.constant 0 : index
    %5 = vector.load %arg2[%c1, %c0_5, %c0_6] : memref<3x24x16xf32, #tpu.memory_space<vmem>>, vector<1x24x16xf32>
    %6 = vector.shape_cast %5 : vector<1x24x16xf32> to vector<24x16xf32>
    %cst_7 = arith.constant dense<0.000000e+00> : vector<1024x16xf32>
    %7 = tpu.matmul %4, %6, %cst_7 {dimension_numbers = #tpu.dot_dimension_numbers<[1], [0], [0], [1], [0, 0, 1, 1], [], []>} : vector<1024x24xf32>, vector<24x16xf32>, vector<1024x16xf32> -> vector<1024x16xf32>
    %8 = arith.addf %3, %7 : vector<1024x16xf32>
    %c64 = arith.constant 64 : index
    %c0_8 = arith.constant 0 : index
    %9 = vector.load %arg1[%c64, %c0_8] : memref<2176x24xf32, #tpu.memory_space<vmem>>, vector<1024x24xf32>
    %c2 = arith.constant 2 : index
    %c0_9 = arith.constant 0 : index
    %c0_10 = arith.constant 0 : index
    %10 = vector.load %arg2[%c2, %c0_9, %c0_10] : memref<3x24x16xf32, #tpu.memory_space<vmem>>, vector<1x24x16xf32>
    %11 = vector.shape_cast %10 : vector<1x24x16xf32> to vector<24x16xf32>
    %cst_11 = arith.constant dense<0.000000e+00> : vector<1024x16xf32>
    %12 = tpu.matmul %9, %11, %cst_11 {dimension_numbers = #tpu.dot_dimension_numbers<[1], [0], [0], [1], [0, 0, 1, 1], [], []>} : vector<1024x24xf32>, vector<24x16xf32>, vector<1024x16xf32> -> vector<1024x16xf32>
    %13 = arith.addf %8, %12 : vector<1024x16xf32>
    %c0_12 = arith.constant 0 : index
    %c0_13 = arith.constant 0 : index
    %14 = vector.load %arg4[%c0_12, %c0_13] : memref<2048x16xf32, #tpu.memory_space<vmem>>, vector<1024x16xf32>
    tpu.vector_store %arg4[%c0_12, %c0_13], %13 {strides = array<i32>} : memref<2048x16xf32, #tpu.memory_space<vmem>>, vector<1024x16xf32>,
    %c1088 = arith.constant 1088 : index
    %c0_14 = arith.constant 0 : index
    %15 = vector.load %arg1[%c1088, %c0_14] : memref<2176x24xf32, #tpu.memory_space<vmem>>, vector<1024x24xf32>
    %c0_15 = arith.constant 0 : index
    %c0_16 = arith.constant 0 : index
    %c0_17 = arith.constant 0 : index
    %16 = vector.load %arg2[%c0_15, %c0_16, %c0_17] : memref<3x24x16xf32, #tpu.memory_space<vmem>>, vector<1x24x16xf32>
    %17 = vector.shape_cast %16 : vector<1x24x16xf32> to vector<24x16xf32>
    %cst_18 = arith.constant dense<0.000000e+00> : vector<1024x16xf32>
    %18 = tpu.matmul %15, %17, %cst_18 {dimension_numbers = #tpu.dot_dimension_numbers<[1], [0], [0], [1], [0, 0, 1, 1], [], []>} : vector<1024x24xf32>, vector<24x16xf32>, vector<1024x16xf32> -> vector<1024x16xf32>
    %c1120 = arith.constant 1120 : index
    %c0_19 = arith.constant 0 : index
    %19 = vector.load %arg1[%c1120, %c0_19] : memref<2176x24xf32, #tpu.memory_space<vmem>>, vector<1024x24xf32>
    %c1_20 = arith.constant 1 : index
    %c0_21 = arith.constant 0 : index
    %c0_22 = arith.constant 0 : index
    %20 = vector.load %arg2[%c1_20, %c0_21, %c0_22] : memref<3x24x16xf32, #tpu.memory_space<vmem>>, vector<1x24x16xf32>
    %21 = vector.shape_cast %20 : vector<1x24x16xf32> to vector<24x16xf32>
    %cst_23 = arith.constant dense<0.000000e+00> : vector<1024x16xf32>
    %22 = tpu.matmul %19, %21, %cst_23 {dimension_numbers = #tpu.dot_dimension_numbers<[1], [0], [0], [1], [0, 0, 1, 1], [], []>} : vector<1024x24xf32>, vector<24x16xf32>, vector<1024x16xf32> -> vector<1024x16xf32>
    %23 = arith.addf %18, %22 : vector<1024x16xf32>
    %c1152 = arith.constant 1152 : index
    %c0_24 = arith.constant 0 : index
    %24 = vector.load %arg1[%c1152, %c0_24] : memref<2176x24xf32, #tpu.memory_space<vmem>>, vector<1024x24xf32>
    %c2_25 = arith.constant 2 : index
    %c0_26 = arith.constant 0 : index
    %c0_27 = arith.constant 0 : index
    %25 = vector.load %arg2[%c2_25, %c0_26, %c0_27] : memref<3x24x16xf32, #tpu.memory_space<vmem>>, vector<1x24x16xf32>
    %26 = vector.shape_cast %25 : vector<1x24x16xf32> to vector<24x16xf32>
    %cst_28 = arith.constant dense<0.000000e+00> : vector<1024x16xf32>
    %27 = tpu.matmul %24, %26, %cst_28 {dimension_numbers = #tpu.dot_dimension_numbers<[1], [0], [0], [1], [0, 0, 1, 1], [], []>} : vector<1024x24xf32>, vector<24x16xf32>, vector<1024x16xf32> -> vector<1024x16xf32>
    %28 = arith.addf %23, %27 : vector<1024x16xf32>
    %c1024 = arith.constant 1024 : index
    %c0_29 = arith.constant 0 : index
    %29 = vector.load %arg4[%c1024, %c0_29] : memref<2048x16xf32, #tpu.memory_space<vmem>>, vector<1024x16xf32>
    tpu.vector_store %arg4[%c1024, %c0_29], %28 {strides = array<i32>} : memref<2048x16xf32, #tpu.memory_space<vmem>>, vector<1024x16xf32>,
    %c0_30 = arith.constant 0 : index
    %c0_31 = arith.constant 0 : index
    %30 = vector.load %arg4[%c0_30, %c0_31] : memref<2048x16xf32, #tpu.memory_space<vmem>>, vector<2048x16xf32>
    %c0_32 = arith.constant 0 : index
    %c0_33 = arith.constant 0 : index
    %31 = vector.load %arg3[%c0_32, %c0_33] : memref<1x4xf32, #tpu.memory_space<vmem>>, vector<1x4xf32>
    %32 = tpu.concatenate %31, %31, %31, %31 in 1 : vector<1x4xf32>, vector<1x4xf32>, vector<1x4xf32>, vector<1x4xf32> -> vector<1x16xf32>
    %33 = vector.broadcast %32 : vector<1x16xf32> to vector<2048x16xf32>
    %34 = arith.addf %30, %33 : vector<2048x16xf32>
    %c0_34 = arith.constant 0 : index
    %c0_35 = arith.constant 0 : index
    %35 = vector.load %arg4[%c0_34, %c0_35] : memref<2048x16xf32, #tpu.memory_space<vmem>>, vector<2048x16xf32>
    tpu.vector_store %arg4[%c0_34, %c0_35], %34 {strides = array<i32>} : memref<2048x16xf32, #tpu.memory_space<vmem>>, vector<2048x16xf32>,
    return
  }
  func.func @transform_0(%arg0: i32) -> (i32, i32) {
    %c0_i32 = arith.constant 0 : i32
    %c0_i32_0 = arith.constant 0 : i32
    %c0_i32_1 = arith.constant 0 : i32
    return %c0_i32, %c0_i32_0 : i32, i32
  }
  func.func @transform_1(%arg0: i32) -> (i32, i32, i32) {
    %c0_i32 = arith.constant 0 : i32
    %c0_i32_0 = arith.constant 0 : i32
    %c0_i32_1 = arith.constant 0 : i32
    %c0_i32_2 = arith.constant 0 : i32
    return %c0_i32, %c0_i32_0, %c0_i32_1 : i32, i32, i32
  }
  func.func @transform_2(%arg0: i32) -> (i32, i32) {
    %c0_i32 = arith.constant 0 : i32
    %c0_i32_0 = arith.constant 0 : i32
    %c0_i32_1 = arith.constant 0 : i32
    return %c0_i32, %c0_i32_0 : i32, i32
  }
  func.func @transform_3(%arg0: i32) -> (i32, i32) {
    %c0_i32 = arith.constant 0 : i32
    %c0_i32_0 = arith.constant 0 : i32
    %c0_i32_1 = arith.constant 0 : i32
    return %c0_i32, %c0_i32_0 : i32, i32
  }
}

</mosaic_0001>

<bundles_post_ra>
// kernel: generator_forward.5
= control target key start
LH: loop header
LB: loop body
LE: loop exit
PB: predicated region body
PF: predicated region fallthrough
CT: control target
= control target key end

     0   :  { %8 = vsyncpa [#allocation3], 0  ;;  %s584_s0 = inlined_call_operand.vmem [shape: f32[2,24], index: 0, kind: input, shape index: {}]   ;;  %s585_s1 = inlined_call_operand.hbm [shape: f32[24,1024], index: 1, kind: input, shape index: {}]   ;;  %s586_s2 = inlined_call_operand.hbm [shape: f32[1,1024], index: 2, kind: input, shape index: {}]   ;;  %s587_s3 = inlined_call_operand.vmem [shape: f32[2,1024], index: 3, kind: output, shape index: {}]  }
   0x1   :  { %9 = vsyncpa [#allocation5], 0  ;;  %s521_s12 = smov [#allocation2]   ;;  %s473_s16 = scalar_lea.hbm %s585_s1, 3072 }
   0x2   :  { %s17_s13 = sshll.u32 %s521_s12, 4  ;;  %p474_p0 = scmp.ne.s32.totalorder %s585_s1, %s473_s16  ;;  %s18_s13 = int_to_ptr.vmem [resolvable:$true] %s17_s13 }
   0x3   :  { %p477_p1 = scmp.lt.u32.totalorder %s473_s16, %s585_s1 }
   0x5   :  { %p479_p2 = pnand %p477_p1, %p474_p0 }
   0x7   :  { %482 = shalt.err (!%p479_p2)
}
   0x8   :  { %s483_s21 = scalar_lea.vmem %s18_s13, 3072  ;;  %p488_p4 = scmp.lt.s32.totalorder %s18_s13, %s18_s13 }
   0x9   :  { %p484_p3 = scmp.ne.s32.totalorder %s18_s13, %s483_s21  ;;  %p489_p5 = scmp.lt.s32.totalorder %s483_s21, %s483_s21 }
   0xb   :  { %p490_p6 = por %p489_p5, %p488_p4 }
   0xd   :  { %p491_p7 = pnand %p490_p6, %p484_p3 }
   0xf   :  { %494 = shalt.err (!%p491_p7)
}
  0x10   :  { %s522_s22 = smov 1024   ;;  %s523_s23 = smov 64  }
  0x11   :  { %23 = dma.hbm_to_vmem [thread:$0]  %s585_s1, 3072, %s18_s13, [#allocation3], %s522_s22, %s522_s22, %s523_s23  }
  0x12   :  { %s524_s26 = smov [#allocation4]   ;;  %s495_s30 = scalar_lea.hbm %s586_s2, 128 }
  0x13   :  { %s30_s27 = sshll.u32 %s524_s26, 4  ;;  %p496_p8 = scmp.ne.s32.totalorder %s586_s2, %s495_s30  ;;  %s31_s27 = int_to_ptr.vmem [resolvable:$true] %s30_s27 }
  0x14   :  { %p499_p9 = scmp.lt.u32.totalorder %s495_s30, %s586_s2 }
  0x16   :  { %p501_p10 = pnand %p499_p9, %p496_p8 }
  0x18   :  { %504 = shalt.err (!%p501_p10)
}
  0x19   :  { %s505_s8 = scalar_lea.vmem %s31_s27, 128  ;;  %p510_p12 = scmp.lt.s32.totalorder %s31_s27, %s31_s27 }
  0x1a   :  { %p506_p11 = scmp.ne.s32.totalorder %s31_s27, %s505_s8  ;;  %p511_p13 = scmp.lt.s32.totalorder %s505_s8, %s505_s8 }
  0x1c   :  { %p512_p0 = por %p511_p13, %p510_p12 }
  0x1e   :  { %p513_p1 = pnand %p512_p0, %p506_p11 }
  0x20   :  { %516 = shalt.err (!%p513_p1)
}
  0x21   :  { %33 = dma.hbm_to_vmem [thread:$0]  %s586_s2, 128, %s31_s27, [#allocation5]  }
  0x22   :  { %517 = dma.done.wait [#allocation3], 3072  }
  0x23   :  { %518 = vsyncadd [#allocation3], 4294964224 }
  0x24   :  { %519 = dma.done.wait [#allocation5], 128  }
  0x25   :  { %520 = vsyncadd [#allocation5], 4294967168  ;;  %v525_v0 = vmov 0.0   ;;  %v42_v1 = vld [vmem:[#allocation2 + $0x8] sm:$0xff]  ;;  %v44_v3 = vld [vmem:[#allocation2 + $0x18] sm:$0xff]  ;;  %vm107_vm0 = vcmask 195584   ;;  %v67_v34 = vlaneseq }
  0x26   :  { %175 = vmatprep.mubr.f32.mxu0 %v525_v0  ;;  %246 = vmatprep.mubr.f32.mxu1 %v525_v0  ;;  %v50_v2 = vld [vmem:[#allocation2 + $0x48] sm:$0xff]  ;;  %v52_v5 = vld [vmem:[#allocation2 + $0x58] sm:$0xff]  ;;  %v41_v6 = vld [vmem:[#allocation2] sm:$0xff]  ;;  %v526_v40 = vmov 1983009808  }
  0x27   :  { %v451_v4 = vpack.c.bf16 %v50_v2, %v42_v1  ;;  %v49_v7 = vld [vmem:[#allocation2 + $0x40] sm:$0xff]  ;;  %v455_v8 = vpack.c.bf16 %v52_v5, %v44_v3  ;;  %v43_v10 = vld [vmem:[#allocation2 + $0x10] sm:$0xff]  ;;  %v58_v12 = vld [vmem:[#allocation2 + $0x88] sm:$0xff]  ;;  %v68_v35 = vshrl.u32 %v67_v34, 7  ;;  %v406_v41 = vunpack.c.l.s4 %v526_v40 }
  0x28   :  { %v453_v9 = vpack.c.bf16 %v49_v7, %v41_v6  ;;  %v51_v11 = vld [vmem:[#allocation2 + $0x50] sm:$0xff]  ;;  %v60_v14 = vld [vmem:[#allocation2 + $0x98] sm:$0xff]  ;;  %v57_v15 = vld [vmem:[#allocation2 + $0x80] sm:$0xff] }
  0x29   :  { %452 = vmatprep.subr.bf16.mxu0 %v451_v4  ;;  %v457_v13 = vpack.c.bf16 %v51_v11, %v43_v10  ;;  %456 = vmatprep.subr.bf16.mxu1 %v455_v8  ;;  %v59_v16 = vld [vmem:[#allocation2 + $0x90] sm:$0xff]  ;;  %v40_v17 = vld [vmem:[%s584_s0] sm:$0x3]  ;;  %v46_v18 = vld [vmem:[#allocation2 + $0x28] sm:$0xff]  ;;  %v69_v36 = vsub.s32 0, %v68_v35  ;;  %v77_v38 = vsub.s32 2, %v68_v35  ;;  %v407_v46 = vunpack.c.0.s8 %v406_v41 }
  0x2a   :  { %454 = vmatpush1.bf16.msra.mxu0 %v453_v9  ;;  %v54_v19 = vld [vmem:[#allocation2 + $0x68] sm:$0xff]  ;;  %v48_v20 = vld [vmem:[#allocation2 + $0x38] sm:$0xff]  ;;  %v45_v22 = vld [vmem:[#allocation2 + $0x20] sm:$0xff]  ;;  %v73_v39 = vsub.s32 1, %v68_v35  ;;  %v81_v42 = vsub.s32 3, %v68_v35  ;;  %v85_v49 = vsub.s32 4, %v68_v35 }
  0x2b   :  { %458 = vmatpush1.bf16.msra.mxu1 %v457_v13  ;;  %115 = vmatprep.subr.mxu0 %v58_v12  ;;  %v56_v21 = vld [vmem:[#allocation2 + $0x78] sm:$0xff]  ;;  %v459_v23 = vpack.c.bf16 %v54_v19, %v46_v18  ;;  %v53_v24 = vld [vmem:[#allocation2 + $0x60] sm:$0xff]  ;;  %v47_v25 = vld [vmem:[#allocation2 + $0x30] sm:$0xff]  ;;  %v93_v53 = vsub.s32 6, %v68_v35  ;;  %v89_v54 = vsub.s32 5, %v68_v35  ;;  %v410_v57 = vsub.s32 %v407_v46, %v68_v35 }
  0x2c   :  { %186 = vmatprep.subr.mxu1 %v60_v14  ;;  %v55_v26 = vld [vmem:[#allocation2 + $0x70] sm:$0xff]  ;;  %v463_v27 = vpack.c.bf16 %v56_v21, %v48_v20  ;;  %v461_v28 = vpack.c.bf16 %v53_v24, %v45_v22  ;;  %v62_v30 = vld [vmem:[#allocation2 + $0xa8] sm:$0xff]  ;;  %v64_v31 = vld [vmem:[#allocation2 + $0xb8] sm:$0xff]  ;;  %v97_v59 = vsub.s32 7, %v68_v35 }
  0x2d   :  { %v465_v29 = vpack.c.bf16 %v55_v26, %v47_v25  ;;  %v61_v32 = vld [vmem:[#allocation2 + $0xa0] sm:$0xff]  ;;  %v63_v33 = vld [vmem:[#allocation2 + $0xb0] sm:$0xff] }
  0x2e   :  { %116 = vmatpush1.msra.mxu0 %v57_v15  ;;  %v65_v37 = vld [vmem:[#allocation4] sm:$0xff] }
  0x2f   :  { %187 = vmatpush1.msra.mxu1 %v59_v16  ;;  %447 = vmatmul.mubr.msk.f32.vlgmr.msra.gmra.mrb[0].mxu0 %vm107_vm0, %v40_v17  ;;  %v70_v43 = vrot.slane %v65_v37, %v69_v36  ;;  %v78_v44 = vrot.slane %v65_v37, %v77_v38  ;;  %v74_v45 = vrot.slane %v65_v37, %v73_v39 }
  0x30   :  { %448 = vmatmul.mubr.msk.f32.vlgmr.msra.gmra.mrb[0].mxu1 %vm107_vm0, %v40_v17  ;;  %460 = vmatprep.subr.bf16.mxu0 %v459_v23  ;;  %v82_v47 = vrot.slane %v65_v37, %v81_v42  ;;  %v86_v62 = vrot.slane %v65_v37, %v85_v49  ;;  %v90_v1 = vrot.slane %v65_v37, %v89_v54 }
  0x31   :  { %464 = vmatprep.subr.bf16.mxu1 %v463_v27  ;;  %462 = vmatpush1.bf16.msra.mxu0 %v461_v28  ;;  %v98_v3 = vrot.slane %v65_v37, %v97_v59 }
  0x32   :  { %466 = vmatpush1.bf16.msra.mxu1 %v465_v29  ;;  %257 = vmatprep.subr.mxu0 %v62_v30 }
  0x33   :  { %328 = vmatprep.subr.mxu1 %v64_v31  ;;  %317 = vmatprep.mubr.f32.mxu0 %v525_v0 }
  0x34   :  { %388 = vmatprep.mubr.f32.mxu1 %v525_v0  ;;  %v94_v0 = vrot.slane %v65_v37, %v93_v53 }
  0x35   :  { %258 = vmatpush1.msra.mxu0 %v61_v32 }
  0x36   :  { %329 = vmatpush1.msra.mxu1 %v63_v33  ;;  %449 = vmatmul.mubr.msk.f32.vlgmr.msra.gmra.mrb[2].mxu0 %vm107_vm0, %v40_v17 }
  0x37   :  { %450 = vmatmul.mubr.msk.f32.vlgmr.msra.gmra.mrb[2].mxu1 %vm107_vm0, %v40_v17 }
 0x102   :  { %v177_v48 = vpop.f32.mrb[0].mxu0 }
 0x103   :  { %v178_v50 = vadd.f32 %v177_v48, %v70_v43  ;;  %v248_v51 = vpop.f32.mrb[0].mxu1  ;;  %v179_v52 = vpop.f32.mrb[1].mxu0 }
 0x104   :  { %v249_v55 = vadd.f32 %v248_v51, %v78_v44  ;;  %v180_v56 = vadd.f32 %v179_v52, %v74_v45  ;;  %v250_v58 = vpop.f32.mrb[1].mxu1 }
 0x105   :  { %v251_v60 = vadd.f32 %v250_v58, %v82_v47 }
 0x106   :  { %v403_v61 = vcombine.low %v178_v50, %v180_v56 }
 0x107   :  { %v404_v63 = vcombine.low %v249_v55, %v251_v60 }
 0x108   :  { %v411_v2 = vrot.slane %v403_v61, %v410_v57 }
 0x109   :  { %v418_v4 = vrot.slane %v404_v63, %v410_v57  ;;  %v319_v5 = vpop.f32.mrb[2].mxu0 }
 0x10a   :  { %v320_v6 = vadd.f32 %v319_v5, %v86_v62  ;;  %v390_v7 = vpop.f32.mrb[2].mxu1  ;;  %v321_v8 = vpop.f32.mrb[3].mxu0 }
 0x10b   :  { %v419_v9 = vcombine.low %v411_v2, %v418_v4  ;;  %v391_v10 = vadd.f32 %v390_v7, %v94_v0  ;;  %v322_v11 = vadd.f32 %v321_v8, %v90_v1  ;;  %v392_v12 = vpop.f32.mrb[3].mxu1 }
 0x10c   :  { %v393_v13 = vadd.f32 %v392_v12, %v98_v3 }
 0x10d   :  { %439 = vst [vmem:[%s587_s3] sm:$0xff] %v419_v9  ;;  %v420_v14 = vcombine.low %v320_v6, %v322_v11 }
 0x10e   :  { %v421_v15 = vcombine.low %v391_v10, %v393_v13 }
 0x10f   :  { %v428_v16 = vrot.slane %v420_v14, %v410_v57 }
 0x110   :  { %v435_v17 = vrot.slane %v421_v15, %v410_v57 }
 0x112   :  { %v436_v18 = vcombine.low %v428_v16, %v435_v17 }
 0x114   :  { %440 = vst [vmem:[%s587_s3 + $0x8] sm:$0xff] %v436_v18 }
 0x115   :  { %445 = vsyncpa [#allocation3], 1 }
 0x116   :  { %446 = vsyncpa [#allocation5], 1 }

// kernel: generator_forward.6
= control target key start
LH: loop header
LB: loop body
LE: loop exit
PB: predicated region body
PF: predicated region fallthrough
CT: control target
= control target key end

     0   :  { %9 = vsyncpa [#allocation3], 0  ;;  %s1511_s0 = inlined_call_operand.vmem [shape: f32[48,192], index: 0, kind: input, shape index: {}]   ;;  %s1512_s1 = inlined_call_operand.hbm [shape: f32[3,192,128], index: 1, kind: input, shape index: {}]   ;;  %s1513_s2 = inlined_call_operand.hbm [shape: f32[1,32], index: 2, kind: input, shape index: {}]   ;;  %s1514_s3 = inlined_call_operand.hbm [shape: f32[1,32], index: 3, kind: input, shape index: {}]   ;;  %s1515_s4 = inlined_call_operand.vmem [shape: f32[32,128], index: 4, kind: output, shape index: {}]  }
   0x1   :  { %10 = vsyncpa [#allocation5], 0  ;;  %s1211_s15 = smov [#allocation4]   ;;  %s1212_s17 = smov [#allocation2]  }
   0x2   :  { %s31_s16 = sshll.u32 %s1211_s15, 4  ;;  %s18_s18 = sshll.u32 %s1212_s17, 4  ;;  %s32_s16 = int_to_ptr.vmem [resolvable:$true] %s31_s16  ;;  %s1245_s18 = int_to_ptr.vmem [resolvable:$true] %s18_s18 }
   0x3   :  { %s1141_s21 = scalar_lea.hbm %s1513_s2, 16 }
   0x4   :  { %p1142_p0 = scmp.ne.s32.totalorder %s1513_s2, %s1141_s21  ;;  %p1145_p1 = scmp.lt.u32.totalorder %s1141_s21, %s1513_s2 }
   0x6   :  { %p1147_p2 = pnand %p1145_p1, %p1142_p0 }
   0x8   :  { %1150 = shalt.err (!%p1147_p2)
}
   0x9   :  { %s1151_s26 = scalar_lea.vmem %s32_s16, 16  ;;  %s1155_s27 = scalar_lea.vmem %s32_s16, 32 }
   0xa   :  { %p1152_p3 = scmp.ne.s32.totalorder %s32_s16, %s1151_s26  ;;  %p1156_p4 = scmp.lt.s32.totalorder %s32_s16, %s32_s16 }
   0xb   :  { %p1157_p5 = scmp.lt.s32.totalorder %s1155_s27, %s1151_s26 }
   0xd   :  { %p1158_p6 = por %p1157_p5, %p1156_p4 }
   0xf   :  { %p1159_p7 = pnand %p1158_p6, %p1152_p3 }
  0x11   :  { %1162 = shalt.err (!%p1159_p7)
}
  0x12   :  { %34 = dma.hbm_to_vmem [thread:$0]  %s1513_s2, 16, %s32_s16, [#allocation5]  }
  0x13   :  { %s1163_s6 = scalar_lea.hbm %s1512_s1, 9216 }
  0x14   :  { %p1164_p8 = scmp.ne.s32.totalorder %s1512_s1, %s1163_s6  ;;  %p1167_p9 = scmp.lt.u32.totalorder %s1163_s6, %s1512_s1 }
  0x16   :  { %p1169_p10 = pnand %p1167_p9, %p1164_p8 }
  0x18   :  { %1172 = shalt.err (!%p1169_p10)
}
  0x19   :  { %s1173_s11 = scalar_lea.vmem %s1245_s18, 9216  ;;  %p1178_p12 = scmp.lt.s32.totalorder %s1245_s18, %s1245_s18 }
  0x1a   :  { %p1174_p11 = scmp.ne.s32.totalorder %s1245_s18, %s1173_s11  ;;  %p1179_p13 = scmp.lt.s32.totalorder %s1173_s11, %s1173_s11 }
  0x1c   :  { %p1180_p0 = por %p1179_p13, %p1178_p12 }
  0x1e   :  { %p1181_p1 = pnand %p1180_p0, %p1174_p11 }
  0x20   :  { %1184 = shalt.err (!%p1181_p1)
}
  0x21   :  { %s1213_s2 = smov 128   ;;  %s1214_s12 = smov 8  }
  0x22   :  { %24 = dma.hbm_to_vmem [thread:$0]  %s1512_s1, 9216, %s1245_s18, [#allocation3], %s1213_s2, %s1213_s2, %s1214_s12  }
  0x23   :  { %s1215_s15 = smov [#allocation6]   ;;  %s1185_s20 = scalar_lea.hbm %s1514_s3, 16 }
  0x24   :  { %s41_s16 = sshll.u32 %s1215_s15, 4  ;;  %p1186_p2 = scmp.ne.s32.totalorder %s1514_s3, %s1185_s20  ;;  %s42_s16 = int_to_ptr.vmem [resolvable:$true] %s41_s16 }
  0x25   :  { %p1189_p3 = scmp.lt.u32.totalorder %s1185_s20, %s1514_s3 }
  0x27   :  { %p1191_p4 = pnand %p1189_p3, %p1186_p2 }
  0x29   :  { %1194 = shalt.err (!%p1191_p4)
}
  0x2a   :  { %s1195_s25 = scalar_lea.vmem %s42_s16, 16  ;;  %s1199_s1 = scalar_lea.vmem %s42_s16, 32 }
  0x2b   :  { %p1196_p5 = scmp.ne.s32.totalorder %s42_s16, %s1195_s25  ;;  %p1200_p6 = scmp.lt.s32.totalorder %s42_s16, %s42_s16 }
  0x2c   :  { %p1201_p7 = scmp.lt.s32.totalorder %s1199_s1, %s1195_s25 }
  0x2e   :  { %p1202_p8 = por %p1201_p7, %p1200_p6 }
  0x30   :  { %p1203_p9 = pnand %p1202_p8, %p1196_p5 }
  0x32   :  { %1206 = shalt.err (!%p1203_p9)
}
  0x33   :  { %44 = dma.hbm_to_vmem [thread:$0]  %s1514_s3, 16, %s42_s16, [#allocation5]  }
  0x34   :  { %1207 = dma.done.wait [#allocation3], 9216  }
  0x35   :  { %1208 = vsyncadd [#allocation3], 4294958080 }
  0x36   :  { %1209 = dma.done.wait [#allocation5], 32  }
  0x37   :  { %1210 = vsyncadd [#allocation5], 4294967264  ;;  %v1216_v0 = vmov 0.0|0.0   ;;  %v87_v1 = vld [vmem:[#allocation2 + $0xc0] sm:$0xff]  ;;  %v88_v2 = vld [vmem:[#allocation2 + $0xc8] sm:$0xff]  ;;  %vm117_vm0 = vcmask 1043456  }
  0x38   :  { %898 = vmatprep.subr.bf16.mxu0 %v1216_v0  ;;  %1006 = vmatprep.subr.bf16.mxu1 %v1216_v0  ;;  %v89_v3 = vld [vmem:[#allocation2 + $0xd0] sm:$0xff]  ;;  %v899_v4 = vpack.c.bf16 %v88_v2, %v87_v1  ;;  %v90_v5 = vld [vmem:[#allocation2 + $0xd8] sm:$0xff]  ;;  %v91_v7 = vld [vmem:[#allocation2 + $0xe0] sm:$0xff]  ;;  %vm130_vm1 = vcmask 523264   ;;  %s1218_s11 = smov 96   ;;  %s1219_s2 = smov 64  }
  0x39   :  { %v902_v6 = vpack.c.bf16 %v90_v5, %v89_v3  ;;  %v92_v8 = vld [vmem:[#allocation2 + $0xe8] sm:$0xff]  ;;  %v93_v10 = vld [vmem:[#allocation2 + $0xf0] sm:$0xff]  ;;  %v94_v11 = vld [vmem:[#allocation2 + $0xf8] sm:$0xff]  ;;  %vm777_vm2 = vcmask 261120   ;;  %vm780_vm3 = vcmask 785408  }
  0x3a   :  { %900 = vmatpush1.bf16.msra.mxu0 %v899_v4  ;;  %1008 = vmatpush1.bf16.msra.mxu1 %v899_v4  ;;  %v905_v9 = vpack.c.bf16 %v92_v8, %v91_v7  ;;  %v1297_v12 = vld [vmem:[%s1511_s0 + $0x18] sm:$0xff]  ;;  %v83_v13 = vld [vmem:[%s1511_s0 + $0x8] sm:$0xf0]  ;;  %v908_v20 = vpack.c.bf16 %v94_v11, %v93_v10  ;;  %v95_v22 = vld [vmem:[#allocation2 + $0x100] sm:$0xff] }
  0x3b   :  { %901 = vmatprep.subr.bf16.mxu0 %v1216_v0  ;;  %1009 = vmatprep.subr.bf16.mxu1 %v1216_v0  ;;  %v1305_v14 = vld [vmem:[%s1511_s0 + $0x48] sm:$0xff]  ;;  %v121_v15 = vrot.slane %v83_v13, 4  ;;  %v122_v16 = vrot.slane %v1297_v12, 4  ;;  %v428_v17 = vld [vmem:[%s1511_s0 + $0x38] sm:$0xf0]  ;;  %v97_v26 = vld [vmem:[#allocation2 + $0x110] sm:$0xff] }
  0x3c   :  { %v465_v18 = vrot.slane %v1305_v14, 4  ;;  %v464_v19 = vrot.slane %v428_v17, 4  ;;  %v96_v23 = vld [vmem:[#allocation2 + $0x108] sm:$0xff]  ;;  %v98_v27 = vld [vmem:[#allocation2 + $0x118] sm:$0xff]  ;;  %v99_v29 = vld [vmem:[#allocation2 + $0x120] sm:$0xff] }
  0x3d   :  { %v123_v21 = vsel %vm117_vm0, %v121_v15, %v122_v16  ;;  %v911_v25 = vpack.c.bf16 %v96_v23, %v95_v22  ;;  %v914_v28 = vpack.c.bf16 %v98_v27, %v97_v26  ;;  %v100_v30 = vld [vmem:[#allocation2 + $0x128] sm:$0xff]  ;;  %v101_v32 = vld [vmem:[#allocation2 + $0x130] sm:$0xff]  ;;  %v102_v33 = vld [vmem:[#allocation2 + $0x138] sm:$0xff] }
  0x3e   :  { %903 = vmatpush1.bf16.msra.mxu0 %v902_v6  ;;  %1011 = vmatpush1.bf16.msra.mxu1 %v902_v6  ;;  %v466_v24 = vsel %vm117_vm0, %v464_v19, %v465_v18  ;;  %v917_v31 = vpack.c.bf16 %v100_v30, %v99_v29  ;;  %v920_v34 = vpack.c.bf16 %v102_v33, %v101_v32  ;;  %v103_v35 = vld [vmem:[#allocation2 + $0x140] sm:$0xff]  ;;  %v104_v36 = vld [vmem:[#allocation2 + $0x148] sm:$0xff]  ;;  %v105_v38 = vld [vmem:[#allocation2 + $0x150] sm:$0xff] }
  0x3f   :  { %904 = vmatprep.subr.bf16.mxu0 %v1216_v0  ;;  %1012 = vmatprep.subr.bf16.mxu1 %v1216_v0  ;;  %v923_v37 = vpack.c.bf16 %v104_v36, %v103_v35  ;;  %v106_v39 = vld [vmem:[#allocation2 + $0x158] sm:$0xff]  ;;  %v107_v41 = vld [vmem:[#allocation2 + $0x160] sm:$0xff]  ;;  %v108_v42 = vld [vmem:[#allocation2 + $0x168] sm:$0xff] }
  0x40   :  { %886 = vmatprep.mubr.msk.f32.mxu0 %vm130_vm1, %v123_v21  ;;  %892 = vmatprep.mubr.msk.f32.mxu1 %vm130_vm1, %v466_v24  ;;  %v926_v40 = vpack.c.bf16 %v106_v39, %v105_v38  ;;  %v929_v43 = vpack.c.bf16 %v108_v42, %v107_v41  ;;  %v109_v44 = vld [vmem:[#allocation2 + $0x170] sm:$0xff]  ;;  %v82_v46 = vld [vmem:[%s1511_s0] sm:$0xf0]  ;;  %v110_v47 = vld [vmem:[#allocation2 + $0x178] sm:$0xff] }
  0x41   :  { %v1337_v45 = vld [vmem:[%s1511_s0 + $0x10] sm:$0xff]  ;;  %v1347_v48 = vld [vmem:[%s1511_s0 + $0x40] sm:$0xff]  ;;  %v118_v50 = vrot.slane %v82_v46, 4  ;;  %v59_v53 = vld [vmem:[#allocation2 + $0x8] sm:$0xff]  ;;  %v932_v54 = vpack.c.bf16 %v110_v47, %v109_v44 }
  0x42   :  { %906 = vmatpush1.bf16.msra.mxu0 %v905_v9  ;;  %1014 = vmatpush1.bf16.msra.mxu1 %v905_v9  ;;  %v427_v49 = vld [vmem:[%s1511_s0 + $0x30] sm:$0xf0]  ;;  %v119_v51 = vrot.slane %v1337_v45, 4  ;;  %v58_v52 = vld [vmem:[#allocation2] sm:$0xff]  ;;  %v462_v56 = vrot.slane %v1347_v48, 4  ;;  %v61_v6 = vld [vmem:[#allocation2 + $0x18] sm:$0xff] }
  0x43   :  { %907 = vmatprep.subr.bf16.mxu0 %v1216_v0  ;;  %1015 = vmatprep.subr.bf16.mxu1 %v1216_v0  ;;  %v461_v55 = vrot.slane %v427_v49, 4  ;;  %v85_v57 = vld [vmem:[%s1511_s0 + $0x28] sm:$0xf]  ;;  %v430_v58 = vld [vmem:[%s1511_s0 + $0x58] sm:$0xf]  ;;  %v935_v61 = vpack.c.bf16 %v59_v53, %v58_v52  ;;  %v60_v5 = vld [vmem:[#allocation2 + $0x10] sm:$0xff] }
  0x44   :  { %v84_v59 = vld [vmem:[%s1511_s0 + $0x20] sm:$0xf]  ;;  %v429_v60 = vld [vmem:[%s1511_s0 + $0x50] sm:$0xf]  ;;  %v126_v62 = vrot.slane %v85_v57, 4  ;;  %v469_v63 = vrot.slane %v430_v58, 4  ;;  %v120_v1 = vsel %vm117_vm0, %v118_v50, %v119_v51  ;;  %v938_v9 = vpack.c.bf16 %v61_v6, %v60_v5 }
  0x45   :  { %v463_v2 = vsel %vm117_vm0, %v461_v55, %v462_v56  ;;  %v124_v3 = vrot.slane %v84_v59, 4  ;;  %v467_v4 = vrot.slane %v429_v60, 4  ;;  %v62_v13 = vld [vmem:[#allocation2 + $0x20] sm:$0xff]  ;;  %v63_v15 = vld [vmem:[#allocation2 + $0x28] sm:$0xff]  ;;  %v400_v17 = vld [vmem:[%s1511_s0 + $0x38] sm:$0xff] }
  0x46   :  { %909 = vmatpush1.bf16.msra.mxu0 %v908_v20  ;;  %1017 = vmatpush1.bf16.msra.mxu1 %v908_v20  ;;  %v127_v7 = vsel %vm117_vm0, %v122_v16, %v126_v62  ;;  %v470_v8 = vsel %vm117_vm0, %v465_v18, %v469_v63  ;;  %v55_v16 = vld [vmem:[%s1511_s0 + $0x8] sm:$0xff]  ;;  %v941_v18 = vpack.c.bf16 %v63_v15, %v62_v13  ;;  %v64_v19 = vld [vmem:[#allocation2 + $0x30] sm:$0xff]  ;;  %v65_v20 = vld [vmem:[#allocation2 + $0x38] sm:$0xff] }
  0x47   :  { %910 = vmatprep.subr.bf16.mxu0 %v1216_v0  ;;  %1018 = vmatprep.subr.bf16.mxu1 %v1216_v0  ;;  %v125_v10 = vsel %vm117_vm0, %v119_v51, %v124_v3  ;;  %v468_v11 = vsel %vm117_vm0, %v462_v56, %v467_v4  ;;  %v944_v21 = vpack.c.bf16 %v65_v20, %v64_v19  ;;  %v66_v22 = vld [vmem:[#allocation2 + $0x40] sm:$0xff]  ;;  %v67_v23 = vld [vmem:[#allocation2 + $0x48] sm:$0xff]  ;;  %v69_v26 = vld [vmem:[#allocation2 + $0x58] sm:$0xff] }
  0x48   :  { %v947_v24 = vpack.c.bf16 %v67_v23, %v66_v22  ;;  %v71_v29 = vld [vmem:[#allocation2 + $0x68] sm:$0xff]  ;;  %v73_v32 = vld [vmem:[#allocation2 + $0x78] sm:$0xff]  ;;  %v293_v47 = vld [vmem:[#allocation2 + $0x180] sm:$0xff] }
  0x49   :  { %v75_v35 = vld [vmem:[#allocation2 + $0x88] sm:$0xff]  ;;  %v77_v38 = vld [vmem:[#allocation2 + $0x98] sm:$0xff]  ;;  %v54_v50 = vld [vmem:[%s1511_s0] sm:$0xff] }
  0x4a   :  { %912 = vmatpush1.bf16.msra.mxu0 %v911_v25  ;;  %1020 = vmatpush1.bf16.msra.mxu1 %v911_v25  ;;  %v68_v25 = vld [vmem:[#allocation2 + $0x50] sm:$0xff]  ;;  %v79_v41 = vld [vmem:[#allocation2 + $0xa8] sm:$0xff]  ;;  %v81_v44 = vld [vmem:[#allocation2 + $0xb8] sm:$0xff] }
  0x4b   :  { %913 = vmatprep.subr.bf16.mxu0 %v1216_v0  ;;  %1021 = vmatprep.subr.bf16.mxu1 %v1216_v0  ;;  %v950_v27 = vpack.c.bf16 %v69_v26, %v68_v25  ;;  %v294_v49 = vld [vmem:[#allocation2 + $0x188] sm:$0xff]  ;;  %v399_v52 = vld [vmem:[%s1511_s0 + $0x30] sm:$0xff]  ;;  %v297_v56 = vld [vmem:[#allocation2 + $0x1a0] sm:$0xff] }
  0x4c   :  { %v971_v51 = vpack.c.bf16 %v294_v49, %v293_v47  ;;  %v295_v53 = vld [vmem:[#allocation2 + $0x190] sm:$0xff]  ;;  %v298_v57 = vld [vmem:[#allocation2 + $0x1a8] sm:$0xff]  ;;  %v300_v60 = vld [vmem:[#allocation2 + $0x1b8] sm:$0xff] }
  0x4d   :  { %v977_v58 = vpack.c.bf16 %v298_v57, %v297_v56  ;;  %v299_v59 = vld [vmem:[#allocation2 + $0x1b0] sm:$0xff]  ;;  %v301_v62 = vld [vmem:[#allocation2 + $0x1c0] sm:$0xff]  ;;  %v302_v63 = vld [vmem:[#allocation2 + $0x1c8] sm:$0xff] }
  0x4e   :  { %915 = vmatpush1.bf16.msra.mxu0 %v914_v28  ;;  %1023 = vmatpush1.bf16.msra.mxu1 %v914_v28  ;;  %v70_v28 = vld [vmem:[#allocation2 + $0x60] sm:$0xff]  ;;  %v306_v4 = vld [vmem:[#allocation2 + $0x1e8] sm:$0xff]  ;;  %v307_v6 = vld [vmem:[#allocation2 + $0x1f0] sm:$0xff] }
  0x4f   :  { %916 = vmatprep.subr.bf16.mxu0 %v1216_v0  ;;  %1024 = vmatprep.subr.bf16.mxu1 %v1216_v0  ;;  %v953_v30 = vpack.c.bf16 %v71_v29, %v70_v28  ;;  %v305_v3 = vld [vmem:[#allocation2 + $0x1e0] sm:$0xff]  ;;  %v311_v13 = vld [vmem:[#allocation2 + $0x210] sm:$0xff]  ;;  %v312_v15 = vld [vmem:[#allocation2 + $0x218] sm:$0xff] }
  0x50   :  { %v989_v5 = vpack.c.bf16 %v306_v4, %v305_v3  ;;  %v315_v20 = vld [vmem:[#allocation2 + $0x230] sm:$0xff]  ;;  %v291_v23 = vld [vmem:[%s1511_s0 + $0x28] sm:$0xff] }
  0x51   :  { %v632_v25 = vld [vmem:[%s1511_s0 + $0x50] sm:$0xff] }
  0x52   :  { %918 = vmatpush1.bf16.msra.mxu0 %v917_v31  ;;  %1026 = vmatpush1.bf16.msra.mxu1 %v917_v31  ;;  %v72_v31 = vld [vmem:[#allocation2 + $0x70] sm:$0xff] }
  0x53   :  { %919 = vmatprep.subr.bf16.mxu0 %v1216_v0  ;;  %1027 = vmatprep.subr.bf16.mxu1 %v1216_v0  ;;  %v956_v33 = vpack.c.bf16 %v73_v32, %v72_v31 }
  0x56   :  { %921 = vmatpush1.bf16.msra.mxu0 %v920_v34  ;;  %1029 = vmatpush1.bf16.msra.mxu1 %v920_v34  ;;  %v74_v34 = vld [vmem:[#allocation2 + $0x80] sm:$0xff] }
  0x57   :  { %922 = vmatprep.subr.bf16.mxu0 %v1216_v0  ;;  %1030 = vmatprep.subr.bf16.mxu1 %v1216_v0  ;;  %v959_v36 = vpack.c.bf16 %v75_v35, %v74_v34 }
  0x5a   :  { %924 = vmatpush1.bf16.msra.mxu0 %v923_v37  ;;  %1032 = vmatpush1.bf16.msra.mxu1 %v923_v37  ;;  %v76_v37 = vld [vmem:[#allocation2 + $0x90] sm:$0xff] }
  0x5b   :  { %925 = vmatprep.subr.bf16.mxu0 %v1216_v0  ;;  %1033 = vmatprep.subr.bf16.mxu1 %v1216_v0  ;;  %v962_v39 = vpack.c.bf16 %v77_v38, %v76_v37 }
  0x5e   :  { %927 = vmatpush1.bf16.msra.mxu0 %v926_v40  ;;  %1035 = vmatpush1.bf16.msra.mxu1 %v926_v40  ;;  %v78_v40 = vld [vmem:[#allocation2 + $0xa0] sm:$0xff] }
  0x5f   :  { %928 = vmatprep.subr.bf16.mxu0 %v1216_v0  ;;  %1036 = vmatprep.subr.bf16.mxu1 %v1216_v0  ;;  %v965_v42 = vpack.c.bf16 %v79_v41, %v78_v40 }
  0x62   :  { %930 = vmatpush1.bf16.msra.mxu0 %v929_v43  ;;  %1038 = vmatpush1.bf16.msra.mxu1 %v929_v43  ;;  %v80_v43 = vld [vmem:[#allocation2 + $0xb0] sm:$0xff] }
  0x63   :  { %931 = vmatprep.subr.bf16.mxu0 %v1216_v0  ;;  %1039 = vmatprep.subr.bf16.mxu1 %v1216_v0  ;;  %v968_v46 = vpack.c.bf16 %v81_v44, %v80_v43 }
  0x66   :  { %933 = vmatpush1.bf16.msra.mxu0 %v932_v54  ;;  %1041 = vmatpush1.bf16.msra.mxu1 %v932_v54  ;;  %v296_v54 = vld [vmem:[#allocation2 + $0x198] sm:$0xff] }
  0x67   :  { %934 = vmatprep.subr.bf16.mxu0 %v1216_v0  ;;  %1042 = vmatprep.subr.bf16.mxu1 %v1216_v0  ;;  %v974_v55 = vpack.c.bf16 %v296_v54, %v295_v53 }
  0x69   :  { %200 = vmatmul.mubr.f32.vlgmr.msra.gmra.mrb[0].mxu0 %v120_v1  ;;  %542 = vmatmul.mubr.f32.vlgmr.msra.gmra.mrb[0].mxu1 %v463_v2  ;;  %v983_v1 = vpack.c.bf16 %v302_v63, %v301_v62  ;;  %v304_v2 = vld [vmem:[#allocation2 + $0x1d8] sm:$0xff] }
  0x6a   :  { %936 = vmatpush1.bf16.msra.mxu0 %v935_v61  ;;  %1044 = vmatpush1.bf16.msra.mxu1 %v935_v61  ;;  %v980_v61 = vpack.c.bf16 %v300_v60, %v299_v59 }
  0x6b   :  { %937 = vmatprep.subr.bf16.mxu0 %v1216_v0  ;;  %1045 = vmatprep.subr.bf16.mxu1 %v1216_v0 }
  0x6c   :  { %887 = vmatprep.mubr.msk.f32.mxu0 %vm130_vm1, %v127_v7  ;;  %893 = vmatprep.mubr.msk.f32.mxu1 %vm130_vm1, %v470_v8  ;;  %v308_v7 = vld [vmem:[#allocation2 + $0x1f8] sm:$0xff] }
  0x6d   :  { %205 = vmatmul.mubr.f32.gmra.mrb[2].mxu0 %v125_v10  ;;  %547 = vmatmul.mubr.f32.gmra.mrb[2].mxu1 %v468_v11  ;;  %v992_v8 = vpack.c.bf16 %v308_v7, %v307_v6  ;;  %v310_v10 = vld [vmem:[#allocation2 + $0x208] sm:$0xff] }
  0x6e   :  { %939 = vmatpush1.bf16.msra.mxu0 %v938_v9  ;;  %1047 = vmatpush1.bf16.msra.mxu1 %v938_v9  ;;  %v309_v9 = vld [vmem:[#allocation2 + $0x200] sm:$0xff] }
  0x6f   :  { %940 = vmatprep.subr.bf16.mxu0 %v1216_v0  ;;  %1048 = vmatprep.subr.bf16.mxu1 %v1216_v0  ;;  %v995_v11 = vpack.c.bf16 %v310_v10, %v309_v9 }
  0x70   :  { %888 = vmatprep.mubr.msk.f32.mxu0 %vm130_vm1, %v55_v16  ;;  %894 = vmatprep.mubr.msk.f32.mxu1 %vm130_vm1, %v400_v17  ;;  %v998_v16 = vpack.c.bf16 %v312_v15, %v311_v13  ;;  %v313_v17 = vld [vmem:[#allocation2 + $0x220] sm:$0xff] }
  0x71   :  { %v838_v13 = vld [vmem:[#allocation6] sm:$0x1] }
  0x72   :  { %942 = vmatpush1.bf16.msra.mxu0 %v941_v18  ;;  %1050 = vmatpush1.bf16.msra.mxu1 %v941_v18  ;;  %v314_v18 = vld [vmem:[#allocation2 + $0x228] sm:$0xff] }
  0x73   :  { %943 = vmatprep.subr.bf16.mxu0 %v1216_v0  ;;  %1051 = vmatprep.subr.bf16.mxu1 %v1216_v0  ;;  %v1001_v19 = vpack.c.bf16 %v314_v18, %v313_v17 }
  0x76   :  { %945 = vmatpush1.bf16.msra.mxu0 %v944_v21  ;;  %1053 = vmatpush1.bf16.msra.mxu1 %v944_v21  ;;  %v316_v21 = vld [vmem:[#allocation2 + $0x238] sm:$0xff] }
  0x77   :  { %946 = vmatprep.subr.bf16.mxu0 %v1216_v0  ;;  %1054 = vmatprep.subr.bf16.mxu1 %v1216_v0  ;;  %v1004_v22 = vpack.c.bf16 %v316_v21, %v315_v20 }
  0x7a   :  { %948 = vmatpush1.bf16.msra.mxu0 %v947_v24  ;;  %1056 = vmatpush1.bf16.msra.mxu1 %v947_v24  ;;  %v633_v24 = vld [vmem:[%s1511_s0 + $0x58] sm:$0xff] }
  0x7b   :  { %949 = vmatprep.subr.bf16.mxu0 %v1216_v0  ;;  %1057 = vmatprep.subr.bf16.mxu1 %v1216_v0 }
  0x7e   :  { %951 = vmatpush1.bf16.msra.mxu0 %v950_v27  ;;  %1059 = vmatpush1.bf16.msra.mxu1 %v950_v27 }
  0x7f   :  { %952 = vmatprep.subr.bf16.mxu0 %v1216_v0  ;;  %1060 = vmatprep.subr.bf16.mxu1 %v1216_v0 }
  0x82   :  { %954 = vmatpush1.bf16.msra.mxu0 %v953_v30  ;;  %1062 = vmatpush1.bf16.msra.mxu1 %v953_v30 }
  0x83   :  { %955 = vmatprep.subr.bf16.mxu0 %v1216_v0  ;;  %1063 = vmatprep.subr.bf16.mxu1 %v1216_v0 }
  0x86   :  { %957 = vmatpush1.bf16.msra.mxu0 %v956_v33  ;;  %1065 = vmatpush1.bf16.msra.mxu1 %v956_v33 }
  0x87   :  { %958 = vmatprep.subr.bf16.mxu0 %v1216_v0  ;;  %1066 = vmatprep.subr.bf16.mxu1 %v1216_v0 }
  0x8a   :  { %960 = vmatpush1.bf16.msra.mxu0 %v959_v36  ;;  %1068 = vmatpush1.bf16.msra.mxu1 %v959_v36 }
  0x8b   :  { %961 = vmatprep.subr.bf16.mxu0 %v1216_v0  ;;  %1069 = vmatprep.subr.bf16.mxu1 %v1216_v0 }
  0x8e   :  { %963 = vmatpush1.bf16.msra.mxu0 %v962_v39  ;;  %1071 = vmatpush1.bf16.msra.mxu1 %v962_v39 }
  0x8f   :  { %964 = vmatprep.subr.bf16.mxu0 %v1216_v0  ;;  %1072 = vmatprep.subr.bf16.mxu1 %v1216_v0 }
  0x92   :  { %966 = vmatpush1.bf16.msra.mxu0 %v965_v42  ;;  %1074 = vmatpush1.bf16.msra.mxu1 %v965_v42 }
  0x93   :  { %967 = vmatprep.subr.bf16.mxu0 %v1216_v0  ;;  %1075 = vmatprep.subr.bf16.mxu1 %v1216_v0 }
  0x96   :  { %969 = vmatpush1.bf16.msra.mxu0 %v968_v46  ;;  %1077 = vmatpush1.bf16.msra.mxu1 %v968_v46 }
  0x97   :  { %970 = vmatprep.subr.bf16.mxu0 %v1216_v0  ;;  %1078 = vmatprep.subr.bf16.mxu1 %v1216_v0 }
  0x99   :  { %280 = vmatmul.mubr.f32.vlgmr.msra.gmra.mrb[0].mxu0 %v54_v50  ;;  %622 = vmatmul.mubr.f32.vlgmr.msra.gmra.mrb[0].mxu1 %v399_v52  ;;  %v782_v50 = vlaneseq }
  0x9a   :  { %972 = vmatpush1.bf16.msra.mxu0 %v971_v51  ;;  %1080 = vmatpush1.bf16.msra.mxu1 %v971_v51 }
  0x9b   :  { %973 = vmatprep.subr.bf16.mxu0 %v1216_v0  ;;  %1081 = vmatprep.subr.bf16.mxu1 %v1216_v0  ;;  %v783_v51 = vshrl.u32 %v782_v50, 7 }
  0x9c   :  { %889 = vmatprep.mubr.msk.f32.mxu0 %vm130_vm1, %v1297_v12  ;;  %895 = vmatprep.mubr.msk.f32.mxu1 %vm130_vm1, %v1305_v14 }
  0x9d   :  { %285 = vmatmul.mubr.f32.gmra.mrb[2].mxu0 %v1337_v45  ;;  %627 = vmatmul.mubr.f32.gmra.mrb[2].mxu1 %v1347_v48 }
  0x9e   :  { %975 = vmatpush1.bf16.msra.mxu0 %v974_v55  ;;  %1083 = vmatpush1.bf16.msra.mxu1 %v974_v55  ;;  %v1475_v55 = vsub.s32 0, %v783_v51 }
  0x9f   :  { %976 = vmatprep.subr.bf16.mxu0 %v1216_v0  ;;  %1084 = vmatprep.subr.bf16.mxu1 %v1216_v0 }
  0xa0   :  { %890 = vmatprep.mubr.msk.f32.mxu0 %vm130_vm1, %v1297_v12  ;;  %896 = vmatprep.mubr.msk.f32.mxu1 %vm130_vm1, %v1305_v14  ;;  %v303_v12 = vld [vmem:[#allocation2 + $0x1d0] sm:$0xff]  ;;  %v843_v15 = vrot.slane %v838_v13, %v1475_v55 }
  0xa1   :  { %v986_v14 = vpack.c.bf16 %v304_v2, %v303_v12 }
  0xa2   :  { %978 = vmatpush1.bf16.msra.mxu0 %v977_v58  ;;  %1086 = vmatpush1.bf16.msra.mxu1 %v977_v58 }
  0xa3   :  { %979 = vmatprep.subr.bf16.mxu0 %v1216_v0  ;;  %1087 = vmatprep.subr.bf16.mxu1 %v1216_v0 }
  0xa6   :  { %981 = vmatpush1.bf16.msra.mxu0 %v980_v61  ;;  %1089 = vmatpush1.bf16.msra.mxu1 %v980_v61 }
  0xa7   :  { %982 = vmatprep.subr.bf16.mxu0 %v1216_v0  ;;  %1090 = vmatprep.subr.bf16.mxu1 %v1216_v0 }
  0xaa   :  { %984 = vmatpush1.bf16.msra.mxu0 %v983_v1  ;;  %1092 = vmatpush1.bf16.msra.mxu1 %v983_v1 }
  0xab   :  { %985 = vmatprep.subr.bf16.mxu0 %v1216_v0  ;;  %1093 = vmatprep.subr.bf16.mxu1 %v1216_v0 }
  0xae   :  { %987 = vmatpush1.bf16.msra.mxu0 %v986_v14  ;;  %1095 = vmatpush1.bf16.msra.mxu1 %v986_v14 }
  0xaf   :  { %988 = vmatprep.subr.bf16.mxu0 %v1216_v0  ;;  %1096 = vmatprep.subr.bf16.mxu1 %v1216_v0 }
  0xb2   :  { %990 = vmatpush1.bf16.msra.mxu0 %v989_v5  ;;  %1098 = vmatpush1.bf16.msra.mxu1 %v989_v5 }
  0xb3   :  { %991 = vmatprep.subr.bf16.mxu0 %v1216_v0  ;;  %1099 = vmatprep.subr.bf16.mxu1 %v1216_v0 }
  0xb6   :  { %993 = vmatpush1.bf16.msra.mxu0 %v992_v8  ;;  %1101 = vmatpush1.bf16.msra.mxu1 %v992_v8 }
  0xb7   :  { %994 = vmatprep.subr.bf16.mxu0 %v1216_v0  ;;  %1102 = vmatprep.subr.bf16.mxu1 %v1216_v0 }
  0xba   :  { %996 = vmatpush1.bf16.msra.mxu0 %v995_v11  ;;  %1104 = vmatpush1.bf16.msra.mxu1 %v995_v11 }
  0xbb   :  { %997 = vmatprep.subr.bf16.mxu0 %v1216_v0  ;;  %1105 = vmatprep.subr.bf16.mxu1 %v1216_v0 }
  0xbe   :  { %999 = vmatpush1.bf16.msra.mxu0 %v998_v16  ;;  %1107 = vmatpush1.bf16.msra.mxu1 %v998_v16 }
  0xbf   :  { %1000 = vmatprep.subr.bf16.mxu0 %v1216_v0  ;;  %1108 = vmatprep.subr.bf16.mxu1 %v1216_v0 }
  0xc2   :  { %1002 = vmatpush1.bf16.msra.mxu0 %v1001_v19  ;;  %1110 = vmatpush1.bf16.msra.mxu1 %v1001_v19 }
  0xc3   :  { %1003 = vmatprep.subr.bf16.mxu0 %v1216_v0  ;;  %1111 = vmatprep.subr.bf16.mxu1 %v1216_v0  ;;  %v290_v0 = vld [vmem:[%s1511_s0 + $0x20] sm:$0xff]  ;;  %s1217_s0 = smov 32  }
  0xc6   :  { %1005 = vmatpush1.bf16.msra.mxu0 %v1004_v22  ;;  %1113 = vmatpush1.bf16.msra.mxu1 %v1004_v22 }
  0xc9   :  { %385 = vmatmul.mubr.f32.vlgmr.msra.gmra.mrb[0].mxu0 %v1337_v45  ;;  %726 = vmatmul.mubr.f32.vlgmr.msra.gmra.mrb[0].mxu1 %v1347_v48 }
  0xca   :  { %891 = vmatprep.mubr.msk.f32.mxu0 %vm130_vm1, %v291_v23  ;;  %897 = vmatprep.mubr.msk.f32.mxu1 %vm130_vm1, %v633_v24  ;;  %v817_v24 = vld [vmem:[#allocation4] sm:$0x1] }
  0xcd   :  { %390 = vmatmul.mubr.f32.gmra.mrb[2].mxu0 %v290_v0  ;;  %731 = vmatmul.mubr.f32.gmra.mrb[2].mxu1 %v632_v25 }
 0x19c   :  { %v386_v26 = vpop.f32.mrb[0].mxu0  ;;  %v727_v27 = vpop.f32.mrb[0].mxu1 }
 0x19d   :  { %v388_v28 = vpop.f32.mrb[1].mxu0  ;;  %v729_v45 = vpop.f32.mrb[1].mxu1 }
 0x1a0   :  { %v391_v29 = vpop.f32.mrb[2].mxu0  ;;  %v732_v48 = vpop.f32.mrb[2].mxu1 }
 0x1a1   :  { %v393_v30 = vpop.f32.mrb[3].mxu0  ;;  %v734_v31 = vpop.f32.mrb[3].mxu1  ;;  %v744_v32 = vadd.f32 %v391_v29, %v386_v26 }
 0x1a3   :  { %v745_v33 = vadd.f32 %v744_v32, %v727_v27 }
 0x1a5   :  { %v746_v34 = vadd.f32 %v745_v33, %v732_v48 }
 0x1a7   :  { %v747_v35 = vrot.slane %v746_v34, 4 }
 0x1a9   :  { %v748_v36 = vadd.f32 %v747_v35, %v746_v34 }
 0x1ab   :  { %v749_v37 = vrot.slane %v748_v36, 2 }
 0x1ad   :  { %v750_v38 = vadd.f32 %v749_v37, %v748_v36 }
 0x1af   :  { %v751_v39 = vrot.slane %v750_v38, 1 }
 0x1b1   :  { %v752_v40 = vadd.f32 %v751_v39, %v750_v38 }
 0x1b3   :  { %762 = vrot.lane.b32.xlu1 %v752_v40, %s1217_s0  ;;  %754 = vrot.lane.b32.xlu0 %v752_v40, %s1218_s11 }
 0x1b7   :  { %758 = vrot.lane.b32.xlu0 %v752_v40, %s1219_s2 }
 0x225   :  { %v755_v41 = vpop.permute.xlu0 %754  ;;  %v763_v46 = vpop.permute.xlu1 %762 }
 0x226   :  { %v757_v42 = vadd.f32 %v755_v41, %v752_v40 }
 0x229   :  { %v759_v43 = vpop.permute.xlu0 %758 }
 0x22a   :  { %v761_v44 = vadd.f32 %v759_v43, %v757_v42 }
 0x22c   :  { %v765_v47 = vadd.f32 %v763_v46, %v761_v44 }
 0x22e   :  { %v766_v49 = vmul.f32 0.0078125, %v765_v47 }
 0x230   :  { %771 = vrot.lane.b32.xlu0 %v766_v49, %s1219_s2  ;;  %768 = vrot.lane.b32.xlu1 %v766_v49, %s1217_s0 }
 0x234   :  { %774 = vrot.lane.b32.xlu1 %v766_v49, %s1218_s11 }
 0x2a2   :  { %v769_v52 = vpop.permute.xlu1 %768  ;;  %v772_v53 = vpop.permute.xlu0 %771 }
 0x2a3   :  { %v778_v54 = vsel %vm777_vm2, %v766_v49, %v769_v52 }
 0x2a4   :  { %v779_v56 = vsel %vm130_vm1, %v778_v54, %v772_v53 }
 0x2a6   :  { %v775_v57 = vpop.permute.xlu1 %774 }
 0x2a7   :  { %v781_v58 = vsel %vm780_vm3, %v779_v56, %v775_v57 }
 0x2a8   :  { %v785_v59 = vrot.slane %v781_v58, %v1475_v55 }
 0x2aa   :  { %v786_v60 = vsub.f32 %v386_v26, %v785_v59  ;;  %v787_v61 = vsub.f32 %v391_v29, %v785_v59  ;;  %v788_v62 = vsub.f32 %v727_v27, %v785_v59  ;;  %v789_v63 = vsub.f32 %v732_v48, %v785_v59 }
 0x2ac   :  { %v790_v1 = vmul.f32 %v786_v60, %v786_v60  ;;  %v791_v12 = vmul.f32 %v787_v61, %v787_v61  ;;  %v792_v2 = vmul.f32 %v788_v62, %v788_v62  ;;  %v793_v3 = vmul.f32 %v789_v63, %v789_v63 }
 0x2ae   :  { %v794_v14 = vadd.f32 %v791_v12, %v790_v1 }
 0x2b0   :  { %v795_v4 = vadd.f32 %v794_v14, %v792_v2 }
 0x2b2   :  { %v796_v5 = vadd.f32 %v795_v4, %v793_v3 }
 0x2b4   :  { %v797_v6 = vrot.slane %v796_v5, 4 }
 0x2b6   :  { %v798_v7 = vadd.f32 %v797_v6, %v796_v5 }
 0x2b8   :  { %v799_v8 = vrot.slane %v798_v7, 2 }
 0x2ba   :  { %v800_v9 = vadd.f32 %v799_v8, %v798_v7 }
 0x2bc   :  { %v801_v10 = vrot.slane %v800_v9, 1 }
 0x2be   :  { %v802_v11 = vadd.f32 %v801_v10, %v800_v9 }
 0x2c0   :  { %808 = vrot.lane.b32.xlu1 %v802_v11, %s1219_s2  ;;  %804 = vrot.lane.b32.xlu0 %v802_v11, %s1218_s11 }
 0x2c4   :  { %812 = vrot.lane.b32.xlu0 %v802_v11, %s1217_s0 }
 0x2c8   :  { %844 = vrot.lane.b32.xlu0 %v843_v15, %s1217_s0 }
 0x332   :  { %v805_v16 = vpop.permute.xlu0 %804  ;;  %v809_v18 = vpop.permute.xlu1 %808 }
 0x333   :  { %v807_v17 = vadd.f32 %v805_v16, %v802_v11 }
 0x335   :  { %v811_v19 = vadd.f32 %v809_v18, %v807_v17 }
 0x336   :  { %v813_v20 = vpop.permute.xlu0 %812 }
 0x337   :  { %v815_v21 = vadd.f32 %v813_v20, %v811_v19 }
 0x339   :  { %v816_v22 = vmul.f32 0.0078125, %v815_v21 }
 0x33a   :  { %v845_v27 = vpop.permute.xlu0 %844 }
 0x33b   :  { %v818_v23 = vadd.f32 1e-05, %v816_v22  ;;  %v853_v34 = vsel %vm777_vm2, %v838_v13, %v845_v27 }
 0x33d   :  { %1139 = vrsqrt.f32 %v818_v23 }
 0x347   :  { %v1140_v0 = vpop.eup %1139 }
 0x348   :  { %v820_v25 = vmul.f32 %v1140_v0, %v817_v24 }
 0x34a   :  { %v825_v26 = vrot.slane %v820_v25, %v1475_v55 }
 0x34c   :  { %829 = vrot.lane.b32.xlu0 %v825_v26, %s1219_s2  ;;  %826 = vrot.lane.b32.xlu1 %v825_v26, %s1217_s0 }
 0x350   :  { %832 = vrot.lane.b32.xlu1 %v825_v26, %s1218_s11  ;;  %850 = vrot.lane.b32.xlu0 %v843_v15, %s1218_s11 }
 0x354   :  { %847 = vrot.lane.b32.xlu1 %v843_v15, %s1219_s2 }
 0x3be   :  { %v827_v28 = vpop.permute.xlu1 %826  ;;  %v830_v29 = vpop.permute.xlu0 %829 }
 0x3bf   :  { %v835_v45 = vsel %vm777_vm2, %v820_v25, %v827_v28 }
 0x3c0   :  { %v836_v48 = vsel %vm130_vm1, %v835_v45, %v830_v29 }
 0x3c2   :  { %v833_v30 = vpop.permute.xlu1 %832  ;;  %v851_v33 = vpop.permute.xlu0 %850 }
 0x3c3   :  { %v837_v31 = vsel %vm780_vm3, %v836_v48, %v833_v30 }
 0x3c4   :  { %v859_v32 = vrot.slane %v837_v31, %v1475_v55 }
 0x3c6   :  { %v848_v35 = vpop.permute.xlu1 %847  ;;  %v860_v37 = vmul.f32 %v859_v32, %v786_v60  ;;  %v861_v39 = vmul.f32 %v859_v32, %v787_v61  ;;  %v862_v40 = vmul.f32 %v859_v32, %v788_v62  ;;  %v863_v41 = vmul.f32 %v859_v32, %v789_v63 }
 0x3c7   :  { %v854_v36 = vsel %vm130_vm1, %v853_v34, %v848_v35 }
 0x3c8   :  { %v855_v38 = vsel %vm780_vm3, %v854_v36, %v851_v33 }
 0x3c9   :  { %v867_v42 = vrot.slane %v855_v38, %v1475_v55 }
 0x3cb   :  { %v868_v43 = vadd.f32 %v867_v42, %v860_v37  ;;  %v869_v44 = vadd.f32 %v867_v42, %v861_v39  ;;  %v870_v46 = vadd.f32 %v867_v42, %v862_v40  ;;  %v871_v47 = vadd.f32 %v867_v42, %v863_v41 }
 0x3cd   :  { %v872_v49 = vmax.f32 %v868_v43, 0.0  ;;  %v873_v50 = vmax.f32 %v869_v44, 0.0  ;;  %v874_v51 = vmax.f32 %v870_v46, 0.0  ;;  %v875_v52 = vmax.f32 %v871_v47, 0.0 }
 0x3cf   :  { %876 = vst [vmem:[%s1515_s4] sm:$0xff] %v872_v49  ;;  %877 = vst [vmem:[%s1515_s4 + $0x8] sm:$0xff] %v873_v50 }
 0x3d0   :  { %878 = vst [vmem:[%s1515_s4 + $0x10] sm:$0xff] %v874_v51  ;;  %879 = vst [vmem:[%s1515_s4 + $0x18] sm:$0xff] %v875_v52 }
 0x3d1   :  { %884 = vsyncpa [#allocation3], 1 }
 0x3d2   :  { %885 = vsyncpa [#allocation5], 1 }

// kernel: generator_forward.7
= control target key start
LH: loop header
LB: loop body
LE: loop exit
PB: predicated region body
PF: predicated region fallthrough
CT: control target
= control target key end

     0   :  { %vm51_vm0 = vcmask 785408   ;;  %vm447_vm1 = vcmask 523264   ;;  %s1792_s29 = smov 80   ;;  %s1793_s30 = smov 112   ;;  %vm968_vm2 = vcmask 130048   ;;  %vm970_vm3 = vcmask 261120   ;;  %s2504_s1 = inlined_call_operand.vmem [shape: f32[3,96,64], index: 1, kind: input, shape index: {}]   ;;  %s2505_s0 = inlined_call_operand.vmem [shape: f32[160,96], index: 0, kind: input, shape index: {}]   ;;  %s2506_s4 = inlined_call_operand.vmem [shape: f32[128,64], index: 4, kind: output, shape index: {}]   ;;  %s2507_s3 = inlined_call_operand.vmem [shape: f32[1,16], index: 3, kind: input, shape index: {}]   ;;  %s2508_s2 = inlined_call_operand.vmem [shape: f32[1,16], index: 2, kind: input, shape index: {}]  }
   0x1   :  { %v1176_v0 = vld [vmem:[%s2504_s1 + $0x60] sm:$0xff]  ;;  %v1177_v1 = vld [vmem:[%s2504_s1 + $0x68] sm:$0xff]  ;;  %v1178_v2 = vld [vmem:[%s2504_s1 + $0x70] sm:$0xff]  ;;  %s1794_s5 = smov 96   ;;  %s1795_s6 = smov 32   ;;  %vm972_vm4 = vcmask 392192  }
   0x2   :  { %v1608_v3 = vpack.c.bf16 %v1177_v1, %v1176_v0  ;;  %v1179_v4 = vld [vmem:[%s2504_s1 + $0x78] sm:$0xff]  ;;  %v1180_v6 = vld [vmem:[%s2504_s1 + $0x80] sm:$0xff]  ;;  %v1181_v7 = vld [vmem:[%s2504_s1 + $0x88] sm:$0xff]  ;;  %s1796_s7 = smov 16   ;;  %s1797_s8 = smov 48  }
   0x3   :  { %v1612_v5 = vpack.c.bf16 %v1179_v4, %v1178_v2  ;;  %v1844_v8 = vld [vmem:[%s2505_s0 + $0x8] sm:$0xff]  ;;  %v1616_v9 = vpack.c.bf16 %v1181_v7, %v1180_v6  ;;  %v1849_v10 = vld [vmem:[%s2505_s0 + $0x58] sm:$0xff]  ;;  %v1182_v11 = vld [vmem:[%s2504_s1 + $0x90] sm:$0xff] }
   0x4   :  { %1609 = vmatprep.subr.bf16.mxu0 %v1608_v3  ;;  %1681 = vmatprep.subr.bf16.mxu1 %v1608_v3  ;;  %v1183_v12 = vld [vmem:[%s2504_s1 + $0x98] sm:$0xff]  ;;  %v1184_v14 = vld [vmem:[%s2504_s1 + $0xa0] sm:$0xff]  ;;  %v1185_v15 = vld [vmem:[%s2504_s1 + $0xa8] sm:$0xff] }
   0x5   :  { %1611 = vmatpush3.bf16.msra.mxu0 %v1608_v3  ;;  %1683 = vmatpush3.bf16.msra.mxu1 %v1608_v3  ;;  %v1620_v13 = vpack.c.bf16 %v1183_v12, %v1182_v11  ;;  %v1624_v16 = vpack.c.bf16 %v1185_v15, %v1184_v14  ;;  %v1186_v17 = vld [vmem:[%s2504_s1 + $0xb0] sm:$0xff]  ;;  %v1187_v18 = vld [vmem:[%s2504_s1 + $0xb8] sm:$0xff]  ;;  %v25_v20 = vld [vmem:[%s2504_s1] sm:$0xff] }
   0x6   :  { %1613 = vmatprep.subr.bf16.mxu0 %v1612_v5  ;;  %1685 = vmatprep.subr.bf16.mxu1 %v1612_v5  ;;  %v1628_v19 = vpack.c.bf16 %v1187_v18, %v1186_v17  ;;  %v26_v21 = vld [vmem:[%s2504_s1 + $0x8] sm:$0xff]  ;;  %v27_v23 = vld [vmem:[%s2504_s1 + $0x10] sm:$0xff]  ;;  %v28_v24 = vld [vmem:[%s2504_s1 + $0x18] sm:$0xff] }
   0x7   :  { %1416 = vmatprep.mubr.msk.f32.mxu0 %vm51_vm0, %v1844_v8  ;;  %1524 = vmatprep.mubr.msk.f32.mxu1 %vm51_vm0, %v1849_v10  ;;  %v1632_v22 = vpack.c.bf16 %v26_v21, %v25_v20  ;;  %v1888_v25 = vld [vmem:[%s2505_s0 + $0x10] sm:$0xff]  ;;  %v1893_v26 = vld [vmem:[%s2505_s0 + $0x60] sm:$0xff]  ;;  %v1636_v27 = vpack.c.bf16 %v28_v24, %v27_v23  ;;  %v30_v29 = vld [vmem:[%s2504_s1 + $0x28] sm:$0xff] }
   0x8   :  { %v29_v28 = vld [vmem:[%s2504_s1 + $0x20] sm:$0xff]  ;;  %v1908_v30 = vld [vmem:[%s2505_s0 + $0x18] sm:$0xff]  ;;  %v1913_v31 = vld [vmem:[%s2505_s0 + $0x68] sm:$0xff] }
   0x9   :  { %1615 = vmatpush3.bf16.msra.mxu0 %v1612_v5  ;;  %1687 = vmatpush3.bf16.msra.mxu1 %v1612_v5  ;;  %v1918_v32 = vld [vmem:[%s2505_s0 + $0x20] sm:$0xff]  ;;  %v1923_v33 = vld [vmem:[%s2505_s0 + $0x70] sm:$0xff]  ;;  %v1640_v34 = vpack.c.bf16 %v30_v29, %v29_v28  ;;  %v32_v36 = vld [vmem:[%s2504_s1 + $0x38] sm:$0xff] }
   0xa   :  { %1617 = vmatprep.subr.bf16.mxu0 %v1616_v9  ;;  %1689 = vmatprep.subr.bf16.mxu1 %v1616_v9  ;;  %v31_v35 = vld [vmem:[%s2504_s1 + $0x30] sm:$0xff]  ;;  %v1942_v37 = vld [vmem:[%s2505_s0 + $0x28] sm:$0xff]  ;;  %v1947_v38 = vld [vmem:[%s2505_s0 + $0x78] sm:$0xff] }
   0xb   :  { %v1952_v39 = vld [vmem:[%s2505_s0 + $0x30] sm:$0xff]  ;;  %v1957_v40 = vld [vmem:[%s2505_s0 + $0x80] sm:$0xff]  ;;  %v1644_v41 = vpack.c.bf16 %v32_v36, %v31_v35  ;;  %v34_v43 = vld [vmem:[%s2504_s1 + $0x48] sm:$0xff] }
   0xc   :  { %v33_v42 = vld [vmem:[%s2504_s1 + $0x40] sm:$0xff]  ;;  %v1976_v44 = vld [vmem:[%s2505_s0 + $0x38] sm:$0xff]  ;;  %v1981_v45 = vld [vmem:[%s2505_s0 + $0x88] sm:$0xff] }
   0xd   :  { %1619 = vmatpush3.bf16.msra.mxu0 %v1616_v9  ;;  %1691 = vmatpush3.bf16.msra.mxu1 %v1616_v9  ;;  %v1986_v46 = vld [vmem:[%s2505_s0 + $0x40] sm:$0xff]  ;;  %v1991_v47 = vld [vmem:[%s2505_s0 + $0x90] sm:$0xff]  ;;  %v1648_v48 = vpack.c.bf16 %v34_v43, %v33_v42  ;;  %v36_v50 = vld [vmem:[%s2504_s1 + $0x58] sm:$0xff] }
   0xe   :  { %1621 = vmatprep.subr.bf16.mxu0 %v1620_v13  ;;  %1693 = vmatprep.subr.bf16.mxu1 %v1620_v13  ;;  %v35_v49 = vld [vmem:[%s2504_s1 + $0x50] sm:$0xff]  ;;  %v17_v51 = vld [vmem:[%s2505_s0] sm:$0xff]  ;;  %v1205_v55 = vld [vmem:[%s2504_s1 + $0xc8] sm:$0xff] }
   0xf   :  { %v456_v52 = vld [vmem:[%s2505_s0 + $0x50] sm:$0xff]  ;;  %v1652_v53 = vpack.c.bf16 %v36_v50, %v35_v49  ;;  %v1204_v54 = vld [vmem:[%s2504_s1 + $0xc0] sm:$0xff]  ;;  %v1207_v58 = vld [vmem:[%s2504_s1 + $0xd8] sm:$0xff] }
  0x10   :  { %v1656_v56 = vpack.c.bf16 %v1205_v55, %v1204_v54  ;;  %v1206_v57 = vld [vmem:[%s2504_s1 + $0xd0] sm:$0xff]  ;;  %v1208_v60 = vld [vmem:[%s2504_s1 + $0xe0] sm:$0xff]  ;;  %v1209_v61 = vld [vmem:[%s2504_s1 + $0xe8] sm:$0xff] }
  0x11   :  { %1623 = vmatpush3.bf16.msra.mxu0 %v1620_v13  ;;  %1695 = vmatpush3.bf16.msra.mxu1 %v1620_v13  ;;  %v1660_v59 = vpack.c.bf16 %v1207_v58, %v1206_v57  ;;  %v1664_v62 = vpack.c.bf16 %v1209_v61, %v1208_v60  ;;  %v1210_v63 = vld [vmem:[%s2504_s1 + $0xf0] sm:$0xff]  ;;  %v1211_v0 = vld [vmem:[%s2504_s1 + $0xf8] sm:$0xff]  ;;  %v1212_v2 = vld [vmem:[%s2504_s1 + $0x100] sm:$0xff] }
  0x12   :  { %1625 = vmatprep.subr.bf16.mxu0 %v1624_v16  ;;  %1697 = vmatprep.subr.bf16.mxu1 %v1624_v16  ;;  %v1668_v1 = vpack.c.bf16 %v1211_v0, %v1210_v63  ;;  %v1213_v3 = vld [vmem:[%s2504_s1 + $0x108] sm:$0xff]  ;;  %v1214_v5 = vld [vmem:[%s2504_s1 + $0x110] sm:$0xff]  ;;  %v1215_v6 = vld [vmem:[%s2504_s1 + $0x118] sm:$0xff] }
  0x13   :  { %v1672_v4 = vpack.c.bf16 %v1213_v3, %v1212_v2  ;;  %v1676_v7 = vpack.c.bf16 %v1215_v6, %v1214_v5  ;;  %v733_v9 = vld [vmem:[%s2505_s0 + $0x98] sm:$0xff] }
  0x15   :  { %1627 = vmatpush3.bf16.msra.mxu0 %v1624_v16  ;;  %1699 = vmatpush3.bf16.msra.mxu1 %v1624_v16 }
  0x16   :  { %1629 = vmatprep.subr.bf16.mxu0 %v1628_v19  ;;  %1701 = vmatprep.subr.bf16.mxu1 %v1628_v19 }
  0x19   :  { %1631 = vmatpush3.bf16.msra.mxu0 %v1628_v19  ;;  %1703 = vmatpush3.bf16.msra.mxu1 %v1628_v19 }
  0x1a   :  { %1633 = vmatprep.subr.bf16.mxu0 %v1632_v22  ;;  %1705 = vmatprep.subr.bf16.mxu1 %v1632_v22 }
  0x1c   :  { %1417 = vmatmul.mubr.msk.f32.vlgmr.msra.gmra.mrb[0].mxu0 %vm51_vm0, %v1888_v25  ;;  %1525 = vmatmul.mubr.msk.f32.vlgmr.msra.gmra.mrb[0].mxu1 %vm51_vm0, %v1893_v26 }
  0x1d   :  { %1635 = vmatpush3.bf16.msra.mxu0 %v1632_v22  ;;  %1707 = vmatpush3.bf16.msra.mxu1 %v1632_v22 }
  0x1e   :  { %1637 = vmatprep.subr.bf16.mxu0 %v1636_v27  ;;  %1709 = vmatprep.subr.bf16.mxu1 %v1636_v27 }
  0x1f   :  { %1419 = vmatprep.mubr.msk.f32.mxu0 %vm51_vm0, %v1908_v30  ;;  %1527 = vmatprep.mubr.msk.f32.mxu1 %vm51_vm0, %v1913_v31 }
  0x20   :  { %1420 = vmatmul.mubr.msk.f32.gmra.mrb[2].mxu0 %vm51_vm0, %v1918_v32  ;;  %1528 = vmatmul.mubr.msk.f32.gmra.mrb[2].mxu1 %vm51_vm0, %v1923_v33 }
  0x21   :  { %1639 = vmatpush3.bf16.msra.mxu0 %v1636_v27  ;;  %1711 = vmatpush3.bf16.msra.mxu1 %v1636_v27 }
  0x22   :  { %1641 = vmatprep.subr.bf16.mxu0 %v1640_v34  ;;  %1713 = vmatprep.subr.bf16.mxu1 %v1640_v34 }
  0x23   :  { %1422 = vmatprep.mubr.msk.f32.mxu0 %vm51_vm0, %v1942_v37  ;;  %1530 = vmatprep.mubr.msk.f32.mxu1 %vm51_vm0, %v1947_v38 }
  0x24   :  { %1423 = vmatmul.mubr.msk.f32.gmra.mrb[4].mxu0 %vm51_vm0, %v1952_v39  ;;  %1531 = vmatmul.mubr.msk.f32.gmra.mrb[4].mxu1 %vm51_vm0, %v1957_v40 }
  0x25   :  { %1643 = vmatpush3.bf16.msra.mxu0 %v1640_v34  ;;  %1715 = vmatpush3.bf16.msra.mxu1 %v1640_v34 }
  0x26   :  { %1645 = vmatprep.subr.bf16.mxu0 %v1644_v41  ;;  %1717 = vmatprep.subr.bf16.mxu1 %v1644_v41 }
  0x27   :  { %1425 = vmatprep.mubr.msk.f32.mxu0 %vm51_vm0, %v1976_v44  ;;  %1533 = vmatprep.mubr.msk.f32.mxu1 %vm51_vm0, %v1981_v45 }
  0x28   :  { %1426 = vmatmul.mubr.msk.f32.gmra.mrb[6].mxu0 %vm51_vm0, %v1986_v46  ;;  %1534 = vmatmul.mubr.msk.f32.gmra.mrb[6].mxu1 %vm51_vm0, %v1991_v47 }
  0x29   :  { %1647 = vmatpush3.bf16.msra.mxu0 %v1644_v41  ;;  %1719 = vmatpush3.bf16.msra.mxu1 %v1644_v41 }
  0x2a   :  { %1649 = vmatprep.subr.bf16.mxu0 %v1648_v48  ;;  %1721 = vmatprep.subr.bf16.mxu1 %v1648_v48 }
  0x2b   :  { %1452 = vmatprep.mubr.msk.f32.mxu0 %vm51_vm0, %v17_v51  ;;  %1560 = vmatprep.mubr.msk.f32.mxu1 %vm51_vm0, %v456_v52 }
  0x2d   :  { %1651 = vmatpush3.bf16.msra.mxu0 %v1648_v48  ;;  %1723 = vmatpush3.bf16.msra.mxu1 %v1648_v48 }
  0x2e   :  { %1653 = vmatprep.subr.bf16.mxu0 %v1652_v53  ;;  %1725 = vmatprep.subr.bf16.mxu1 %v1652_v53 }
  0x31   :  { %1655 = vmatpush3.bf16.msra.mxu0 %v1652_v53  ;;  %1727 = vmatpush3.bf16.msra.mxu1 %v1652_v53 }
  0x32   :  { %1657 = vmatprep.subr.bf16.mxu0 %v1656_v56  ;;  %1729 = vmatprep.subr.bf16.mxu1 %v1656_v56 }
  0x34   :  { %1453 = vmatmul.mubr.msk.f32.vlgmr.msra.gmra.mrb[0].mxu0 %vm51_vm0, %v1844_v8  ;;  %1561 = vmatmul.mubr.msk.f32.vlgmr.msra.gmra.mrb[0].mxu1 %vm51_vm0, %v1849_v10  ;;  %v296_v8 = vld [vmem:[%s2505_s0 + $0x48] sm:$0xff] }
  0x35   :  { %1659 = vmatpush3.bf16.msra.mxu0 %v1656_v56  ;;  %1731 = vmatpush3.bf16.msra.mxu1 %v1656_v56 }
  0x36   :  { %1661 = vmatprep.subr.bf16.mxu0 %v1660_v59  ;;  %1733 = vmatprep.subr.bf16.mxu1 %v1660_v59 }
  0x37   :  { %1455 = vmatprep.mubr.msk.f32.mxu0 %vm51_vm0, %v1888_v25  ;;  %1563 = vmatprep.mubr.msk.f32.mxu1 %vm51_vm0, %v1893_v26 }
  0x38   :  { %1456 = vmatmul.mubr.msk.f32.gmra.mrb[2].mxu0 %vm51_vm0, %v1908_v30  ;;  %1564 = vmatmul.mubr.msk.f32.gmra.mrb[2].mxu1 %vm51_vm0, %v1913_v31 }
  0x39   :  { %1663 = vmatpush3.bf16.msra.mxu0 %v1660_v59  ;;  %1735 = vmatpush3.bf16.msra.mxu1 %v1660_v59 }
  0x3a   :  { %1665 = vmatprep.subr.bf16.mxu0 %v1664_v62  ;;  %1737 = vmatprep.subr.bf16.mxu1 %v1664_v62 }
  0x3b   :  { %1458 = vmatprep.mubr.msk.f32.mxu0 %vm51_vm0, %v1918_v32  ;;  %1566 = vmatprep.mubr.msk.f32.mxu1 %vm51_vm0, %v1923_v33 }
  0x3c   :  { %1459 = vmatmul.mubr.msk.f32.gmra.mrb[4].mxu0 %vm51_vm0, %v1942_v37  ;;  %1567 = vmatmul.mubr.msk.f32.gmra.mrb[4].mxu1 %vm51_vm0, %v1947_v38 }
  0x3d   :  { %1667 = vmatpush3.bf16.msra.mxu0 %v1664_v62  ;;  %1739 = vmatpush3.bf16.msra.mxu1 %v1664_v62 }
  0x3e   :  { %1669 = vmatprep.subr.bf16.mxu0 %v1668_v1  ;;  %1741 = vmatprep.subr.bf16.mxu1 %v1668_v1 }
  0x3f   :  { %1461 = vmatprep.mubr.msk.f32.mxu0 %vm51_vm0, %v1952_v39  ;;  %1569 = vmatprep.mubr.msk.f32.mxu1 %vm51_vm0, %v1957_v40 }
  0x40   :  { %1462 = vmatmul.mubr.msk.f32.gmra.mrb[6].mxu0 %vm51_vm0, %v1976_v44  ;;  %1570 = vmatmul.mubr.msk.f32.gmra.mrb[6].mxu1 %vm51_vm0, %v1981_v45 }
  0x41   :  { %1671 = vmatpush3.bf16.msra.mxu0 %v1668_v1  ;;  %1743 = vmatpush3.bf16.msra.mxu1 %v1668_v1 }
  0x42   :  { %1673 = vmatprep.subr.bf16.mxu0 %v1672_v4  ;;  %1745 = vmatprep.subr.bf16.mxu1 %v1672_v4 }
  0x43   :  { %1488 = vmatprep.mubr.msk.f32.mxu0 %vm51_vm0, %v1888_v25  ;;  %1596 = vmatprep.mubr.msk.f32.mxu1 %vm51_vm0, %v1893_v26 }
  0x45   :  { %1675 = vmatpush3.bf16.msra.mxu0 %v1672_v4  ;;  %1747 = vmatpush3.bf16.msra.mxu1 %v1672_v4 }
  0x46   :  { %1677 = vmatprep.subr.bf16.mxu0 %v1676_v7  ;;  %1749 = vmatprep.subr.bf16.mxu1 %v1676_v7 }
  0x49   :  { %1679 = vmatpush3.bf16.msra.mxu0 %v1676_v7  ;;  %1751 = vmatpush3.bf16.msra.mxu1 %v1676_v7 }
  0x4c   :  { %1489 = vmatmul.mubr.msk.f32.vlgmr.msra.gmra.mrb[0].mxu0 %vm51_vm0, %v1908_v30  ;;  %1597 = vmatmul.mubr.msk.f32.vlgmr.msra.gmra.mrb[0].mxu1 %vm51_vm0, %v1913_v31 }
  0x4d   :  { %1491 = vmatprep.mubr.msk.f32.mxu0 %vm51_vm0, %v1918_v32  ;;  %1599 = vmatprep.mubr.msk.f32.mxu1 %vm51_vm0, %v1923_v33 }
  0x50   :  { %1492 = vmatmul.mubr.msk.f32.gmra.mrb[2].mxu0 %vm51_vm0, %v1942_v37  ;;  %1600 = vmatmul.mubr.msk.f32.gmra.mrb[2].mxu1 %vm51_vm0, %v1947_v38 }
  0x51   :  { %1494 = vmatprep.mubr.msk.f32.mxu0 %vm51_vm0, %v1952_v39  ;;  %1602 = vmatprep.mubr.msk.f32.mxu1 %vm51_vm0, %v1957_v40 }
  0x54   :  { %1495 = vmatmul.mubr.msk.f32.gmra.mrb[4].mxu0 %vm51_vm0, %v1976_v44  ;;  %1603 = vmatmul.mubr.msk.f32.gmra.mrb[4].mxu1 %vm51_vm0, %v1981_v45 }
  0x55   :  { %1497 = vmatprep.mubr.msk.f32.mxu0 %vm51_vm0, %v1986_v46  ;;  %1605 = vmatprep.mubr.msk.f32.mxu1 %vm51_vm0, %v1991_v47 }
  0x58   :  { %1498 = vmatmul.mubr.msk.f32.gmra.mrb[6].mxu0 %vm51_vm0, %v296_v8  ;;  %1606 = vmatmul.mubr.msk.f32.gmra.mrb[6].mxu1 %vm51_vm0, %v733_v9 }
 0x11f   :  { %v1490_v10 = vpop.f32.mrb[0].mxu0  ;;  %v1598_v11 = vpop.f32.mrb[0].mxu1 }
 0x120   :  { %449 = vst.msk [vmem:[%s2506_s4 + $0x8] sm:$0xff] %vm447_vm1, %v1490_v10  ;;  %884 = vst.msk [vmem:[%s2506_s4 + $0x48] sm:$0xff] %vm447_vm1, %v1598_v11  ;;  %v400_v12 = vpop.f32.mrb[1].mxu0  ;;  %v836_v13 = vpop.f32.mrb[1].mxu1 }
 0x121   :  { %448 = vst.msk [vmem:[%s2506_s4] sm:$0xff] %vm447_vm1, %v400_v12  ;;  %883 = vst.msk [vmem:[%s2506_s4 + $0x40] sm:$0xff] %vm447_vm1, %v836_v13 }
 0x123   :  { %v1493_v14 = vpop.f32.mrb[2].mxu0  ;;  %v1601_v15 = vpop.f32.mrb[2].mxu1 }
 0x124   :  { %451 = vst.msk [vmem:[%s2506_s4 + $0x18] sm:$0xff] %vm447_vm1, %v1493_v14  ;;  %886 = vst.msk [vmem:[%s2506_s4 + $0x58] sm:$0xff] %vm447_vm1, %v1601_v15  ;;  %v410_v16 = vpop.f32.mrb[3].mxu0  ;;  %v846_v17 = vpop.f32.mrb[3].mxu1 }
 0x125   :  { %450 = vst.msk [vmem:[%s2506_s4 + $0x10] sm:$0xff] %vm447_vm1, %v410_v16  ;;  %885 = vst.msk [vmem:[%s2506_s4 + $0x50] sm:$0xff] %vm447_vm1, %v846_v17 }
 0x127   :  { %v2150_v18 = vld [vmem:[%s2506_s4 + $0x8] sm:$0xff]  ;;  %v1496_v19 = vpop.f32.mrb[4].mxu0  ;;  %v1604_v20 = vpop.f32.mrb[4].mxu1 }
 0x128   :  { %v2155_v21 = vld [vmem:[%s2506_s4] sm:$0xff]  ;;  %453 = vst.msk [vmem:[%s2506_s4 + $0x28] sm:$0xff] %vm447_vm1, %v1496_v19  ;;  %888 = vst.msk [vmem:[%s2506_s4 + $0x68] sm:$0xff] %vm447_vm1, %v1604_v20  ;;  %v420_v22 = vpop.f32.mrb[5].mxu0  ;;  %v856_v23 = vpop.f32.mrb[5].mxu1  ;;  %v908_v24 = vsel %vm447_vm1, %v2150_v18, 0.0 }
 0x129   :  { %v907_v25 = vsel %vm447_vm1, %v2155_v21, 0.0  ;;  %452 = vst.msk [vmem:[%s2506_s4 + $0x20] sm:$0xff] %vm447_vm1, %v420_v22  ;;  %887 = vst.msk [vmem:[%s2506_s4 + $0x60] sm:$0xff] %vm447_vm1, %v856_v23  ;;  %v2236_v46 = vld [vmem:[%s2506_s4 + $0x40] sm:$0xff]  ;;  %v2243_v49 = vld [vmem:[%s2506_s4 + $0x48] sm:$0xff] }
 0x12a   :  { %v909_v28 = vadd.f32 %v908_v24, %v907_v25  ;;  %v922_v51 = vsel %vm447_vm1, %v2236_v46, 0.0  ;;  %v924_v54 = vsel %vm447_vm1, %v2243_v49, 0.0  ;;  %v974_v24 = vlaneseq }
 0x12b   :  { %v1499_v26 = vpop.f32.mrb[6].mxu0  ;;  %v1607_v27 = vpop.f32.mrb[6].mxu1  ;;  %v2180_v29 = vld [vmem:[%s2506_s4 + $0x18] sm:$0xff] }
 0x12c   :  { %v2185_v30 = vld [vmem:[%s2506_s4 + $0x10] sm:$0xff]  ;;  %455 = vst.msk [vmem:[%s2506_s4 + $0x38] sm:$0xff] %vm447_vm1, %v1499_v26  ;;  %890 = vst.msk [vmem:[%s2506_s4 + $0x78] sm:$0xff] %vm447_vm1, %v1607_v27  ;;  %v430_v31 = vpop.f32.mrb[7].mxu0  ;;  %v866_v32 = vpop.f32.mrb[7].mxu1  ;;  %v912_v35 = vsel %vm447_vm1, %v2180_v29, 0.0 }
 0x12d   :  { %v910_v33 = vsel %vm447_vm1, %v2185_v30, 0.0  ;;  %454 = vst.msk [vmem:[%s2506_s4 + $0x30] sm:$0xff] %vm447_vm1, %v430_v31  ;;  %889 = vst.msk [vmem:[%s2506_s4 + $0x70] sm:$0xff] %vm447_vm1, %v866_v32  ;;  %v2250_v52 = vld [vmem:[%s2506_s4 + $0x50] sm:$0xff]  ;;  %v2257_v55 = vld [vmem:[%s2506_s4 + $0x58] sm:$0xff]  ;;  %v975_v25 = vshrl.u32 %v974_v24, 7 }
 0x12e   :  { %v911_v34 = vadd.f32 %v910_v33, %v909_v28  ;;  %v926_v57 = vsel %vm447_vm1, %v2250_v52, 0.0  ;;  %v928_v60 = vsel %vm447_vm1, %v2257_v55, 0.0 }
 0x12f   :  { %v2210_v36 = vld [vmem:[%s2506_s4 + $0x28] sm:$0xff]  ;;  %v2298_v31 = vsub.s32 0, %v975_v25 }
 0x130   :  { %v2215_v37 = vld [vmem:[%s2506_s4 + $0x20] sm:$0xff]  ;;  %v913_v38 = vadd.f32 %v912_v35, %v911_v34  ;;  %v916_v41 = vsel %vm447_vm1, %v2210_v36, 0.0  ;;  %v2271_v61 = vld [vmem:[%s2506_s4 + $0x68] sm:$0xff] }
 0x131   :  { %v914_v39 = vsel %vm447_vm1, %v2215_v37, 0.0  ;;  %v2264_v58 = vld [vmem:[%s2506_s4 + $0x60] sm:$0xff]  ;;  %v932_v2 = vsel %vm447_vm1, %v2271_v61, 0.0 }
 0x132   :  { %v915_v40 = vadd.f32 %v914_v39, %v913_v38  ;;  %v930_v63 = vsel %vm447_vm1, %v2264_v58, 0.0 }
 0x133   :  { %v2229_v43 = vld [vmem:[%s2506_s4 + $0x38] sm:$0xff] }
 0x134   :  { %v2224_v42 = vld [vmem:[%s2506_s4 + $0x30] sm:$0xff]  ;;  %v917_v44 = vadd.f32 %v916_v41, %v915_v40  ;;  %v920_v48 = vsel %vm447_vm1, %v2229_v43, 0.0  ;;  %v2285_v3 = vld [vmem:[%s2506_s4 + $0x78] sm:$0xff] }
 0x135   :  { %v918_v45 = vsel %vm447_vm1, %v2224_v42, 0.0  ;;  %v2278_v0 = vld [vmem:[%s2506_s4 + $0x70] sm:$0xff]  ;;  %v936_v7 = vsel %vm447_vm1, %v2285_v3, 0.0 }
 0x136   :  { %v919_v47 = vadd.f32 %v918_v45, %v917_v44  ;;  %v934_v5 = vsel %vm447_vm1, %v2278_v0, 0.0 }
 0x138   :  { %v921_v50 = vadd.f32 %v920_v48, %v919_v47 }
 0x13a   :  { %v923_v53 = vadd.f32 %v922_v51, %v921_v50 }
 0x13c   :  { %v925_v56 = vadd.f32 %v924_v54, %v923_v53 }
 0x13e   :  { %v927_v59 = vadd.f32 %v926_v57, %v925_v56 }
 0x140   :  { %v929_v62 = vadd.f32 %v928_v60, %v927_v59 }
 0x142   :  { %v931_v1 = vadd.f32 %v930_v63, %v929_v62 }
 0x144   :  { %v933_v4 = vadd.f32 %v932_v2, %v931_v1 }
 0x146   :  { %v935_v6 = vadd.f32 %v934_v5, %v933_v4 }
 0x148   :  { %v937_v8 = vadd.f32 %v936_v7, %v935_v6 }
 0x14a   :  { %v938_v9 = vrot.slane %v937_v8, 4 }
 0x14c   :  { %v939_v10 = vadd.f32 %v938_v9, %v937_v8 }
 0x14e   :  { %v940_v11 = vrot.slane %v939_v10, 2 }
 0x150   :  { %v941_v12 = vadd.f32 %v940_v11, %v939_v10 }
 0x152   :  { %v942_v13 = vrot.slane %v941_v12, 1 }
 0x154   :  { %v943_v14 = vadd.f32 %v942_v13, %v941_v12 }
 0x156   :  { %953 = vrot.lane.b32.xlu1 %v943_v14, %s1792_s29  ;;  %945 = vrot.lane.b32.xlu0 %v943_v14, %s1793_s30 }
 0x15a   :  { %949 = vrot.lane.b32.xlu0 %v943_v14, %s1794_s5 }
 0x1c8   :  { %v946_v15 = vpop.permute.xlu0 %945  ;;  %v954_v20 = vpop.permute.xlu1 %953 }
 0x1c9   :  { %v948_v16 = vadd.f32 %v946_v15, %v943_v14 }
 0x1cc   :  { %v950_v17 = vpop.permute.xlu0 %949 }
 0x1cd   :  { %v952_v19 = vadd.f32 %v950_v17, %v948_v16 }
 0x1cf   :  { %v956_v22 = vadd.f32 %v954_v20, %v952_v19 }
 0x1d1   :  { %v957_v23 = vmul.f32 0.001953125, %v956_v22 }
 0x1d3   :  { %962 = vrot.lane.b32.xlu0 %v957_v23, %s1795_s6  ;;  %959 = vrot.lane.b32.xlu1 %v957_v23, %s1796_s7 }
 0x1d7   :  { %965 = vrot.lane.b32.xlu1 %v957_v23, %s1797_s8 }
 0x245   :  { %v960_v26 = vpop.permute.xlu1 %959  ;;  %v963_v27 = vpop.permute.xlu0 %962 }
 0x246   :  { %v969_v28 = vsel %vm968_vm2, %v957_v23, %v960_v26 }
 0x247   :  { %v971_v32 = vsel %vm970_vm3, %v969_v28, %v963_v27 }
 0x249   :  { %v966_v33 = vpop.permute.xlu1 %965 }
 0x24a   :  { %v973_v34 = vsel %vm972_vm4, %v971_v32, %v966_v33 }
 0x24b   :  { %v977_v35 = vrot.slane %v973_v34, %v2298_v31 }
 0x24d   :  { %v2304_v38 = vsub.f32 %v2155_v21, %v977_v35  ;;  %v2307_v39 = vsub.f32 %v2150_v18, %v977_v35  ;;  %v2310_v40 = vsub.f32 %v2185_v30, %v977_v35  ;;  %v2313_v41 = vsub.f32 %v2180_v29, %v977_v35 }
 0x24e   :  { %v2320_v47 = vsub.f32 %v2215_v37, %v977_v35  ;;  %v2325_v18 = vsub.f32 %v2210_v36, %v977_v35  ;;  %v2332_v51 = vsub.f32 %v2224_v42, %v977_v35  ;;  %v2338_v36 = vsub.f32 %v2229_v43, %v977_v35 }
 0x24f   :  { %v994_v44 = vmul.f32 %v2304_v38, %v2304_v38  ;;  %v995_v45 = vmul.f32 %v2307_v39, %v2307_v39  ;;  %v996_v21 = vmul.f32 %v2310_v40, %v2310_v40  ;;  %v997_v30 = vmul.f32 %v2313_v41, %v2313_v41 }
 0x250   :  { %v998_v37 = vmul.f32 %v2320_v47, %v2320_v47  ;;  %v999_v56 = vmul.f32 %v2325_v18, %v2325_v18  ;;  %v2344_v60 = vsub.f32 %v2236_v46, %v977_v35  ;;  %v1000_v42 = vmul.f32 %v2332_v51, %v2332_v51 }
 0x251   :  { %v1010_v29 = vsel %vm447_vm1, %v994_v44, 0.0  ;;  %v1011_v48 = vsel %vm447_vm1, %v995_v45, 0.0  ;;  %v1013_v53 = vsel %vm447_vm1, %v996_v21, 0.0  ;;  %v1015_v57 = vsel %vm447_vm1, %v997_v30, 0.0 }
 0x252   :  { %v1012_v50 = vadd.f32 %v1011_v48, %v1010_v29  ;;  %v1017_v62 = vsel %vm447_vm1, %v998_v37, 0.0  ;;  %v2350_v1 = vsub.f32 %v2243_v49, %v977_v35  ;;  %v1001_v43 = vmul.f32 %v2338_v36, %v2338_v36 }
 0x253   :  { %v1019_v2 = vsel %vm447_vm1, %v999_v56, 0.0  ;;  %v2356_v5 = vsub.f32 %v2250_v52, %v977_v35  ;;  %v1002_v46 = vmul.f32 %v2344_v60, %v2344_v60  ;;  %v1021_v6 = vsel %vm447_vm1, %v1000_v42, 0.0 }
 0x254   :  { %v1014_v54 = vadd.f32 %v1013_v53, %v1012_v50  ;;  %v2362_v8 = vsub.f32 %v2257_v55, %v977_v35  ;;  %v1003_v49 = vmul.f32 %v2350_v1, %v2350_v1  ;;  %v1023_v9 = vsel %vm447_vm1, %v1001_v43, 0.0  ;;  %v1082_v50 = vld [vmem:[%s2507_s3] sm:$0x1] }
 0x255   :  { %v2368_v11 = vsub.f32 %v2264_v58, %v977_v35  ;;  %v1004_v52 = vmul.f32 %v2356_v5, %v2356_v5  ;;  %v1025_v12 = vsel %vm447_vm1, %v1002_v46, 0.0  ;;  %v2374_v14 = vsub.f32 %v2271_v61, %v977_v35  ;;  %v1061_v43 = vld [vmem:[%s2508_s2] sm:$0x1] }
 0x256   :  { %v1016_v59 = vadd.f32 %v1015_v57, %v1014_v54  ;;  %v1005_v55 = vmul.f32 %v2362_v8, %v2362_v8  ;;  %v1027_v15 = vsel %vm447_vm1, %v1003_v49, 0.0  ;;  %v2380_v17 = vsub.f32 %v2278_v0, %v977_v35 }
 0x257   :  { %v1006_v58 = vmul.f32 %v2368_v11, %v2368_v11  ;;  %v1029_v19 = vsel %vm447_vm1, %v1004_v52, 0.0  ;;  %v2386_v22 = vsub.f32 %v2285_v3, %v977_v35  ;;  %v1007_v61 = vmul.f32 %v2374_v14, %v2374_v14 }
 0x258   :  { %v1018_v63 = vadd.f32 %v1017_v62, %v1016_v59  ;;  %v1031_v23 = vsel %vm447_vm1, %v1005_v55, 0.0  ;;  %v1008_v25 = vmul.f32 %v2380_v17, %v2380_v17  ;;  %v1087_v37 = vrot.slane %v1082_v50, %v2298_v31 }
 0x259   :  { %v1033_v0 = vsel %vm447_vm1, %v1006_v58, 0.0  ;;  %v1009_v27 = vmul.f32 %v2386_v22, %v2386_v22  ;;  %v1035_v28 = vsel %vm447_vm1, %v1007_v61, 0.0 }
 0x25a   :  { %v1020_v4 = vadd.f32 %v1019_v2, %v1018_v63  ;;  %v1037_v3 = vsel %vm447_vm1, %v1008_v25, 0.0 }
 0x25b   :  { %v1039_v34 = vsel %vm447_vm1, %v1009_v27, 0.0 }
 0x25c   :  { %v1022_v7 = vadd.f32 %v1021_v6, %v1020_v4 }
 0x25e   :  { %v1024_v10 = vadd.f32 %v1023_v9, %v1022_v7 }
 0x260   :  { %v1026_v13 = vadd.f32 %v1025_v12, %v1024_v10 }
 0x262   :  { %v1028_v16 = vadd.f32 %v1027_v15, %v1026_v13 }
 0x264   :  { %v1030_v20 = vadd.f32 %v1029_v19, %v1028_v16 }
 0x266   :  { %v1032_v24 = vadd.f32 %v1031_v23, %v1030_v20 }
 0x268   :  { %v1034_v26 = vadd.f32 %v1033_v0, %v1032_v24 }
 0x26a   :  { %v1036_v32 = vadd.f32 %v1035_v28, %v1034_v26 }
 0x26c   :  { %v1038_v33 = vadd.f32 %v1037_v3, %v1036_v32 }
 0x26e   :  { %v1040_v35 = vadd.f32 %v1039_v34, %v1038_v33 }
 0x270   :  { %v1041_v44 = vrot.slane %v1040_v35, 4 }
 0x272   :  { %v1042_v45 = vadd.f32 %v1041_v44, %v1040_v35 }
 0x274   :  { %v1043_v21 = vrot.slane %v1042_v45, 2 }
 0x276   :  { %v1044_v30 = vadd.f32 %v1043_v21, %v1042_v45 }
 0x278   :  { %v1045_v29 = vrot.slane %v1044_v30, 1 }
 0x27a   :  { %v1046_v48 = vadd.f32 %v1045_v29, %v1044_v30 }
 0x27c   :  { %1052 = vrot.lane.b32.xlu1 %v1046_v48, %s1794_s5  ;;  %1048 = vrot.lane.b32.xlu0 %v1046_v48, %s1793_s30 }
 0x280   :  { %1056 = vrot.lane.b32.xlu0 %v1046_v48, %s1792_s29 }
 0x284   :  { %1088 = vrot.lane.b32.xlu0 %v1087_v37, %s1796_s7 }
 0x2ee   :  { %v1049_v53 = vpop.permute.xlu0 %1048  ;;  %v1053_v56 = vpop.permute.xlu1 %1052 }
 0x2ef   :  { %v1051_v54 = vadd.f32 %v1049_v53, %v1046_v48 }
 0x2f1   :  { %v1055_v57 = vadd.f32 %v1053_v56, %v1051_v54 }
 0x2f2   :  { %v1057_v59 = vpop.permute.xlu0 %1056 }
 0x2f3   :  { %v1059_v42 = vadd.f32 %v1057_v59, %v1055_v57 }
 0x2f5   :  { %v1060_v62 = vmul.f32 0.001953125, %v1059_v42 }
 0x2f6   :  { %v1089_v6 = vpop.permute.xlu0 %1088 }
 0x2f7   :  { %v1062_v63 = vadd.f32 1e-05, %v1060_v62  ;;  %v1097_v16 = vsel %vm968_vm2, %v1082_v50, %v1089_v6 }
 0x2f9   :  { %1790 = vrsqrt.f32 %v1062_v63 }
 0x303   :  { %v1791_v2 = vpop.eup %1790 }
 0x304   :  { %v1064_v4 = vmul.f32 %v1791_v2, %v1061_v43 }
 0x306   :  { %v1069_v46 = vrot.slane %v1064_v4, %v2298_v31 }
 0x308   :  { %1073 = vrot.lane.b32.xlu0 %v1069_v46, %s1795_s6  ;;  %1070 = vrot.lane.b32.xlu1 %v1069_v46, %s1796_s7 }
 0x30c   :  { %1076 = vrot.lane.b32.xlu1 %v1069_v46, %s1797_s8  ;;  %1094 = vrot.lane.b32.xlu0 %v1087_v37, %s1797_s8 }
 0x310   :  { %1091 = vrot.lane.b32.xlu1 %v1087_v37, %s1795_s6 }
 0x37a   :  { %v1071_v7 = vpop.permute.xlu1 %1070  ;;  %v1074_v9 = vpop.permute.xlu0 %1073 }
 0x37b   :  { %v1079_v49 = vsel %vm968_vm2, %v1064_v4, %v1071_v7 }
 0x37c   :  { %v1080_v10 = vsel %vm970_vm3, %v1079_v49, %v1074_v9 }
 0x37e   :  { %v1077_v52 = vpop.permute.xlu1 %1076  ;;  %v1095_v15 = vpop.permute.xlu0 %1094 }
 0x37f   :  { %v1081_v12 = vsel %vm972_vm4, %v1080_v10, %v1077_v52 }
 0x380   :  { %v1103_v13 = vrot.slane %v1081_v12, %v2298_v31 }
 0x382   :  { %v1092_v55 = vpop.permute.xlu1 %1091  ;;  %v1104_v58 = vmul.f32 %v1103_v13, %v2304_v38  ;;  %v1105_v19 = vmul.f32 %v1103_v13, %v2307_v39  ;;  %v1106_v20 = vmul.f32 %v1103_v13, %v2310_v40  ;;  %v1107_v61 = vmul.f32 %v1103_v13, %v2313_v41 }
 0x383   :  { %v1108_v23 = vmul.f32 %v1103_v13, %v2320_v47  ;;  %v1109_v24 = vmul.f32 %v1103_v13, %v2325_v18  ;;  %v1098_v25 = vsel %vm970_vm3, %v1097_v16, %v1092_v55  ;;  %v1110_v0 = vmul.f32 %v1103_v13, %v2332_v51 }
 0x384   :  { %v1111_v26 = vmul.f32 %v1103_v13, %v2338_v36  ;;  %v1112_v27 = vmul.f32 %v1103_v13, %v2344_v60  ;;  %v1099_v38 = vsel %vm972_vm4, %v1098_v25, %v1095_v15  ;;  %v1113_v39 = vmul.f32 %v1103_v13, %v2350_v1 }
 0x385   :  { %v1114_v40 = vmul.f32 %v1103_v13, %v2356_v5  ;;  %v1115_v41 = vmul.f32 %v1103_v13, %v2362_v8  ;;  %v1123_v47 = vrot.slane %v1099_v38, %v2298_v31  ;;  %v1116_v18 = vmul.f32 %v1103_v13, %v2368_v11 }
 0x386   :  { %v1117_v28 = vmul.f32 %v1103_v13, %v2374_v14  ;;  %v1118_v51 = vmul.f32 %v1103_v13, %v2380_v17  ;;  %v1119_v36 = vmul.f32 %v1103_v13, %v2386_v22 }
 0x387   :  { %v1124_v32 = vadd.f32 %v1123_v47, %v1104_v58  ;;  %v1125_v60 = vadd.f32 %v1123_v47, %v1105_v19  ;;  %v1126_v3 = vadd.f32 %v1123_v47, %v1106_v20  ;;  %v1127_v33 = vadd.f32 %v1123_v47, %v1107_v61 }
 0x388   :  { %v1128_v34 = vadd.f32 %v1123_v47, %v1108_v23  ;;  %v1129_v1 = vadd.f32 %v1123_v47, %v1109_v24  ;;  %v1130_v35 = vadd.f32 %v1123_v47, %v1110_v0  ;;  %v1131_v5 = vadd.f32 %v1123_v47, %v1111_v26 }
 0x389   :  { %v1132_v44 = vadd.f32 %v1123_v47, %v1112_v27  ;;  %v1133_v8 = vadd.f32 %v1123_v47, %v1113_v39  ;;  %v1134_v45 = vadd.f32 %v1123_v47, %v1114_v40  ;;  %v1135_v31 = vadd.f32 %v1123_v47, %v1115_v41 }
 0x38a   :  { %v1136_v21 = vadd.f32 %v1123_v47, %v1116_v18  ;;  %v1137_v11 = vadd.f32 %v1123_v47, %v1117_v28  ;;  %v1138_v30 = vadd.f32 %v1123_v47, %v1118_v51  ;;  %v1139_v14 = vadd.f32 %v1123_v47, %v1119_v36 }
 0x38b   :  { %v1140_v29 = vmax.f32 %v1124_v32, 0.0  ;;  %v1141_v17 = vmax.f32 %v1125_v60, 0.0  ;;  %v1142_v48 = vmax.f32 %v1126_v3, 0.0  ;;  %v1143_v22 = vmax.f32 %v1127_v33, 0.0 }
 0x38c   :  { %v1144_v50 = vmax.f32 %v1128_v34, 0.0  ;;  %v1145_v37 = vmax.f32 %v1129_v1, 0.0  ;;  %v1146_v53 = vmax.f32 %v1130_v35, 0.0  ;;  %v1147_v54 = vmax.f32 %v1131_v5, 0.0 }
 0x38d   :  { %v1148_v56 = vmax.f32 %v1132_v44, 0.0  ;;  %v1149_v57 = vmax.f32 %v1133_v8, 0.0  ;;  %v1150_v59 = vmax.f32 %v1134_v45, 0.0  ;;  %v1151_v42 = vmax.f32 %v1135_v31, 0.0  ;;  %1156 = vst.msk [vmem:[%s2506_s4] sm:$0xff] %vm447_vm1, %v1140_v29  ;;  %1157 = vst.msk [vmem:[%s2506_s4 + $0x8] sm:$0xff] %vm447_vm1, %v1141_v17 }
 0x38e   :  { %1158 = vst.msk [vmem:[%s2506_s4 + $0x10] sm:$0xff] %vm447_vm1, %v1142_v48  ;;  %1159 = vst.msk [vmem:[%s2506_s4 + $0x18] sm:$0xff] %vm447_vm1, %v1143_v22  ;;  %v1152_v62 = vmax.f32 %v1136_v21, 0.0  ;;  %v1153_v63 = vmax.f32 %v1137_v11, 0.0  ;;  %v1154_v43 = vmax.f32 %v1138_v30, 0.0  ;;  %v1155_v2 = vmax.f32 %v1139_v14, 0.0 }
 0x38f   :  { %1160 = vst.msk [vmem:[%s2506_s4 + $0x20] sm:$0xff] %vm447_vm1, %v1144_v50  ;;  %1161 = vst.msk [vmem:[%s2506_s4 + $0x28] sm:$0xff] %vm447_vm1, %v1145_v37 }
 0x390   :  { %1162 = vst.msk [vmem:[%s2506_s4 + $0x30] sm:$0xff] %vm447_vm1, %v1146_v53  ;;  %1163 = vst.msk [vmem:[%s2506_s4 + $0x38] sm:$0xff] %vm447_vm1, %v1147_v54 }
 0x391   :  { %1164 = vst.msk [vmem:[%s2506_s4 + $0x40] sm:$0xff] %vm447_vm1, %v1148_v56  ;;  %1165 = vst.msk [vmem:[%s2506_s4 + $0x48] sm:$0xff] %vm447_vm1, %v1149_v57 }
 0x392   :  { %1166 = vst.msk [vmem:[%s2506_s4 + $0x50] sm:$0xff] %vm447_vm1, %v1150_v59  ;;  %1167 = vst.msk [vmem:[%s2506_s4 + $0x58] sm:$0xff] %vm447_vm1, %v1151_v42 }
 0x393   :  { %1168 = vst.msk [vmem:[%s2506_s4 + $0x60] sm:$0xff] %vm447_vm1, %v1152_v62  ;;  %1169 = vst.msk [vmem:[%s2506_s4 + $0x68] sm:$0xff] %vm447_vm1, %v1153_v63 }
 0x394   :  { %1170 = vst.msk [vmem:[%s2506_s4 + $0x70] sm:$0xff] %vm447_vm1, %v1154_v43  ;;  %1171 = vst.msk [vmem:[%s2506_s4 + $0x78] sm:$0xff] %vm447_vm1, %v1155_v2 }

// kernel: generator_forward.8
= control target key start
LH: loop header
LB: loop body
LE: loop exit
PB: predicated region body
PF: predicated region fallthrough
CT: control target
= control target key end

     0   :  { %vm64_vm0 = vcmask 392192   ;;  %vm1009_vm1 = vcmask 261120   ;;  %s3889_s16 = smov 120   ;;  %s3890_s17 = smov 112   ;;  %vm2284_vm2 = vcmask 64512   ;;  %vm2286_vm3 = vcmask 130048   ;;  %s6726_s1 = inlined_call_operand.vmem [shape: f32[3,48,32], index: 1, kind: input, shape index: {}]   ;;  %s6727_s0 = inlined_call_operand.vmem [shape: f32[576,48], index: 0, kind: input, shape index: {}]   ;;  %s6728_s4 = inlined_call_operand.vmem [shape: f32[512,32], index: 4, kind: output, shape index: {}]   ;;  %s6729_s3 = inlined_call_operand.vmem [shape: f32[1,8], index: 3, kind: input, shape index: {}]   ;;  %s6730_s2 = inlined_call_operand.vmem [shape: f32[1,8], index: 2, kind: input, shape index: {}]  }
   0x1   :  { %v2876_v0 = vld [vmem:[%s6726_s1 + $0x30] sm:$0xff]  ;;  %v2877_v1 = vld [vmem:[%s6726_s1 + $0x38] sm:$0xff]  ;;  %v2878_v2 = vld [vmem:[%s6726_s1 + $0x40] sm:$0xff]  ;;  %s3891_s18 = smov 16   ;;  %s3892_s19 = smov 8   ;;  %vm2288_vm4 = vcmask 195584  }
   0x2   :  { %v3680_v3 = vpack.c.bf16 %v2877_v1, %v2876_v0  ;;  %v2879_v4 = vld [vmem:[%s6726_s1 + $0x48] sm:$0xff]  ;;  %v2880_v6 = vld [vmem:[%s6726_s1 + $0x50] sm:$0xff]  ;;  %v2881_v7 = vld [vmem:[%s6726_s1 + $0x58] sm:$0xff]  ;;  %s3893_s20 = smov 24  }
   0x3   :  { %v3684_v5 = vpack.c.bf16 %v2879_v4, %v2878_v2  ;;  %v3940_v8 = vld [vmem:[%s6727_s0 + $0x10] sm:$0xff]  ;;  %v3688_v10 = vpack.c.bf16 %v2881_v7, %v2880_v6  ;;  %v49_v11 = vld [vmem:[%s6726_s1] sm:$0xff]  ;;  %v50_v12 = vld [vmem:[%s6726_s1 + $0x8] sm:$0xff] }
   0x4   :  { %3681 = vmatprep.subr.bf16.mxu0 %v3680_v3  ;;  %3717 = vmatprep.subr.bf16.mxu1 %v3680_v3  ;;  %v3945_v9 = vld [vmem:[%s6727_s0 + $0x130] sm:$0xff]  ;;  %v3692_v13 = vpack.c.bf16 %v50_v12, %v49_v11  ;;  %v52_v15 = vld [vmem:[%s6726_s1 + $0x18] sm:$0xff]  ;;  %v3976_v18 = vld [vmem:[%s6727_s0 + $0x20] sm:$0xff] }
   0x5   :  { %3683 = vmatpush3.bf16.msra.mxu0 %v3680_v3  ;;  %3719 = vmatpush3.bf16.msra.mxu1 %v3680_v3  ;;  %v51_v14 = vld [vmem:[%s6726_s1 + $0x10] sm:$0xff]  ;;  %v3966_v16 = vld [vmem:[%s6727_s0 + $0x18] sm:$0xff]  ;;  %v3981_v20 = vld [vmem:[%s6727_s0 + $0x140] sm:$0xff] }
   0x6   :  { %3685 = vmatprep.subr.bf16.mxu0 %v3684_v5  ;;  %3721 = vmatprep.subr.bf16.mxu1 %v3684_v5  ;;  %v3971_v17 = vld [vmem:[%s6727_s0 + $0x138] sm:$0xff]  ;;  %v3696_v19 = vpack.c.bf16 %v52_v15, %v51_v14  ;;  %v3992_v21 = vld [vmem:[%s6727_s0 + $0x28] sm:$0xff]  ;;  %v4004_v23 = vld [vmem:[%s6727_s0 + $0x30] sm:$0xff] }
   0x7   :  { %3332 = vmatprep.mubr.msk.f32.mxu0 %vm64_vm0, %v3940_v8  ;;  %3512 = vmatprep.mubr.msk.f32.mxu1 %vm64_vm0, %v3945_v9  ;;  %v3997_v22 = vld [vmem:[%s6727_s0 + $0x148] sm:$0xff]  ;;  %v4009_v24 = vld [vmem:[%s6727_s0 + $0x150] sm:$0xff]  ;;  %v53_v25 = vld [vmem:[%s6726_s1 + $0x20] sm:$0xff] }
   0x8   :  { %v54_v26 = vld [vmem:[%s6726_s1 + $0x28] sm:$0xff]  ;;  %v4028_v28 = vld [vmem:[%s6727_s0 + $0x38] sm:$0xff]  ;;  %v4038_v30 = vld [vmem:[%s6727_s0 + $0x40] sm:$0xff] }
   0x9   :  { %3687 = vmatpush3.bf16.msra.mxu0 %v3684_v5  ;;  %3723 = vmatpush3.bf16.msra.mxu1 %v3684_v5  ;;  %v3700_v27 = vpack.c.bf16 %v54_v26, %v53_v25  ;;  %v4033_v29 = vld [vmem:[%s6727_s0 + $0x158] sm:$0xff]  ;;  %v4043_v31 = vld [vmem:[%s6727_s0 + $0x160] sm:$0xff]  ;;  %v4056_v32 = vld [vmem:[%s6727_s0 + $0x48] sm:$0xff] }
   0xa   :  { %3689 = vmatprep.subr.bf16.mxu0 %v3688_v10  ;;  %3725 = vmatprep.subr.bf16.mxu1 %v3688_v10  ;;  %v4061_v33 = vld [vmem:[%s6727_s0 + $0x168] sm:$0xff]  ;;  %v4066_v34 = vld [vmem:[%s6727_s0 + $0x50] sm:$0xff]  ;;  %v2946_v36 = vld [vmem:[%s6726_s1 + $0x60] sm:$0xff] }
   0xb   :  { %v4071_v35 = vld [vmem:[%s6727_s0 + $0x170] sm:$0xff]  ;;  %v2947_v37 = vld [vmem:[%s6726_s1 + $0x68] sm:$0xff]  ;;  %v4092_v39 = vld [vmem:[%s6727_s0 + $0x58] sm:$0xff] }
   0xc   :  { %v4083_v38 = vpack.c.bf16 %v2947_v37, %v2946_v36  ;;  %v4097_v40 = vld [vmem:[%s6727_s0 + $0x178] sm:$0xff]  ;;  %v4102_v41 = vld [vmem:[%s6727_s0 + $0x60] sm:$0xff]  ;;  %v4122_v43 = vld [vmem:[%s6727_s0 + $0x68] sm:$0xff] }
   0xd   :  { %3691 = vmatpush3.bf16.msra.mxu0 %v3688_v10  ;;  %3727 = vmatpush3.bf16.msra.mxu1 %v3688_v10  ;;  %v4107_v42 = vld [vmem:[%s6727_s0 + $0x180] sm:$0xff]  ;;  %v4127_v44 = vld [vmem:[%s6727_s0 + $0x188] sm:$0xff]  ;;  %v4132_v45 = vld [vmem:[%s6727_s0 + $0x70] sm:$0xff] }
   0xe   :  { %3693 = vmatprep.subr.bf16.mxu0 %v3692_v13  ;;  %3729 = vmatprep.subr.bf16.mxu1 %v3692_v13  ;;  %v4137_v46 = vld [vmem:[%s6727_s0 + $0x190] sm:$0xff]  ;;  %v4150_v47 = vld [vmem:[%s6727_s0 + $0x78] sm:$0xff]  ;;  %v4160_v49 = vld [vmem:[%s6727_s0 + $0x80] sm:$0xff] }
   0xf   :  { %v4155_v48 = vld [vmem:[%s6727_s0 + $0x198] sm:$0xff]  ;;  %v4165_v50 = vld [vmem:[%s6727_s0 + $0x1a0] sm:$0xff]  ;;  %v4178_v51 = vld [vmem:[%s6727_s0 + $0x88] sm:$0xff] }
  0x10   :  { %3333 = vmatmul.mubr.msk.f32.vlgmr.msra.gmra.mrb[0].mxu0 %vm64_vm0, %v3966_v16  ;;  %3513 = vmatmul.mubr.msk.f32.vlgmr.msra.gmra.mrb[0].mxu1 %vm64_vm0, %v3971_v17  ;;  %v4183_v52 = vld [vmem:[%s6727_s0 + $0x1a8] sm:$0xff]  ;;  %v4188_v53 = vld [vmem:[%s6727_s0 + $0x90] sm:$0xff]  ;;  %v4206_v55 = vld [vmem:[%s6727_s0 + $0x98] sm:$0xff] }
  0x11   :  { %3695 = vmatpush3.bf16.msra.mxu0 %v3692_v13  ;;  %3335 = vmatprep.mubr.msk.f32.mxu0 %vm64_vm0, %v3976_v18  ;;  %v4193_v54 = vld [vmem:[%s6727_s0 + $0x1b0] sm:$0xff]  ;;  %v4211_v56 = vld [vmem:[%s6727_s0 + $0x1b8] sm:$0xff]  ;;  %v4216_v57 = vld [vmem:[%s6727_s0 + $0xa0] sm:$0xff] }
  0x12   :  { %3515 = vmatprep.mubr.msk.f32.mxu1 %vm64_vm0, %v3981_v20  ;;  %3697 = vmatprep.subr.bf16.mxu0 %v3696_v19  ;;  %v4221_v58 = vld [vmem:[%s6727_s0 + $0x1c0] sm:$0xff]  ;;  %v4234_v59 = vld [vmem:[%s6727_s0 + $0xa8] sm:$0xff]  ;;  %v4244_v61 = vld [vmem:[%s6727_s0 + $0xb0] sm:$0xff] }
  0x13   :  { %3731 = vmatpush3.bf16.msra.mxu1 %v3692_v13  ;;  %v4239_v60 = vld [vmem:[%s6727_s0 + $0x1c8] sm:$0xff]  ;;  %v4249_v62 = vld [vmem:[%s6727_s0 + $0x1d0] sm:$0xff]  ;;  %v4262_v63 = vld [vmem:[%s6727_s0 + $0xb8] sm:$0xff] }
  0x14   :  { %3336 = vmatmul.mubr.msk.f32.gmra.mrb[2].mxu0 %vm64_vm0, %v3992_v21  ;;  %3516 = vmatmul.mubr.msk.f32.gmra.mrb[2].mxu1 %vm64_vm0, %v3997_v22  ;;  %v4267_v0 = vld [vmem:[%s6727_s0 + $0x1d8] sm:$0xff]  ;;  %v4272_v1 = vld [vmem:[%s6727_s0 + $0xc0] sm:$0xff]  ;;  %v4290_v3 = vld [vmem:[%s6727_s0 + $0xc8] sm:$0xff] }
  0x15   :  { %3338 = vmatprep.mubr.msk.f32.mxu0 %vm64_vm0, %v4004_v23  ;;  %3518 = vmatprep.mubr.msk.f32.mxu1 %vm64_vm0, %v4009_v24  ;;  %v4277_v2 = vld [vmem:[%s6727_s0 + $0x1e0] sm:$0xff]  ;;  %v4295_v4 = vld [vmem:[%s6727_s0 + $0x1e8] sm:$0xff]  ;;  %v4300_v5 = vld [vmem:[%s6727_s0 + $0xd0] sm:$0xff] }
  0x16   :  { %3699 = vmatpush3.bf16.msra.mxu0 %v3696_v19  ;;  %3733 = vmatprep.subr.bf16.mxu1 %v3696_v19  ;;  %v4305_v6 = vld [vmem:[%s6727_s0 + $0x1f0] sm:$0xff]  ;;  %v4318_v7 = vld [vmem:[%s6727_s0 + $0xd8] sm:$0xff]  ;;  %v4328_v11 = vld [vmem:[%s6727_s0 + $0xe0] sm:$0xff] }
  0x17   :  { %3701 = vmatprep.subr.bf16.mxu0 %v3700_v27  ;;  %3735 = vmatpush3.bf16.msra.mxu1 %v3696_v19  ;;  %v4323_v10 = vld [vmem:[%s6727_s0 + $0x1f8] sm:$0xff]  ;;  %v4333_v12 = vld [vmem:[%s6727_s0 + $0x200] sm:$0xff]  ;;  %v4346_v13 = vld [vmem:[%s6727_s0 + $0xe8] sm:$0xff] }
  0x18   :  { %3339 = vmatmul.mubr.msk.f32.gmra.mrb[4].mxu0 %vm64_vm0, %v4028_v28  ;;  %3519 = vmatmul.mubr.msk.f32.gmra.mrb[4].mxu1 %vm64_vm0, %v4033_v29  ;;  %6779 = vst [vmem:[#allocation2_spill] sm:$0xff] %v4346_v13  ;;  %v4351_v14 = vld [vmem:[%s6727_s0 + $0x208] sm:$0xff]  ;;  %v4356_v15 = vld [vmem:[%s6727_s0 + $0xf0] sm:$0xff]  ;;  %v4374_v25 = vld [vmem:[%s6727_s0 + $0xf8] sm:$0xff] }
  0x19   :  { %3341 = vmatprep.mubr.msk.f32.mxu0 %vm64_vm0, %v4038_v30  ;;  %3521 = vmatprep.mubr.msk.f32.mxu1 %vm64_vm0, %v4043_v31  ;;  %6780 = vst [vmem:[#allocation3_spill] sm:$0xff] %v4351_v14  ;;  %6781 = vst [vmem:[#allocation4_spill] sm:$0xff] %v4356_v15  ;;  %v4361_v19 = vld [vmem:[%s6727_s0 + $0x210] sm:$0xff]  ;;  %v4379_v26 = vld [vmem:[%s6727_s0 + $0x218] sm:$0xff] }
  0x1a   :  { %3703 = vmatpush3.bf16.msra.mxu0 %v3700_v27  ;;  %3737 = vmatprep.subr.bf16.mxu1 %v3700_v27  ;;  %6782 = vst [vmem:[#allocation5_spill] sm:$0xff] %v4361_v19  ;;  %6783 = vst [vmem:[#allocation6_spill] sm:$0xff] %v4374_v25  ;;  %v4389_v36 = vld [vmem:[%s6727_s0 + $0x220] sm:$0xff]  ;;  %v4402_v37 = vld [vmem:[%s6727_s0 + $0x108] sm:$0xff] }
  0x1b   :  { %3739 = vmatpush3.bf16.msra.mxu1 %v3700_v27  ;;  %3705 = vmatprep.subr.bf16.mxu0 %v4083_v38  ;;  %6784 = vst [vmem:[#allocation7_spill] sm:$0xff] %v4379_v26  ;;  %v4384_v27 = vld [vmem:[%s6727_s0 + $0x100] sm:$0xff]  ;;  %6786 = vst [vmem:[#allocation9_spill] sm:$0xff] %v4389_v36 }
  0x1c   :  { %3342 = vmatmul.mubr.msk.f32.gmra.mrb[6].mxu0 %vm64_vm0, %v4056_v32  ;;  %3522 = vmatmul.mubr.msk.f32.gmra.mrb[6].mxu1 %vm64_vm0, %v4061_v33  ;;  %6785 = vst [vmem:[#allocation8_spill] sm:$0xff] %v4384_v27 }
  0x1d   :  { %3344 = vmatprep.mubr.msk.f32.mxu0 %vm64_vm0, %v4066_v34  ;;  %3524 = vmatprep.mubr.msk.f32.mxu1 %vm64_vm0, %v4071_v35 }
  0x1e   :  { %3741 = vmatprep.subr.bf16.mxu1 %v4083_v38 }
  0x20   :  { %3345 = vmatmul.mubr.msk.f32.gmra.mrb[8].mxu0 %vm64_vm0, %v4092_v39  ;;  %3525 = vmatmul.mubr.msk.f32.gmra.mrb[8].mxu1 %vm64_vm0, %v4097_v40 }
  0x21   :  { %3347 = vmatprep.mubr.msk.f32.mxu0 %vm64_vm0, %v4102_v41  ;;  %3527 = vmatprep.mubr.msk.f32.mxu1 %vm64_vm0, %v4107_v42 }
  0x24   :  { %3348 = vmatmul.mubr.msk.f32.gmra.mrb[10].mxu0 %vm64_vm0, %v4122_v43  ;;  %3528 = vmatmul.mubr.msk.f32.gmra.mrb[10].mxu1 %vm64_vm0, %v4127_v44 }
  0x25   :  { %3350 = vmatprep.mubr.msk.f32.mxu0 %vm64_vm0, %v4132_v45  ;;  %3530 = vmatprep.mubr.msk.f32.mxu1 %vm64_vm0, %v4137_v46 }
  0x28   :  { %3351 = vmatmul.mubr.msk.f32.gmra.mrb[12].mxu0 %vm64_vm0, %v4150_v47  ;;  %3531 = vmatmul.mubr.msk.f32.gmra.mrb[12].mxu1 %vm64_vm0, %v4155_v48 }
  0x29   :  { %3353 = vmatprep.mubr.msk.f32.mxu0 %vm64_vm0, %v4160_v49  ;;  %3533 = vmatprep.mubr.msk.f32.mxu1 %vm64_vm0, %v4165_v50 }
  0x2c   :  { %3354 = vmatmul.mubr.msk.f32.gmra.mrb[14].mxu0 %vm64_vm0, %v4178_v51  ;;  %3534 = vmatmul.mubr.msk.f32.gmra.mrb[14].mxu1 %vm64_vm0, %v4183_v52 }
  0x2d   :  { %3356 = vmatprep.mubr.msk.f32.mxu0 %vm64_vm0, %v4188_v53  ;;  %3536 = vmatprep.mubr.msk.f32.mxu1 %vm64_vm0, %v4193_v54 }
  0x30   :  { %3357 = vmatmul.mubr.msk.f32.gmra.mrb[16].mxu0 %vm64_vm0, %v4206_v55  ;;  %3537 = vmatmul.mubr.msk.f32.gmra.mrb[16].mxu1 %vm64_vm0, %v4211_v56 }
  0x31   :  { %3359 = vmatprep.mubr.msk.f32.mxu0 %vm64_vm0, %v4216_v57  ;;  %3539 = vmatprep.mubr.msk.f32.mxu1 %vm64_vm0, %v4221_v58 }
  0x34   :  { %3360 = vmatmul.mubr.msk.f32.gmra.mrb[18].mxu0 %vm64_vm0, %v4234_v59  ;;  %3540 = vmatmul.mubr.msk.f32.gmra.mrb[18].mxu1 %vm64_vm0, %v4239_v60 }
  0x35   :  { %3362 = vmatprep.mubr.msk.f32.mxu0 %vm64_vm0, %v4244_v61  ;;  %3542 = vmatprep.mubr.msk.f32.mxu1 %vm64_vm0, %v4249_v62 }
  0x38   :  { %3363 = vmatmul.mubr.msk.f32.gmra.mrb[20].mxu0 %vm64_vm0, %v4262_v63  ;;  %3543 = vmatmul.mubr.msk.f32.gmra.mrb[20].mxu1 %vm64_vm0, %v4267_v0 }
  0x39   :  { %3365 = vmatprep.mubr.msk.f32.mxu0 %vm64_vm0, %v4272_v1  ;;  %3545 = vmatprep.mubr.msk.f32.mxu1 %vm64_vm0, %v4277_v2 }
  0x3c   :  { %3366 = vmatmul.mubr.msk.f32.gmra.mrb[22].mxu0 %vm64_vm0, %v4290_v3  ;;  %3546 = vmatmul.mubr.msk.f32.gmra.mrb[22].mxu1 %vm64_vm0, %v4295_v4 }
  0x3d   :  { %3368 = vmatprep.mubr.msk.f32.mxu0 %vm64_vm0, %v4300_v5  ;;  %3548 = vmatprep.mubr.msk.f32.mxu1 %vm64_vm0, %v4305_v6 }
  0x40   :  { %3369 = vmatmul.mubr.msk.f32.gmra.mrb[24].mxu0 %vm64_vm0, %v4318_v7  ;;  %3549 = vmatmul.mubr.msk.f32.gmra.mrb[24].mxu1 %vm64_vm0, %v4323_v10 }
  0x41   :  { %3371 = vmatprep.mubr.msk.f32.mxu0 %vm64_vm0, %v4328_v11  ;;  %3551 = vmatprep.mubr.msk.f32.mxu1 %vm64_vm0, %v4333_v12 }
  0x44   :  { %3372 = vmatmul.mubr.msk.f32.gmra.mrb[26].mxu0 %vm64_vm0, %v4346_v13  ;;  %3552 = vmatmul.mubr.msk.f32.gmra.mrb[26].mxu1 %vm64_vm0, %v4351_v14  ;;  %v1043_v14 = vld [vmem:[%s6727_s0 + $0x128] sm:$0xff] }
  0x45   :  { %3374 = vmatprep.mubr.msk.f32.mxu0 %vm64_vm0, %v4356_v15  ;;  %3554 = vmatprep.mubr.msk.f32.mxu1 %vm64_vm0, %v4361_v19  ;;  %v4407_v19 = vld [vmem:[%s6727_s0 + $0x228] sm:$0xff] }
  0x46   :  { %6787 = vst [vmem:[#allocation10_spill] sm:$0xff] %v4407_v19  ;;  %v18_v15 = vld [vmem:[%s6727_s0 + $0x8] sm:$0xff] }
  0x48   :  { %3375 = vmatmul.mubr.msk.f32.gmra.mrb[28].mxu0 %vm64_vm0, %v4374_v25  ;;  %3555 = vmatmul.mubr.msk.f32.gmra.mrb[28].mxu1 %vm64_vm0, %v4379_v26  ;;  %v17_v26 = vld [vmem:[%s6727_s0] sm:$0xff]  ;;  %v2949_v25 = vld [vmem:[%s6726_s1 + $0x78] sm:$0xff] }
  0x49   :  { %3377 = vmatprep.mubr.msk.f32.mxu0 %vm64_vm0, %v4384_v27  ;;  %3557 = vmatprep.mubr.msk.f32.mxu1 %vm64_vm0, %v4389_v36  ;;  %v1042_v27 = vld [vmem:[%s6727_s0 + $0x120] sm:$0xff]  ;;  %v2948_v36 = vld [vmem:[%s6726_s1 + $0x70] sm:$0xff] }
  0x4a   :  { %v3708_v13 = vpack.c.bf16 %v2949_v25, %v2948_v36 }
  0x4c   :  { %3378 = vmatmul.mubr.msk.f32.gmra.mrb[30].mxu0 %vm64_vm0, %v4402_v37  ;;  %3558 = vmatmul.mubr.msk.f32.gmra.mrb[30].mxu1 %vm64_vm0, %v4407_v19  ;;  %v2950_v19 = vld [vmem:[%s6726_s1 + $0x80] sm:$0xff] }
  0x4d   :  { %3392 = vmatprep.mubr.msk.f32.mxu0 %vm64_vm0, %v17_v26  ;;  %3572 = vmatprep.mubr.msk.f32.mxu1 %vm64_vm0, %v1042_v27  ;;  %v2951_v26 = vld [vmem:[%s6726_s1 + $0x88] sm:$0xff] }
  0x50   :  { %3393 = vmatmul.mubr.msk.f32.vlgmr.msra.gmra.mrb[0].mxu0 %vm64_vm0, %v18_v15  ;;  %3573 = vmatmul.mubr.msk.f32.vlgmr.msra.gmra.mrb[0].mxu1 %vm64_vm0, %v1043_v14  ;;  %v3712_v15 = vpack.c.bf16 %v2951_v26, %v2950_v19 }
  0x51   :  { %3707 = vmatpush3.bf16.msra.mxu0 %v4083_v38  ;;  %3395 = vmatprep.mubr.msk.f32.mxu0 %vm64_vm0, %v3940_v8  ;;  %v6788_v8 = vld [vmem:[#allocation2_spill] sm:$0xff] }
  0x52   :  { %3575 = vmatprep.mubr.msk.f32.mxu1 %vm64_vm0, %v3945_v9  ;;  %3709 = vmatprep.subr.bf16.mxu0 %v3708_v13  ;;  %v6789_v9 = vld [vmem:[#allocation3_spill] sm:$0xff] }
  0x53   :  { %3743 = vmatpush3.bf16.msra.mxu1 %v4083_v38  ;;  %v6792_v38 = vld [vmem:[#allocation6_spill] sm:$0xff] }
  0x54   :  { %3396 = vmatmul.mubr.msk.f32.gmra.mrb[2].mxu0 %vm64_vm0, %v3966_v16  ;;  %3576 = vmatmul.mubr.msk.f32.gmra.mrb[2].mxu1 %vm64_vm0, %v3971_v17  ;;  %v6790_v16 = vld [vmem:[#allocation4_spill] sm:$0xff]  ;;  %v6791_v17 = vld [vmem:[#allocation5_spill] sm:$0xff] }
  0x55   :  { %3398 = vmatprep.mubr.msk.f32.mxu0 %vm64_vm0, %v3976_v18  ;;  %3578 = vmatprep.mubr.msk.f32.mxu1 %vm64_vm0, %v3981_v20 }
  0x56   :  { %3711 = vmatpush3.bf16.msra.mxu0 %v3708_v13  ;;  %3745 = vmatprep.subr.bf16.mxu1 %v3708_v13 }
  0x57   :  { %3713 = vmatprep.subr.bf16.mxu0 %v3712_v15  ;;  %3747 = vmatpush3.bf16.msra.mxu1 %v3708_v13  ;;  %v6793_v13 = vld [vmem:[#allocation7_spill] sm:$0xff] }
  0x58   :  { %3399 = vmatmul.mubr.msk.f32.gmra.mrb[4].mxu0 %vm64_vm0, %v3992_v21  ;;  %3579 = vmatmul.mubr.msk.f32.gmra.mrb[4].mxu1 %vm64_vm0, %v3997_v22 }
  0x59   :  { %3401 = vmatprep.mubr.msk.f32.mxu0 %vm64_vm0, %v4004_v23  ;;  %3581 = vmatprep.mubr.msk.f32.mxu1 %vm64_vm0, %v4009_v24 }
  0x5a   :  { %3715 = vmatpush3.bf16.msra.mxu0 %v3712_v15  ;;  %3749 = vmatprep.subr.bf16.mxu1 %v3712_v15 }
  0x5b   :  { %3751 = vmatpush3.bf16.msra.mxu1 %v3712_v15 }
  0x5c   :  { %3402 = vmatmul.mubr.msk.f32.gmra.mrb[6].mxu0 %vm64_vm0, %v4028_v28  ;;  %3582 = vmatmul.mubr.msk.f32.gmra.mrb[6].mxu1 %vm64_vm0, %v4033_v29 }
  0x5d   :  { %3404 = vmatprep.mubr.msk.f32.mxu0 %vm64_vm0, %v4038_v30  ;;  %3584 = vmatprep.mubr.msk.f32.mxu1 %vm64_vm0, %v4043_v31 }
  0x60   :  { %3405 = vmatmul.mubr.msk.f32.gmra.mrb[8].mxu0 %vm64_vm0, %v4056_v32  ;;  %3585 = vmatmul.mubr.msk.f32.gmra.mrb[8].mxu1 %vm64_vm0, %v4061_v33 }
  0x61   :  { %3407 = vmatprep.mubr.msk.f32.mxu0 %vm64_vm0, %v4066_v34  ;;  %3587 = vmatprep.mubr.msk.f32.mxu1 %vm64_vm0, %v4071_v35 }
  0x64   :  { %3408 = vmatmul.mubr.msk.f32.gmra.mrb[10].mxu0 %vm64_vm0, %v4092_v39  ;;  %3588 = vmatmul.mubr.msk.f32.gmra.mrb[10].mxu1 %vm64_vm0, %v4097_v40 }
  0x65   :  { %3410 = vmatprep.mubr.msk.f32.mxu0 %vm64_vm0, %v4102_v41  ;;  %3590 = vmatprep.mubr.msk.f32.mxu1 %vm64_vm0, %v4107_v42 }
  0x68   :  { %3411 = vmatmul.mubr.msk.f32.gmra.mrb[12].mxu0 %vm64_vm0, %v4122_v43  ;;  %3591 = vmatmul.mubr.msk.f32.gmra.mrb[12].mxu1 %vm64_vm0, %v4127_v44 }
  0x69   :  { %3413 = vmatprep.mubr.msk.f32.mxu0 %vm64_vm0, %v4132_v45  ;;  %3593 = vmatprep.mubr.msk.f32.mxu1 %vm64_vm0, %v4137_v46 }
  0x6c   :  { %3414 = vmatmul.mubr.msk.f32.gmra.mrb[14].mxu0 %vm64_vm0, %v4150_v47  ;;  %3594 = vmatmul.mubr.msk.f32.gmra.mrb[14].mxu1 %vm64_vm0, %v4155_v48 }
  0x6d   :  { %3416 = vmatprep.mubr.msk.f32.mxu0 %vm64_vm0, %v4160_v49  ;;  %3596 = vmatprep.mubr.msk.f32.mxu1 %vm64_vm0, %v4165_v50 }
  0x70   :  { %3417 = vmatmul.mubr.msk.f32.gmra.mrb[16].mxu0 %vm64_vm0, %v4178_v51  ;;  %3597 = vmatmul.mubr.msk.f32.gmra.mrb[16].mxu1 %vm64_vm0, %v4183_v52 }
  0x71   :  { %3419 = vmatprep.mubr.msk.f32.mxu0 %vm64_vm0, %v4188_v53  ;;  %3599 = vmatprep.mubr.msk.f32.mxu1 %vm64_vm0, %v4193_v54 }
  0x74   :  { %3420 = vmatmul.mubr.msk.f32.gmra.mrb[18].mxu0 %vm64_vm0, %v4206_v55  ;;  %3600 = vmatmul.mubr.msk.f32.gmra.mrb[18].mxu1 %vm64_vm0, %v4211_v56 }
  0x75   :  { %3422 = vmatprep.mubr.msk.f32.mxu0 %vm64_vm0, %v4216_v57  ;;  %3602 = vmatprep.mubr.msk.f32.mxu1 %vm64_vm0, %v4221_v58 }
  0x78   :  { %3423 = vmatmul.mubr.msk.f32.gmra.mrb[20].mxu0 %vm64_vm0, %v4234_v59  ;;  %3603 = vmatmul.mubr.msk.f32.gmra.mrb[20].mxu1 %vm64_vm0, %v4239_v60 }
  0x79   :  { %3425 = vmatprep.mubr.msk.f32.mxu0 %vm64_vm0, %v4244_v61  ;;  %3605 = vmatprep.mubr.msk.f32.mxu1 %vm64_vm0, %v4249_v62 }
  0x7c   :  { %3426 = vmatmul.mubr.msk.f32.gmra.mrb[22].mxu0 %vm64_vm0, %v4262_v63  ;;  %3606 = vmatmul.mubr.msk.f32.gmra.mrb[22].mxu1 %vm64_vm0, %v4267_v0 }
  0x7d   :  { %3428 = vmatprep.mubr.msk.f32.mxu0 %vm64_vm0, %v4272_v1  ;;  %3608 = vmatprep.mubr.msk.f32.mxu1 %vm64_vm0, %v4277_v2 }
  0x80   :  { %3429 = vmatmul.mubr.msk.f32.gmra.mrb[24].mxu0 %vm64_vm0, %v4290_v3  ;;  %3609 = vmatmul.mubr.msk.f32.gmra.mrb[24].mxu1 %vm64_vm0, %v4295_v4 }
  0x81   :  { %3431 = vmatprep.mubr.msk.f32.mxu0 %vm64_vm0, %v4300_v5  ;;  %3611 = vmatprep.mubr.msk.f32.mxu1 %vm64_vm0, %v4305_v6 }
  0x84   :  { %3432 = vmatmul.mubr.msk.f32.gmra.mrb[26].mxu0 %vm64_vm0, %v4318_v7  ;;  %3612 = vmatmul.mubr.msk.f32.gmra.mrb[26].mxu1 %vm64_vm0, %v4323_v10 }
  0x85   :  { %3434 = vmatprep.mubr.msk.f32.mxu0 %vm64_vm0, %v4328_v11  ;;  %3614 = vmatprep.mubr.msk.f32.mxu1 %vm64_vm0, %v4333_v12 }
  0x88   :  { %3435 = vmatmul.mubr.msk.f32.gmra.mrb[28].mxu0 %vm64_vm0, %v6788_v8  ;;  %3615 = vmatmul.mubr.msk.f32.gmra.mrb[28].mxu1 %vm64_vm0, %v6789_v9 }
  0x89   :  { %3437 = vmatprep.mubr.msk.f32.mxu0 %vm64_vm0, %v6790_v16  ;;  %3617 = vmatprep.mubr.msk.f32.mxu1 %vm64_vm0, %v6791_v17 }
  0x8c   :  { %3438 = vmatmul.mubr.msk.f32.gmra.mrb[30].mxu0 %vm64_vm0, %v6792_v38  ;;  %3618 = vmatmul.mubr.msk.f32.gmra.mrb[30].mxu1 %vm64_vm0, %v6793_v13 }
  0x8d   :  { %3452 = vmatprep.mubr.msk.f32.mxu0 %vm64_vm0, %v3976_v18  ;;  %3632 = vmatprep.mubr.msk.f32.mxu1 %vm64_vm0, %v3981_v20  ;;  %v6794_v18 = vld [vmem:[#allocation8_spill] sm:$0xff]  ;;  %v6795_v20 = vld [vmem:[#allocation9_spill] sm:$0xff] }
  0x90   :  { %3453 = vmatmul.mubr.msk.f32.vlgmr.msra.gmra.mrb[0].mxu0 %vm64_vm0, %v3992_v21  ;;  %3633 = vmatmul.mubr.msk.f32.vlgmr.msra.gmra.mrb[0].mxu1 %vm64_vm0, %v3997_v22  ;;  %v647_v21 = vld [vmem:[%s6727_s0 + $0x110] sm:$0xff] }
  0x91   :  { %3455 = vmatprep.mubr.msk.f32.mxu0 %vm64_vm0, %v4004_v23  ;;  %3635 = vmatprep.mubr.msk.f32.mxu1 %vm64_vm0, %v4009_v24  ;;  %v1670_v22 = vld [vmem:[%s6727_s0 + $0x230] sm:$0xff]  ;;  %v6796_v23 = vld [vmem:[#allocation10_spill] sm:$0xff]  ;;  %v648_v24 = vld [vmem:[%s6727_s0 + $0x118] sm:$0xff] }
  0x94   :  { %3456 = vmatmul.mubr.msk.f32.gmra.mrb[2].mxu0 %vm64_vm0, %v4028_v28  ;;  %3636 = vmatmul.mubr.msk.f32.gmra.mrb[2].mxu1 %vm64_vm0, %v4033_v29  ;;  %v1671_v28 = vld [vmem:[%s6727_s0 + $0x238] sm:$0xff]  ;;  %s3888_s0 = smov 104  }
  0x95   :  { %3458 = vmatprep.mubr.msk.f32.mxu0 %vm64_vm0, %v4038_v30  ;;  %3638 = vmatprep.mubr.msk.f32.mxu1 %vm64_vm0, %v4043_v31 }
  0x98   :  { %3459 = vmatmul.mubr.msk.f32.gmra.mrb[4].mxu0 %vm64_vm0, %v4056_v32  ;;  %3639 = vmatmul.mubr.msk.f32.gmra.mrb[4].mxu1 %vm64_vm0, %v4061_v33 }
  0x99   :  { %3461 = vmatprep.mubr.msk.f32.mxu0 %vm64_vm0, %v4066_v34  ;;  %3641 = vmatprep.mubr.msk.f32.mxu1 %vm64_vm0, %v4071_v35 }
  0x9c   :  { %3462 = vmatmul.mubr.msk.f32.gmra.mrb[6].mxu0 %vm64_vm0, %v4092_v39  ;;  %3642 = vmatmul.mubr.msk.f32.gmra.mrb[6].mxu1 %vm64_vm0, %v4097_v40 }
  0x9d   :  { %3464 = vmatprep.mubr.msk.f32.mxu0 %vm64_vm0, %v4102_v41  ;;  %3644 = vmatprep.mubr.msk.f32.mxu1 %vm64_vm0, %v4107_v42 }
  0xa0   :  { %3465 = vmatmul.mubr.msk.f32.gmra.mrb[8].mxu0 %vm64_vm0, %v4122_v43  ;;  %3645 = vmatmul.mubr.msk.f32.gmra.mrb[8].mxu1 %vm64_vm0, %v4127_v44 }
  0xa1   :  { %3467 = vmatprep.mubr.msk.f32.mxu0 %vm64_vm0, %v4132_v45  ;;  %3647 = vmatprep.mubr.msk.f32.mxu1 %vm64_vm0, %v4137_v46 }
  0xa4   :  { %3468 = vmatmul.mubr.msk.f32.gmra.mrb[10].mxu0 %vm64_vm0, %v4150_v47  ;;  %3648 = vmatmul.mubr.msk.f32.gmra.mrb[10].mxu1 %vm64_vm0, %v4155_v48 }
  0xa5   :  { %3470 = vmatprep.mubr.msk.f32.mxu0 %vm64_vm0, %v4160_v49  ;;  %3650 = vmatprep.mubr.msk.f32.mxu1 %vm64_vm0, %v4165_v50 }
  0xa8   :  { %3471 = vmatmul.mubr.msk.f32.gmra.mrb[12].mxu0 %vm64_vm0, %v4178_v51  ;;  %3651 = vmatmul.mubr.msk.f32.gmra.mrb[12].mxu1 %vm64_vm0, %v4183_v52 }
  0xa9   :  { %3473 = vmatprep.mubr.msk.f32.mxu0 %vm64_vm0, %v4188_v53  ;;  %3653 = vmatprep.mubr.msk.f32.mxu1 %vm64_vm0, %v4193_v54 }
  0xac   :  { %3474 = vmatmul.mubr.msk.f32.gmra.mrb[14].mxu0 %vm64_vm0, %v4206_v55  ;;  %3654 = vmatmul.mubr.msk.f32.gmra.mrb[14].mxu1 %vm64_vm0, %v4211_v56 }
  0xad   :  { %3476 = vmatprep.mubr.msk.f32.mxu0 %vm64_vm0, %v4216_v57  ;;  %3656 = vmatprep.mubr.msk.f32.mxu1 %vm64_vm0, %v4221_v58 }
  0xb0   :  { %3477 = vmatmul.mubr.msk.f32.gmra.mrb[16].mxu0 %vm64_vm0, %v4234_v59  ;;  %3657 = vmatmul.mubr.msk.f32.gmra.mrb[16].mxu1 %vm64_vm0, %v4239_v60 }
  0xb1   :  { %3479 = vmatprep.mubr.msk.f32.mxu0 %vm64_vm0, %v4244_v61  ;;  %3659 = vmatprep.mubr.msk.f32.mxu1 %vm64_vm0, %v4249_v62 }
  0xb4   :  { %3480 = vmatmul.mubr.msk.f32.gmra.mrb[18].mxu0 %vm64_vm0, %v4262_v63  ;;  %3660 = vmatmul.mubr.msk.f32.gmra.mrb[18].mxu1 %vm64_vm0, %v4267_v0 }
  0xb5   :  { %3482 = vmatprep.mubr.msk.f32.mxu0 %vm64_vm0, %v4272_v1  ;;  %3662 = vmatprep.mubr.msk.f32.mxu1 %vm64_vm0, %v4277_v2 }
  0xb8   :  { %3483 = vmatmul.mubr.msk.f32.gmra.mrb[20].mxu0 %vm64_vm0, %v4290_v3  ;;  %3663 = vmatmul.mubr.msk.f32.gmra.mrb[20].mxu1 %vm64_vm0, %v4295_v4 }
  0xb9   :  { %3485 = vmatprep.mubr.msk.f32.mxu0 %vm64_vm0, %v4300_v5  ;;  %3665 = vmatprep.mubr.msk.f32.mxu1 %vm64_vm0, %v4305_v6 }
  0xbc   :  { %3486 = vmatmul.mubr.msk.f32.gmra.mrb[22].mxu0 %vm64_vm0, %v4318_v7  ;;  %3666 = vmatmul.mubr.msk.f32.gmra.mrb[22].mxu1 %vm64_vm0, %v4323_v10 }
  0xbd   :  { %3488 = vmatprep.mubr.msk.f32.mxu0 %vm64_vm0, %v4328_v11  ;;  %3668 = vmatprep.mubr.msk.f32.mxu1 %vm64_vm0, %v4333_v12 }
  0xc0   :  { %3489 = vmatmul.mubr.msk.f32.gmra.mrb[24].mxu0 %vm64_vm0, %v6788_v8  ;;  %3669 = vmatmul.mubr.msk.f32.gmra.mrb[24].mxu1 %vm64_vm0, %v6789_v9 }
  0xc1   :  { %3491 = vmatprep.mubr.msk.f32.mxu0 %vm64_vm0, %v6790_v16  ;;  %3671 = vmatprep.mubr.msk.f32.mxu1 %vm64_vm0, %v6791_v17 }
  0xc4   :  { %3492 = vmatmul.mubr.msk.f32.gmra.mrb[26].mxu0 %vm64_vm0, %v6792_v38  ;;  %3672 = vmatmul.mubr.msk.f32.gmra.mrb[26].mxu1 %vm64_vm0, %v6793_v13 }
  0xc5   :  { %3494 = vmatprep.mubr.msk.f32.mxu0 %vm64_vm0, %v6794_v18  ;;  %3674 = vmatprep.mubr.msk.f32.mxu1 %vm64_vm0, %v6795_v20 }
  0xc8   :  { %3495 = vmatmul.mubr.msk.f32.gmra.mrb[28].mxu0 %vm64_vm0, %v4402_v37  ;;  %3675 = vmatmul.mubr.msk.f32.gmra.mrb[28].mxu1 %vm64_vm0, %v6796_v23 }
  0xc9   :  { %3497 = vmatprep.mubr.msk.f32.mxu0 %vm64_vm0, %v647_v21  ;;  %3677 = vmatprep.mubr.msk.f32.mxu1 %vm64_vm0, %v1670_v22 }
  0xcc   :  { %3498 = vmatmul.mubr.msk.f32.gmra.mrb[30].mxu0 %vm64_vm0, %v648_v24  ;;  %3678 = vmatmul.mubr.msk.f32.gmra.mrb[30].mxu1 %vm64_vm0, %v1671_v28 }
 0x163   :  { %v3454_v29 = vpop.f32.mrb[0].mxu0  ;;  %v3634_v30 = vpop.f32.mrb[0].mxu1 }
 0x164   :  { %1011 = vst.msk [vmem:[%s6728_s4 + $0x8] sm:$0xff] %vm1009_vm1, %v3454_v29  ;;  %2032 = vst.msk [vmem:[%s6728_s4 + $0x108] sm:$0xff] %vm1009_vm1, %v3634_v30  ;;  %v818_v31 = vpop.f32.mrb[1].mxu0  ;;  %v1840_v32 = vpop.f32.mrb[1].mxu1 }
 0x165   :  { %1010 = vst.msk [vmem:[%s6728_s4] sm:$0xff] %vm1009_vm1, %v818_v31  ;;  %2031 = vst.msk [vmem:[%s6728_s4 + $0x100] sm:$0xff] %vm1009_vm1, %v1840_v32 }
 0x167   :  { %v3457_v33 = vpop.f32.mrb[2].mxu0  ;;  %v3637_v34 = vpop.f32.mrb[2].mxu1 }
 0x168   :  { %1013 = vst.msk [vmem:[%s6728_s4 + $0x18] sm:$0xff] %vm1009_vm1, %v3457_v33  ;;  %2034 = vst.msk [vmem:[%s6728_s4 + $0x118] sm:$0xff] %vm1009_vm1, %v3637_v34  ;;  %v828_v35 = vpop.f32.mrb[3].mxu0  ;;  %v1850_v39 = vpop.f32.mrb[3].mxu1 }
 0x169   :  { %1012 = vst.msk [vmem:[%s6728_s4 + $0x10] sm:$0xff] %vm1009_vm1, %v828_v35  ;;  %2033 = vst.msk [vmem:[%s6728_s4 + $0x110] sm:$0xff] %vm1009_vm1, %v1850_v39 }
 0x16b   :  { %v4734_v40 = vld [vmem:[%s6728_s4 + $0x8] sm:$0xff]  ;;  %v3460_v41 = vpop.f32.mrb[4].mxu0  ;;  %v3640_v42 = vpop.f32.mrb[4].mxu1 }
 0x16c   :  { %v4739_v43 = vld [vmem:[%s6728_s4] sm:$0xff]  ;;  %1015 = vst.msk [vmem:[%s6728_s4 + $0x28] sm:$0xff] %vm1009_vm1, %v3460_v41  ;;  %2036 = vst.msk [vmem:[%s6728_s4 + $0x128] sm:$0xff] %vm1009_vm1, %v3640_v42  ;;  %v838_v44 = vpop.f32.mrb[5].mxu0  ;;  %v1860_v45 = vpop.f32.mrb[5].mxu1  ;;  %v2128_v46 = vsel %vm1009_vm1, %v4734_v40, 0.0 }
 0x16d   :  { %v2127_v47 = vsel %vm1009_vm1, %v4739_v43, 0.0  ;;  %1014 = vst.msk [vmem:[%s6728_s4 + $0x20] sm:$0xff] %vm1009_vm1, %v838_v44  ;;  %2035 = vst.msk [vmem:[%s6728_s4 + $0x120] sm:$0xff] %vm1009_vm1, %v1860_v45 }
 0x16e   :  { %v2129_v50 = vadd.f32 %v2128_v46, %v2127_v47 }
 0x16f   :  { %v3463_v48 = vpop.f32.mrb[6].mxu0  ;;  %v3643_v49 = vpop.f32.mrb[6].mxu1  ;;  %v4764_v51 = vld [vmem:[%s6728_s4 + $0x18] sm:$0xff] }
 0x170   :  { %v4769_v52 = vld [vmem:[%s6728_s4 + $0x10] sm:$0xff]  ;;  %1017 = vst.msk [vmem:[%s6728_s4 + $0x38] sm:$0xff] %vm1009_vm1, %v3463_v48  ;;  %2038 = vst.msk [vmem:[%s6728_s4 + $0x138] sm:$0xff] %vm1009_vm1, %v3643_v49  ;;  %v848_v53 = vpop.f32.mrb[7].mxu0  ;;  %v1870_v54 = vpop.f32.mrb[7].mxu1  ;;  %v2132_v57 = vsel %vm1009_vm1, %v4764_v51, 0.0 }
 0x171   :  { %v2130_v55 = vsel %vm1009_vm1, %v4769_v52, 0.0  ;;  %1016 = vst.msk [vmem:[%s6728_s4 + $0x30] sm:$0xff] %vm1009_vm1, %v848_v53  ;;  %2037 = vst.msk [vmem:[%s6728_s4 + $0x130] sm:$0xff] %vm1009_vm1, %v1870_v54 }
 0x172   :  { %v2131_v56 = vadd.f32 %v2130_v55, %v2129_v50 }
 0x173   :  { %v3466_v58 = vpop.f32.mrb[8].mxu0  ;;  %v3646_v59 = vpop.f32.mrb[8].mxu1  ;;  %v4794_v60 = vld [vmem:[%s6728_s4 + $0x28] sm:$0xff] }
 0x174   :  { %v4799_v61 = vld [vmem:[%s6728_s4 + $0x20] sm:$0xff]  ;;  %v2133_v62 = vadd.f32 %v2132_v57, %v2131_v56  ;;  %1019 = vst.msk [vmem:[%s6728_s4 + $0x48] sm:$0xff] %vm1009_vm1, %v3466_v58  ;;  %2040 = vst.msk [vmem:[%s6728_s4 + $0x148] sm:$0xff] %vm1009_vm1, %v3646_v59  ;;  %v858_v63 = vpop.f32.mrb[9].mxu0  ;;  %v1880_v0 = vpop.f32.mrb[9].mxu1  ;;  %v2136_v3 = vsel %vm1009_vm1, %v4794_v60, 0.0 }
 0x175   :  { %v2134_v1 = vsel %vm1009_vm1, %v4799_v61, 0.0  ;;  %1018 = vst.msk [vmem:[%s6728_s4 + $0x40] sm:$0xff] %vm1009_vm1, %v858_v63  ;;  %2039 = vst.msk [vmem:[%s6728_s4 + $0x140] sm:$0xff] %vm1009_vm1, %v1880_v0 }
 0x176   :  { %v2135_v2 = vadd.f32 %v2134_v1, %v2133_v62 }
 0x177   :  { %v3469_v4 = vpop.f32.mrb[10].mxu0  ;;  %v3649_v5 = vpop.f32.mrb[10].mxu1  ;;  %v4824_v6 = vld [vmem:[%s6728_s4 + $0x38] sm:$0xff] }
 0x178   :  { %v4829_v7 = vld [vmem:[%s6728_s4 + $0x30] sm:$0xff]  ;;  %v2137_v10 = vadd.f32 %v2136_v3, %v2135_v2  ;;  %1021 = vst.msk [vmem:[%s6728_s4 + $0x58] sm:$0xff] %vm1009_vm1, %v3469_v4  ;;  %2042 = vst.msk [vmem:[%s6728_s4 + $0x158] sm:$0xff] %vm1009_vm1, %v3649_v5  ;;  %v868_v11 = vpop.f32.mrb[11].mxu0  ;;  %v1890_v12 = vpop.f32.mrb[11].mxu1  ;;  %v2140_v25 = vsel %vm1009_vm1, %v4824_v6, 0.0 }
 0x179   :  { %v2138_v14 = vsel %vm1009_vm1, %v4829_v7, 0.0  ;;  %1020 = vst.msk [vmem:[%s6728_s4 + $0x50] sm:$0xff] %vm1009_vm1, %v868_v11  ;;  %2041 = vst.msk [vmem:[%s6728_s4 + $0x150] sm:$0xff] %vm1009_vm1, %v1890_v12 }
 0x17a   :  { %v2139_v19 = vadd.f32 %v2138_v14, %v2137_v10 }
 0x17b   :  { %v3472_v27 = vpop.f32.mrb[12].mxu0  ;;  %v3652_v36 = vpop.f32.mrb[12].mxu1  ;;  %v4854_v37 = vld [vmem:[%s6728_s4 + $0x48] sm:$0xff] }
 0x17c   :  { %v4859_v26 = vld [vmem:[%s6728_s4 + $0x40] sm:$0xff]  ;;  %v2141_v15 = vadd.f32 %v2140_v25, %v2139_v19  ;;  %1023 = vst.msk [vmem:[%s6728_s4 + $0x68] sm:$0xff] %vm1009_vm1, %v3472_v27  ;;  %2044 = vst.msk [vmem:[%s6728_s4 + $0x168] sm:$0xff] %vm1009_vm1, %v3652_v36  ;;  %v878_v8 = vpop.f32.mrb[13].mxu0  ;;  %v1900_v9 = vpop.f32.mrb[13].mxu1  ;;  %v2144_v38 = vsel %vm1009_vm1, %v4854_v37, 0.0 }
 0x17d   :  { %v2142_v16 = vsel %vm1009_vm1, %v4859_v26, 0.0  ;;  %1022 = vst.msk [vmem:[%s6728_s4 + $0x60] sm:$0xff] %vm1009_vm1, %v878_v8  ;;  %2043 = vst.msk [vmem:[%s6728_s4 + $0x160] sm:$0xff] %vm1009_vm1, %v1900_v9 }
 0x17e   :  { %v2143_v17 = vadd.f32 %v2142_v16, %v2141_v15 }
 0x17f   :  { %v3475_v13 = vpop.f32.mrb[14].mxu0  ;;  %v3655_v18 = vpop.f32.mrb[14].mxu1  ;;  %v4884_v20 = vld [vmem:[%s6728_s4 + $0x58] sm:$0xff] }
 0x180   :  { %v4889_v21 = vld [vmem:[%s6728_s4 + $0x50] sm:$0xff]  ;;  %v2145_v22 = vadd.f32 %v2144_v38, %v2143_v17  ;;  %1025 = vst.msk [vmem:[%s6728_s4 + $0x78] sm:$0xff] %vm1009_vm1, %v3475_v13  ;;  %2046 = vst.msk [vmem:[%s6728_s4 + $0x178] sm:$0xff] %vm1009_vm1, %v3655_v18  ;;  %v888_v23 = vpop.f32.mrb[15].mxu0  ;;  %v1910_v24 = vpop.f32.mrb[15].mxu1  ;;  %v2148_v30 = vsel %vm1009_vm1, %v4884_v20, 0.0 }
 0x181   :  { %v2146_v28 = vsel %vm1009_vm1, %v4889_v21, 0.0  ;;  %1024 = vst.msk [vmem:[%s6728_s4 + $0x70] sm:$0xff] %vm1009_vm1, %v888_v23  ;;  %2045 = vst.msk [vmem:[%s6728_s4 + $0x170] sm:$0xff] %vm1009_vm1, %v1910_v24 }
 0x182   :  { %v2147_v29 = vadd.f32 %v2146_v28, %v2145_v22 }
 0x183   :  { %v3478_v31 = vpop.f32.mrb[16].mxu0  ;;  %v3658_v32 = vpop.f32.mrb[16].mxu1  ;;  %v4914_v33 = vld [vmem:[%s6728_s4 + $0x68] sm:$0xff] }
 0x184   :  { %v4919_v34 = vld [vmem:[%s6728_s4 + $0x60] sm:$0xff]  ;;  %v2149_v35 = vadd.f32 %v2148_v30, %v2147_v29  ;;  %1027 = vst.msk [vmem:[%s6728_s4 + $0x88] sm:$0xff] %vm1009_vm1, %v3478_v31  ;;  %2048 = vst.msk [vmem:[%s6728_s4 + $0x188] sm:$0xff] %vm1009_vm1, %v3658_v32  ;;  %v898_v39 = vpop.f32.mrb[17].mxu0  ;;  %v1920_v41 = vpop.f32.mrb[17].mxu1  ;;  %v2152_v45 = vsel %vm1009_vm1, %v4914_v33, 0.0 }
 0x185   :  { %v2150_v42 = vsel %vm1009_vm1, %v4919_v34, 0.0  ;;  %1026 = vst.msk [vmem:[%s6728_s4 + $0x80] sm:$0xff] %vm1009_vm1, %v898_v39  ;;  %2047 = vst.msk [vmem:[%s6728_s4 + $0x180] sm:$0xff] %vm1009_vm1, %v1920_v41 }
 0x186   :  { %v2151_v44 = vadd.f32 %v2150_v42, %v2149_v35 }
 0x187   :  { %v3481_v46 = vpop.f32.mrb[18].mxu0  ;;  %v3661_v47 = vpop.f32.mrb[18].mxu1  ;;  %v4944_v48 = vld [vmem:[%s6728_s4 + $0x78] sm:$0xff] }
 0x188   :  { %v4949_v49 = vld [vmem:[%s6728_s4 + $0x70] sm:$0xff]  ;;  %v2153_v50 = vadd.f32 %v2152_v45, %v2151_v44  ;;  %1029 = vst.msk [vmem:[%s6728_s4 + $0x98] sm:$0xff] %vm1009_vm1, %v3481_v46  ;;  %2050 = vst.msk [vmem:[%s6728_s4 + $0x198] sm:$0xff] %vm1009_vm1, %v3661_v47  ;;  %v908_v53 = vpop.f32.mrb[19].mxu0  ;;  %v1930_v54 = vpop.f32.mrb[19].mxu1  ;;  %v2156_v57 = vsel %vm1009_vm1, %v4944_v48, 0.0 }
 0x189   :  { %v2154_v55 = vsel %vm1009_vm1, %v4949_v49, 0.0  ;;  %1028 = vst.msk [vmem:[%s6728_s4 + $0x90] sm:$0xff] %vm1009_vm1, %v908_v53  ;;  %2049 = vst.msk [vmem:[%s6728_s4 + $0x190] sm:$0xff] %vm1009_vm1, %v1930_v54 }
 0x18a   :  { %v2155_v56 = vadd.f32 %v2154_v55, %v2153_v50 }
 0x18b   :  { %v3484_v58 = vpop.f32.mrb[20].mxu0  ;;  %v3664_v59 = vpop.f32.mrb[20].mxu1  ;;  %v4974_v62 = vld [vmem:[%s6728_s4 + $0x88] sm:$0xff] }
 0x18c   :  { %v4979_v63 = vld [vmem:[%s6728_s4 + $0x80] sm:$0xff]  ;;  %v2157_v0 = vadd.f32 %v2156_v57, %v2155_v56  ;;  %1031 = vst.msk [vmem:[%s6728_s4 + $0xa8] sm:$0xff] %vm1009_vm1, %v3484_v58  ;;  %2052 = vst.msk [vmem:[%s6728_s4 + $0x1a8] sm:$0xff] %vm1009_vm1, %v3664_v59  ;;  %v918_v1 = vpop.f32.mrb[21].mxu0  ;;  %v1940_v2 = vpop.f32.mrb[21].mxu1  ;;  %v2160_v5 = vsel %vm1009_vm1, %v4974_v62, 0.0 }
 0x18d   :  { %v2158_v3 = vsel %vm1009_vm1, %v4979_v63, 0.0  ;;  %1030 = vst.msk [vmem:[%s6728_s4 + $0xa0] sm:$0xff] %vm1009_vm1, %v918_v1  ;;  %2051 = vst.msk [vmem:[%s6728_s4 + $0x1a0] sm:$0xff] %vm1009_vm1, %v1940_v2 }
 0x18e   :  { %v2159_v4 = vadd.f32 %v2158_v3, %v2157_v0 }
 0x18f   :  { %v3487_v10 = vpop.f32.mrb[22].mxu0  ;;  %v3667_v11 = vpop.f32.mrb[22].mxu1  ;;  %v5004_v12 = vld [vmem:[%s6728_s4 + $0x98] sm:$0xff] }
 0x190   :  { %v5009_v14 = vld [vmem:[%s6728_s4 + $0x90] sm:$0xff]  ;;  %v2161_v19 = vadd.f32 %v2160_v5, %v2159_v4  ;;  %1033 = vst.msk [vmem:[%s6728_s4 + $0xb8] sm:$0xff] %vm1009_vm1, %v3487_v10  ;;  %2054 = vst.msk [vmem:[%s6728_s4 + $0x1b8] sm:$0xff] %vm1009_vm1, %v3667_v11  ;;  %v928_v25 = vpop.f32.mrb[23].mxu0  ;;  %v1950_v27 = vpop.f32.mrb[23].mxu1  ;;  %v2164_v8 = vsel %vm1009_vm1, %v5004_v12, 0.0 }
 0x191   :  { %v2162_v36 = vsel %vm1009_vm1, %v5009_v14, 0.0  ;;  %1032 = vst.msk [vmem:[%s6728_s4 + $0xb0] sm:$0xff] %vm1009_vm1, %v928_v25  ;;  %2053 = vst.msk [vmem:[%s6728_s4 + $0x1b0] sm:$0xff] %vm1009_vm1, %v1950_v27 }
 0x192   :  { %v2163_v15 = vadd.f32 %v2162_v36, %v2161_v19 }
 0x193   :  { %v3490_v9 = vpop.f32.mrb[24].mxu0  ;;  %v3670_v16 = vpop.f32.mrb[24].mxu1  ;;  %v5034_v17 = vld [vmem:[%s6728_s4 + $0xa8] sm:$0xff] }
 0x194   :  { %v5039_v38 = vld [vmem:[%s6728_s4 + $0xa0] sm:$0xff]  ;;  %v2165_v13 = vadd.f32 %v2164_v8, %v2163_v15  ;;  %1035 = vst.msk [vmem:[%s6728_s4 + $0xc8] sm:$0xff] %vm1009_vm1, %v3490_v9  ;;  %2056 = vst.msk [vmem:[%s6728_s4 + $0x1c8] sm:$0xff] %vm1009_vm1, %v3670_v16  ;;  %v938_v18 = vpop.f32.mrb[25].mxu0  ;;  %v1960_v22 = vpop.f32.mrb[25].mxu1  ;;  %v2168_v28 = vsel %vm1009_vm1, %v5034_v17, 0.0 }
 0x195   :  { %v2166_v23 = vsel %vm1009_vm1, %v5039_v38, 0.0  ;;  %1034 = vst.msk [vmem:[%s6728_s4 + $0xc0] sm:$0xff] %vm1009_vm1, %v938_v18  ;;  %2055 = vst.msk [vmem:[%s6728_s4 + $0x1c0] sm:$0xff] %vm1009_vm1, %v1960_v22 }
 0x196   :  { %v2167_v24 = vadd.f32 %v2166_v23, %v2165_v13 }
 0x197   :  { %v3493_v29 = vpop.f32.mrb[26].mxu0  ;;  %v3673_v30 = vpop.f32.mrb[26].mxu1  ;;  %v5064_v31 = vld [vmem:[%s6728_s4 + $0xb8] sm:$0xff] }
 0x198   :  { %v5069_v32 = vld [vmem:[%s6728_s4 + $0xb0] sm:$0xff]  ;;  %v2169_v35 = vadd.f32 %v2168_v28, %v2167_v24  ;;  %1037 = vst.msk [vmem:[%s6728_s4 + $0xd8] sm:$0xff] %vm1009_vm1, %v3493_v29  ;;  %2058 = vst.msk [vmem:[%s6728_s4 + $0x1d8] sm:$0xff] %vm1009_vm1, %v3673_v30  ;;  %v948_v39 = vpop.f32.mrb[27].mxu0  ;;  %v1970_v41 = vpop.f32.mrb[27].mxu1  ;;  %v2172_v45 = vsel %vm1009_vm1, %v5064_v31, 0.0 }
 0x199   :  { %v2170_v42 = vsel %vm1009_vm1, %v5069_v32, 0.0  ;;  %1036 = vst.msk [vmem:[%s6728_s4 + $0xd0] sm:$0xff] %vm1009_vm1, %v948_v39  ;;  %2057 = vst.msk [vmem:[%s6728_s4 + $0x1d0] sm:$0xff] %vm1009_vm1, %v1970_v41  ;;  %v5180_v24 = vld [vmem:[%s6728_s4 + $0x100] sm:$0xff]  ;;  %v5187_v30 = vld [vmem:[%s6728_s4 + $0x108] sm:$0xff] }
 0x19a   :  { %v2171_v44 = vadd.f32 %v2170_v42, %v2169_v35  ;;  %v2190_v39 = vsel %vm1009_vm1, %v5180_v24, 0.0  ;;  %v5194_v41 = vld [vmem:[%s6728_s4 + $0x110] sm:$0xff] }
 0x19b   :  { %v3496_v46 = vpop.f32.mrb[28].mxu0  ;;  %v3676_v47 = vpop.f32.mrb[28].mxu1  ;;  %v5094_v50 = vld [vmem:[%s6728_s4 + $0xc8] sm:$0xff] }
 0x19c   :  { %v5099_v53 = vld [vmem:[%s6728_s4 + $0xc0] sm:$0xff]  ;;  %v2173_v54 = vadd.f32 %v2172_v45, %v2171_v44  ;;  %1039 = vst.msk [vmem:[%s6728_s4 + $0xe8] sm:$0xff] %vm1009_vm1, %v3496_v46  ;;  %2060 = vst.msk [vmem:[%s6728_s4 + $0x1e8] sm:$0xff] %vm1009_vm1, %v3676_v47  ;;  %v958_v55 = vpop.f32.mrb[29].mxu0  ;;  %v1980_v56 = vpop.f32.mrb[29].mxu1  ;;  %v2176_v59 = vsel %vm1009_vm1, %v5094_v50, 0.0 }
 0x19d   :  { %v2174_v57 = vsel %vm1009_vm1, %v5099_v53, 0.0  ;;  %1038 = vst.msk [vmem:[%s6728_s4 + $0xe0] sm:$0xff] %vm1009_vm1, %v958_v55  ;;  %2059 = vst.msk [vmem:[%s6728_s4 + $0x1e0] sm:$0xff] %vm1009_vm1, %v1980_v56  ;;  %v2192_v44 = vsel %vm1009_vm1, %v5187_v30, 0.0  ;;  %v5201_v45 = vld [vmem:[%s6728_s4 + $0x118] sm:$0xff]  ;;  %v2194_v47 = vsel %vm1009_vm1, %v5194_v41, 0.0 }
 0x19e   :  { %v2175_v58 = vadd.f32 %v2174_v57, %v2173_v54  ;;  %v5208_v54 = vld [vmem:[%s6728_s4 + $0x120] sm:$0xff]  ;;  %v2196_v56 = vsel %vm1009_vm1, %v5201_v45, 0.0  ;;  %v5215_v57 = vld [vmem:[%s6728_s4 + $0x128] sm:$0xff] }
 0x19f   :  { %v3499_v0 = vpop.f32.mrb[30].mxu0  ;;  %v3679_v1 = vpop.f32.mrb[30].mxu1  ;;  %v5124_v2 = vld [vmem:[%s6728_s4 + $0xd8] sm:$0xff] }
 0x1a0   :  { %v5129_v3 = vld [vmem:[%s6728_s4 + $0xd0] sm:$0xff]  ;;  %v2177_v4 = vadd.f32 %v2176_v59, %v2175_v58  ;;  %1041 = vst.msk [vmem:[%s6728_s4 + $0xf8] sm:$0xff] %vm1009_vm1, %v3499_v0  ;;  %2062 = vst.msk [vmem:[%s6728_s4 + $0x1f8] sm:$0xff] %vm1009_vm1, %v3679_v1  ;;  %v968_v5 = vpop.f32.mrb[31].mxu0  ;;  %v1990_v10 = vpop.f32.mrb[31].mxu1  ;;  %v2180_v25 = vsel %vm1009_vm1, %v5124_v2, 0.0 }
 0x1a1   :  { %v2178_v11 = vsel %vm1009_vm1, %v5129_v3, 0.0  ;;  %1040 = vst.msk [vmem:[%s6728_s4 + $0xf0] sm:$0xff] %vm1009_vm1, %v968_v5  ;;  %2061 = vst.msk [vmem:[%s6728_s4 + $0x1f0] sm:$0xff] %vm1009_vm1, %v1990_v10  ;;  %v2198_v59 = vsel %vm1009_vm1, %v5208_v54, 0.0  ;;  %v5222_v0 = vld [vmem:[%s6728_s4 + $0x130] sm:$0xff]  ;;  %v5229_v5 = vld [vmem:[%s6728_s4 + $0x138] sm:$0xff] }
 0x1a2   :  { %v2179_v19 = vadd.f32 %v2178_v11, %v2177_v4  ;;  %v2200_v4 = vsel %vm1009_vm1, %v5215_v57, 0.0  ;;  %v2202_v11 = vsel %vm1009_vm1, %v5222_v0, 0.0 }
 0x1a3   :  { %v5154_v27 = vld [vmem:[%s6728_s4 + $0xe8] sm:$0xff] }
 0x1a4   :  { %v5159_v36 = vld [vmem:[%s6728_s4 + $0xe0] sm:$0xff]  ;;  %v2181_v15 = vadd.f32 %v2180_v25, %v2179_v19  ;;  %v2184_v16 = vsel %vm1009_vm1, %v5154_v27, 0.0 }
 0x1a5   :  { %v2182_v8 = vsel %vm1009_vm1, %v5159_v36, 0.0  ;;  %v5236_v19 = vld [vmem:[%s6728_s4 + $0x140] sm:$0xff] }
 0x1a6   :  { %v2183_v9 = vadd.f32 %v2182_v8, %v2181_v15  ;;  %v2204_v15 = vsel %vm1009_vm1, %v5229_v5, 0.0  ;;  %v5243_v8 = vld [vmem:[%s6728_s4 + $0x148] sm:$0xff] }
 0x1a7   :  { %v5168_v13 = vld [vmem:[%s6728_s4 + $0xf8] sm:$0xff] }
 0x1a8   :  { %v5173_v18 = vld [vmem:[%s6728_s4 + $0xf0] sm:$0xff]  ;;  %v2185_v22 = vadd.f32 %v2184_v16, %v2183_v9  ;;  %v2188_v29 = vsel %vm1009_vm1, %v5168_v13, 0.0  ;;  %v2206_v16 = vsel %vm1009_vm1, %v5236_v19, 0.0 }
 0x1a9   :  { %v2186_v23 = vsel %vm1009_vm1, %v5173_v18, 0.0 }
 0x1aa   :  { %v2187_v28 = vadd.f32 %v2186_v23, %v2185_v22  ;;  %v5250_v22 = vld [vmem:[%s6728_s4 + $0x150] sm:$0xff] }
 0x1ac   :  { %v2189_v35 = vadd.f32 %v2188_v29, %v2187_v28  ;;  %v2208_v28 = vsel %vm1009_vm1, %v5243_v8, 0.0  ;;  %v5257_v29 = vld [vmem:[%s6728_s4 + $0x158] sm:$0xff] }
 0x1ae   :  { %v2191_v42 = vadd.f32 %v2190_v39, %v2189_v35  ;;  %v2210_v39 = vsel %vm1009_vm1, %v5250_v22, 0.0 }
 0x1b0   :  { %v2193_v46 = vadd.f32 %v2192_v44, %v2191_v42  ;;  %v5264_v42 = vld [vmem:[%s6728_s4 + $0x160] sm:$0xff] }
 0x1b2   :  { %v2195_v55 = vadd.f32 %v2194_v47, %v2193_v46  ;;  %v2212_v46 = vsel %vm1009_vm1, %v5257_v29, 0.0  ;;  %v5271_v47 = vld [vmem:[%s6728_s4 + $0x168] sm:$0xff] }
 0x1b4   :  { %v2197_v58 = vadd.f32 %v2196_v56, %v2195_v55  ;;  %v2214_v56 = vsel %vm1009_vm1, %v5264_v42, 0.0 }
 0x1b6   :  { %v2199_v1 = vadd.f32 %v2198_v59, %v2197_v58  ;;  %v5278_v58 = vld [vmem:[%s6728_s4 + $0x170] sm:$0xff] }
 0x1b8   :  { %v2201_v10 = vadd.f32 %v2200_v4, %v2199_v1  ;;  %v2216_v1 = vsel %vm1009_vm1, %v5271_v47, 0.0  ;;  %v5285_v4 = vld [vmem:[%s6728_s4 + $0x178] sm:$0xff] }
 0x1ba   :  { %v2203_v25 = vadd.f32 %v2202_v11, %v2201_v10  ;;  %v2218_v11 = vsel %vm1009_vm1, %v5278_v58, 0.0 }
 0x1bc   :  { %v2205_v9 = vadd.f32 %v2204_v15, %v2203_v25  ;;  %v5292_v25 = vld [vmem:[%s6728_s4 + $0x180] sm:$0xff] }
 0x1be   :  { %v2207_v23 = vadd.f32 %v2206_v16, %v2205_v9  ;;  %v2220_v9 = vsel %vm1009_vm1, %v5285_v4, 0.0  ;;  %v5299_v16 = vld [vmem:[%s6728_s4 + $0x188] sm:$0xff] }
 0x1bf   :  { %6797 = vst [vmem:[#allocation2_spill] sm:$0xff] %v5299_v16 }
 0x1c0   :  { %v2209_v35 = vadd.f32 %v2208_v28, %v2207_v23  ;;  %v2222_v28 = vsel %vm1009_vm1, %v5292_v25, 0.0 }
 0x1c2   :  { %v2211_v44 = vadd.f32 %v2210_v39, %v2209_v35  ;;  %v5306_v35 = vld [vmem:[%s6728_s4 + $0x190] sm:$0xff] }
 0x1c3   :  { %6798 = vst [vmem:[#allocation3_spill] sm:$0xff] %v5306_v35 }
 0x1c4   :  { %v2213_v55 = vadd.f32 %v2212_v46, %v2211_v44  ;;  %v2224_v44 = vsel %vm1009_vm1, %v5299_v16, 0.0  ;;  %v5313_v46 = vld [vmem:[%s6728_s4 + $0x198] sm:$0xff] }
 0x1c5   :  { %6799 = vst [vmem:[#allocation4_spill] sm:$0xff] %v5313_v46 }
 0x1c6   :  { %v2215_v59 = vadd.f32 %v2214_v56, %v2213_v55  ;;  %v2226_v56 = vsel %vm1009_vm1, %v5306_v35, 0.0 }
 0x1c8   :  { %v2217_v10 = vadd.f32 %v2216_v1, %v2215_v59  ;;  %v5320_v59 = vld [vmem:[%s6728_s4 + $0x1a0] sm:$0xff] }
 0x1c9   :  { %6800 = vst [vmem:[#allocation5_spill] sm:$0xff] %v5320_v59 }
 0x1ca   :  { %v2219_v15 = vadd.f32 %v2218_v11, %v2217_v10  ;;  %v2228_v10 = vsel %vm1009_vm1, %v5313_v46, 0.0  ;;  %v5327_v11 = vld [vmem:[%s6728_s4 + $0x1a8] sm:$0xff] }
 0x1cb   :  { %6801 = vst [vmem:[#allocation6_spill] sm:$0xff] %v5327_v11 }
 0x1cc   :  { %v2221_v23 = vadd.f32 %v2220_v9, %v2219_v15  ;;  %v2230_v9 = vsel %vm1009_vm1, %v5320_v59, 0.0 }
 0x1ce   :  { %v2223_v39 = vadd.f32 %v2222_v28, %v2221_v23  ;;  %v5334_v23 = vld [vmem:[%s6728_s4 + $0x1b0] sm:$0xff] }
 0x1cf   :  { %6802 = vst [vmem:[#allocation7_spill] sm:$0xff] %v5334_v23 }
 0x1d0   :  { %v2225_v55 = vadd.f32 %v2224_v44, %v2223_v39  ;;  %v2232_v39 = vsel %vm1009_vm1, %v5327_v11, 0.0  ;;  %v5341_v44 = vld [vmem:[%s6728_s4 + $0x1b8] sm:$0xff] }
 0x1d1   :  { %6803 = vst [vmem:[#allocation8_spill] sm:$0xff] %v5341_v44 }
 0x1d2   :  { %v2227_v1 = vadd.f32 %v2226_v56, %v2225_v55  ;;  %v2234_v56 = vsel %vm1009_vm1, %v5334_v23, 0.0 }
 0x1d4   :  { %v2229_v15 = vadd.f32 %v2228_v10, %v2227_v1  ;;  %v5348_v1 = vld [vmem:[%s6728_s4 + $0x1c0] sm:$0xff] }
 0x1d5   :  { %6804 = vst [vmem:[#allocation9_spill] sm:$0xff] %v5348_v1 }
 0x1d6   :  { %v2231_v28 = vadd.f32 %v2230_v9, %v2229_v15  ;;  %v2236_v15 = vsel %vm1009_vm1, %v5341_v44, 0.0  ;;  %v5355_v9 = vld [vmem:[%s6728_s4 + $0x1c8] sm:$0xff] }
 0x1d7   :  { %6805 = vst [vmem:[#allocation10_spill] sm:$0xff] %v5355_v9 }
 0x1d8   :  { %v2233_v55 = vadd.f32 %v2232_v39, %v2231_v28  ;;  %v2238_v28 = vsel %vm1009_vm1, %v5348_v1, 0.0  ;;  %v5362_v39 = vld [vmem:[%s6728_s4 + $0x1d0] sm:$0xff] }
 0x1d9   :  { %6806 = vst [vmem:[#allocation11_spill] sm:$0xff] %v5362_v39 }
 0x1da   :  { %v2235_v10 = vadd.f32 %v2234_v56, %v2233_v55  ;;  %v2240_v55 = vsel %vm1009_vm1, %v5355_v9, 0.0  ;;  %v5369_v56 = vld [vmem:[%s6728_s4 + $0x1d8] sm:$0xff] }
 0x1db   :  { %6807 = vst [vmem:[#allocation12_spill] sm:$0xff] %v5369_v56 }
 0x1dc   :  { %v2237_v11 = vadd.f32 %v2236_v15, %v2235_v10  ;;  %v2242_v10 = vsel %vm1009_vm1, %v5362_v39, 0.0  ;;  %v5376_v15 = vld [vmem:[%s6728_s4 + $0x1e0] sm:$0xff] }
 0x1dd   :  { %6808 = vst [vmem:[#allocation13_spill] sm:$0xff] %v5376_v15 }
 0x1de   :  { %v2239_v23 = vadd.f32 %v2238_v28, %v2237_v11  ;;  %v2244_v11 = vsel %vm1009_vm1, %v5369_v56, 0.0  ;;  %v5383_v28 = vld [vmem:[%s6728_s4 + $0x1e8] sm:$0xff] }
 0x1df   :  { %6809 = vst [vmem:[#allocation14_spill] sm:$0xff] %v5383_v28 }
 0x1e0   :  { %v2241_v44 = vadd.f32 %v2240_v55, %v2239_v23  ;;  %v2246_v23 = vsel %vm1009_vm1, %v5376_v15, 0.0  ;;  %v5390_v55 = vld [vmem:[%s6728_s4 + $0x1f0] sm:$0xff] }
 0x1e2   :  { %v2243_v1 = vadd.f32 %v2242_v10, %v2241_v44  ;;  %v2248_v44 = vsel %vm1009_vm1, %v5383_v28, 0.0  ;;  %v5397_v10 = vld [vmem:[%s6728_s4 + $0x1f8] sm:$0xff] }
 0x1e3   :  { %v2252_v15 = vsel %vm1009_vm1, %v5397_v10, 0.0 }
 0x1e4   :  { %v2245_v9 = vadd.f32 %v2244_v11, %v2243_v1  ;;  %v2250_v1 = vsel %vm1009_vm1, %v5390_v55, 0.0 }
 0x1e6   :  { %v2247_v39 = vadd.f32 %v2246_v23, %v2245_v9 }
 0x1e8   :  { %v2249_v56 = vadd.f32 %v2248_v44, %v2247_v39 }
 0x1ea   :  { %v2251_v11 = vadd.f32 %v2250_v1, %v2249_v56 }
 0x1ec   :  { %v2253_v59 = vadd.f32 %v2252_v15, %v2251_v11 }
 0x1ee   :  { %v2254_v46 = vrot.slane %v2253_v59, 4 }
 0x1f0   :  { %v2255_v35 = vadd.f32 %v2254_v46, %v2253_v59 }
 0x1f2   :  { %v2256_v9 = vrot.slane %v2255_v35, 2 }
 0x1f4   :  { %v2257_v23 = vadd.f32 %v2256_v9, %v2255_v35  ;;  %v2290_v35 = vlaneseq }
 0x1f6   :  { %v2258_v16 = vrot.slane %v2257_v23, 1  ;;  %v2291_v59 = vshrl.u32 %v2290_v35, 7 }
 0x1f8   :  { %v2259_v28 = vadd.f32 %v2258_v16, %v2257_v23 }
 0x1fa   :  { %2269 = vrot.lane.b32.xlu1 %v2259_v28, %s3888_s0  ;;  %2261 = vrot.lane.b32.xlu0 %v2259_v28, %s3889_s16 }
 0x1fe   :  { %2265 = vrot.lane.b32.xlu0 %v2259_v28, %s3890_s17 }
 0x26c   :  { %v2262_v39 = vpop.permute.xlu0 %2261  ;;  %v2270_v15 = vpop.permute.xlu1 %2269 }
 0x26d   :  { %v2264_v56 = vadd.f32 %v2262_v39, %v2259_v28 }
 0x270   :  { %v2266_v44 = vpop.permute.xlu0 %2265 }
 0x271   :  { %v2268_v1 = vadd.f32 %v2266_v44, %v2264_v56  ;;  %v5411_v56 = vsub.s32 0, %v2291_v59 }
 0x273   :  { %v2272_v11 = vadd.f32 %v2270_v15, %v2268_v1 }
 0x275   :  { %v2273_v46 = vmul.f32 0.00048828125, %v2272_v11 }
 0x277   :  { %2278 = vrot.lane.b32.xlu0 %v2273_v46, %s3891_s18  ;;  %2275 = vrot.lane.b32.xlu1 %v2273_v46, %s3892_s19 }
 0x27b   :  { %2281 = vrot.lane.b32.xlu1 %v2273_v46, %s3893_s20 }
 0x2e9   :  { %v2276_v16 = vpop.permute.xlu1 %2275  ;;  %v2279_v9 = vpop.permute.xlu0 %2278 }
 0x2ea   :  { %v2285_v28 = vsel %vm2284_vm2, %v2273_v46, %v2276_v16 }
 0x2eb   :  { %v2287_v39 = vsel %vm2286_vm3, %v2285_v28, %v2279_v9 }
 0x2ed   :  { %v2282_v23 = vpop.permute.xlu1 %2281 }
 0x2ee   :  { %v2289_v44 = vsel %vm2288_vm4, %v2287_v39, %v2282_v23 }
 0x2ef   :  { %v5415_v1 = vrot.slane %v2289_v44, %v5411_v56 }
 0x2f1   :  { %v5419_v15 = vsub.f32 %v4739_v43, %v5415_v1  ;;  %v5423_v11 = vsub.f32 %v4734_v40, %v5415_v1  ;;  %v5427_v46 = vsub.f32 %v4769_v52, %v5415_v1  ;;  %v5431_v16 = vsub.f32 %v4764_v51, %v5415_v1 }
 0x2f2   :  { %v5439_v43 = vsub.f32 %v4799_v61, %v5415_v1  ;;  %v5445_v52 = vsub.f32 %v4794_v60, %v5415_v1  ;;  %v5453_v39 = vsub.f32 %v4829_v7, %v5415_v1  ;;  %v5460_v60 = vsub.f32 %v4824_v6, %v5415_v1 }
 0x2f3   :  { %6810 = vst [vmem:[#allocation15_spill] sm:$0xff] %v5427_v46  ;;  %v2358_v35 = vmul.f32 %v5419_v15, %v5419_v15  ;;  %v2359_v59 = vmul.f32 %v5423_v11, %v5423_v11  ;;  %v2360_v40 = vmul.f32 %v5427_v46, %v5427_v46  ;;  %v2361_v51 = vmul.f32 %v5431_v16, %v5431_v16 }
 0x2f4   :  { %v2362_v61 = vmul.f32 %v5439_v43, %v5439_v43  ;;  %v5467_v7 = vsub.f32 %v4859_v26, %v5415_v1  ;;  %v5474_v6 = vsub.f32 %v4854_v37, %v5415_v1  ;;  %v5481_v26 = vsub.f32 %v4889_v21, %v5415_v1 }
 0x2f5   :  { %v2422_v9 = vsel %vm1009_vm1, %v2358_v35, 0.0  ;;  %v2423_v28 = vsel %vm1009_vm1, %v2359_v59, 0.0  ;;  %v2425_v44 = vsel %vm1009_vm1, %v2360_v40, 0.0  ;;  %v2363_v35 = vmul.f32 %v5445_v52, %v5445_v52 }
 0x2f6   :  { %v2424_v23 = vadd.f32 %v2423_v28, %v2422_v9  ;;  %v2427_v59 = vsel %vm1009_vm1, %v2361_v51, 0.0  ;;  %v2364_v28 = vmul.f32 %v5453_v39, %v5453_v39  ;;  %v2429_v40 = vsel %vm1009_vm1, %v2362_v61, 0.0 }
 0x2f7   :  { %v2431_v51 = vsel %vm1009_vm1, %v2363_v35, 0.0  ;;  %v5488_v37 = vsub.f32 %v4884_v20, %v5415_v1  ;;  %v5495_v21 = vsub.f32 %v4919_v34, %v5415_v1  ;;  %v5502_v20 = vsub.f32 %v4914_v33, %v5415_v1 }
 0x2f8   :  { %v2426_v46 = vadd.f32 %v2425_v44, %v2424_v23  ;;  %v2365_v44 = vmul.f32 %v5460_v60, %v5460_v60  ;;  %v2433_v61 = vsel %vm1009_vm1, %v2364_v28, 0.0  ;;  %v5509_v34 = vsub.f32 %v4949_v49, %v5415_v1 }
 0x2f9   :  { %v5516_v33 = vsub.f32 %v4944_v48, %v5415_v1  ;;  %v5523_v49 = vsub.f32 %v4979_v63, %v5415_v1  ;;  %v5530_v48 = vsub.f32 %v4974_v62, %v5415_v1  ;;  %v5537_v63 = vsub.f32 %v5009_v14, %v5415_v1 }
 0x2fa   :  { %v2428_v9 = vadd.f32 %v2427_v59, %v2426_v46  ;;  %v2366_v59 = vmul.f32 %v5467_v7, %v5467_v7  ;;  %v2435_v35 = vsel %vm1009_vm1, %v2365_v44, 0.0  ;;  %v5544_v62 = vsub.f32 %v5004_v12, %v5415_v1 }
 0x2fb   :  { %v5551_v14 = vsub.f32 %v5039_v38, %v5415_v1  ;;  %v5558_v12 = vsub.f32 %v5034_v17, %v5415_v1  ;;  %v5565_v38 = vsub.f32 %v5069_v32, %v5415_v1  ;;  %v5572_v17 = vsub.f32 %v5064_v31, %v5415_v1 }
 0x2fc   :  { %v2430_v23 = vadd.f32 %v2429_v40, %v2428_v9  ;;  %v2367_v40 = vmul.f32 %v5474_v6, %v5474_v6  ;;  %v2437_v28 = vsel %vm1009_vm1, %v2366_v59, 0.0  ;;  %v5579_v32 = vsub.f32 %v5099_v53, %v5415_v1 }
 0x2fd   :  { %v5586_v31 = vsub.f32 %v5094_v50, %v5415_v1  ;;  %v5593_v53 = vsub.f32 %v5129_v3, %v5415_v1  ;;  %v5600_v50 = vsub.f32 %v5124_v2, %v5415_v1  ;;  %v5607_v3 = vsub.f32 %v5159_v36, %v5415_v1 }
 0x2fe   :  { %v2432_v46 = vadd.f32 %v2431_v51, %v2430_v23  ;;  %v2368_v51 = vmul.f32 %v5481_v26, %v5481_v26  ;;  %v2439_v44 = vsel %vm1009_vm1, %v2367_v40, 0.0  ;;  %v5614_v2 = vsub.f32 %v5154_v27, %v5415_v1 }
 0x2ff   :  { %v5621_v36 = vsub.f32 %v5173_v18, %v5415_v1  ;;  %v5628_v27 = vsub.f32 %v5168_v13, %v5415_v1  ;;  %v5635_v18 = vsub.f32 %v5180_v24, %v5415_v1  ;;  %v5642_v13 = vsub.f32 %v5187_v30, %v5415_v1 }
 0x300   :  { %v2434_v9 = vadd.f32 %v2433_v61, %v2432_v46  ;;  %v2369_v61 = vmul.f32 %v5488_v37, %v5488_v37  ;;  %v2441_v59 = vsel %vm1009_vm1, %v2368_v51, 0.0  ;;  %v5649_v24 = vsub.f32 %v5194_v41, %v5415_v1 }
 0x301   :  { %v5656_v30 = vsub.f32 %v5201_v45, %v5415_v1  ;;  %v5663_v41 = vsub.f32 %v5208_v54, %v5415_v1  ;;  %v5670_v45 = vsub.f32 %v5215_v57, %v5415_v1  ;;  %v5677_v54 = vsub.f32 %v5222_v0, %v5415_v1 }
 0x302   :  { %v2436_v23 = vadd.f32 %v2435_v35, %v2434_v9  ;;  %v2370_v35 = vmul.f32 %v5495_v21, %v5495_v21  ;;  %v2443_v40 = vsel %vm1009_vm1, %v2369_v61, 0.0  ;;  %v5684_v57 = vsub.f32 %v5229_v5, %v5415_v1 }
 0x303   :  { %v5691_v0 = vsub.f32 %v5236_v19, %v5415_v1  ;;  %v5698_v5 = vsub.f32 %v5243_v8, %v5415_v1  ;;  %v5705_v19 = vsub.f32 %v5250_v22, %v5415_v1  ;;  %v5712_v8 = vsub.f32 %v5257_v29, %v5415_v1 }
 0x304   :  { %v2438_v46 = vadd.f32 %v2437_v28, %v2436_v23  ;;  %v2371_v28 = vmul.f32 %v5502_v20, %v5502_v20  ;;  %v2445_v51 = vsel %vm1009_vm1, %v2370_v35, 0.0  ;;  %v5719_v22 = vsub.f32 %v5264_v42, %v5415_v1 }
 0x305   :  { %v5726_v29 = vsub.f32 %v5271_v47, %v5415_v1  ;;  %v5733_v42 = vsub.f32 %v5278_v58, %v5415_v1  ;;  %v5740_v47 = vsub.f32 %v5285_v4, %v5415_v1  ;;  %v5747_v58 = vsub.f32 %v5292_v25, %v5415_v1 }
 0x306   :  { %v2440_v9 = vadd.f32 %v2439_v44, %v2438_v46  ;;  %v2372_v44 = vmul.f32 %v5509_v34, %v5509_v34  ;;  %v2447_v61 = vsel %vm1009_vm1, %v2371_v28, 0.0  ;;  %6811 = vst [vmem:[#allocation16_spill] sm:$0xff] %v5719_v22 }
 0x307   :  { %6812 = vst [vmem:[#allocation17_spill] sm:$0xff] %v5726_v29  ;;  %6813 = vst [vmem:[#allocation18_spill] sm:$0xff] %v5733_v42 }
 0x308   :  { %v2442_v23 = vadd.f32 %v2441_v59, %v2440_v9  ;;  %v2373_v59 = vmul.f32 %v5516_v33, %v5516_v33  ;;  %v2449_v35 = vsel %vm1009_vm1, %v2372_v44, 0.0  ;;  %6814 = vst [vmem:[#allocation19_spill] sm:$0xff] %v5740_v47  ;;  %6815 = vst [vmem:[#allocation20_spill] sm:$0xff] %v5747_v58 }
 0x30a   :  { %v2444_v46 = vadd.f32 %v2443_v40, %v2442_v23  ;;  %v2374_v40 = vmul.f32 %v5523_v49, %v5523_v49  ;;  %v2451_v28 = vsel %vm1009_vm1, %v2373_v59, 0.0 }
 0x30c   :  { %v2446_v9 = vadd.f32 %v2445_v51, %v2444_v46  ;;  %v2375_v51 = vmul.f32 %v5530_v48, %v5530_v48  ;;  %v2453_v44 = vsel %vm1009_vm1, %v2374_v40, 0.0 }
 0x30e   :  { %v2448_v23 = vadd.f32 %v2447_v61, %v2446_v9  ;;  %v2376_v61 = vmul.f32 %v5537_v63, %v5537_v63  ;;  %v2455_v59 = vsel %vm1009_vm1, %v2375_v51, 0.0 }
 0x310   :  { %v2450_v46 = vadd.f32 %v2449_v35, %v2448_v23  ;;  %v2377_v35 = vmul.f32 %v5544_v62, %v5544_v62  ;;  %v2457_v40 = vsel %vm1009_vm1, %v2376_v61, 0.0 }
 0x312   :  { %v2452_v9 = vadd.f32 %v2451_v28, %v2450_v46  ;;  %v2378_v28 = vmul.f32 %v5551_v14, %v5551_v14  ;;  %v2459_v51 = vsel %vm1009_vm1, %v2377_v35, 0.0 }
 0x314   :  { %v2454_v23 = vadd.f32 %v2453_v44, %v2452_v9  ;;  %v2379_v44 = vmul.f32 %v5558_v12, %v5558_v12  ;;  %v2461_v61 = vsel %vm1009_vm1, %v2378_v28, 0.0 }
 0x316   :  { %v2456_v46 = vadd.f32 %v2455_v59, %v2454_v23  ;;  %v2380_v59 = vmul.f32 %v5565_v38, %v5565_v38  ;;  %v2463_v35 = vsel %vm1009_vm1, %v2379_v44, 0.0 }
 0x318   :  { %v2458_v9 = vadd.f32 %v2457_v40, %v2456_v46  ;;  %v2381_v40 = vmul.f32 %v5572_v17, %v5572_v17  ;;  %v2465_v28 = vsel %vm1009_vm1, %v2380_v59, 0.0 }
 0x31a   :  { %v2460_v23 = vadd.f32 %v2459_v51, %v2458_v9  ;;  %v2382_v51 = vmul.f32 %v5579_v32, %v5579_v32  ;;  %v2467_v44 = vsel %vm1009_vm1, %v2381_v40, 0.0 }
 0x31c   :  { %v2462_v46 = vadd.f32 %v2461_v61, %v2460_v23  ;;  %v2383_v61 = vmul.f32 %v5586_v31, %v5586_v31  ;;  %v2469_v59 = vsel %vm1009_vm1, %v2382_v51, 0.0 }
 0x31e   :  { %v2464_v9 = vadd.f32 %v2463_v35, %v2462_v46  ;;  %v2384_v35 = vmul.f32 %v5593_v53, %v5593_v53  ;;  %v2471_v40 = vsel %vm1009_vm1, %v2383_v61, 0.0 }
 0x320   :  { %v2466_v23 = vadd.f32 %v2465_v28, %v2464_v9  ;;  %v2385_v28 = vmul.f32 %v5600_v50, %v5600_v50  ;;  %v2473_v51 = vsel %vm1009_vm1, %v2384_v35, 0.0 }
 0x322   :  { %v2468_v46 = vadd.f32 %v2467_v44, %v2466_v23  ;;  %v2386_v44 = vmul.f32 %v5607_v3, %v5607_v3  ;;  %v2475_v61 = vsel %vm1009_vm1, %v2385_v28, 0.0 }
 0x324   :  { %v2470_v9 = vadd.f32 %v2469_v59, %v2468_v46  ;;  %v2387_v59 = vmul.f32 %v5614_v2, %v5614_v2  ;;  %v2477_v35 = vsel %vm1009_vm1, %v2386_v44, 0.0 }
 0x326   :  { %v2472_v23 = vadd.f32 %v2471_v40, %v2470_v9  ;;  %v2388_v40 = vmul.f32 %v5621_v36, %v5621_v36  ;;  %v2479_v28 = vsel %vm1009_vm1, %v2387_v59, 0.0 }
 0x328   :  { %v2474_v46 = vadd.f32 %v2473_v51, %v2472_v23  ;;  %v2389_v51 = vmul.f32 %v5628_v27, %v5628_v27  ;;  %v2481_v44 = vsel %vm1009_vm1, %v2388_v40, 0.0 }
 0x32a   :  { %v2476_v9 = vadd.f32 %v2475_v61, %v2474_v46  ;;  %v2390_v61 = vmul.f32 %v5635_v18, %v5635_v18  ;;  %v2483_v59 = vsel %vm1009_vm1, %v2389_v51, 0.0 }
 0x32c   :  { %v2478_v23 = vadd.f32 %v2477_v35, %v2476_v9  ;;  %v2391_v35 = vmul.f32 %v5642_v13, %v5642_v13  ;;  %v2485_v40 = vsel %vm1009_vm1, %v2390_v61, 0.0 }
 0x32e   :  { %v2480_v46 = vadd.f32 %v2479_v28, %v2478_v23  ;;  %v2392_v28 = vmul.f32 %v5649_v24, %v5649_v24  ;;  %v2487_v51 = vsel %vm1009_vm1, %v2391_v35, 0.0 }
 0x330   :  { %v2482_v9 = vadd.f32 %v2481_v44, %v2480_v46  ;;  %v2393_v44 = vmul.f32 %v5656_v30, %v5656_v30  ;;  %v2489_v61 = vsel %vm1009_vm1, %v2392_v28, 0.0 }
 0x332   :  { %v2484_v23 = vadd.f32 %v2483_v59, %v2482_v9  ;;  %v2394_v59 = vmul.f32 %v5663_v41, %v5663_v41  ;;  %v2491_v35 = vsel %vm1009_vm1, %v2393_v44, 0.0 }
 0x334   :  { %v2486_v46 = vadd.f32 %v2485_v40, %v2484_v23  ;;  %v2395_v40 = vmul.f32 %v5670_v45, %v5670_v45  ;;  %v2493_v28 = vsel %vm1009_vm1, %v2394_v59, 0.0 }
 0x336   :  { %v2488_v9 = vadd.f32 %v2487_v51, %v2486_v46  ;;  %v2396_v51 = vmul.f32 %v5677_v54, %v5677_v54  ;;  %v2495_v44 = vsel %vm1009_vm1, %v2395_v40, 0.0 }
 0x338   :  { %v2490_v23 = vadd.f32 %v2489_v61, %v2488_v9  ;;  %v2397_v61 = vmul.f32 %v5684_v57, %v5684_v57  ;;  %v2497_v59 = vsel %vm1009_vm1, %v2396_v51, 0.0 }
 0x33a   :  { %v2492_v46 = vadd.f32 %v2491_v35, %v2490_v23  ;;  %v2398_v35 = vmul.f32 %v5691_v0, %v5691_v0  ;;  %v2499_v40 = vsel %vm1009_vm1, %v2397_v61, 0.0 }
 0x33c   :  { %v2494_v9 = vadd.f32 %v2493_v28, %v2492_v46  ;;  %v2399_v28 = vmul.f32 %v5698_v5, %v5698_v5  ;;  %v2501_v51 = vsel %vm1009_vm1, %v2398_v35, 0.0 }
 0x33e   :  { %v2496_v23 = vadd.f32 %v2495_v44, %v2494_v9  ;;  %v2400_v44 = vmul.f32 %v5705_v19, %v5705_v19  ;;  %v2503_v61 = vsel %vm1009_vm1, %v2399_v28, 0.0 }
 0x340   :  { %v2498_v46 = vadd.f32 %v2497_v59, %v2496_v23  ;;  %v2401_v59 = vmul.f32 %v5712_v8, %v5712_v8  ;;  %v2505_v35 = vsel %vm1009_vm1, %v2400_v44, 0.0 }
 0x342   :  { %v2500_v9 = vadd.f32 %v2499_v40, %v2498_v46  ;;  %v2402_v40 = vmul.f32 %v5719_v22, %v5719_v22  ;;  %v2507_v28 = vsel %vm1009_vm1, %v2401_v59, 0.0 }
 0x344   :  { %v2502_v23 = vadd.f32 %v2501_v51, %v2500_v9  ;;  %v2403_v51 = vmul.f32 %v5726_v29, %v5726_v29  ;;  %v2509_v44 = vsel %vm1009_vm1, %v2402_v40, 0.0  ;;  %v2405_v29 = vmul.f32 %v5740_v47, %v5740_v47 }
 0x346   :  { %v2504_v46 = vadd.f32 %v2503_v61, %v2502_v23  ;;  %v2404_v61 = vmul.f32 %v5733_v42, %v5733_v42  ;;  %v2511_v59 = vsel %vm1009_vm1, %v2403_v51, 0.0  ;;  %v2406_v42 = vmul.f32 %v5747_v58, %v5747_v58 }
 0x347   :  { %v2515_v51 = vsel %vm1009_vm1, %v2405_v29, 0.0 }
 0x348   :  { %v2506_v9 = vadd.f32 %v2505_v35, %v2504_v46  ;;  %v6816_v35 = vld [vmem:[#allocation2_spill] sm:$0xff]  ;;  %v2513_v40 = vsel %vm1009_vm1, %v2404_v61, 0.0  ;;  %v2517_v61 = vsel %vm1009_vm1, %v2406_v42, 0.0 }
 0x349   :  { %v5754_v4 = vsub.f32 %v6816_v35, %v5415_v1 }
 0x34a   :  { %v2508_v23 = vadd.f32 %v2507_v28, %v2506_v9  ;;  %v6818_v28 = vld [vmem:[#allocation3_spill] sm:$0xff] }
 0x34b   :  { %6817 = vst [vmem:[#allocation2_spill] sm:$0xff] %v5754_v4  ;;  %v5761_v25 = vsub.f32 %v6818_v28, %v5415_v1  ;;  %v2407_v47 = vmul.f32 %v5754_v4, %v5754_v4 }
 0x34c   :  { %v2510_v46 = vadd.f32 %v2509_v44, %v2508_v23  ;;  %v6820_v44 = vld [vmem:[#allocation4_spill] sm:$0xff] }
 0x34d   :  { %6819 = vst [vmem:[#allocation3_spill] sm:$0xff] %v5761_v25  ;;  %v5768_v35 = vsub.f32 %v6820_v44, %v5415_v1  ;;  %v2408_v58 = vmul.f32 %v5761_v25, %v5761_v25  ;;  %v2519_v29 = vsel %vm1009_vm1, %v2407_v47, 0.0 }
 0x34e   :  { %v2512_v9 = vadd.f32 %v2511_v59, %v2510_v46  ;;  %v6822_v59 = vld [vmem:[#allocation5_spill] sm:$0xff] }
 0x34f   :  { %6821 = vst [vmem:[#allocation4_spill] sm:$0xff] %v5768_v35  ;;  %v5775_v28 = vsub.f32 %v6822_v59, %v5415_v1  ;;  %v2409_v4 = vmul.f32 %v5768_v35, %v5768_v35  ;;  %v2521_v42 = vsel %vm1009_vm1, %v2408_v58, 0.0 }
 0x350   :  { %v2514_v23 = vadd.f32 %v2513_v40, %v2512_v9  ;;  %v6824_v40 = vld [vmem:[#allocation6_spill] sm:$0xff] }
 0x351   :  { %6823 = vst [vmem:[#allocation5_spill] sm:$0xff] %v5775_v28  ;;  %v5782_v44 = vsub.f32 %v6824_v40, %v5415_v1  ;;  %v2410_v25 = vmul.f32 %v5775_v28, %v5775_v28  ;;  %v2523_v47 = vsel %vm1009_vm1, %v2409_v4, 0.0 }
 0x352   :  { %v2516_v46 = vadd.f32 %v2515_v51, %v2514_v23  ;;  %v6826_v51 = vld [vmem:[#allocation7_spill] sm:$0xff] }
 0x353   :  { %6825 = vst [vmem:[#allocation6_spill] sm:$0xff] %v5782_v44  ;;  %v5789_v59 = vsub.f32 %v6826_v51, %v5415_v1  ;;  %v2411_v35 = vmul.f32 %v5782_v44, %v5782_v44  ;;  %v2525_v58 = vsel %vm1009_vm1, %v2410_v25, 0.0 }
 0x354   :  { %v2518_v9 = vadd.f32 %v2517_v61, %v2516_v46  ;;  %v6828_v61 = vld [vmem:[#allocation8_spill] sm:$0xff] }
 0x355   :  { %6827 = vst [vmem:[#allocation7_spill] sm:$0xff] %v5789_v59  ;;  %v5796_v40 = vsub.f32 %v6828_v61, %v5415_v1  ;;  %v2412_v28 = vmul.f32 %v5789_v59, %v5789_v59  ;;  %v2527_v4 = vsel %vm1009_vm1, %v2411_v35, 0.0 }
 0x356   :  { %v2520_v23 = vadd.f32 %v2519_v29, %v2518_v9  ;;  %v6830_v29 = vld [vmem:[#allocation9_spill] sm:$0xff] }
 0x357   :  { %6829 = vst [vmem:[#allocation8_spill] sm:$0xff] %v5796_v40  ;;  %v5803_v51 = vsub.f32 %v6830_v29, %v5415_v1  ;;  %v2413_v44 = vmul.f32 %v5796_v40, %v5796_v40  ;;  %v2529_v25 = vsel %vm1009_vm1, %v2412_v28, 0.0 }
 0x358   :  { %v2522_v46 = vadd.f32 %v2521_v42, %v2520_v23  ;;  %v6832_v42 = vld [vmem:[#allocation10_spill] sm:$0xff] }
 0x359   :  { %6831 = vst [vmem:[#allocation9_spill] sm:$0xff] %v5803_v51  ;;  %v5810_v61 = vsub.f32 %v6832_v42, %v5415_v1  ;;  %v2414_v59 = vmul.f32 %v5803_v51, %v5803_v51  ;;  %v2531_v35 = vsel %vm1009_vm1, %v2413_v44, 0.0 }
 0x35a   :  { %v2524_v9 = vadd.f32 %v2523_v47, %v2522_v46  ;;  %v6834_v47 = vld [vmem:[#allocation11_spill] sm:$0xff] }
 0x35b   :  { %6833 = vst [vmem:[#allocation10_spill] sm:$0xff] %v5810_v61  ;;  %v5817_v29 = vsub.f32 %v6834_v47, %v5415_v1  ;;  %v2415_v40 = vmul.f32 %v5810_v61, %v5810_v61  ;;  %v2533_v28 = vsel %vm1009_vm1, %v2414_v59, 0.0 }
 0x35c   :  { %v2526_v23 = vadd.f32 %v2525_v58, %v2524_v9  ;;  %v6836_v58 = vld [vmem:[#allocation12_spill] sm:$0xff] }
 0x35d   :  { %6835 = vst [vmem:[#allocation11_spill] sm:$0xff] %v5817_v29  ;;  %v5824_v42 = vsub.f32 %v6836_v58, %v5415_v1  ;;  %v2416_v51 = vmul.f32 %v5817_v29, %v5817_v29  ;;  %v2535_v44 = vsel %vm1009_vm1, %v2415_v40, 0.0 }
 0x35e   :  { %v2528_v46 = vadd.f32 %v2527_v4, %v2526_v23  ;;  %v6838_v4 = vld [vmem:[#allocation13_spill] sm:$0xff] }
 0x35f   :  { %6837 = vst [vmem:[#allocation12_spill] sm:$0xff] %v5824_v42  ;;  %v5831_v47 = vsub.f32 %v6838_v4, %v5415_v1  ;;  %v2417_v61 = vmul.f32 %v5824_v42, %v5824_v42  ;;  %v2537_v59 = vsel %vm1009_vm1, %v2416_v51, 0.0 }
 0x360   :  { %v2530_v9 = vadd.f32 %v2529_v25, %v2528_v46  ;;  %v6840_v25 = vld [vmem:[#allocation14_spill] sm:$0xff] }
 0x361   :  { %6839 = vst [vmem:[#allocation13_spill] sm:$0xff] %v5831_v47  ;;  %v5838_v58 = vsub.f32 %v6840_v25, %v5415_v1  ;;  %v2418_v4 = vmul.f32 %v5831_v47, %v5831_v47  ;;  %v2539_v40 = vsel %vm1009_vm1, %v2417_v61, 0.0 }
 0x362   :  { %v2532_v23 = vadd.f32 %v2531_v35, %v2530_v9  ;;  %v5845_v35 = vsub.f32 %v5390_v55, %v5415_v1 }
 0x363   :  { %6841 = vst [vmem:[#allocation14_spill] sm:$0xff] %v5838_v58  ;;  %v2419_v25 = vmul.f32 %v5838_v58, %v5838_v58 }
 0x364   :  { %v2534_v46 = vadd.f32 %v2533_v28, %v2532_v23  ;;  %6842 = vst [vmem:[#allocation21_spill] sm:$0xff] %v5845_v35  ;;  %v5852_v28 = vsub.f32 %v5397_v10, %v5415_v1  ;;  %v2420_v55 = vmul.f32 %v5845_v35, %v5845_v35 }
 0x366   :  { %v2536_v9 = vadd.f32 %v2535_v44, %v2534_v46  ;;  %v2541_v44 = vsel %vm1009_vm1, %v2418_v4, 0.0  ;;  %v2421_v51 = vmul.f32 %v5852_v28, %v5852_v28  ;;  %v2545_v10 = vsel %vm1009_vm1, %v2420_v55, 0.0 }
 0x368   :  { %v2538_v23 = vadd.f32 %v2537_v59, %v2536_v9  ;;  %v2543_v9 = vsel %vm1009_vm1, %v2419_v25, 0.0  ;;  %v2547_v58 = vsel %vm1009_vm1, %v2421_v51, 0.0  ;;  %v2569_v51 = vld [vmem:[%s6730_s2] sm:$0x1] }
 0x36a   :  { %v2540_v46 = vadd.f32 %v2539_v40, %v2538_v23 }
 0x36c   :  { %v2542_v42 = vadd.f32 %v2541_v44, %v2540_v46 }
 0x36e   :  { %v2544_v59 = vadd.f32 %v2543_v9, %v2542_v42  ;;  %v2590_v42 = vld [vmem:[%s6729_s3] sm:$0x1] }
 0x36f   :  { %v2595_v4 = vrot.slane %v2590_v42, %v5411_v56 }
 0x370   :  { %v2546_v1 = vadd.f32 %v2545_v10, %v2544_v59 }
 0x372   :  { %v2548_v47 = vadd.f32 %v2547_v58, %v2546_v1 }
 0x374   :  { %v2549_v61 = vrot.slane %v2548_v47, 4 }
 0x376   :  { %v2550_v23 = vadd.f32 %v2549_v61, %v2548_v47 }
 0x378   :  { %v2551_v40 = vrot.slane %v2550_v23, 2 }
 0x37a   :  { %v2552_v29 = vadd.f32 %v2551_v40, %v2550_v23 }
 0x37c   :  { %v2553_v35 = vrot.slane %v2552_v29, 1 }
 0x37e   :  { %v2554_v22 = vadd.f32 %v2553_v35, %v2552_v29 }
 0x380   :  { %2560 = vrot.lane.b32.xlu1 %v2554_v22, %s3890_s17  ;;  %2556 = vrot.lane.b32.xlu0 %v2554_v22, %s3889_s16 }
 0x384   :  { %2564 = vrot.lane.b32.xlu0 %v2554_v22, %s3888_s0 }
 0x388   :  { %2596 = vrot.lane.b32.xlu0 %v2595_v4, %s3892_s19 }
 0x3f2   :  { %v2557_v58 = vpop.permute.xlu0 %2556  ;;  %v2561_v25 = vpop.permute.xlu1 %2560 }
 0x3f3   :  { %v2559_v47 = vadd.f32 %v2557_v58, %v2554_v22 }
 0x3f5   :  { %v2563_v46 = vadd.f32 %v2561_v25, %v2559_v47 }
 0x3f6   :  { %v2565_v55 = vpop.permute.xlu0 %2564 }
 0x3f7   :  { %v2567_v29 = vadd.f32 %v2565_v55, %v2563_v46 }
 0x3f9   :  { %v2568_v35 = vmul.f32 0.00048828125, %v2567_v29  ;;  %v6843_v29 = vld [vmem:[#allocation15_spill] sm:$0xff] }
 0x3fa   :  { %v2597_v22 = vpop.permute.xlu0 %2596 }
 0x3fb   :  { %v2570_v44 = vadd.f32 1e-05, %v2568_v35  ;;  %v2605_v46 = vsel %vm2284_vm2, %v2590_v42, %v2597_v22  ;;  %v6846_v22 = vld [vmem:[#allocation18_spill] sm:$0xff] }
 0x3fd   :  { %3886 = vrsqrt.f32 %v2570_v44 }
 0x407   :  { %v3887_v9 = vpop.eup %3886 }
 0x408   :  { %v2572_v59 = vmul.f32 %v3887_v9, %v2569_v51 }
 0x40a   :  { %v2577_v10 = vrot.slane %v2572_v59, %v5411_v56 }
 0x40c   :  { %2581 = vrot.lane.b32.xlu0 %v2577_v10, %s3891_s18  ;;  %2578 = vrot.lane.b32.xlu1 %v2577_v10, %s3892_s19 }
 0x410   :  { %2584 = vrot.lane.b32.xlu1 %v2577_v10, %s3893_s20  ;;  %2602 = vrot.lane.b32.xlu0 %v2595_v4, %s3893_s20  ;;  %v6845_v10 = vld [vmem:[#allocation17_spill] sm:$0xff] }
 0x414   :  { %2599 = vrot.lane.b32.xlu1 %v2595_v4, %s3891_s18 }
 0x47e   :  { %v2579_v1 = vpop.permute.xlu1 %2578  ;;  %v2582_v23 = vpop.permute.xlu0 %2581 }
 0x47f   :  { %v2587_v61 = vsel %vm2284_vm2, %v2572_v59, %v2579_v1  ;;  %v6844_v59 = vld [vmem:[#allocation16_spill] sm:$0xff] }
 0x480   :  { %v2588_v40 = vsel %vm2286_vm3, %v2587_v61, %v2582_v23  ;;  %v6849_v23 = vld [vmem:[#allocation20_spill] sm:$0xff] }
 0x482   :  { %v2585_v58 = vpop.permute.xlu1 %2584  ;;  %v2603_v1 = vpop.permute.xlu0 %2602 }
 0x483   :  { %v2589_v47 = vsel %vm2288_vm4, %v2588_v40, %v2585_v58  ;;  %v6851_v40 = vld [vmem:[#allocation2_spill] sm:$0xff] }
 0x484   :  { %v5886_v25 = vrot.slane %v2589_v47, %v5411_v56  ;;  %v6853_v47 = vld [vmem:[#allocation3_spill] sm:$0xff] }
 0x486   :  { %v5891_v55 = vmul.f32 %v5886_v25, %v5419_v15  ;;  %v5895_v4 = vmul.f32 %v5886_v25, %v5423_v11  ;;  %v5899_v35 = vmul.f32 %v5886_v25, %v6843_v29  ;;  %v5903_v44 = vmul.f32 %v5886_v25, %v5431_v16  ;;  %v2600_v9 = vpop.permute.xlu1 %2599 }
 0x487   :  { %v5907_v51 = vmul.f32 %v5886_v25, %v5439_v43  ;;  %v5911_v15 = vmul.f32 %v5886_v25, %v5445_v52  ;;  %v5915_v11 = vmul.f32 %v5886_v25, %v5453_v39  ;;  %v5919_v42 = vmul.f32 %v5886_v25, %v5460_v60 }
 0x488   :  { %v5923_v16 = vmul.f32 %v5886_v25, %v5467_v7  ;;  %v5927_v43 = vmul.f32 %v5886_v25, %v5474_v6  ;;  %v5931_v52 = vmul.f32 %v5886_v25, %v5481_v26  ;;  %v5935_v39 = vmul.f32 %v5886_v25, %v5488_v37 }
 0x489   :  { %v5939_v60 = vmul.f32 %v5886_v25, %v5495_v21  ;;  %v5943_v7 = vmul.f32 %v5886_v25, %v5502_v20  ;;  %v5947_v6 = vmul.f32 %v5886_v25, %v5509_v34  ;;  %v5951_v26 = vmul.f32 %v5886_v25, %v5516_v33 }
 0x48a   :  { %v5955_v37 = vmul.f32 %v5886_v25, %v5523_v49  ;;  %v5959_v21 = vmul.f32 %v5886_v25, %v5530_v48  ;;  %v5963_v20 = vmul.f32 %v5886_v25, %v5537_v63  ;;  %v5967_v34 = vmul.f32 %v5886_v25, %v5544_v62 }
 0x48b   :  { %v5971_v33 = vmul.f32 %v5886_v25, %v5551_v14  ;;  %v5975_v49 = vmul.f32 %v5886_v25, %v5558_v12  ;;  %v5979_v48 = vmul.f32 %v5886_v25, %v5565_v38  ;;  %v5983_v63 = vmul.f32 %v5886_v25, %v5572_v17 }
 0x48c   :  { %v5987_v62 = vmul.f32 %v5886_v25, %v5579_v32  ;;  %v5991_v14 = vmul.f32 %v5886_v25, %v5586_v31  ;;  %v5995_v12 = vmul.f32 %v5886_v25, %v5593_v53  ;;  %v5999_v38 = vmul.f32 %v5886_v25, %v5600_v50 }
 0x48d   :  { %v6003_v17 = vmul.f32 %v5886_v25, %v5607_v3  ;;  %v6007_v32 = vmul.f32 %v5886_v25, %v5614_v2  ;;  %v6011_v31 = vmul.f32 %v5886_v25, %v5621_v36  ;;  %v6015_v53 = vmul.f32 %v5886_v25, %v5628_v27 }
 0x48e   :  { %v6019_v50 = vmul.f32 %v5886_v25, %v5635_v18  ;;  %v6023_v3 = vmul.f32 %v5886_v25, %v5642_v13  ;;  %v6027_v2 = vmul.f32 %v5886_v25, %v5649_v24  ;;  %v6031_v36 = vmul.f32 %v5886_v25, %v5656_v30 }
 0x48f   :  { %v6035_v27 = vmul.f32 %v5886_v25, %v5663_v41  ;;  %v6039_v18 = vmul.f32 %v5886_v25, %v5670_v45  ;;  %v6043_v13 = vmul.f32 %v5886_v25, %v5677_v54  ;;  %v6047_v24 = vmul.f32 %v5886_v25, %v5684_v57 }
 0x490   :  { %v6051_v30 = vmul.f32 %v5886_v25, %v5691_v0  ;;  %v6055_v41 = vmul.f32 %v5886_v25, %v5698_v5  ;;  %v6059_v45 = vmul.f32 %v5886_v25, %v5705_v19  ;;  %v6063_v54 = vmul.f32 %v5886_v25, %v5712_v8  ;;  %v6847_v19 = vld [vmem:[#allocation19_spill] sm:$0xff] }
 0x491   :  { %v6067_v57 = vmul.f32 %v5886_v25, %v6844_v59  ;;  %v6071_v0 = vmul.f32 %v5886_v25, %v6845_v10  ;;  %v6075_v5 = vmul.f32 %v5886_v25, %v6846_v22  ;;  %v6079_v61 = vmul.f32 %v5886_v25, %v6847_v19  ;;  %v6855_v59 = vld [vmem:[#allocation4_spill] sm:$0xff]  ;;  %v6857_v22 = vld [vmem:[#allocation5_spill] sm:$0xff] }
 0x492   :  { %v6083_v8 = vmul.f32 %v5886_v25, %v6849_v23  ;;  %v6087_v58 = vmul.f32 %v5886_v25, %v6851_v40  ;;  %v6091_v29 = vmul.f32 %v5886_v25, %v6853_v47  ;;  %v6095_v10 = vmul.f32 %v5886_v25, %v6855_v59  ;;  %v6861_v40 = vld [vmem:[#allocation7_spill] sm:$0xff]  ;;  %v6862_v47 = vld [vmem:[#allocation8_spill] sm:$0xff]  ;;  %v6864_v59 = vld [vmem:[#allocation9_spill] sm:$0xff] }
 0x493   :  { %6848 = vst [vmem:[#allocation15_spill] sm:$0xff] %v6079_v61  ;;  %v6099_v19 = vmul.f32 %v5886_v25, %v6857_v22  ;;  %v6859_v61 = vld [vmem:[#allocation6_spill] sm:$0xff] }
 0x494   :  { %6850 = vst [vmem:[#allocation16_spill] sm:$0xff] %v6083_v8  ;;  %6852 = vst [vmem:[#allocation17_spill] sm:$0xff] %v6087_v58  ;;  %v6103_v23 = vmul.f32 %v5886_v25, %v6859_v61  ;;  %v2606_v8 = vsel %vm2286_vm3, %v2605_v46, %v2600_v9  ;;  %v6108_v58 = vmul.f32 %v5886_v25, %v6861_v40  ;;  %v6868_v9 = vld [vmem:[#allocation12_spill] sm:$0xff] }
 0x495   :  { %6854 = vst [vmem:[#allocation18_spill] sm:$0xff] %v6091_v29  ;;  %6856 = vst [vmem:[#allocation19_spill] sm:$0xff] %v6095_v10  ;;  %v6112_v29 = vmul.f32 %v5886_v25, %v6862_v47  ;;  %v6116_v10 = vmul.f32 %v5886_v25, %v6864_v59  ;;  %v2607_v22 = vsel %vm2288_vm4, %v2606_v8, %v2603_v1  ;;  %v6870_v1 = vld [vmem:[#allocation14_spill] sm:$0xff] }
 0x496   :  { %6858 = vst [vmem:[#allocation20_spill] sm:$0xff] %v6099_v19  ;;  %6860 = vst [vmem:[#allocation2_spill] sm:$0xff] %v6103_v23  ;;  %v6865_v19 = vld [vmem:[#allocation10_spill] sm:$0xff]  ;;  %v6867_v23 = vld [vmem:[#allocation11_spill] sm:$0xff]  ;;  %v6129_v40 = vmul.f32 %v5886_v25, %v6868_v9  ;;  %v6132_v47 = vrot.slane %v2607_v22, %v5411_v56  ;;  %v6140_v8 = vmul.f32 %v5886_v25, %v6870_v1 }
 0x497   :  { %6863 = vst [vmem:[#allocation3_spill] sm:$0xff] %v6112_v29  ;;  %v6121_v61 = vmul.f32 %v5886_v25, %v6865_v19  ;;  %v6125_v46 = vmul.f32 %v5886_v25, %v6867_v23  ;;  %v6869_v29 = vld [vmem:[#allocation13_spill] sm:$0xff]  ;;  %v6148_v23 = vmul.f32 %v5886_v25, %v5852_v28 }
 0x498   :  { %v6136_v59 = vmul.f32 %v5886_v25, %v6869_v29  ;;  %v6871_v19 = vld [vmem:[#allocation21_spill] sm:$0xff]  ;;  %v6152_v56 = vadd.f32 %v6132_v47, %v5891_v55  ;;  %v6156_v29 = vadd.f32 %v6132_v47, %v5895_v4  ;;  %v6160_v22 = vadd.f32 %v6132_v47, %v5899_v35 }
 0x499   :  { %6866 = vst [vmem:[#allocation4_spill] sm:$0xff] %v6121_v61  ;;  %v6144_v61 = vmul.f32 %v5886_v25, %v6871_v19  ;;  %v6164_v9 = vadd.f32 %v6132_v47, %v5903_v44  ;;  %v6168_v28 = vadd.f32 %v6132_v47, %v5907_v51  ;;  %v6172_v25 = vadd.f32 %v6132_v47, %v5911_v15 }
 0x49a   :  { %v6176_v55 = vadd.f32 %v6132_v47, %v5915_v11  ;;  %v6180_v4 = vadd.f32 %v6132_v47, %v5919_v42  ;;  %v6184_v35 = vadd.f32 %v6132_v47, %v5923_v16  ;;  %v6188_v44 = vadd.f32 %v6132_v47, %v5927_v43 }
 0x49b   :  { %v6192_v51 = vadd.f32 %v6132_v47, %v5931_v52  ;;  %v6196_v15 = vadd.f32 %v6132_v47, %v5935_v39  ;;  %v6200_v11 = vadd.f32 %v6132_v47, %v5939_v60  ;;  %v6204_v42 = vadd.f32 %v6132_v47, %v5943_v7  ;;  %v6877_v1 = vld [vmem:[#allocation16_spill] sm:$0xff]  ;;  %v6878_v19 = vld [vmem:[#allocation17_spill] sm:$0xff] }
 0x49c   :  { %v6208_v16 = vadd.f32 %v6132_v47, %v5947_v6  ;;  %v6212_v43 = vadd.f32 %v6132_v47, %v5951_v26  ;;  %v6216_v52 = vadd.f32 %v6132_v47, %v5955_v37  ;;  %v6220_v39 = vadd.f32 %v6132_v47, %v5959_v21 }
 0x49d   :  { %v6224_v60 = vadd.f32 %v6132_v47, %v5963_v20  ;;  %v6228_v7 = vadd.f32 %v6132_v47, %v5967_v34  ;;  %v6232_v6 = vadd.f32 %v6132_v47, %v5971_v33  ;;  %v6236_v26 = vadd.f32 %v6132_v47, %v5975_v49 }
 0x49e   :  { %v6240_v37 = vadd.f32 %v6132_v47, %v5979_v48  ;;  %v6244_v21 = vadd.f32 %v6132_v47, %v5983_v63  ;;  %v6248_v20 = vadd.f32 %v6132_v47, %v5987_v62  ;;  %v6252_v34 = vadd.f32 %v6132_v47, %v5991_v14 }
 0x49f   :  { %v6256_v33 = vadd.f32 %v6132_v47, %v5995_v12  ;;  %v6260_v49 = vadd.f32 %v6132_v47, %v5999_v38  ;;  %v6264_v48 = vadd.f32 %v6132_v47, %v6003_v17  ;;  %v6268_v63 = vadd.f32 %v6132_v47, %v6007_v32 }
 0x4a0   :  { %v6272_v62 = vadd.f32 %v6132_v47, %v6011_v31  ;;  %v6276_v14 = vadd.f32 %v6132_v47, %v6015_v53  ;;  %v6280_v12 = vadd.f32 %v6132_v47, %v6019_v50  ;;  %v6284_v38 = vadd.f32 %v6132_v47, %v6023_v3 }
 0x4a1   :  { %v6288_v17 = vadd.f32 %v6132_v47, %v6027_v2  ;;  %v6292_v32 = vadd.f32 %v6132_v47, %v6031_v36  ;;  %v6296_v31 = vadd.f32 %v6132_v47, %v6035_v27  ;;  %v6300_v53 = vadd.f32 %v6132_v47, %v6039_v18 }
 0x4a2   :  { %v6304_v50 = vadd.f32 %v6132_v47, %v6043_v13  ;;  %v6308_v3 = vadd.f32 %v6132_v47, %v6047_v24  ;;  %v6312_v2 = vadd.f32 %v6132_v47, %v6051_v30  ;;  %v6316_v36 = vadd.f32 %v6132_v47, %v6055_v41  ;;  %v6875_v41 = vld [vmem:[#allocation15_spill] sm:$0xff] }
 0x4a3   :  { %v6320_v27 = vadd.f32 %v6132_v47, %v6059_v45  ;;  %v6324_v18 = vadd.f32 %v6132_v47, %v6063_v54  ;;  %v6328_v13 = vadd.f32 %v6132_v47, %v6067_v57  ;;  %v6332_v24 = vadd.f32 %v6132_v47, %v6071_v0 }
 0x4a4   :  { %v6336_v30 = vadd.f32 %v6132_v47, %v6075_v5  ;;  %v6340_v45 = vadd.f32 %v6132_v47, %v6875_v41  ;;  %v6344_v54 = vadd.f32 %v6132_v47, %v6877_v1  ;;  %v6348_v57 = vadd.f32 %v6132_v47, %v6878_v19 }
 0x4a5   :  { %6872 = vst [vmem:[#allocation5_spill] sm:$0xff] %v6328_v13  ;;  %6873 = vst [vmem:[#allocation6_spill] sm:$0xff] %v6332_v24  ;;  %v6880_v13 = vld [vmem:[#allocation18_spill] sm:$0xff]  ;;  %v6881_v24 = vld [vmem:[#allocation19_spill] sm:$0xff]  ;;  %v6368_v19 = vadd.f32 %v6132_v47, %v6108_v58  ;;  %v6388_v58 = vadd.f32 %v6132_v47, %v6129_v40  ;;  %v2745_v40 = vmax.f32 %v6156_v29, 0.0  ;;  %v2756_v29 = vmax.f32 %v6200_v11, 0.0 }
 0x4a6   :  { %6874 = vst [vmem:[#allocation7_spill] sm:$0xff] %v6336_v30  ;;  %6876 = vst [vmem:[#allocation8_spill] sm:$0xff] %v6340_v45  ;;  %v6352_v0 = vadd.f32 %v6132_v47, %v6880_v13  ;;  %v6356_v5 = vadd.f32 %v6132_v47, %v6881_v24  ;;  %v6883_v30 = vld [vmem:[#allocation20_spill] sm:$0xff]  ;;  %v6884_v45 = vld [vmem:[#allocation2_spill] sm:$0xff]  ;;  %v6376_v24 = vadd.f32 %v6132_v47, %v6116_v10  ;;  %v2767_v11 = vmax.f32 %v6244_v21, 0.0 }
 0x4a7   :  { %6879 = vst [vmem:[#allocation9_spill] sm:$0xff] %v6348_v57  ;;  %v6360_v41 = vadd.f32 %v6132_v47, %v6883_v30  ;;  %v6364_v1 = vadd.f32 %v6132_v47, %v6884_v45  ;;  %v6885_v57 = vld [vmem:[#allocation3_spill] sm:$0xff]  ;;  %v6384_v45 = vadd.f32 %v6132_v47, %v6125_v46  ;;  %6888 = vst [vmem:[#allocation12_spill] sm:$0xff] %v6388_v58  ;;  %v2746_v58 = vmax.f32 %v6160_v22, 0.0 }
 0x4a8   :  { %6882 = vst [vmem:[#allocation10_spill] sm:$0xff] %v6356_v5  ;;  %v6372_v13 = vadd.f32 %v6132_v47, %v6885_v57  ;;  %v6886_v5 = vld [vmem:[#allocation4_spill] sm:$0xff]  ;;  %v6392_v57 = vadd.f32 %v6132_v47, %v6136_v59  ;;  %v6396_v10 = vadd.f32 %v6132_v47, %v6140_v8  ;;  %v6404_v46 = vadd.f32 %v6132_v47, %v6148_v23 }
 0x4a9   :  { %v6380_v30 = vadd.f32 %v6132_v47, %v6886_v5  ;;  %6887 = vst [vmem:[#allocation11_spill] sm:$0xff] %v6384_v45  ;;  %v6400_v5 = vadd.f32 %v6132_v47, %v6144_v61  ;;  %v2744_v45 = vmax.f32 %v6152_v56, 0.0  ;;  %v2747_v59 = vmax.f32 %v6164_v9, 0.0  ;;  %2809 = vst.msk [vmem:[%s6728_s4 + $0x8] sm:$0xff] %vm1009_vm1, %v2745_v40 }
 0x4aa   :  { %6889 = vst [vmem:[#allocation13_spill] sm:$0xff] %v6392_v57  ;;  %6890 = vst [vmem:[#allocation14_spill] sm:$0xff] %v6396_v10  ;;  %v2748_v57 = vmax.f32 %v6168_v28, 0.0  ;;  %v2749_v8 = vmax.f32 %v6172_v25, 0.0  ;;  %v2750_v10 = vmax.f32 %v6176_v55, 0.0  ;;  %v2751_v61 = vmax.f32 %v6180_v4, 0.0 }
 0x4ab   :  { %6891 = vst [vmem:[#allocation21_spill] sm:$0xff] %v6400_v5  ;;  %v2752_v5 = vmax.f32 %v6184_v35, 0.0  ;;  %v2753_v47 = vmax.f32 %v6188_v44, 0.0  ;;  %v2754_v23 = vmax.f32 %v6192_v51, 0.0  ;;  %v2755_v56 = vmax.f32 %v6196_v15, 0.0  ;;  %2808 = vst.msk [vmem:[%s6728_s4] sm:$0xff] %vm1009_vm1, %v2744_v45 }
 0x4ac   :  { %2810 = vst.msk [vmem:[%s6728_s4 + $0x10] sm:$0xff] %vm1009_vm1, %v2746_v58  ;;  %2811 = vst.msk [vmem:[%s6728_s4 + $0x18] sm:$0xff] %vm1009_vm1, %v2747_v59  ;;  %v2757_v22 = vmax.f32 %v6204_v42, 0.0  ;;  %v2758_v9 = vmax.f32 %v6208_v16, 0.0  ;;  %v2759_v28 = vmax.f32 %v6212_v43, 0.0  ;;  %v2760_v25 = vmax.f32 %v6216_v52, 0.0 }
 0x4ad   :  { %2812 = vst.msk [vmem:[%s6728_s4 + $0x20] sm:$0xff] %vm1009_vm1, %v2748_v57  ;;  %2813 = vst.msk [vmem:[%s6728_s4 + $0x28] sm:$0xff] %vm1009_vm1, %v2749_v8  ;;  %v2761_v55 = vmax.f32 %v6220_v39, 0.0  ;;  %v2762_v4 = vmax.f32 %v6224_v60, 0.0  ;;  %v2763_v35 = vmax.f32 %v6228_v7, 0.0  ;;  %v2764_v44 = vmax.f32 %v6232_v6, 0.0 }
 0x4ae   :  { %2814 = vst.msk [vmem:[%s6728_s4 + $0x30] sm:$0xff] %vm1009_vm1, %v2750_v10  ;;  %2815 = vst.msk [vmem:[%s6728_s4 + $0x38] sm:$0xff] %vm1009_vm1, %v2751_v61  ;;  %v2765_v51 = vmax.f32 %v6236_v26, 0.0  ;;  %v2766_v15 = vmax.f32 %v6240_v37, 0.0  ;;  %v2768_v42 = vmax.f32 %v6248_v20, 0.0  ;;  %v2769_v16 = vmax.f32 %v6252_v34, 0.0 }
 0x4af   :  { %2816 = vst.msk [vmem:[%s6728_s4 + $0x40] sm:$0xff] %vm1009_vm1, %v2752_v5  ;;  %2817 = vst.msk [vmem:[%s6728_s4 + $0x48] sm:$0xff] %vm1009_vm1, %v2753_v47  ;;  %v2770_v43 = vmax.f32 %v6256_v33, 0.0  ;;  %v2771_v52 = vmax.f32 %v6260_v49, 0.0  ;;  %v2772_v39 = vmax.f32 %v6264_v48, 0.0  ;;  %v2773_v60 = vmax.f32 %v6268_v63, 0.0 }
 0x4b0   :  { %2818 = vst.msk [vmem:[%s6728_s4 + $0x50] sm:$0xff] %vm1009_vm1, %v2754_v23  ;;  %2819 = vst.msk [vmem:[%s6728_s4 + $0x58] sm:$0xff] %vm1009_vm1, %v2755_v56  ;;  %v2774_v7 = vmax.f32 %v6272_v62, 0.0  ;;  %v2775_v6 = vmax.f32 %v6276_v14, 0.0  ;;  %v2776_v26 = vmax.f32 %v6280_v12, 0.0  ;;  %v2777_v37 = vmax.f32 %v6284_v38, 0.0 }
 0x4b1   :  { %2820 = vst.msk [vmem:[%s6728_s4 + $0x60] sm:$0xff] %vm1009_vm1, %v2756_v29  ;;  %2821 = vst.msk [vmem:[%s6728_s4 + $0x68] sm:$0xff] %vm1009_vm1, %v2757_v22  ;;  %v2778_v21 = vmax.f32 %v6288_v17, 0.0  ;;  %v2779_v20 = vmax.f32 %v6292_v32, 0.0  ;;  %v2780_v34 = vmax.f32 %v6296_v31, 0.0  ;;  %v2781_v33 = vmax.f32 %v6300_v53, 0.0 }
 0x4b2   :  { %2822 = vst.msk [vmem:[%s6728_s4 + $0x70] sm:$0xff] %vm1009_vm1, %v2758_v9  ;;  %2823 = vst.msk [vmem:[%s6728_s4 + $0x78] sm:$0xff] %vm1009_vm1, %v2759_v28  ;;  %v2782_v49 = vmax.f32 %v6304_v50, 0.0  ;;  %v2783_v48 = vmax.f32 %v6308_v3, 0.0  ;;  %v2784_v63 = vmax.f32 %v6312_v2, 0.0  ;;  %v2785_v62 = vmax.f32 %v6316_v36, 0.0 }
 0x4b3   :  { %2824 = vst.msk [vmem:[%s6728_s4 + $0x80] sm:$0xff] %vm1009_vm1, %v2760_v25  ;;  %2825 = vst.msk [vmem:[%s6728_s4 + $0x88] sm:$0xff] %vm1009_vm1, %v2761_v55  ;;  %v2786_v14 = vmax.f32 %v6320_v27, 0.0  ;;  %v2787_v12 = vmax.f32 %v6324_v18, 0.0  ;;  %v6892_v38 = vld [vmem:[#allocation5_spill] sm:$0xff]  ;;  %v6893_v32 = vld [vmem:[#allocation6_spill] sm:$0xff] }
 0x4b4   :  { %2826 = vst.msk [vmem:[%s6728_s4 + $0x90] sm:$0xff] %vm1009_vm1, %v2762_v4  ;;  %2827 = vst.msk [vmem:[%s6728_s4 + $0x98] sm:$0xff] %vm1009_vm1, %v2763_v35  ;;  %v2788_v17 = vmax.f32 %v6892_v38, 0.0  ;;  %v2789_v31 = vmax.f32 %v6893_v32, 0.0  ;;  %v6894_v53 = vld [vmem:[#allocation7_spill] sm:$0xff]  ;;  %v6895_v3 = vld [vmem:[#allocation8_spill] sm:$0xff] }
 0x4b5   :  { %2828 = vst.msk [vmem:[%s6728_s4 + $0xa0] sm:$0xff] %vm1009_vm1, %v2764_v44  ;;  %2829 = vst.msk [vmem:[%s6728_s4 + $0xa8] sm:$0xff] %vm1009_vm1, %v2765_v51  ;;  %v2790_v50 = vmax.f32 %v6894_v53, 0.0  ;;  %v2791_v2 = vmax.f32 %v6895_v3, 0.0  ;;  %v2792_v36 = vmax.f32 %v6344_v54, 0.0  ;;  %v6896_v27 = vld [vmem:[#allocation9_spill] sm:$0xff] }
 0x4b6   :  { %2830 = vst.msk [vmem:[%s6728_s4 + $0xb0] sm:$0xff] %vm1009_vm1, %v2766_v15  ;;  %2831 = vst.msk [vmem:[%s6728_s4 + $0xb8] sm:$0xff] %vm1009_vm1, %v2767_v11  ;;  %v2793_v18 = vmax.f32 %v6896_v27, 0.0  ;;  %v2794_v45 = vmax.f32 %v6352_v0, 0.0  ;;  %v6897_v58 = vld [vmem:[#allocation10_spill] sm:$0xff]  ;;  %v2796_v54 = vmax.f32 %v6360_v41, 0.0 }
 0x4b7   :  { %2832 = vst.msk [vmem:[%s6728_s4 + $0xc0] sm:$0xff] %vm1009_vm1, %v2768_v42  ;;  %2833 = vst.msk [vmem:[%s6728_s4 + $0xc8] sm:$0xff] %vm1009_vm1, %v2769_v16  ;;  %v2795_v57 = vmax.f32 %v6897_v58, 0.0  ;;  %v2797_v0 = vmax.f32 %v6364_v1, 0.0  ;;  %v2798_v10 = vmax.f32 %v6368_v19, 0.0  ;;  %v2799_v5 = vmax.f32 %v6372_v13, 0.0 }
 0x4b8   :  { %2834 = vst.msk [vmem:[%s6728_s4 + $0xd0] sm:$0xff] %vm1009_vm1, %v2770_v43  ;;  %2835 = vst.msk [vmem:[%s6728_s4 + $0xd8] sm:$0xff] %vm1009_vm1, %v2771_v52  ;;  %v2800_v41 = vmax.f32 %v6376_v24, 0.0  ;;  %v2801_v1 = vmax.f32 %v6380_v30, 0.0  ;;  %v6898_v19 = vld [vmem:[#allocation11_spill] sm:$0xff]  ;;  %v6899_v40 = vld [vmem:[#allocation12_spill] sm:$0xff] }
 0x4b9   :  { %2836 = vst.msk [vmem:[%s6728_s4 + $0xe0] sm:$0xff] %vm1009_vm1, %v2772_v39  ;;  %2837 = vst.msk [vmem:[%s6728_s4 + $0xe8] sm:$0xff] %vm1009_vm1, %v2773_v60  ;;  %v2802_v13 = vmax.f32 %v6898_v19, 0.0  ;;  %v2803_v59 = vmax.f32 %v6899_v40, 0.0  ;;  %v6900_v24 = vld [vmem:[#allocation13_spill] sm:$0xff]  ;;  %v6901_v8 = vld [vmem:[#allocation14_spill] sm:$0xff] }
 0x4ba   :  { %2838 = vst.msk [vmem:[%s6728_s4 + $0xf0] sm:$0xff] %vm1009_vm1, %v2774_v7  ;;  %2839 = vst.msk [vmem:[%s6728_s4 + $0xf8] sm:$0xff] %vm1009_vm1, %v2775_v6  ;;  %v2804_v30 = vmax.f32 %v6900_v24, 0.0  ;;  %v2805_v61 = vmax.f32 %v6901_v8, 0.0  ;;  %v6902_v47 = vld [vmem:[#allocation21_spill] sm:$0xff]  ;;  %v2807_v56 = vmax.f32 %v6404_v46, 0.0 }
 0x4bb   :  { %2840 = vst.msk [vmem:[%s6728_s4 + $0x100] sm:$0xff] %vm1009_vm1, %v2776_v26  ;;  %2841 = vst.msk [vmem:[%s6728_s4 + $0x108] sm:$0xff] %vm1009_vm1, %v2777_v37  ;;  %v2806_v23 = vmax.f32 %v6902_v47, 0.0 }
 0x4bc   :  { %2842 = vst.msk [vmem:[%s6728_s4 + $0x110] sm:$0xff] %vm1009_vm1, %v2778_v21  ;;  %2843 = vst.msk [vmem:[%s6728_s4 + $0x118] sm:$0xff] %vm1009_vm1, %v2779_v20 }
 0x4bd   :  { %2844 = vst.msk [vmem:[%s6728_s4 + $0x120] sm:$0xff] %vm1009_vm1, %v2780_v34  ;;  %2845 = vst.msk [vmem:[%s6728_s4 + $0x128] sm:$0xff] %vm1009_vm1, %v2781_v33 }
 0x4be   :  { %2846 = vst.msk [vmem:[%s6728_s4 + $0x130] sm:$0xff] %vm1009_vm1, %v2782_v49  ;;  %2847 = vst.msk [vmem:[%s6728_s4 + $0x138] sm:$0xff] %vm1009_vm1, %v2783_v48 }
 0x4bf   :  { %2848 = vst.msk [vmem:[%s6728_s4 + $0x140] sm:$0xff] %vm1009_vm1, %v2784_v63  ;;  %2849 = vst.msk [vmem:[%s6728_s4 + $0x148] sm:$0xff] %vm1009_vm1, %v2785_v62 }
 0x4c0   :  { %2850 = vst.msk [vmem:[%s6728_s4 + $0x150] sm:$0xff] %vm1009_vm1, %v2786_v14  ;;  %2851 = vst.msk [vmem:[%s6728_s4 + $0x158] sm:$0xff] %vm1009_vm1, %v2787_v12 }
 0x4c1   :  { %2852 = vst.msk [vmem:[%s6728_s4 + $0x160] sm:$0xff] %vm1009_vm1, %v2788_v17  ;;  %2853 = vst.msk [vmem:[%s6728_s4 + $0x168] sm:$0xff] %vm1009_vm1, %v2789_v31 }
 0x4c2   :  { %2854 = vst.msk [vmem:[%s6728_s4 + $0x170] sm:$0xff] %vm1009_vm1, %v2790_v50  ;;  %2855 = vst.msk [vmem:[%s6728_s4 + $0x178] sm:$0xff] %vm1009_vm1, %v2791_v2 }
 0x4c3   :  { %2856 = vst.msk [vmem:[%s6728_s4 + $0x180] sm:$0xff] %vm1009_vm1, %v2792_v36  ;;  %2857 = vst.msk [vmem:[%s6728_s4 + $0x188] sm:$0xff] %vm1009_vm1, %v2793_v18 }
 0x4c4   :  { %2858 = vst.msk [vmem:[%s6728_s4 + $0x190] sm:$0xff] %vm1009_vm1, %v2794_v45  ;;  %2859 = vst.msk [vmem:[%s6728_s4 + $0x198] sm:$0xff] %vm1009_vm1, %v2795_v57 }
 0x4c5   :  { %2860 = vst.msk [vmem:[%s6728_s4 + $0x1a0] sm:$0xff] %vm1009_vm1, %v2796_v54  ;;  %2861 = vst.msk [vmem:[%s6728_s4 + $0x1a8] sm:$0xff] %vm1009_vm1, %v2797_v0 }
 0x4c6   :  { %2862 = vst.msk [vmem:[%s6728_s4 + $0x1b0] sm:$0xff] %vm1009_vm1, %v2798_v10  ;;  %2863 = vst.msk [vmem:[%s6728_s4 + $0x1b8] sm:$0xff] %vm1009_vm1, %v2799_v5 }
 0x4c7   :  { %2864 = vst.msk [vmem:[%s6728_s4 + $0x1c0] sm:$0xff] %vm1009_vm1, %v2800_v41  ;;  %2865 = vst.msk [vmem:[%s6728_s4 + $0x1c8] sm:$0xff] %vm1009_vm1, %v2801_v1 }
 0x4c8   :  { %2866 = vst.msk [vmem:[%s6728_s4 + $0x1d0] sm:$0xff] %vm1009_vm1, %v2802_v13  ;;  %2867 = vst.msk [vmem:[%s6728_s4 + $0x1d8] sm:$0xff] %vm1009_vm1, %v2803_v59 }
 0x4c9   :  { %2868 = vst.msk [vmem:[%s6728_s4 + $0x1e0] sm:$0xff] %vm1009_vm1, %v2804_v30  ;;  %2869 = vst.msk [vmem:[%s6728_s4 + $0x1e8] sm:$0xff] %vm1009_vm1, %v2805_v61 }
 0x4ca   :  { %2870 = vst.msk [vmem:[%s6728_s4 + $0x1f0] sm:$0xff] %vm1009_vm1, %v2806_v23  ;;  %2871 = vst.msk [vmem:[%s6728_s4 + $0x1f8] sm:$0xff] %vm1009_vm1, %v2807_v56 }

// kernel: generator_forward.9
= control target key start
LH: loop header
LB: loop body
LE: loop exit
PB: predicated region body
PF: predicated region fallthrough
CT: control target
= control target key end

     0   :  { %vm153_vm0 = vcmask 195584   ;;  %s10983_s6 = smov 4   ;;  %s10985_s7 = smov 12   ;;  %vm7129_vm1 = vcmask 31744   ;;  %vm7131_vm2 = vcmask 64512   ;;  %vm3309_vm3 = vcmask 130048   ;;  %s17412_s1 = inlined_call_operand.vmem [shape: f32[3,24,16], index: 1, kind: input, shape index: {}]   ;;  %s17413_s0 = inlined_call_operand.vmem [shape: f32[2176,24], index: 0, kind: input, shape index: {}]   ;;  %s17414_s2 = inlined_call_operand.vmem [shape: f32[1,4], index: 2, kind: input, shape index: {}]   ;;  %s17415_s3 = inlined_call_operand.vmem [shape: f32[2048,16], index: 3, kind: output, shape index: {}]  }
   0x1   :  { %v7655_v0 = vld [vmem:[%s17412_s1 + $0x18] sm:$0xff]  ;;  %v7656_v1 = vld [vmem:[%s17412_s1 + $0x20] sm:$0xff]  ;;  %v7657_v5 = vld [vmem:[%s17412_s1 + $0x28] sm:$0xff]  ;;  %vm7133_vm4 = vcmask 97280  }
   0x2   :  { %v10409_v2 = vpack.c.bf16 %v7656_v1, %v7655_v0  ;;  %v18_v3 = vld [vmem:[%s17413_s0 + $0x20] sm:$0xff]  ;;  %v143_v7 = vld [vmem:[%s17412_s1 + $0x8] sm:$0xff]  ;;  %v20_v11 = vld [vmem:[%s17413_s0 + $0x30] sm:$0xff] }
   0x3   :  { %v3442_v4 = vld [vmem:[%s17413_s0 + $0x460] sm:$0xff]  ;;  %9227 = vmatprep.mubr.msk.f32.mxu0 %vm153_vm0, %v18_v3  ;;  %v19_v9 = vld [vmem:[%s17413_s0 + $0x28] sm:$0xff]  ;;  %v3444_v12 = vld [vmem:[%s17413_s0 + $0x470] sm:$0xff] }
   0x4   :  { %9821 = vmatprep.mubr.msk.f32.mxu1 %vm153_vm0, %v3442_v4  ;;  %v142_v6 = vld [vmem:[%s17412_s1] sm:$0xff]  ;;  %10410 = vmatprep.subr.bf16.mxu0 %v10409_v2  ;;  %v3443_v10 = vld [vmem:[%s17413_s0 + $0x468] sm:$0xff]  ;;  %v21_v13 = vld [vmem:[%s17413_s0 + $0x38] sm:$0xff] }
   0x5   :  { %10422 = vmatprep.subr.bf16.mxu1 %v10409_v2  ;;  %10412 = vmatpush3.bf16.msra.mxu0 %v10409_v2  ;;  %v10413_v8 = vpack.c.bf16 %v143_v7, %v142_v6  ;;  %v3445_v14 = vld [vmem:[%s17413_s0 + $0x478] sm:$0xff]  ;;  %v22_v15 = vld [vmem:[%s17413_s0 + $0x40] sm:$0xff]  ;;  %v23_v17 = vld [vmem:[%s17413_s0 + $0x48] sm:$0xff] }
   0x6   :  { %10424 = vmatpush3.bf16.msra.mxu1 %v10409_v2  ;;  %9225 = vmatprep.subr.mxu0 %v7657_v5  ;;  %v3446_v16 = vld [vmem:[%s17413_s0 + $0x480] sm:$0xff]  ;;  %v3447_v18 = vld [vmem:[%s17413_s0 + $0x488] sm:$0xff]  ;;  %v24_v19 = vld [vmem:[%s17413_s0 + $0x50] sm:$0xff] }
   0x7   :  { %9819 = vmatprep.subr.mxu1 %v7657_v5  ;;  %v3448_v20 = vld [vmem:[%s17413_s0 + $0x490] sm:$0xff]  ;;  %v25_v21 = vld [vmem:[%s17413_s0 + $0x58] sm:$0xff]  ;;  %v26_v23 = vld [vmem:[%s17413_s0 + $0x60] sm:$0xff] }
   0x8   :  { %v3449_v22 = vld [vmem:[%s17413_s0 + $0x498] sm:$0xff]  ;;  %v3450_v24 = vld [vmem:[%s17413_s0 + $0x4a0] sm:$0xff]  ;;  %v27_v25 = vld [vmem:[%s17413_s0 + $0x68] sm:$0xff] }
   0x9   :  { %9226 = vmatpush3.msra.mxu0 %v7657_v5  ;;  %v3451_v26 = vld [vmem:[%s17413_s0 + $0x4a8] sm:$0xff]  ;;  %v28_v27 = vld [vmem:[%s17413_s0 + $0x70] sm:$0xff]  ;;  %v29_v29 = vld [vmem:[%s17413_s0 + $0x78] sm:$0xff] }
   0xa   :  { %9820 = vmatpush3.msra.mxu1 %v7657_v5  ;;  %9228 = vmatmul.mubr.msk.f32.vlgmr.msra.gmra.mrb[0].mxu0 %vm153_vm0, %v19_v9  ;;  %v3452_v28 = vld [vmem:[%s17413_s0 + $0x4b0] sm:$0xff]  ;;  %v3453_v30 = vld [vmem:[%s17413_s0 + $0x4b8] sm:$0xff]  ;;  %v30_v31 = vld [vmem:[%s17413_s0 + $0x80] sm:$0xff] }
   0xb   :  { %10414 = vmatprep.subr.bf16.mxu0 %v10413_v8  ;;  %9822 = vmatmul.mubr.msk.f32.vlgmr.msra.gmra.mrb[0].mxu1 %vm153_vm0, %v3443_v10  ;;  %v3454_v32 = vld [vmem:[%s17413_s0 + $0x4c0] sm:$0xff]  ;;  %v31_v33 = vld [vmem:[%s17413_s0 + $0x88] sm:$0xff]  ;;  %v32_v35 = vld [vmem:[%s17413_s0 + $0x90] sm:$0xff] }
   0xc   :  { %10426 = vmatprep.subr.bf16.mxu1 %v10413_v8  ;;  %10416 = vmatpush3.bf16.msra.mxu0 %v10413_v8  ;;  %v3455_v34 = vld [vmem:[%s17413_s0 + $0x4c8] sm:$0xff]  ;;  %v3456_v36 = vld [vmem:[%s17413_s0 + $0x4d0] sm:$0xff]  ;;  %v33_v37 = vld [vmem:[%s17413_s0 + $0x98] sm:$0xff] }
   0xd   :  { %10428 = vmatpush3.bf16.msra.mxu1 %v10413_v8  ;;  %9230 = vmatprep.mubr.msk.f32.mxu0 %vm153_vm0, %v20_v11  ;;  %v3457_v38 = vld [vmem:[%s17413_s0 + $0x4d8] sm:$0xff]  ;;  %v34_v39 = vld [vmem:[%s17413_s0 + $0xa0] sm:$0xff]  ;;  %v35_v41 = vld [vmem:[%s17413_s0 + $0xa8] sm:$0xff] }
   0xe   :  { %9824 = vmatprep.mubr.msk.f32.mxu1 %vm153_vm0, %v3444_v12  ;;  %9231 = vmatmul.mubr.msk.f32.gmra.mrb[2].mxu0 %vm153_vm0, %v21_v13  ;;  %v3458_v40 = vld [vmem:[%s17413_s0 + $0x4e0] sm:$0xff]  ;;  %v11163_v42 = vld [vmem:[%s17413_s0 + $0x4e8] sm:$0xff]  ;;  %v11168_v43 = vld [vmem:[%s17413_s0 + $0xb0] sm:$0xff] }
   0xf   :  { %9825 = vmatmul.mubr.msk.f32.gmra.mrb[2].mxu1 %vm153_vm0, %v3445_v14  ;;  %9233 = vmatprep.mubr.msk.f32.mxu0 %vm153_vm0, %v22_v15  ;;  %v11173_v44 = vld [vmem:[%s17413_s0 + $0x4f0] sm:$0xff]  ;;  %v11183_v45 = vld [vmem:[%s17413_s0 + $0xb8] sm:$0xff]  ;;  %v11195_v47 = vld [vmem:[%s17413_s0 + $0xc0] sm:$0xff] }
  0x10   :  { %9827 = vmatprep.mubr.msk.f32.mxu1 %vm153_vm0, %v3446_v16  ;;  %v11190_v46 = vld [vmem:[%s17413_s0 + $0x4f8] sm:$0xff]  ;;  %v11200_v48 = vld [vmem:[%s17413_s0 + $0x500] sm:$0xff]  ;;  %v144_v49 = vld [vmem:[%s17412_s1 + $0x10] sm:$0xff] }
  0x11   :  { %v11214_v50 = vld [vmem:[%s17413_s0 + $0xc8] sm:$0xff]  ;;  %v11226_v52 = vld [vmem:[%s17413_s0 + $0xd0] sm:$0xff]  ;;  %9423 = vmatprep.subr.mxu0 %v144_v49  ;;  %10017 = vmatprep.subr.mxu1 %v144_v49  ;;  %v11242_v54 = vld [vmem:[%s17413_s0 + $0xd8] sm:$0xff] }
  0x12   :  { %9234 = vmatmul.mubr.msk.f32.gmra.mrb[4].mxu0 %vm153_vm0, %v23_v17  ;;  %v11221_v51 = vld [vmem:[%s17413_s0 + $0x508] sm:$0xff]  ;;  %v11231_v53 = vld [vmem:[%s17413_s0 + $0x510] sm:$0xff]  ;;  %10018 = vmatpush3.msra.mxu1 %v144_v49  ;;  %v11249_v55 = vld [vmem:[%s17413_s0 + $0x518] sm:$0xff] }
  0x13   :  { %9828 = vmatmul.mubr.msk.f32.gmra.mrb[4].mxu1 %vm153_vm0, %v3447_v18  ;;  %9236 = vmatprep.mubr.msk.f32.mxu0 %vm153_vm0, %v24_v19  ;;  %v11254_v56 = vld [vmem:[%s17413_s0 + $0xe0] sm:$0xff]  ;;  %v11270_v58 = vld [vmem:[%s17413_s0 + $0xe8] sm:$0xff]  ;;  %v11282_v60 = vld [vmem:[%s17413_s0 + $0xf0] sm:$0xff] }
  0x14   :  { %9830 = vmatprep.mubr.msk.f32.mxu1 %vm153_vm0, %v3448_v20  ;;  %9424 = vmatpush3.msra.mxu0 %v144_v49  ;;  %v11259_v57 = vld [vmem:[%s17413_s0 + $0x520] sm:$0xff]  ;;  %v11277_v59 = vld [vmem:[%s17413_s0 + $0x528] sm:$0xff]  ;;  %v11287_v61 = vld [vmem:[%s17413_s0 + $0x530] sm:$0xff] }
  0x15   :  { %v11298_v62 = vld [vmem:[%s17413_s0 + $0xf8] sm:$0xff]  ;;  %v11310_v0 = vld [vmem:[%s17413_s0 + $0x100] sm:$0xff]  ;;  %v11326_v2 = vld [vmem:[%s17413_s0 + $0x108] sm:$0xff] }
  0x16   :  { %9237 = vmatmul.mubr.msk.f32.gmra.mrb[6].mxu0 %vm153_vm0, %v25_v21  ;;  %v11305_v63 = vld [vmem:[%s17413_s0 + $0x538] sm:$0xff]  ;;  %v11315_v1 = vld [vmem:[%s17413_s0 + $0x540] sm:$0xff]  ;;  %v11333_v3 = vld [vmem:[%s17413_s0 + $0x548] sm:$0xff] }
  0x17   :  { %9831 = vmatmul.mubr.msk.f32.gmra.mrb[6].mxu1 %vm153_vm0, %v3449_v22  ;;  %9239 = vmatprep.mubr.msk.f32.mxu0 %vm153_vm0, %v26_v23  ;;  %v11338_v4 = vld [vmem:[%s17413_s0 + $0x110] sm:$0xff]  ;;  %v11354_v6 = vld [vmem:[%s17413_s0 + $0x118] sm:$0xff]  ;;  %v11366_v8 = vld [vmem:[%s17413_s0 + $0x120] sm:$0xff] }
  0x18   :  { %9833 = vmatprep.mubr.msk.f32.mxu1 %vm153_vm0, %v3450_v24  ;;  %v11343_v5 = vld [vmem:[%s17413_s0 + $0x550] sm:$0xff]  ;;  %v11361_v7 = vld [vmem:[%s17413_s0 + $0x558] sm:$0xff]  ;;  %v11371_v9 = vld [vmem:[%s17413_s0 + $0x560] sm:$0xff] }
  0x19   :  { %v11382_v10 = vld [vmem:[%s17413_s0 + $0x128] sm:$0xff]  ;;  %v11394_v12 = vld [vmem:[%s17413_s0 + $0x130] sm:$0xff]  ;;  %v11410_v14 = vld [vmem:[%s17413_s0 + $0x138] sm:$0xff] }
  0x1a   :  { %9240 = vmatmul.mubr.msk.f32.gmra.mrb[8].mxu0 %vm153_vm0, %v27_v25  ;;  %v11389_v11 = vld [vmem:[%s17413_s0 + $0x568] sm:$0xff]  ;;  %v11399_v13 = vld [vmem:[%s17413_s0 + $0x570] sm:$0xff]  ;;  %v11417_v15 = vld [vmem:[%s17413_s0 + $0x578] sm:$0xff] }
  0x1b   :  { %9834 = vmatmul.mubr.msk.f32.gmra.mrb[8].mxu1 %vm153_vm0, %v3451_v26  ;;  %9242 = vmatprep.mubr.msk.f32.mxu0 %vm153_vm0, %v28_v27  ;;  %v11422_v16 = vld [vmem:[%s17413_s0 + $0x140] sm:$0xff]  ;;  %v11438_v18 = vld [vmem:[%s17413_s0 + $0x148] sm:$0xff]  ;;  %v11450_v20 = vld [vmem:[%s17413_s0 + $0x150] sm:$0xff] }
  0x1c   :  { %9836 = vmatprep.mubr.msk.f32.mxu1 %vm153_vm0, %v3452_v28  ;;  %v11427_v17 = vld [vmem:[%s17413_s0 + $0x580] sm:$0xff]  ;;  %v11445_v19 = vld [vmem:[%s17413_s0 + $0x588] sm:$0xff]  ;;  %v11455_v21 = vld [vmem:[%s17413_s0 + $0x590] sm:$0xff] }
  0x1d   :  { %v11466_v22 = vld [vmem:[%s17413_s0 + $0x158] sm:$0xff]  ;;  %v11478_v24 = vld [vmem:[%s17413_s0 + $0x160] sm:$0xff]  ;;  %v11494_v26 = vld [vmem:[%s17413_s0 + $0x168] sm:$0xff] }
  0x1e   :  { %9243 = vmatmul.mubr.msk.f32.gmra.mrb[10].mxu0 %vm153_vm0, %v29_v29  ;;  %v11473_v23 = vld [vmem:[%s17413_s0 + $0x598] sm:$0xff]  ;;  %v11483_v25 = vld [vmem:[%s17413_s0 + $0x5a0] sm:$0xff]  ;;  %v11501_v27 = vld [vmem:[%s17413_s0 + $0x5a8] sm:$0xff] }
  0x1f   :  { %9837 = vmatmul.mubr.msk.f32.gmra.mrb[10].mxu1 %vm153_vm0, %v3453_v30  ;;  %9245 = vmatprep.mubr.msk.f32.mxu0 %vm153_vm0, %v30_v31  ;;  %v11506_v28 = vld [vmem:[%s17413_s0 + $0x170] sm:$0xff]  ;;  %v11522_v30 = vld [vmem:[%s17413_s0 + $0x178] sm:$0xff]  ;;  %v11606_v49 = vld [vmem:[%s17413_s0 + $0x1a8] sm:$0xff] }
  0x20   :  { %9839 = vmatprep.mubr.msk.f32.mxu1 %vm153_vm0, %v3454_v32  ;;  %v11511_v29 = vld [vmem:[%s17413_s0 + $0x5b0] sm:$0xff]  ;;  %v11529_v31 = vld [vmem:[%s17413_s0 + $0x5b8] sm:$0xff]  ;;  %v11534_v32 = vld [vmem:[%s17413_s0 + $0x180] sm:$0xff]  ;;  %17580 = vst [vmem:[#allocation9_spill] sm:$0xff] %v11606_v49 }
  0x22   :  { %9246 = vmatmul.mubr.msk.f32.gmra.mrb[12].mxu0 %vm153_vm0, %v31_v33  ;;  %v11539_v33 = vld [vmem:[%s17413_s0 + $0x5c0] sm:$0xff] }
  0x23   :  { %9840 = vmatmul.mubr.msk.f32.gmra.mrb[12].mxu1 %vm153_vm0, %v3455_v34  ;;  %9248 = vmatprep.mubr.msk.f32.mxu0 %vm153_vm0, %v32_v35  ;;  %v11550_v34 = vld [vmem:[%s17413_s0 + $0x188] sm:$0xff] }
  0x24   :  { %9842 = vmatprep.mubr.msk.f32.mxu1 %vm153_vm0, %v3456_v36  ;;  %v11557_v35 = vld [vmem:[%s17413_s0 + $0x5c8] sm:$0xff]  ;;  %v11562_v36 = vld [vmem:[%s17413_s0 + $0x190] sm:$0xff] }
  0x25   :  { %17573 = vst [vmem:[#allocation2_spill] sm:$0xff] %v11557_v35  ;;  %17574 = vst [vmem:[#allocation3_spill] sm:$0xff] %v11562_v36 }
  0x26   :  { %9249 = vmatmul.mubr.msk.f32.gmra.mrb[14].mxu0 %vm153_vm0, %v33_v37  ;;  %v11567_v37 = vld [vmem:[%s17413_s0 + $0x5d0] sm:$0xff] }
  0x27   :  { %9843 = vmatmul.mubr.msk.f32.gmra.mrb[14].mxu1 %vm153_vm0, %v3457_v38  ;;  %9251 = vmatprep.mubr.msk.f32.mxu0 %vm153_vm0, %v34_v39  ;;  %17575 = vst [vmem:[#allocation4_spill] sm:$0xff] %v11567_v37  ;;  %v11578_v38 = vld [vmem:[%s17413_s0 + $0x198] sm:$0xff] }
  0x28   :  { %9845 = vmatprep.mubr.msk.f32.mxu1 %vm153_vm0, %v3458_v40  ;;  %17576 = vst [vmem:[#allocation5_spill] sm:$0xff] %v11578_v38  ;;  %v11585_v39 = vld [vmem:[%s17413_s0 + $0x5d8] sm:$0xff]  ;;  %v11590_v40 = vld [vmem:[%s17413_s0 + $0x1a0] sm:$0xff] }
  0x29   :  { %17577 = vst [vmem:[#allocation6_spill] sm:$0xff] %v11585_v39  ;;  %17578 = vst [vmem:[#allocation7_spill] sm:$0xff] %v11590_v40 }
  0x2a   :  { %9252 = vmatmul.mubr.msk.f32.gmra.mrb[16].mxu0 %vm153_vm0, %v35_v41  ;;  %v11595_v41 = vld [vmem:[%s17413_s0 + $0x5e0] sm:$0xff] }
  0x2b   :  { %9846 = vmatmul.mubr.msk.f32.gmra.mrb[16].mxu1 %vm153_vm0, %v11163_v42  ;;  %9254 = vmatprep.mubr.msk.f32.mxu0 %vm153_vm0, %v11168_v43  ;;  %17579 = vst [vmem:[#allocation8_spill] sm:$0xff] %v11595_v41 }
  0x2c   :  { %9848 = vmatprep.mubr.msk.f32.mxu1 %vm153_vm0, %v11173_v44 }
  0x2e   :  { %9255 = vmatmul.mubr.msk.f32.gmra.mrb[18].mxu0 %vm153_vm0, %v11183_v45 }
  0x2f   :  { %9849 = vmatmul.mubr.msk.f32.gmra.mrb[18].mxu1 %vm153_vm0, %v11190_v46  ;;  %9257 = vmatprep.mubr.msk.f32.mxu0 %vm153_vm0, %v11195_v47 }
  0x30   :  { %9851 = vmatprep.mubr.msk.f32.mxu1 %vm153_vm0, %v11200_v48 }
  0x32   :  { %9258 = vmatmul.mubr.msk.f32.gmra.mrb[20].mxu0 %vm153_vm0, %v11214_v50 }
  0x33   :  { %9852 = vmatmul.mubr.msk.f32.gmra.mrb[20].mxu1 %vm153_vm0, %v11221_v51  ;;  %9260 = vmatprep.mubr.msk.f32.mxu0 %vm153_vm0, %v11226_v52 }
  0x34   :  { %9854 = vmatprep.mubr.msk.f32.mxu1 %vm153_vm0, %v11231_v53 }
  0x36   :  { %9261 = vmatmul.mubr.msk.f32.gmra.mrb[22].mxu0 %vm153_vm0, %v11242_v54 }
  0x37   :  { %9855 = vmatmul.mubr.msk.f32.gmra.mrb[22].mxu1 %vm153_vm0, %v11249_v55  ;;  %9263 = vmatprep.mubr.msk.f32.mxu0 %vm153_vm0, %v11254_v56 }
  0x38   :  { %9857 = vmatprep.mubr.msk.f32.mxu1 %vm153_vm0, %v11259_v57 }
  0x3a   :  { %9264 = vmatmul.mubr.msk.f32.gmra.mrb[24].mxu0 %vm153_vm0, %v11270_v58 }
  0x3b   :  { %9858 = vmatmul.mubr.msk.f32.gmra.mrb[24].mxu1 %vm153_vm0, %v11277_v59  ;;  %9266 = vmatprep.mubr.msk.f32.mxu0 %vm153_vm0, %v11282_v60 }
  0x3c   :  { %9860 = vmatprep.mubr.msk.f32.mxu1 %vm153_vm0, %v11287_v61 }
  0x3e   :  { %9267 = vmatmul.mubr.msk.f32.gmra.mrb[26].mxu0 %vm153_vm0, %v11298_v62 }
  0x3f   :  { %9861 = vmatmul.mubr.msk.f32.gmra.mrb[26].mxu1 %vm153_vm0, %v11305_v63  ;;  %9269 = vmatprep.mubr.msk.f32.mxu0 %vm153_vm0, %v11310_v0 }
  0x40   :  { %9863 = vmatprep.mubr.msk.f32.mxu1 %vm153_vm0, %v11315_v1 }
  0x42   :  { %9270 = vmatmul.mubr.msk.f32.gmra.mrb[28].mxu0 %vm153_vm0, %v11326_v2 }
  0x43   :  { %9864 = vmatmul.mubr.msk.f32.gmra.mrb[28].mxu1 %vm153_vm0, %v11333_v3  ;;  %9272 = vmatprep.mubr.msk.f32.mxu0 %vm153_vm0, %v11338_v4 }
  0x44   :  { %9866 = vmatprep.mubr.msk.f32.mxu1 %vm153_vm0, %v11343_v5 }
  0x46   :  { %9273 = vmatmul.mubr.msk.f32.gmra.mrb[30].mxu0 %vm153_vm0, %v11354_v6 }
  0x47   :  { %9867 = vmatmul.mubr.msk.f32.gmra.mrb[30].mxu1 %vm153_vm0, %v11361_v7  ;;  %9275 = vmatprep.mubr.msk.f32.mxu0 %vm153_vm0, %v11366_v8 }
  0x48   :  { %9869 = vmatprep.mubr.msk.f32.mxu1 %vm153_vm0, %v11371_v9 }
  0x4a   :  { %9276 = vmatmul.mubr.msk.f32.gmra.mrb[32].mxu0 %vm153_vm0, %v11382_v10 }
  0x4b   :  { %9870 = vmatmul.mubr.msk.f32.gmra.mrb[32].mxu1 %vm153_vm0, %v11389_v11  ;;  %9278 = vmatprep.mubr.msk.f32.mxu0 %vm153_vm0, %v11394_v12 }
  0x4c   :  { %9872 = vmatprep.mubr.msk.f32.mxu1 %vm153_vm0, %v11399_v13 }
  0x4e   :  { %9279 = vmatmul.mubr.msk.f32.gmra.mrb[34].mxu0 %vm153_vm0, %v11410_v14 }
  0x4f   :  { %9873 = vmatmul.mubr.msk.f32.gmra.mrb[34].mxu1 %vm153_vm0, %v11417_v15  ;;  %9281 = vmatprep.mubr.msk.f32.mxu0 %vm153_vm0, %v11422_v16 }
  0x50   :  { %9875 = vmatprep.mubr.msk.f32.mxu1 %vm153_vm0, %v11427_v17 }
  0x52   :  { %9282 = vmatmul.mubr.msk.f32.gmra.mrb[36].mxu0 %vm153_vm0, %v11438_v18 }
  0x53   :  { %9876 = vmatmul.mubr.msk.f32.gmra.mrb[36].mxu1 %vm153_vm0, %v11445_v19  ;;  %9284 = vmatprep.mubr.msk.f32.mxu0 %vm153_vm0, %v11450_v20 }
  0x54   :  { %9878 = vmatprep.mubr.msk.f32.mxu1 %vm153_vm0, %v11455_v21 }
  0x56   :  { %9285 = vmatmul.mubr.msk.f32.gmra.mrb[38].mxu0 %vm153_vm0, %v11466_v22 }
  0x57   :  { %9879 = vmatmul.mubr.msk.f32.gmra.mrb[38].mxu1 %vm153_vm0, %v11473_v23  ;;  %9287 = vmatprep.mubr.msk.f32.mxu0 %vm153_vm0, %v11478_v24 }
  0x58   :  { %9881 = vmatprep.mubr.msk.f32.mxu1 %vm153_vm0, %v11483_v25 }
  0x5a   :  { %9288 = vmatmul.mubr.msk.f32.gmra.mrb[40].mxu0 %vm153_vm0, %v11494_v26 }
  0x5b   :  { %9882 = vmatmul.mubr.msk.f32.gmra.mrb[40].mxu1 %vm153_vm0, %v11501_v27  ;;  %9290 = vmatprep.mubr.msk.f32.mxu0 %vm153_vm0, %v11506_v28 }
  0x5c   :  { %9884 = vmatprep.mubr.msk.f32.mxu1 %vm153_vm0, %v11511_v29 }
  0x5e   :  { %9291 = vmatmul.mubr.msk.f32.gmra.mrb[42].mxu0 %vm153_vm0, %v11522_v30 }
  0x5f   :  { %9885 = vmatmul.mubr.msk.f32.gmra.mrb[42].mxu1 %vm153_vm0, %v11529_v31  ;;  %9293 = vmatprep.mubr.msk.f32.mxu0 %vm153_vm0, %v11534_v32 }
  0x60   :  { %9887 = vmatprep.mubr.msk.f32.mxu1 %vm153_vm0, %v11539_v33 }
  0x62   :  { %9294 = vmatmul.mubr.msk.f32.gmra.mrb[44].mxu0 %vm153_vm0, %v11550_v34 }
  0x63   :  { %9888 = vmatmul.mubr.msk.f32.gmra.mrb[44].mxu1 %vm153_vm0, %v11557_v35  ;;  %9296 = vmatprep.mubr.msk.f32.mxu0 %vm153_vm0, %v11562_v36  ;;  %v11864_v36 = vld [vmem:[%s17413_s0 + $0x238] sm:$0xff] }
  0x64   :  { %9890 = vmatprep.mubr.msk.f32.mxu1 %vm153_vm0, %v11567_v37  ;;  %v11613_v37 = vld [vmem:[%s17413_s0 + $0x5e8] sm:$0xff]  ;;  %17616 = vst [vmem:[#allocation45_spill] sm:$0xff] %v11864_v36  ;;  %v11873_v35 = vld [vmem:[%s17413_s0 + $0x678] sm:$0xff] }
  0x65   :  { %17581 = vst [vmem:[#allocation10_spill] sm:$0xff] %v11613_v37  ;;  %17617 = vst [vmem:[#allocation46_spill] sm:$0xff] %v11873_v35 }
  0x66   :  { %9297 = vmatmul.mubr.msk.f32.gmra.mrb[46].mxu0 %vm153_vm0, %v11578_v38  ;;  %v11641_v38 = vld [vmem:[%s17413_s0 + $0x5f8] sm:$0xff] }
  0x67   :  { %9891 = vmatmul.mubr.msk.f32.gmra.mrb[46].mxu1 %vm153_vm0, %v11585_v39  ;;  %9299 = vmatprep.mubr.msk.f32.mxu0 %vm153_vm0, %v11590_v40  ;;  %v11618_v39 = vld [vmem:[%s17413_s0 + $0x1b0] sm:$0xff]  ;;  %17585 = vst [vmem:[#allocation14_spill] sm:$0xff] %v11641_v38 }
  0x68   :  { %9893 = vmatprep.mubr.msk.f32.mxu1 %vm153_vm0, %v11595_v41  ;;  %17582 = vst [vmem:[#allocation11_spill] sm:$0xff] %v11618_v39  ;;  %v11623_v40 = vld [vmem:[%s17413_s0 + $0x5f0] sm:$0xff]  ;;  %v11634_v41 = vld [vmem:[%s17413_s0 + $0x1b8] sm:$0xff] }
  0x69   :  { %17583 = vst [vmem:[#allocation12_spill] sm:$0xff] %v11623_v40  ;;  %17584 = vst [vmem:[#allocation13_spill] sm:$0xff] %v11634_v41 }
  0x6a   :  { %9300 = vmatmul.mubr.msk.f32.gmra.mrb[48].mxu0 %vm153_vm0, %v11606_v49  ;;  %v11669_v49 = vld [vmem:[%s17413_s0 + $0x608] sm:$0xff] }
  0x6b   :  { %9894 = vmatmul.mubr.msk.f32.gmra.mrb[48].mxu1 %vm153_vm0, %v11613_v37  ;;  %9302 = vmatprep.mubr.msk.f32.mxu0 %vm153_vm0, %v11618_v39  ;;  %v11646_v37 = vld [vmem:[%s17413_s0 + $0x1c0] sm:$0xff]  ;;  %17589 = vst [vmem:[#allocation18_spill] sm:$0xff] %v11669_v49 }
  0x6c   :  { %9896 = vmatprep.mubr.msk.f32.mxu1 %vm153_vm0, %v11623_v40  ;;  %17586 = vst [vmem:[#allocation15_spill] sm:$0xff] %v11646_v37  ;;  %v11651_v39 = vld [vmem:[%s17413_s0 + $0x600] sm:$0xff]  ;;  %v11662_v40 = vld [vmem:[%s17413_s0 + $0x1c8] sm:$0xff] }
  0x6d   :  { %17587 = vst [vmem:[#allocation16_spill] sm:$0xff] %v11651_v39  ;;  %17588 = vst [vmem:[#allocation17_spill] sm:$0xff] %v11662_v40 }
  0x6e   :  { %9303 = vmatmul.mubr.msk.f32.gmra.mrb[50].mxu0 %vm153_vm0, %v11634_v41  ;;  %v11697_v41 = vld [vmem:[%s17413_s0 + $0x618] sm:$0xff] }
  0x6f   :  { %9897 = vmatmul.mubr.msk.f32.gmra.mrb[50].mxu1 %vm153_vm0, %v11641_v38  ;;  %9305 = vmatprep.mubr.msk.f32.mxu0 %vm153_vm0, %v11646_v37  ;;  %v11674_v38 = vld [vmem:[%s17413_s0 + $0x1d0] sm:$0xff]  ;;  %17593 = vst [vmem:[#allocation22_spill] sm:$0xff] %v11697_v41 }
  0x70   :  { %9899 = vmatprep.mubr.msk.f32.mxu1 %vm153_vm0, %v11651_v39  ;;  %17590 = vst [vmem:[#allocation19_spill] sm:$0xff] %v11674_v38  ;;  %v11679_v37 = vld [vmem:[%s17413_s0 + $0x610] sm:$0xff]  ;;  %v11690_v39 = vld [vmem:[%s17413_s0 + $0x1d8] sm:$0xff] }
  0x71   :  { %17591 = vst [vmem:[#allocation20_spill] sm:$0xff] %v11679_v37  ;;  %17592 = vst [vmem:[#allocation21_spill] sm:$0xff] %v11690_v39 }
  0x72   :  { %9306 = vmatmul.mubr.msk.f32.gmra.mrb[52].mxu0 %vm153_vm0, %v11662_v40  ;;  %v11725_v40 = vld [vmem:[%s17413_s0 + $0x628] sm:$0xff] }
  0x73   :  { %9900 = vmatmul.mubr.msk.f32.gmra.mrb[52].mxu1 %vm153_vm0, %v11669_v49  ;;  %9308 = vmatprep.mubr.msk.f32.mxu0 %vm153_vm0, %v11674_v38  ;;  %v11702_v49 = vld [vmem:[%s17413_s0 + $0x1e0] sm:$0xff]  ;;  %17597 = vst [vmem:[#allocation26_spill] sm:$0xff] %v11725_v40 }
  0x74   :  { %9902 = vmatprep.mubr.msk.f32.mxu1 %vm153_vm0, %v11679_v37  ;;  %17594 = vst [vmem:[#allocation23_spill] sm:$0xff] %v11702_v49  ;;  %v11707_v38 = vld [vmem:[%s17413_s0 + $0x620] sm:$0xff]  ;;  %v11718_v37 = vld [vmem:[%s17413_s0 + $0x1e8] sm:$0xff] }
  0x75   :  { %17595 = vst [vmem:[#allocation24_spill] sm:$0xff] %v11707_v38  ;;  %17596 = vst [vmem:[#allocation25_spill] sm:$0xff] %v11718_v37 }
  0x76   :  { %9309 = vmatmul.mubr.msk.f32.gmra.mrb[54].mxu0 %vm153_vm0, %v11690_v39  ;;  %v11753_v39 = vld [vmem:[%s17413_s0 + $0x638] sm:$0xff] }
  0x77   :  { %9903 = vmatmul.mubr.msk.f32.gmra.mrb[54].mxu1 %vm153_vm0, %v11697_v41  ;;  %9311 = vmatprep.mubr.msk.f32.mxu0 %vm153_vm0, %v11702_v49  ;;  %v11730_v41 = vld [vmem:[%s17413_s0 + $0x1f0] sm:$0xff]  ;;  %17601 = vst [vmem:[#allocation30_spill] sm:$0xff] %v11753_v39 }
  0x78   :  { %9905 = vmatprep.mubr.msk.f32.mxu1 %vm153_vm0, %v11707_v38  ;;  %17598 = vst [vmem:[#allocation27_spill] sm:$0xff] %v11730_v41  ;;  %v11735_v49 = vld [vmem:[%s17413_s0 + $0x630] sm:$0xff]  ;;  %v11746_v38 = vld [vmem:[%s17413_s0 + $0x1f8] sm:$0xff] }
  0x79   :  { %17599 = vst [vmem:[#allocation28_spill] sm:$0xff] %v11735_v49  ;;  %17600 = vst [vmem:[#allocation29_spill] sm:$0xff] %v11746_v38 }
  0x7a   :  { %9312 = vmatmul.mubr.msk.f32.gmra.mrb[56].mxu0 %vm153_vm0, %v11718_v37  ;;  %v11781_v37 = vld [vmem:[%s17413_s0 + $0x648] sm:$0xff] }
  0x7b   :  { %9906 = vmatmul.mubr.msk.f32.gmra.mrb[56].mxu1 %vm153_vm0, %v11725_v40  ;;  %9314 = vmatprep.mubr.msk.f32.mxu0 %vm153_vm0, %v11730_v41  ;;  %v11758_v40 = vld [vmem:[%s17413_s0 + $0x200] sm:$0xff]  ;;  %17605 = vst [vmem:[#allocation34_spill] sm:$0xff] %v11781_v37 }
  0x7c   :  { %9908 = vmatprep.mubr.msk.f32.mxu1 %vm153_vm0, %v11735_v49  ;;  %17602 = vst [vmem:[#allocation31_spill] sm:$0xff] %v11758_v40  ;;  %v11763_v41 = vld [vmem:[%s17413_s0 + $0x640] sm:$0xff]  ;;  %v11774_v49 = vld [vmem:[%s17413_s0 + $0x208] sm:$0xff] }
  0x7d   :  { %17603 = vst [vmem:[#allocation32_spill] sm:$0xff] %v11763_v41  ;;  %17604 = vst [vmem:[#allocation33_spill] sm:$0xff] %v11774_v49 }
  0x7e   :  { %9315 = vmatmul.mubr.msk.f32.gmra.mrb[58].mxu0 %vm153_vm0, %v11746_v38  ;;  %v11809_v38 = vld [vmem:[%s17413_s0 + $0x658] sm:$0xff] }
  0x7f   :  { %9909 = vmatmul.mubr.msk.f32.gmra.mrb[58].mxu1 %vm153_vm0, %v11753_v39  ;;  %9317 = vmatprep.mubr.msk.f32.mxu0 %vm153_vm0, %v11758_v40  ;;  %v11786_v39 = vld [vmem:[%s17413_s0 + $0x210] sm:$0xff]  ;;  %17609 = vst [vmem:[#allocation38_spill] sm:$0xff] %v11809_v38 }
  0x80   :  { %9911 = vmatprep.mubr.msk.f32.mxu1 %vm153_vm0, %v11763_v41  ;;  %17606 = vst [vmem:[#allocation35_spill] sm:$0xff] %v11786_v39  ;;  %v11791_v40 = vld [vmem:[%s17413_s0 + $0x650] sm:$0xff]  ;;  %v11802_v41 = vld [vmem:[%s17413_s0 + $0x218] sm:$0xff] }
  0x81   :  { %17607 = vst [vmem:[#allocation36_spill] sm:$0xff] %v11791_v40  ;;  %17608 = vst [vmem:[#allocation37_spill] sm:$0xff] %v11802_v41 }
  0x82   :  { %9318 = vmatmul.mubr.msk.f32.gmra.mrb[60].mxu0 %vm153_vm0, %v11774_v49  ;;  %v11837_v49 = vld [vmem:[%s17413_s0 + $0x668] sm:$0xff] }
  0x83   :  { %9912 = vmatmul.mubr.msk.f32.gmra.mrb[60].mxu1 %vm153_vm0, %v11781_v37  ;;  %9320 = vmatprep.mubr.msk.f32.mxu0 %vm153_vm0, %v11786_v39  ;;  %v11814_v37 = vld [vmem:[%s17413_s0 + $0x220] sm:$0xff]  ;;  %17613 = vst [vmem:[#allocation42_spill] sm:$0xff] %v11837_v49 }
  0x84   :  { %9914 = vmatprep.mubr.msk.f32.mxu1 %vm153_vm0, %v11791_v40  ;;  %17610 = vst [vmem:[#allocation39_spill] sm:$0xff] %v11814_v37  ;;  %v11819_v39 = vld [vmem:[%s17413_s0 + $0x660] sm:$0xff]  ;;  %v11830_v40 = vld [vmem:[%s17413_s0 + $0x228] sm:$0xff] }
  0x85   :  { %17611 = vst [vmem:[#allocation40_spill] sm:$0xff] %v11819_v39  ;;  %17612 = vst [vmem:[#allocation41_spill] sm:$0xff] %v11830_v40 }
  0x86   :  { %9321 = vmatmul.mubr.msk.f32.gmra.mrb[62].mxu0 %vm153_vm0, %v11802_v41  ;;  %v7915_v41 = vld [vmem:[%s17412_s1 + $0x38] sm:$0xff] }
  0x87   :  { %9915 = vmatmul.mubr.msk.f32.gmra.mrb[62].mxu1 %vm153_vm0, %v11809_v38  ;;  %9323 = vmatprep.mubr.msk.f32.mxu0 %vm153_vm0, %v11814_v37  ;;  %v11842_v38 = vld [vmem:[%s17413_s0 + $0x230] sm:$0xff] }
  0x88   :  { %9917 = vmatprep.mubr.msk.f32.mxu1 %vm153_vm0, %v11819_v39  ;;  %17614 = vst [vmem:[#allocation43_spill] sm:$0xff] %v11842_v38  ;;  %v11847_v37 = vld [vmem:[%s17413_s0 + $0x670] sm:$0xff] }
  0x89   :  { %17615 = vst [vmem:[#allocation44_spill] sm:$0xff] %v11847_v37  ;;  %v7914_v39 = vld [vmem:[%s17412_s1 + $0x30] sm:$0xff] }
  0x8a   :  { %9324 = vmatmul.mubr.msk.f32.gmra.mrb[64].mxu0 %vm153_vm0, %v11830_v40  ;;  %v11866_v40 = vpack.c.bf16 %v7915_v41, %v7914_v39  ;;  %v11896_v39 = vld [vmem:[%s17413_s0 + $0x248] sm:$0xff] }
  0x8b   :  { %9918 = vmatmul.mubr.msk.f32.gmra.mrb[64].mxu1 %vm153_vm0, %v11837_v49  ;;  %9326 = vmatprep.mubr.msk.f32.mxu0 %vm153_vm0, %v11842_v38  ;;  %v11878_v49 = vld [vmem:[%s17413_s0 + $0x240] sm:$0xff]  ;;  %17620 = vst [vmem:[#allocation49_spill] sm:$0xff] %v11896_v39  ;;  %v11903_v41 = vld [vmem:[%s17413_s0 + $0x688] sm:$0xff] }
  0x8c   :  { %9920 = vmatprep.mubr.msk.f32.mxu1 %vm153_vm0, %v11847_v37  ;;  %17618 = vst [vmem:[#allocation47_spill] sm:$0xff] %v11878_v49  ;;  %v11883_v38 = vld [vmem:[%s17413_s0 + $0x680] sm:$0xff]  ;;  %10418 = vmatprep.subr.bf16.mxu0 %v11866_v40  ;;  %17621 = vst [vmem:[#allocation50_spill] sm:$0xff] %v11903_v41  ;;  %v147_v37 = vld [vmem:[%s17413_s0 + $0x410] sm:$0xff] }
  0x8d   :  { %17619 = vst [vmem:[#allocation48_spill] sm:$0xff] %v11883_v38  ;;  %10430 = vmatprep.subr.bf16.mxu1 %v11866_v40 }
  0x8e   :  { %9327 = vmatmul.mubr.msk.f32.gmra.mrb[66].mxu0 %vm153_vm0, %v11864_v36  ;;  %v11931_v36 = vld [vmem:[%s17413_s0 + $0x698] sm:$0xff] }
  0x8f   :  { %9921 = vmatmul.mubr.msk.f32.gmra.mrb[66].mxu1 %vm153_vm0, %v11873_v35  ;;  %9329 = vmatprep.mubr.msk.f32.mxu0 %vm153_vm0, %v11878_v49  ;;  %v11908_v35 = vld [vmem:[%s17413_s0 + $0x250] sm:$0xff]  ;;  %17625 = vst [vmem:[#allocation54_spill] sm:$0xff] %v11931_v36 }
  0x90   :  { %9923 = vmatprep.mubr.msk.f32.mxu1 %vm153_vm0, %v11883_v38  ;;  %17622 = vst [vmem:[#allocation51_spill] sm:$0xff] %v11908_v35  ;;  %v11913_v49 = vld [vmem:[%s17413_s0 + $0x690] sm:$0xff]  ;;  %v11924_v38 = vld [vmem:[%s17413_s0 + $0x258] sm:$0xff] }
  0x91   :  { %17623 = vst [vmem:[#allocation52_spill] sm:$0xff] %v11913_v49  ;;  %17624 = vst [vmem:[#allocation53_spill] sm:$0xff] %v11924_v38 }
  0x92   :  { %9330 = vmatmul.mubr.msk.f32.gmra.mrb[68].mxu0 %vm153_vm0, %v11896_v39  ;;  %v11959_v39 = vld [vmem:[%s17413_s0 + $0x6a8] sm:$0xff] }
  0x93   :  { %9924 = vmatmul.mubr.msk.f32.gmra.mrb[68].mxu1 %vm153_vm0, %v11903_v41  ;;  %9332 = vmatprep.mubr.msk.f32.mxu0 %vm153_vm0, %v11908_v35  ;;  %v11936_v41 = vld [vmem:[%s17413_s0 + $0x260] sm:$0xff]  ;;  %17629 = vst [vmem:[#allocation58_spill] sm:$0xff] %v11959_v39 }
  0x94   :  { %9926 = vmatprep.mubr.msk.f32.mxu1 %vm153_vm0, %v11913_v49  ;;  %17626 = vst [vmem:[#allocation55_spill] sm:$0xff] %v11936_v41  ;;  %v11941_v35 = vld [vmem:[%s17413_s0 + $0x6a0] sm:$0xff]  ;;  %v11952_v49 = vld [vmem:[%s17413_s0 + $0x268] sm:$0xff] }
  0x95   :  { %17627 = vst [vmem:[#allocation56_spill] sm:$0xff] %v11941_v35  ;;  %17628 = vst [vmem:[#allocation57_spill] sm:$0xff] %v11952_v49 }
  0x96   :  { %9333 = vmatmul.mubr.msk.f32.gmra.mrb[70].mxu0 %vm153_vm0, %v11924_v38  ;;  %v11987_v38 = vld [vmem:[%s17413_s0 + $0x6b8] sm:$0xff] }
  0x97   :  { %9927 = vmatmul.mubr.msk.f32.gmra.mrb[70].mxu1 %vm153_vm0, %v11931_v36  ;;  %9335 = vmatprep.mubr.msk.f32.mxu0 %vm153_vm0, %v11936_v41  ;;  %v11964_v36 = vld [vmem:[%s17413_s0 + $0x270] sm:$0xff]  ;;  %17633 = vst [vmem:[#allocation62_spill] sm:$0xff] %v11987_v38 }
  0x98   :  { %9929 = vmatprep.mubr.msk.f32.mxu1 %vm153_vm0, %v11941_v35  ;;  %17630 = vst [vmem:[#allocation59_spill] sm:$0xff] %v11964_v36  ;;  %v11969_v41 = vld [vmem:[%s17413_s0 + $0x6b0] sm:$0xff]  ;;  %v11980_v35 = vld [vmem:[%s17413_s0 + $0x278] sm:$0xff] }
  0x99   :  { %17631 = vst [vmem:[#allocation60_spill] sm:$0xff] %v11969_v41  ;;  %17632 = vst [vmem:[#allocation61_spill] sm:$0xff] %v11980_v35 }
  0x9a   :  { %9336 = vmatmul.mubr.msk.f32.gmra.mrb[72].mxu0 %vm153_vm0, %v11952_v49  ;;  %v12015_v49 = vld [vmem:[%s17413_s0 + $0x6c8] sm:$0xff] }
  0x9b   :  { %9930 = vmatmul.mubr.msk.f32.gmra.mrb[72].mxu1 %vm153_vm0, %v11959_v39  ;;  %9338 = vmatprep.mubr.msk.f32.mxu0 %vm153_vm0, %v11964_v36  ;;  %v11992_v39 = vld [vmem:[%s17413_s0 + $0x280] sm:$0xff]  ;;  %17637 = vst [vmem:[#allocation66_spill] sm:$0xff] %v12015_v49 }
  0x9c   :  { %9932 = vmatprep.mubr.msk.f32.mxu1 %vm153_vm0, %v11969_v41  ;;  %17634 = vst [vmem:[#allocation63_spill] sm:$0xff] %v11992_v39  ;;  %v11997_v36 = vld [vmem:[%s17413_s0 + $0x6c0] sm:$0xff]  ;;  %v12008_v41 = vld [vmem:[%s17413_s0 + $0x288] sm:$0xff] }
  0x9d   :  { %17635 = vst [vmem:[#allocation64_spill] sm:$0xff] %v11997_v36  ;;  %17636 = vst [vmem:[#allocation65_spill] sm:$0xff] %v12008_v41 }
  0x9e   :  { %9339 = vmatmul.mubr.msk.f32.gmra.mrb[74].mxu0 %vm153_vm0, %v11980_v35  ;;  %v12043_v35 = vld [vmem:[%s17413_s0 + $0x6d8] sm:$0xff] }
  0x9f   :  { %9933 = vmatmul.mubr.msk.f32.gmra.mrb[74].mxu1 %vm153_vm0, %v11987_v38  ;;  %9341 = vmatprep.mubr.msk.f32.mxu0 %vm153_vm0, %v11992_v39  ;;  %v12020_v38 = vld [vmem:[%s17413_s0 + $0x290] sm:$0xff]  ;;  %17641 = vst [vmem:[#allocation70_spill] sm:$0xff] %v12043_v35 }
  0xa0   :  { %9935 = vmatprep.mubr.msk.f32.mxu1 %vm153_vm0, %v11997_v36  ;;  %17638 = vst [vmem:[#allocation67_spill] sm:$0xff] %v12020_v38  ;;  %v12025_v39 = vld [vmem:[%s17413_s0 + $0x6d0] sm:$0xff]  ;;  %v12036_v36 = vld [vmem:[%s17413_s0 + $0x298] sm:$0xff] }
  0xa1   :  { %17639 = vst [vmem:[#allocation68_spill] sm:$0xff] %v12025_v39  ;;  %17640 = vst [vmem:[#allocation69_spill] sm:$0xff] %v12036_v36 }
  0xa2   :  { %9342 = vmatmul.mubr.msk.f32.gmra.mrb[76].mxu0 %vm153_vm0, %v12008_v41  ;;  %v12071_v41 = vld [vmem:[%s17413_s0 + $0x6e8] sm:$0xff] }
  0xa3   :  { %9936 = vmatmul.mubr.msk.f32.gmra.mrb[76].mxu1 %vm153_vm0, %v12015_v49  ;;  %9344 = vmatprep.mubr.msk.f32.mxu0 %vm153_vm0, %v12020_v38  ;;  %v12048_v49 = vld [vmem:[%s17413_s0 + $0x2a0] sm:$0xff]  ;;  %17645 = vst [vmem:[#allocation74_spill] sm:$0xff] %v12071_v41 }
  0xa4   :  { %9938 = vmatprep.mubr.msk.f32.mxu1 %vm153_vm0, %v12025_v39  ;;  %17642 = vst [vmem:[#allocation71_spill] sm:$0xff] %v12048_v49  ;;  %v12053_v38 = vld [vmem:[%s17413_s0 + $0x6e0] sm:$0xff]  ;;  %v12064_v39 = vld [vmem:[%s17413_s0 + $0x2a8] sm:$0xff] }
  0xa5   :  { %17643 = vst [vmem:[#allocation72_spill] sm:$0xff] %v12053_v38  ;;  %17644 = vst [vmem:[#allocation73_spill] sm:$0xff] %v12064_v39 }
  0xa6   :  { %9345 = vmatmul.mubr.msk.f32.gmra.mrb[78].mxu0 %vm153_vm0, %v12036_v36  ;;  %v12099_v36 = vld [vmem:[%s17413_s0 + $0x6f8] sm:$0xff] }
  0xa7   :  { %9939 = vmatmul.mubr.msk.f32.gmra.mrb[78].mxu1 %vm153_vm0, %v12043_v35  ;;  %9347 = vmatprep.mubr.msk.f32.mxu0 %vm153_vm0, %v12048_v49  ;;  %v12076_v35 = vld [vmem:[%s17413_s0 + $0x2b0] sm:$0xff]  ;;  %17649 = vst [vmem:[#allocation78_spill] sm:$0xff] %v12099_v36 }
  0xa8   :  { %9941 = vmatprep.mubr.msk.f32.mxu1 %vm153_vm0, %v12053_v38  ;;  %17646 = vst [vmem:[#allocation75_spill] sm:$0xff] %v12076_v35  ;;  %v12081_v49 = vld [vmem:[%s17413_s0 + $0x6f0] sm:$0xff]  ;;  %v12092_v38 = vld [vmem:[%s17413_s0 + $0x2b8] sm:$0xff] }
  0xa9   :  { %17647 = vst [vmem:[#allocation76_spill] sm:$0xff] %v12081_v49  ;;  %17648 = vst [vmem:[#allocation77_spill] sm:$0xff] %v12092_v38 }
  0xaa   :  { %9348 = vmatmul.mubr.msk.f32.gmra.mrb[80].mxu0 %vm153_vm0, %v12064_v39  ;;  %v12127_v39 = vld [vmem:[%s17413_s0 + $0x708] sm:$0xff] }
  0xab   :  { %9942 = vmatmul.mubr.msk.f32.gmra.mrb[80].mxu1 %vm153_vm0, %v12071_v41  ;;  %9350 = vmatprep.mubr.msk.f32.mxu0 %vm153_vm0, %v12076_v35  ;;  %v12104_v41 = vld [vmem:[%s17413_s0 + $0x2c0] sm:$0xff]  ;;  %17653 = vst [vmem:[#allocation82_spill] sm:$0xff] %v12127_v39 }
  0xac   :  { %9944 = vmatprep.mubr.msk.f32.mxu1 %vm153_vm0, %v12081_v49  ;;  %17650 = vst [vmem:[#allocation79_spill] sm:$0xff] %v12104_v41  ;;  %v12109_v35 = vld [vmem:[%s17413_s0 + $0x700] sm:$0xff]  ;;  %v12120_v49 = vld [vmem:[%s17413_s0 + $0x2c8] sm:$0xff] }
  0xad   :  { %17651 = vst [vmem:[#allocation80_spill] sm:$0xff] %v12109_v35  ;;  %17652 = vst [vmem:[#allocation81_spill] sm:$0xff] %v12120_v49 }
  0xae   :  { %9351 = vmatmul.mubr.msk.f32.gmra.mrb[82].mxu0 %vm153_vm0, %v12092_v38  ;;  %v12155_v38 = vld [vmem:[%s17413_s0 + $0x718] sm:$0xff] }
  0xaf   :  { %9945 = vmatmul.mubr.msk.f32.gmra.mrb[82].mxu1 %vm153_vm0, %v12099_v36  ;;  %9353 = vmatprep.mubr.msk.f32.mxu0 %vm153_vm0, %v12104_v41  ;;  %v12132_v36 = vld [vmem:[%s17413_s0 + $0x2d0] sm:$0xff]  ;;  %17657 = vst [vmem:[#allocation86_spill] sm:$0xff] %v12155_v38 }
  0xb0   :  { %9947 = vmatprep.mubr.msk.f32.mxu1 %vm153_vm0, %v12109_v35  ;;  %17654 = vst [vmem:[#allocation83_spill] sm:$0xff] %v12132_v36  ;;  %v12137_v41 = vld [vmem:[%s17413_s0 + $0x710] sm:$0xff]  ;;  %v12148_v35 = vld [vmem:[%s17413_s0 + $0x2d8] sm:$0xff] }
  0xb1   :  { %17655 = vst [vmem:[#allocation84_spill] sm:$0xff] %v12137_v41  ;;  %17656 = vst [vmem:[#allocation85_spill] sm:$0xff] %v12148_v35 }
  0xb2   :  { %9354 = vmatmul.mubr.msk.f32.gmra.mrb[84].mxu0 %vm153_vm0, %v12120_v49  ;;  %v12183_v49 = vld [vmem:[%s17413_s0 + $0x728] sm:$0xff] }
  0xb3   :  { %9948 = vmatmul.mubr.msk.f32.gmra.mrb[84].mxu1 %vm153_vm0, %v12127_v39  ;;  %9356 = vmatprep.mubr.msk.f32.mxu0 %vm153_vm0, %v12132_v36  ;;  %v12160_v39 = vld [vmem:[%s17413_s0 + $0x2e0] sm:$0xff]  ;;  %17661 = vst [vmem:[#allocation90_spill] sm:$0xff] %v12183_v49 }
  0xb4   :  { %9950 = vmatprep.mubr.msk.f32.mxu1 %vm153_vm0, %v12137_v41  ;;  %17658 = vst [vmem:[#allocation87_spill] sm:$0xff] %v12160_v39  ;;  %v12165_v36 = vld [vmem:[%s17413_s0 + $0x720] sm:$0xff]  ;;  %v12176_v41 = vld [vmem:[%s17413_s0 + $0x2e8] sm:$0xff] }
  0xb5   :  { %17659 = vst [vmem:[#allocation88_spill] sm:$0xff] %v12165_v36  ;;  %17660 = vst [vmem:[#allocation89_spill] sm:$0xff] %v12176_v41 }
  0xb6   :  { %9357 = vmatmul.mubr.msk.f32.gmra.mrb[86].mxu0 %vm153_vm0, %v12148_v35  ;;  %v12211_v35 = vld [vmem:[%s17413_s0 + $0x738] sm:$0xff] }
  0xb7   :  { %9951 = vmatmul.mubr.msk.f32.gmra.mrb[86].mxu1 %vm153_vm0, %v12155_v38  ;;  %9359 = vmatprep.mubr.msk.f32.mxu0 %vm153_vm0, %v12160_v39  ;;  %v12188_v38 = vld [vmem:[%s17413_s0 + $0x2f0] sm:$0xff]  ;;  %17665 = vst [vmem:[#allocation94_spill] sm:$0xff] %v12211_v35 }
  0xb8   :  { %9953 = vmatprep.mubr.msk.f32.mxu1 %vm153_vm0, %v12165_v36  ;;  %17662 = vst [vmem:[#allocation91_spill] sm:$0xff] %v12188_v38  ;;  %v12193_v39 = vld [vmem:[%s17413_s0 + $0x730] sm:$0xff]  ;;  %v12204_v36 = vld [vmem:[%s17413_s0 + $0x2f8] sm:$0xff] }
  0xb9   :  { %17663 = vst [vmem:[#allocation92_spill] sm:$0xff] %v12193_v39  ;;  %17664 = vst [vmem:[#allocation93_spill] sm:$0xff] %v12204_v36 }
  0xba   :  { %9360 = vmatmul.mubr.msk.f32.gmra.mrb[88].mxu0 %vm153_vm0, %v12176_v41  ;;  %v12239_v41 = vld [vmem:[%s17413_s0 + $0x748] sm:$0xff] }
  0xbb   :  { %9954 = vmatmul.mubr.msk.f32.gmra.mrb[88].mxu1 %vm153_vm0, %v12183_v49  ;;  %9362 = vmatprep.mubr.msk.f32.mxu0 %vm153_vm0, %v12188_v38  ;;  %v12216_v49 = vld [vmem:[%s17413_s0 + $0x300] sm:$0xff]  ;;  %17669 = vst [vmem:[#allocation98_spill] sm:$0xff] %v12239_v41 }
  0xbc   :  { %9956 = vmatprep.mubr.msk.f32.mxu1 %vm153_vm0, %v12193_v39  ;;  %17666 = vst [vmem:[#allocation95_spill] sm:$0xff] %v12216_v49  ;;  %v12221_v38 = vld [vmem:[%s17413_s0 + $0x740] sm:$0xff]  ;;  %v12232_v39 = vld [vmem:[%s17413_s0 + $0x308] sm:$0xff] }
  0xbd   :  { %17667 = vst [vmem:[#allocation96_spill] sm:$0xff] %v12221_v38  ;;  %17668 = vst [vmem:[#allocation97_spill] sm:$0xff] %v12232_v39 }
  0xbe   :  { %9363 = vmatmul.mubr.msk.f32.gmra.mrb[90].mxu0 %vm153_vm0, %v12204_v36  ;;  %v12267_v36 = vld [vmem:[%s17413_s0 + $0x758] sm:$0xff] }
  0xbf   :  { %9957 = vmatmul.mubr.msk.f32.gmra.mrb[90].mxu1 %vm153_vm0, %v12211_v35  ;;  %9365 = vmatprep.mubr.msk.f32.mxu0 %vm153_vm0, %v12216_v49  ;;  %v12244_v35 = vld [vmem:[%s17413_s0 + $0x310] sm:$0xff]  ;;  %17673 = vst [vmem:[#allocation102_spill] sm:$0xff] %v12267_v36 }
  0xc0   :  { %9959 = vmatprep.mubr.msk.f32.mxu1 %vm153_vm0, %v12221_v38  ;;  %17670 = vst [vmem:[#allocation99_spill] sm:$0xff] %v12244_v35  ;;  %v12249_v49 = vld [vmem:[%s17413_s0 + $0x750] sm:$0xff]  ;;  %v12260_v38 = vld [vmem:[%s17413_s0 + $0x318] sm:$0xff] }
  0xc1   :  { %17671 = vst [vmem:[#allocation100_spill] sm:$0xff] %v12249_v49  ;;  %17672 = vst [vmem:[#allocation101_spill] sm:$0xff] %v12260_v38 }
  0xc2   :  { %9366 = vmatmul.mubr.msk.f32.gmra.mrb[92].mxu0 %vm153_vm0, %v12232_v39  ;;  %v12295_v39 = vld [vmem:[%s17413_s0 + $0x768] sm:$0xff] }
  0xc3   :  { %9960 = vmatmul.mubr.msk.f32.gmra.mrb[92].mxu1 %vm153_vm0, %v12239_v41  ;;  %9368 = vmatprep.mubr.msk.f32.mxu0 %vm153_vm0, %v12244_v35  ;;  %v12272_v41 = vld [vmem:[%s17413_s0 + $0x320] sm:$0xff]  ;;  %17677 = vst [vmem:[#allocation106_spill] sm:$0xff] %v12295_v39 }
  0xc4   :  { %9962 = vmatprep.mubr.msk.f32.mxu1 %vm153_vm0, %v12249_v49  ;;  %17674 = vst [vmem:[#allocation103_spill] sm:$0xff] %v12272_v41  ;;  %v12277_v35 = vld [vmem:[%s17413_s0 + $0x760] sm:$0xff]  ;;  %v12288_v49 = vld [vmem:[%s17413_s0 + $0x328] sm:$0xff] }
  0xc5   :  { %17675 = vst [vmem:[#allocation104_spill] sm:$0xff] %v12277_v35  ;;  %17676 = vst [vmem:[#allocation105_spill] sm:$0xff] %v12288_v49 }
  0xc6   :  { %9369 = vmatmul.mubr.msk.f32.gmra.mrb[94].mxu0 %vm153_vm0, %v12260_v38  ;;  %v12323_v38 = vld [vmem:[%s17413_s0 + $0x778] sm:$0xff] }
  0xc7   :  { %9963 = vmatmul.mubr.msk.f32.gmra.mrb[94].mxu1 %vm153_vm0, %v12267_v36  ;;  %9371 = vmatprep.mubr.msk.f32.mxu0 %vm153_vm0, %v12272_v41  ;;  %v12300_v36 = vld [vmem:[%s17413_s0 + $0x330] sm:$0xff]  ;;  %17681 = vst [vmem:[#allocation110_spill] sm:$0xff] %v12323_v38 }
  0xc8   :  { %9965 = vmatprep.mubr.msk.f32.mxu1 %vm153_vm0, %v12277_v35  ;;  %17678 = vst [vmem:[#allocation107_spill] sm:$0xff] %v12300_v36  ;;  %v12305_v41 = vld [vmem:[%s17413_s0 + $0x770] sm:$0xff]  ;;  %v12316_v35 = vld [vmem:[%s17413_s0 + $0x338] sm:$0xff] }
  0xc9   :  { %17679 = vst [vmem:[#allocation108_spill] sm:$0xff] %v12305_v41  ;;  %17680 = vst [vmem:[#allocation109_spill] sm:$0xff] %v12316_v35 }
  0xca   :  { %9372 = vmatmul.mubr.msk.f32.gmra.mrb[96].mxu0 %vm153_vm0, %v12288_v49  ;;  %v12351_v49 = vld [vmem:[%s17413_s0 + $0x788] sm:$0xff] }
  0xcb   :  { %9966 = vmatmul.mubr.msk.f32.gmra.mrb[96].mxu1 %vm153_vm0, %v12295_v39  ;;  %9374 = vmatprep.mubr.msk.f32.mxu0 %vm153_vm0, %v12300_v36  ;;  %v12328_v39 = vld [vmem:[%s17413_s0 + $0x340] sm:$0xff]  ;;  %17685 = vst [vmem:[#allocation114_spill] sm:$0xff] %v12351_v49 }
  0xcc   :  { %9968 = vmatprep.mubr.msk.f32.mxu1 %vm153_vm0, %v12305_v41  ;;  %17682 = vst [vmem:[#allocation111_spill] sm:$0xff] %v12328_v39  ;;  %v12333_v36 = vld [vmem:[%s17413_s0 + $0x780] sm:$0xff]  ;;  %v12344_v41 = vld [vmem:[%s17413_s0 + $0x348] sm:$0xff] }
  0xcd   :  { %17683 = vst [vmem:[#allocation112_spill] sm:$0xff] %v12333_v36  ;;  %17684 = vst [vmem:[#allocation113_spill] sm:$0xff] %v12344_v41 }
  0xce   :  { %9375 = vmatmul.mubr.msk.f32.gmra.mrb[98].mxu0 %vm153_vm0, %v12316_v35  ;;  %v12379_v35 = vld [vmem:[%s17413_s0 + $0x798] sm:$0xff] }
  0xcf   :  { %9969 = vmatmul.mubr.msk.f32.gmra.mrb[98].mxu1 %vm153_vm0, %v12323_v38  ;;  %9377 = vmatprep.mubr.msk.f32.mxu0 %vm153_vm0, %v12328_v39  ;;  %v12356_v38 = vld [vmem:[%s17413_s0 + $0x350] sm:$0xff]  ;;  %17689 = vst [vmem:[#allocation118_spill] sm:$0xff] %v12379_v35 }
  0xd0   :  { %9971 = vmatprep.mubr.msk.f32.mxu1 %vm153_vm0, %v12333_v36  ;;  %17686 = vst [vmem:[#allocation115_spill] sm:$0xff] %v12356_v38  ;;  %v12361_v39 = vld [vmem:[%s17413_s0 + $0x790] sm:$0xff]  ;;  %v12372_v36 = vld [vmem:[%s17413_s0 + $0x358] sm:$0xff] }
  0xd1   :  { %17687 = vst [vmem:[#allocation116_spill] sm:$0xff] %v12361_v39  ;;  %17688 = vst [vmem:[#allocation117_spill] sm:$0xff] %v12372_v36 }
  0xd2   :  { %9378 = vmatmul.mubr.msk.f32.gmra.mrb[100].mxu0 %vm153_vm0, %v12344_v41  ;;  %v12407_v41 = vld [vmem:[%s17413_s0 + $0x7a8] sm:$0xff] }
  0xd3   :  { %9972 = vmatmul.mubr.msk.f32.gmra.mrb[100].mxu1 %vm153_vm0, %v12351_v49  ;;  %9380 = vmatprep.mubr.msk.f32.mxu0 %vm153_vm0, %v12356_v38  ;;  %v12384_v49 = vld [vmem:[%s17413_s0 + $0x360] sm:$0xff]  ;;  %17693 = vst [vmem:[#allocation122_spill] sm:$0xff] %v12407_v41 }
  0xd4   :  { %9974 = vmatprep.mubr.msk.f32.mxu1 %vm153_vm0, %v12361_v39  ;;  %17690 = vst [vmem:[#allocation119_spill] sm:$0xff] %v12384_v49  ;;  %v12389_v38 = vld [vmem:[%s17413_s0 + $0x7a0] sm:$0xff]  ;;  %v12400_v39 = vld [vmem:[%s17413_s0 + $0x368] sm:$0xff] }
  0xd5   :  { %17691 = vst [vmem:[#allocation120_spill] sm:$0xff] %v12389_v38  ;;  %17692 = vst [vmem:[#allocation121_spill] sm:$0xff] %v12400_v39 }
  0xd6   :  { %9381 = vmatmul.mubr.msk.f32.gmra.mrb[102].mxu0 %vm153_vm0, %v12372_v36  ;;  %v12435_v36 = vld [vmem:[%s17413_s0 + $0x7b8] sm:$0xff] }
  0xd7   :  { %9975 = vmatmul.mubr.msk.f32.gmra.mrb[102].mxu1 %vm153_vm0, %v12379_v35  ;;  %9383 = vmatprep.mubr.msk.f32.mxu0 %vm153_vm0, %v12384_v49  ;;  %v12412_v35 = vld [vmem:[%s17413_s0 + $0x370] sm:$0xff]  ;;  %17697 = vst [vmem:[#allocation126_spill] sm:$0xff] %v12435_v36 }
  0xd8   :  { %9977 = vmatprep.mubr.msk.f32.mxu1 %vm153_vm0, %v12389_v38  ;;  %17694 = vst [vmem:[#allocation123_spill] sm:$0xff] %v12412_v35  ;;  %v12417_v49 = vld [vmem:[%s17413_s0 + $0x7b0] sm:$0xff]  ;;  %v12428_v38 = vld [vmem:[%s17413_s0 + $0x378] sm:$0xff] }
  0xd9   :  { %17695 = vst [vmem:[#allocation124_spill] sm:$0xff] %v12417_v49  ;;  %17696 = vst [vmem:[#allocation125_spill] sm:$0xff] %v12428_v38 }
  0xda   :  { %9384 = vmatmul.mubr.msk.f32.gmra.mrb[104].mxu0 %vm153_vm0, %v12400_v39  ;;  %v12463_v39 = vld [vmem:[%s17413_s0 + $0x7c8] sm:$0xff] }
  0xdb   :  { %9978 = vmatmul.mubr.msk.f32.gmra.mrb[104].mxu1 %vm153_vm0, %v12407_v41  ;;  %9386 = vmatprep.mubr.msk.f32.mxu0 %vm153_vm0, %v12412_v35  ;;  %v12440_v41 = vld [vmem:[%s17413_s0 + $0x380] sm:$0xff]  ;;  %17701 = vst [vmem:[#allocation130_spill] sm:$0xff] %v12463_v39 }
  0xdc   :  { %9980 = vmatprep.mubr.msk.f32.mxu1 %vm153_vm0, %v12417_v49  ;;  %17698 = vst [vmem:[#allocation127_spill] sm:$0xff] %v12440_v41  ;;  %v12445_v35 = vld [vmem:[%s17413_s0 + $0x7c0] sm:$0xff]  ;;  %v12456_v49 = vld [vmem:[%s17413_s0 + $0x388] sm:$0xff] }
  0xdd   :  { %17699 = vst [vmem:[#allocation128_spill] sm:$0xff] %v12445_v35  ;;  %17700 = vst [vmem:[#allocation129_spill] sm:$0xff] %v12456_v49 }
  0xde   :  { %9387 = vmatmul.mubr.msk.f32.gmra.mrb[106].mxu0 %vm153_vm0, %v12428_v38  ;;  %v12491_v38 = vld [vmem:[%s17413_s0 + $0x7d8] sm:$0xff] }
  0xdf   :  { %9981 = vmatmul.mubr.msk.f32.gmra.mrb[106].mxu1 %vm153_vm0, %v12435_v36  ;;  %9389 = vmatprep.mubr.msk.f32.mxu0 %vm153_vm0, %v12440_v41  ;;  %v12468_v36 = vld [vmem:[%s17413_s0 + $0x390] sm:$0xff]  ;;  %17705 = vst [vmem:[#allocation134_spill] sm:$0xff] %v12491_v38 }
  0xe0   :  { %9983 = vmatprep.mubr.msk.f32.mxu1 %vm153_vm0, %v12445_v35  ;;  %17702 = vst [vmem:[#allocation131_spill] sm:$0xff] %v12468_v36  ;;  %v12473_v41 = vld [vmem:[%s17413_s0 + $0x7d0] sm:$0xff]  ;;  %v12484_v35 = vld [vmem:[%s17413_s0 + $0x398] sm:$0xff] }
  0xe1   :  { %17703 = vst [vmem:[#allocation132_spill] sm:$0xff] %v12473_v41  ;;  %17704 = vst [vmem:[#allocation133_spill] sm:$0xff] %v12484_v35 }
  0xe2   :  { %9390 = vmatmul.mubr.msk.f32.gmra.mrb[108].mxu0 %vm153_vm0, %v12456_v49  ;;  %v12519_v49 = vld [vmem:[%s17413_s0 + $0x7e8] sm:$0xff] }
  0xe3   :  { %9984 = vmatmul.mubr.msk.f32.gmra.mrb[108].mxu1 %vm153_vm0, %v12463_v39  ;;  %9392 = vmatprep.mubr.msk.f32.mxu0 %vm153_vm0, %v12468_v36  ;;  %v12496_v39 = vld [vmem:[%s17413_s0 + $0x3a0] sm:$0xff]  ;;  %17709 = vst [vmem:[#allocation138_spill] sm:$0xff] %v12519_v49 }
  0xe4   :  { %9986 = vmatprep.mubr.msk.f32.mxu1 %vm153_vm0, %v12473_v41  ;;  %17706 = vst [vmem:[#allocation135_spill] sm:$0xff] %v12496_v39  ;;  %v12501_v36 = vld [vmem:[%s17413_s0 + $0x7e0] sm:$0xff]  ;;  %v12512_v41 = vld [vmem:[%s17413_s0 + $0x3a8] sm:$0xff] }
  0xe5   :  { %17707 = vst [vmem:[#allocation136_spill] sm:$0xff] %v12501_v36  ;;  %17708 = vst [vmem:[#allocation137_spill] sm:$0xff] %v12512_v41 }
  0xe6   :  { %9393 = vmatmul.mubr.msk.f32.gmra.mrb[110].mxu0 %vm153_vm0, %v12484_v35  ;;  %v12547_v35 = vld [vmem:[%s17413_s0 + $0x7f8] sm:$0xff] }
  0xe7   :  { %9987 = vmatmul.mubr.msk.f32.gmra.mrb[110].mxu1 %vm153_vm0, %v12491_v38  ;;  %9395 = vmatprep.mubr.msk.f32.mxu0 %vm153_vm0, %v12496_v39  ;;  %v12524_v38 = vld [vmem:[%s17413_s0 + $0x3b0] sm:$0xff]  ;;  %17713 = vst [vmem:[#allocation142_spill] sm:$0xff] %v12547_v35 }
  0xe8   :  { %9989 = vmatprep.mubr.msk.f32.mxu1 %vm153_vm0, %v12501_v36  ;;  %17710 = vst [vmem:[#allocation139_spill] sm:$0xff] %v12524_v38  ;;  %v12529_v39 = vld [vmem:[%s17413_s0 + $0x7f0] sm:$0xff]  ;;  %v12540_v36 = vld [vmem:[%s17413_s0 + $0x3b8] sm:$0xff] }
  0xe9   :  { %17711 = vst [vmem:[#allocation140_spill] sm:$0xff] %v12529_v39  ;;  %17712 = vst [vmem:[#allocation141_spill] sm:$0xff] %v12540_v36 }
  0xea   :  { %9396 = vmatmul.mubr.msk.f32.gmra.mrb[112].mxu0 %vm153_vm0, %v12512_v41  ;;  %v12575_v41 = vld [vmem:[%s17413_s0 + $0x808] sm:$0xff] }
  0xeb   :  { %9990 = vmatmul.mubr.msk.f32.gmra.mrb[112].mxu1 %vm153_vm0, %v12519_v49  ;;  %9398 = vmatprep.mubr.msk.f32.mxu0 %vm153_vm0, %v12524_v38  ;;  %v12552_v49 = vld [vmem:[%s17413_s0 + $0x3c0] sm:$0xff]  ;;  %17717 = vst [vmem:[#allocation146_spill] sm:$0xff] %v12575_v41 }
  0xec   :  { %9992 = vmatprep.mubr.msk.f32.mxu1 %vm153_vm0, %v12529_v39  ;;  %17714 = vst [vmem:[#allocation143_spill] sm:$0xff] %v12552_v49  ;;  %v12557_v38 = vld [vmem:[%s17413_s0 + $0x800] sm:$0xff]  ;;  %v12568_v39 = vld [vmem:[%s17413_s0 + $0x3c8] sm:$0xff] }
  0xed   :  { %17715 = vst [vmem:[#allocation144_spill] sm:$0xff] %v12557_v38  ;;  %17716 = vst [vmem:[#allocation145_spill] sm:$0xff] %v12568_v39 }
  0xee   :  { %9399 = vmatmul.mubr.msk.f32.gmra.mrb[114].mxu0 %vm153_vm0, %v12540_v36  ;;  %v12603_v36 = vld [vmem:[%s17413_s0 + $0x818] sm:$0xff] }
  0xef   :  { %9993 = vmatmul.mubr.msk.f32.gmra.mrb[114].mxu1 %vm153_vm0, %v12547_v35  ;;  %9401 = vmatprep.mubr.msk.f32.mxu0 %vm153_vm0, %v12552_v49  ;;  %v12580_v35 = vld [vmem:[%s17413_s0 + $0x3d0] sm:$0xff]  ;;  %17721 = vst [vmem:[#allocation150_spill] sm:$0xff] %v12603_v36 }
  0xf0   :  { %9995 = vmatprep.mubr.msk.f32.mxu1 %vm153_vm0, %v12557_v38  ;;  %17718 = vst [vmem:[#allocation147_spill] sm:$0xff] %v12580_v35  ;;  %v12585_v49 = vld [vmem:[%s17413_s0 + $0x810] sm:$0xff]  ;;  %v12596_v38 = vld [vmem:[%s17413_s0 + $0x3d8] sm:$0xff] }
  0xf1   :  { %17719 = vst [vmem:[#allocation148_spill] sm:$0xff] %v12585_v49  ;;  %17720 = vst [vmem:[#allocation149_spill] sm:$0xff] %v12596_v38 }
  0xf2   :  { %9402 = vmatmul.mubr.msk.f32.gmra.mrb[116].mxu0 %vm153_vm0, %v12568_v39  ;;  %v12631_v39 = vld [vmem:[%s17413_s0 + $0x828] sm:$0xff] }
  0xf3   :  { %9996 = vmatmul.mubr.msk.f32.gmra.mrb[116].mxu1 %vm153_vm0, %v12575_v41  ;;  %9404 = vmatprep.mubr.msk.f32.mxu0 %vm153_vm0, %v12580_v35  ;;  %v12608_v41 = vld [vmem:[%s17413_s0 + $0x3e0] sm:$0xff]  ;;  %17725 = vst [vmem:[#allocation154_spill] sm:$0xff] %v12631_v39 }
  0xf4   :  { %9998 = vmatprep.mubr.msk.f32.mxu1 %vm153_vm0, %v12585_v49  ;;  %17722 = vst [vmem:[#allocation151_spill] sm:$0xff] %v12608_v41  ;;  %v12613_v35 = vld [vmem:[%s17413_s0 + $0x820] sm:$0xff]  ;;  %v12624_v49 = vld [vmem:[%s17413_s0 + $0x3e8] sm:$0xff] }
  0xf5   :  { %17723 = vst [vmem:[#allocation152_spill] sm:$0xff] %v12613_v35  ;;  %17724 = vst [vmem:[#allocation153_spill] sm:$0xff] %v12624_v49 }
  0xf6   :  { %9405 = vmatmul.mubr.msk.f32.gmra.mrb[118].mxu0 %vm153_vm0, %v12596_v38  ;;  %v12659_v38 = vld [vmem:[%s17413_s0 + $0x838] sm:$0xff] }
  0xf7   :  { %9999 = vmatmul.mubr.msk.f32.gmra.mrb[118].mxu1 %vm153_vm0, %v12603_v36  ;;  %9407 = vmatprep.mubr.msk.f32.mxu0 %vm153_vm0, %v12608_v41  ;;  %v12636_v36 = vld [vmem:[%s17413_s0 + $0x3f0] sm:$0xff]  ;;  %17729 = vst [vmem:[#allocation158_spill] sm:$0xff] %v12659_v38 }
  0xf8   :  { %10001 = vmatprep.mubr.msk.f32.mxu1 %vm153_vm0, %v12613_v35  ;;  %17726 = vst [vmem:[#allocation155_spill] sm:$0xff] %v12636_v36  ;;  %v12641_v41 = vld [vmem:[%s17413_s0 + $0x830] sm:$0xff]  ;;  %v12652_v35 = vld [vmem:[%s17413_s0 + $0x3f8] sm:$0xff] }
  0xf9   :  { %17727 = vst [vmem:[#allocation156_spill] sm:$0xff] %v12641_v41  ;;  %17728 = vst [vmem:[#allocation157_spill] sm:$0xff] %v12652_v35 }
  0xfa   :  { %9408 = vmatmul.mubr.msk.f32.gmra.mrb[120].mxu0 %vm153_vm0, %v12624_v49  ;;  %v3570_v49 = vld [vmem:[%s17413_s0 + $0x848] sm:$0xff] }
  0xfb   :  { %10002 = vmatmul.mubr.msk.f32.gmra.mrb[120].mxu1 %vm153_vm0, %v12631_v39  ;;  %9410 = vmatprep.mubr.msk.f32.mxu0 %vm153_vm0, %v12636_v36  ;;  %v145_v39 = vld [vmem:[%s17413_s0 + $0x400] sm:$0xff] }
  0xfc   :  { %10004 = vmatprep.mubr.msk.f32.mxu1 %vm153_vm0, %v12641_v41  ;;  %v3569_v36 = vld [vmem:[%s17413_s0 + $0x840] sm:$0xff]  ;;  %v146_v41 = vld [vmem:[%s17413_s0 + $0x408] sm:$0xff] }
  0xfe   :  { %9411 = vmatmul.mubr.msk.f32.gmra.mrb[122].mxu0 %vm153_vm0, %v12652_v35  ;;  %v14_v35 = vld [vmem:[%s17413_s0] sm:$0xff] }
  0xff   :  { %10005 = vmatmul.mubr.msk.f32.gmra.mrb[122].mxu1 %vm153_vm0, %v12659_v38  ;;  %9413 = vmatprep.mubr.msk.f32.mxu0 %vm153_vm0, %v145_v39  ;;  %v3571_v38 = vld [vmem:[%s17413_s0 + $0x850] sm:$0xff]  ;;  %v3572_v39 = vld [vmem:[%s17413_s0 + $0x858] sm:$0xff] }
 0x100   :  { %10007 = vmatprep.mubr.msk.f32.mxu1 %vm153_vm0, %v3569_v36  ;;  %v148_v36 = vld [vmem:[%s17413_s0 + $0x418] sm:$0xff] }
 0x102   :  { %9414 = vmatmul.mubr.msk.f32.gmra.mrb[124].mxu0 %vm153_vm0, %v146_v41  ;;  %v16_v41 = vld [vmem:[%s17413_s0 + $0x10] sm:$0xff] }
 0x103   :  { %10008 = vmatmul.mubr.msk.f32.gmra.mrb[124].mxu1 %vm153_vm0, %v3570_v49  ;;  %9416 = vmatprep.mubr.msk.f32.mxu0 %vm153_vm0, %v147_v37  ;;  %v3438_v49 = vld [vmem:[%s17413_s0 + $0x440] sm:$0xff]  ;;  %v15_v37 = vld [vmem:[%s17413_s0 + $0x8] sm:$0xff] }
 0x104   :  { %10010 = vmatprep.mubr.msk.f32.mxu1 %vm153_vm0, %v3571_v38  ;;  %v3439_v38 = vld [vmem:[%s17413_s0 + $0x448] sm:$0xff] }
 0x106   :  { %9417 = vmatmul.mubr.msk.f32.gmra.mrb[126].mxu0 %vm153_vm0, %v148_v36  ;;  %v7916_v36 = vld [vmem:[%s17412_s1 + $0x40] sm:$0xff] }
 0x107   :  { %10011 = vmatmul.mubr.msk.f32.gmra.mrb[126].mxu1 %vm153_vm0, %v3572_v39  ;;  %9425 = vmatprep.mubr.msk.f32.mxu0 %vm153_vm0, %v14_v35  ;;  %v3440_v35 = vld [vmem:[%s17413_s0 + $0x450] sm:$0xff]  ;;  %v17_v39 = vld [vmem:[%s17413_s0 + $0x18] sm:$0xff] }
 0x108   :  { %10019 = vmatprep.mubr.msk.f32.mxu1 %vm153_vm0, %v3438_v49  ;;  %v3441_v49 = vld [vmem:[%s17413_s0 + $0x458] sm:$0xff] }
 0x10a   :  { %9426 = vmatmul.mubr.msk.f32.vlgmr.msra.gmra.mrb[0].mxu0 %vm153_vm0, %v15_v37  ;;  %v10948_v37 = vld [vmem:[%s17413_s0 + $0x20] sm:$0xff] }
 0x10b   :  { %10020 = vmatmul.mubr.msk.f32.vlgmr.msra.gmra.mrb[0].mxu1 %vm153_vm0, %v3439_v38  ;;  %10420 = vmatpush3.bf16.msra.mxu0 %v11866_v40  ;;  %v10950_v38 = vld [vmem:[%s17413_s0 + $0x28] sm:$0xff] }
 0x10c   :  { %10432 = vmatpush3.bf16.msra.mxu1 %v11866_v40  ;;  %9428 = vmatprep.mubr.msk.f32.mxu0 %vm153_vm0, %v16_v41  ;;  %v10949_v40 = vld [vmem:[%s17413_s0 + $0x460] sm:$0xff]  ;;  %v10951_v41 = vld [vmem:[%s17413_s0 + $0x468] sm:$0xff] }
 0x10d   :  { %10022 = vmatprep.mubr.msk.f32.mxu1 %vm153_vm0, %v3440_v35  ;;  %9621 = vmatprep.subr.mxu0 %v7916_v36  ;;  %v10952_v35 = vld [vmem:[%s17413_s0 + $0x30] sm:$0xff] }
 0x10e   :  { %9429 = vmatmul.mubr.msk.f32.gmra.mrb[2].mxu0 %vm153_vm0, %v17_v39  ;;  %10215 = vmatprep.subr.mxu1 %v7916_v36  ;;  %v10954_v39 = vld [vmem:[%s17413_s0 + $0x38] sm:$0xff] }
 0x10f   :  { %10023 = vmatmul.mubr.msk.f32.gmra.mrb[2].mxu1 %vm153_vm0, %v3441_v49  ;;  %9431 = vmatprep.mubr.msk.f32.mxu0 %vm153_vm0, %v10948_v37  ;;  %v10955_v49 = vld [vmem:[%s17413_s0 + $0x478] sm:$0xff]  ;;  %v10956_v37 = vld [vmem:[%s17413_s0 + $0x40] sm:$0xff] }
 0x110   :  { %10025 = vmatprep.mubr.msk.f32.mxu1 %vm153_vm0, %v10949_v40  ;;  %9622 = vmatpush3.msra.mxu0 %v7916_v36  ;;  %v10957_v40 = vld [vmem:[%s17413_s0 + $0x480] sm:$0xff] }
 0x111   :  { %10216 = vmatpush3.msra.mxu1 %v7916_v36  ;;  %v10953_v36 = vld [vmem:[%s17413_s0 + $0x470] sm:$0xff] }
 0x112   :  { %9432 = vmatmul.mubr.msk.f32.gmra.mrb[4].mxu0 %vm153_vm0, %v10950_v38  ;;  %v10958_v38 = vld [vmem:[%s17413_s0 + $0x48] sm:$0xff] }
 0x113   :  { %10026 = vmatmul.mubr.msk.f32.gmra.mrb[4].mxu1 %vm153_vm0, %v10951_v41  ;;  %9434 = vmatprep.mubr.msk.f32.mxu0 %vm153_vm0, %v10952_v35  ;;  %v10959_v41 = vld [vmem:[%s17413_s0 + $0x488] sm:$0xff]  ;;  %v10960_v35 = vld [vmem:[%s17413_s0 + $0x50] sm:$0xff] }
 0x114   :  { %10028 = vmatprep.mubr.msk.f32.mxu1 %vm153_vm0, %v10953_v36  ;;  %v10961_v36 = vld [vmem:[%s17413_s0 + $0x490] sm:$0xff] }
 0x116   :  { %9435 = vmatmul.mubr.msk.f32.gmra.mrb[6].mxu0 %vm153_vm0, %v10954_v39  ;;  %v10962_v39 = vld [vmem:[%s17413_s0 + $0x58] sm:$0xff] }
 0x117   :  { %10029 = vmatmul.mubr.msk.f32.gmra.mrb[6].mxu1 %vm153_vm0, %v10955_v49  ;;  %9437 = vmatprep.mubr.msk.f32.mxu0 %vm153_vm0, %v10956_v37  ;;  %v10963_v49 = vld [vmem:[%s17413_s0 + $0x498] sm:$0xff]  ;;  %v10964_v37 = vld [vmem:[%s17413_s0 + $0x60] sm:$0xff] }
 0x118   :  { %10031 = vmatprep.mubr.msk.f32.mxu1 %vm153_vm0, %v10957_v40  ;;  %v10965_v40 = vld [vmem:[%s17413_s0 + $0x4a0] sm:$0xff] }
 0x11a   :  { %9438 = vmatmul.mubr.msk.f32.gmra.mrb[8].mxu0 %vm153_vm0, %v10958_v38  ;;  %v10966_v38 = vld [vmem:[%s17413_s0 + $0x68] sm:$0xff] }
 0x11b   :  { %10032 = vmatmul.mubr.msk.f32.gmra.mrb[8].mxu1 %vm153_vm0, %v10959_v41  ;;  %9440 = vmatprep.mubr.msk.f32.mxu0 %vm153_vm0, %v10960_v35  ;;  %v10967_v41 = vld [vmem:[%s17413_s0 + $0x4a8] sm:$0xff]  ;;  %v10968_v35 = vld [vmem:[%s17413_s0 + $0x70] sm:$0xff] }
 0x11c   :  { %10034 = vmatprep.mubr.msk.f32.mxu1 %vm153_vm0, %v10961_v36  ;;  %v10969_v36 = vld [vmem:[%s17413_s0 + $0x4b0] sm:$0xff] }
 0x11e   :  { %9441 = vmatmul.mubr.msk.f32.gmra.mrb[10].mxu0 %vm153_vm0, %v10962_v39  ;;  %v10970_v39 = vld [vmem:[%s17413_s0 + $0x78] sm:$0xff] }
 0x11f   :  { %10035 = vmatmul.mubr.msk.f32.gmra.mrb[10].mxu1 %vm153_vm0, %v10963_v49  ;;  %9443 = vmatprep.mubr.msk.f32.mxu0 %vm153_vm0, %v10964_v37  ;;  %v10971_v49 = vld [vmem:[%s17413_s0 + $0x4b8] sm:$0xff]  ;;  %v10972_v37 = vld [vmem:[%s17413_s0 + $0x80] sm:$0xff] }
 0x120   :  { %10037 = vmatprep.mubr.msk.f32.mxu1 %vm153_vm0, %v10965_v40  ;;  %v10973_v40 = vld [vmem:[%s17413_s0 + $0x4c0] sm:$0xff] }
 0x122   :  { %9444 = vmatmul.mubr.msk.f32.gmra.mrb[12].mxu0 %vm153_vm0, %v10966_v38  ;;  %v10974_v38 = vld [vmem:[%s17413_s0 + $0x88] sm:$0xff] }
 0x123   :  { %10038 = vmatmul.mubr.msk.f32.gmra.mrb[12].mxu1 %vm153_vm0, %v10967_v41  ;;  %9446 = vmatprep.mubr.msk.f32.mxu0 %vm153_vm0, %v10968_v35  ;;  %v10975_v41 = vld [vmem:[%s17413_s0 + $0x4c8] sm:$0xff]  ;;  %v10976_v35 = vld [vmem:[%s17413_s0 + $0x90] sm:$0xff] }
 0x124   :  { %10040 = vmatprep.mubr.msk.f32.mxu1 %vm153_vm0, %v10969_v36  ;;  %v10977_v36 = vld [vmem:[%s17413_s0 + $0x4d0] sm:$0xff] }
 0x126   :  { %9447 = vmatmul.mubr.msk.f32.gmra.mrb[14].mxu0 %vm153_vm0, %v10970_v39  ;;  %v10978_v39 = vld [vmem:[%s17413_s0 + $0x98] sm:$0xff] }
 0x127   :  { %10041 = vmatmul.mubr.msk.f32.gmra.mrb[14].mxu1 %vm153_vm0, %v10971_v49  ;;  %9449 = vmatprep.mubr.msk.f32.mxu0 %vm153_vm0, %v10972_v37  ;;  %v10979_v49 = vld [vmem:[%s17413_s0 + $0x4d8] sm:$0xff]  ;;  %v10980_v37 = vld [vmem:[%s17413_s0 + $0xa0] sm:$0xff] }
 0x128   :  { %10043 = vmatprep.mubr.msk.f32.mxu1 %vm153_vm0, %v10973_v40  ;;  %v10981_v40 = vld [vmem:[%s17413_s0 + $0x4e0] sm:$0xff] }
 0x12a   :  { %9450 = vmatmul.mubr.msk.f32.gmra.mrb[16].mxu0 %vm153_vm0, %v10974_v38  ;;  %v10982_v38 = vld [vmem:[%s17413_s0 + $0xa8] sm:$0xff] }
 0x12b   :  { %10044 = vmatmul.mubr.msk.f32.gmra.mrb[16].mxu1 %vm153_vm0, %v10975_v41  ;;  %9452 = vmatprep.mubr.msk.f32.mxu0 %vm153_vm0, %v10976_v35  ;;  %v17786_v41 = vld [vmem:[#allocation58_spill] sm:$0xff]  ;;  %v17787_v35 = vld [vmem:[#allocation59_spill] sm:$0xff] }
 0x12c   :  { %10046 = vmatprep.mubr.msk.f32.mxu1 %vm153_vm0, %v10977_v36  ;;  %v17788_v36 = vld [vmem:[#allocation60_spill] sm:$0xff] }
 0x12e   :  { %9453 = vmatmul.mubr.msk.f32.gmra.mrb[18].mxu0 %vm153_vm0, %v10978_v39  ;;  %v17789_v39 = vld [vmem:[#allocation61_spill] sm:$0xff] }
 0x12f   :  { %10047 = vmatmul.mubr.msk.f32.gmra.mrb[18].mxu1 %vm153_vm0, %v10979_v49  ;;  %9455 = vmatprep.mubr.msk.f32.mxu0 %vm153_vm0, %v10980_v37  ;;  %v17790_v49 = vld [vmem:[#allocation62_spill] sm:$0xff]  ;;  %v17791_v37 = vld [vmem:[#allocation63_spill] sm:$0xff] }
 0x130   :  { %10049 = vmatprep.mubr.msk.f32.mxu1 %vm153_vm0, %v10981_v40  ;;  %v17792_v40 = vld [vmem:[#allocation64_spill] sm:$0xff] }
 0x132   :  { %9456 = vmatmul.mubr.msk.f32.gmra.mrb[20].mxu0 %vm153_vm0, %v10982_v38  ;;  %v17793_v38 = vld [vmem:[#allocation65_spill] sm:$0xff] }
 0x133   :  { %10050 = vmatmul.mubr.msk.f32.gmra.mrb[20].mxu1 %vm153_vm0, %v11163_v42  ;;  %9458 = vmatprep.mubr.msk.f32.mxu0 %vm153_vm0, %v11168_v43  ;;  %v17730_v42 = vld [vmem:[#allocation2_spill] sm:$0xff]  ;;  %v17731_v43 = vld [vmem:[#allocation3_spill] sm:$0xff] }
 0x134   :  { %10052 = vmatprep.mubr.msk.f32.mxu1 %vm153_vm0, %v11173_v44  ;;  %v17732_v44 = vld [vmem:[#allocation4_spill] sm:$0xff] }
 0x136   :  { %9459 = vmatmul.mubr.msk.f32.gmra.mrb[22].mxu0 %vm153_vm0, %v11183_v45  ;;  %v17733_v45 = vld [vmem:[#allocation5_spill] sm:$0xff] }
 0x137   :  { %10053 = vmatmul.mubr.msk.f32.gmra.mrb[22].mxu1 %vm153_vm0, %v11190_v46  ;;  %9461 = vmatprep.mubr.msk.f32.mxu0 %vm153_vm0, %v11195_v47  ;;  %v17734_v46 = vld [vmem:[#allocation6_spill] sm:$0xff]  ;;  %v17735_v47 = vld [vmem:[#allocation7_spill] sm:$0xff] }
 0x138   :  { %10055 = vmatprep.mubr.msk.f32.mxu1 %vm153_vm0, %v11200_v48  ;;  %v17736_v48 = vld [vmem:[#allocation8_spill] sm:$0xff] }
 0x13a   :  { %9462 = vmatmul.mubr.msk.f32.gmra.mrb[24].mxu0 %vm153_vm0, %v11214_v50  ;;  %v17737_v50 = vld [vmem:[#allocation9_spill] sm:$0xff] }
 0x13b   :  { %10056 = vmatmul.mubr.msk.f32.gmra.mrb[24].mxu1 %vm153_vm0, %v11221_v51  ;;  %9464 = vmatprep.mubr.msk.f32.mxu0 %vm153_vm0, %v11226_v52  ;;  %v17738_v51 = vld [vmem:[#allocation10_spill] sm:$0xff]  ;;  %v17739_v52 = vld [vmem:[#allocation11_spill] sm:$0xff] }
 0x13c   :  { %10058 = vmatprep.mubr.msk.f32.mxu1 %vm153_vm0, %v11231_v53  ;;  %v17740_v53 = vld [vmem:[#allocation12_spill] sm:$0xff] }
 0x13e   :  { %9465 = vmatmul.mubr.msk.f32.gmra.mrb[26].mxu0 %vm153_vm0, %v11242_v54  ;;  %v17741_v54 = vld [vmem:[#allocation13_spill] sm:$0xff] }
 0x13f   :  { %10059 = vmatmul.mubr.msk.f32.gmra.mrb[26].mxu1 %vm153_vm0, %v11249_v55  ;;  %9467 = vmatprep.mubr.msk.f32.mxu0 %vm153_vm0, %v11254_v56  ;;  %v17742_v55 = vld [vmem:[#allocation14_spill] sm:$0xff]  ;;  %v17743_v56 = vld [vmem:[#allocation15_spill] sm:$0xff] }
 0x140   :  { %10061 = vmatprep.mubr.msk.f32.mxu1 %vm153_vm0, %v11259_v57  ;;  %v17744_v57 = vld [vmem:[#allocation16_spill] sm:$0xff] }
 0x142   :  { %9468 = vmatmul.mubr.msk.f32.gmra.mrb[28].mxu0 %vm153_vm0, %v11270_v58  ;;  %v17745_v58 = vld [vmem:[#allocation17_spill] sm:$0xff] }
 0x143   :  { %10062 = vmatmul.mubr.msk.f32.gmra.mrb[28].mxu1 %vm153_vm0, %v11277_v59  ;;  %9470 = vmatprep.mubr.msk.f32.mxu0 %vm153_vm0, %v11282_v60  ;;  %v17746_v59 = vld [vmem:[#allocation18_spill] sm:$0xff]  ;;  %v17747_v60 = vld [vmem:[#allocation19_spill] sm:$0xff] }
 0x144   :  { %10064 = vmatprep.mubr.msk.f32.mxu1 %vm153_vm0, %v11287_v61  ;;  %v17748_v61 = vld [vmem:[#allocation20_spill] sm:$0xff] }
 0x146   :  { %9471 = vmatmul.mubr.msk.f32.gmra.mrb[30].mxu0 %vm153_vm0, %v11298_v62  ;;  %v17749_v62 = vld [vmem:[#allocation21_spill] sm:$0xff] }
 0x147   :  { %10065 = vmatmul.mubr.msk.f32.gmra.mrb[30].mxu1 %vm153_vm0, %v11305_v63  ;;  %9473 = vmatprep.mubr.msk.f32.mxu0 %vm153_vm0, %v11310_v0  ;;  %v17750_v63 = vld [vmem:[#allocation22_spill] sm:$0xff]  ;;  %v17751_v0 = vld [vmem:[#allocation23_spill] sm:$0xff] }
 0x148   :  { %10067 = vmatprep.mubr.msk.f32.mxu1 %vm153_vm0, %v11315_v1  ;;  %v17752_v1 = vld [vmem:[#allocation24_spill] sm:$0xff] }
 0x14a   :  { %9474 = vmatmul.mubr.msk.f32.gmra.mrb[32].mxu0 %vm153_vm0, %v11326_v2  ;;  %v17753_v2 = vld [vmem:[#allocation25_spill] sm:$0xff] }
 0x14b   :  { %10068 = vmatmul.mubr.msk.f32.gmra.mrb[32].mxu1 %vm153_vm0, %v11333_v3  ;;  %9476 = vmatprep.mubr.msk.f32.mxu0 %vm153_vm0, %v11338_v4  ;;  %v17754_v3 = vld [vmem:[#allocation26_spill] sm:$0xff]  ;;  %v17755_v4 = vld [vmem:[#allocation27_spill] sm:$0xff] }
 0x14c   :  { %10070 = vmatprep.mubr.msk.f32.mxu1 %vm153_vm0, %v11343_v5  ;;  %v17756_v5 = vld [vmem:[#allocation28_spill] sm:$0xff] }
 0x14e   :  { %9477 = vmatmul.mubr.msk.f32.gmra.mrb[34].mxu0 %vm153_vm0, %v11354_v6  ;;  %v17757_v6 = vld [vmem:[#allocation29_spill] sm:$0xff] }
 0x14f   :  { %10071 = vmatmul.mubr.msk.f32.gmra.mrb[34].mxu1 %vm153_vm0, %v11361_v7  ;;  %9479 = vmatprep.mubr.msk.f32.mxu0 %vm153_vm0, %v11366_v8  ;;  %v17758_v7 = vld [vmem:[#allocation30_spill] sm:$0xff]  ;;  %v17759_v8 = vld [vmem:[#allocation31_spill] sm:$0xff] }
 0x150   :  { %10073 = vmatprep.mubr.msk.f32.mxu1 %vm153_vm0, %v11371_v9  ;;  %v17760_v9 = vld [vmem:[#allocation32_spill] sm:$0xff] }
 0x152   :  { %9480 = vmatmul.mubr.msk.f32.gmra.mrb[36].mxu0 %vm153_vm0, %v11382_v10  ;;  %v17761_v10 = vld [vmem:[#allocation33_spill] sm:$0xff] }
 0x153   :  { %10074 = vmatmul.mubr.msk.f32.gmra.mrb[36].mxu1 %vm153_vm0, %v11389_v11  ;;  %9482 = vmatprep.mubr.msk.f32.mxu0 %vm153_vm0, %v11394_v12  ;;  %v17762_v11 = vld [vmem:[#allocation34_spill] sm:$0xff]  ;;  %v17763_v12 = vld [vmem:[#allocation35_spill] sm:$0xff] }
 0x154   :  { %10076 = vmatprep.mubr.msk.f32.mxu1 %vm153_vm0, %v11399_v13  ;;  %v17764_v13 = vld [vmem:[#allocation36_spill] sm:$0xff] }
 0x156   :  { %9483 = vmatmul.mubr.msk.f32.gmra.mrb[38].mxu0 %vm153_vm0, %v11410_v14  ;;  %v17765_v14 = vld [vmem:[#allocation37_spill] sm:$0xff] }
 0x157   :  { %10077 = vmatmul.mubr.msk.f32.gmra.mrb[38].mxu1 %vm153_vm0, %v11417_v15  ;;  %9485 = vmatprep.mubr.msk.f32.mxu0 %vm153_vm0, %v11422_v16  ;;  %v17766_v15 = vld [vmem:[#allocation38_spill] sm:$0xff]  ;;  %v17767_v16 = vld [vmem:[#allocation39_spill] sm:$0xff] }
 0x158   :  { %10079 = vmatprep.mubr.msk.f32.mxu1 %vm153_vm0, %v11427_v17  ;;  %v17768_v17 = vld [vmem:[#allocation40_spill] sm:$0xff] }
 0x15a   :  { %9486 = vmatmul.mubr.msk.f32.gmra.mrb[40].mxu0 %vm153_vm0, %v11438_v18  ;;  %v17769_v18 = vld [vmem:[#allocation41_spill] sm:$0xff] }
 0x15b   :  { %10080 = vmatmul.mubr.msk.f32.gmra.mrb[40].mxu1 %vm153_vm0, %v11445_v19  ;;  %9488 = vmatprep.mubr.msk.f32.mxu0 %vm153_vm0, %v11450_v20  ;;  %v17770_v19 = vld [vmem:[#allocation42_spill] sm:$0xff]  ;;  %v17771_v20 = vld [vmem:[#allocation43_spill] sm:$0xff] }
 0x15c   :  { %10082 = vmatprep.mubr.msk.f32.mxu1 %vm153_vm0, %v11455_v21  ;;  %v17772_v21 = vld [vmem:[#allocation44_spill] sm:$0xff] }
 0x15e   :  { %9489 = vmatmul.mubr.msk.f32.gmra.mrb[42].mxu0 %vm153_vm0, %v11466_v22  ;;  %v17773_v22 = vld [vmem:[#allocation45_spill] sm:$0xff] }
 0x15f   :  { %10083 = vmatmul.mubr.msk.f32.gmra.mrb[42].mxu1 %vm153_vm0, %v11473_v23  ;;  %9491 = vmatprep.mubr.msk.f32.mxu0 %vm153_vm0, %v11478_v24  ;;  %v17774_v23 = vld [vmem:[#allocation46_spill] sm:$0xff]  ;;  %v17775_v24 = vld [vmem:[#allocation47_spill] sm:$0xff] }
 0x160   :  { %10085 = vmatprep.mubr.msk.f32.mxu1 %vm153_vm0, %v11483_v25  ;;  %v17776_v25 = vld [vmem:[#allocation48_spill] sm:$0xff] }
 0x162   :  { %9492 = vmatmul.mubr.msk.f32.gmra.mrb[44].mxu0 %vm153_vm0, %v11494_v26  ;;  %v17777_v26 = vld [vmem:[#allocation49_spill] sm:$0xff] }
 0x163   :  { %10086 = vmatmul.mubr.msk.f32.gmra.mrb[44].mxu1 %vm153_vm0, %v11501_v27  ;;  %9494 = vmatprep.mubr.msk.f32.mxu0 %vm153_vm0, %v11506_v28  ;;  %v17778_v27 = vld [vmem:[#allocation50_spill] sm:$0xff]  ;;  %v17779_v28 = vld [vmem:[#allocation51_spill] sm:$0xff] }
 0x164   :  { %10088 = vmatprep.mubr.msk.f32.mxu1 %vm153_vm0, %v11511_v29  ;;  %v17780_v29 = vld [vmem:[#allocation52_spill] sm:$0xff] }
 0x166   :  { %9495 = vmatmul.mubr.msk.f32.gmra.mrb[46].mxu0 %vm153_vm0, %v11522_v30  ;;  %v17781_v30 = vld [vmem:[#allocation53_spill] sm:$0xff] }
 0x167   :  { %10089 = vmatmul.mubr.msk.f32.gmra.mrb[46].mxu1 %vm153_vm0, %v11529_v31  ;;  %9497 = vmatprep.mubr.msk.f32.mxu0 %vm153_vm0, %v11534_v32  ;;  %v17782_v31 = vld [vmem:[#allocation54_spill] sm:$0xff]  ;;  %v17783_v32 = vld [vmem:[#allocation55_spill] sm:$0xff] }
 0x168   :  { %10091 = vmatprep.mubr.msk.f32.mxu1 %vm153_vm0, %v11539_v33  ;;  %v17784_v33 = vld [vmem:[#allocation56_spill] sm:$0xff] }
 0x16a   :  { %9498 = vmatmul.mubr.msk.f32.gmra.mrb[48].mxu0 %vm153_vm0, %v11550_v34  ;;  %v17785_v34 = vld [vmem:[#allocation57_spill] sm:$0xff] }
 0x16b   :  { %10092 = vmatmul.mubr.msk.f32.gmra.mrb[48].mxu1 %vm153_vm0, %v17730_v42  ;;  %9500 = vmatprep.mubr.msk.f32.mxu0 %vm153_vm0, %v17731_v43  ;;  %v17794_v42 = vld [vmem:[#allocation66_spill] sm:$0xff]  ;;  %v17795_v43 = vld [vmem:[#allocation67_spill] sm:$0xff] }
 0x16c   :  { %10094 = vmatprep.mubr.msk.f32.mxu1 %vm153_vm0, %v17732_v44  ;;  %v17796_v44 = vld [vmem:[#allocation68_spill] sm:$0xff] }
 0x16e   :  { %9501 = vmatmul.mubr.msk.f32.gmra.mrb[50].mxu0 %vm153_vm0, %v17733_v45  ;;  %v17797_v45 = vld [vmem:[#allocation69_spill] sm:$0xff] }
 0x16f   :  { %10095 = vmatmul.mubr.msk.f32.gmra.mrb[50].mxu1 %vm153_vm0, %v17734_v46  ;;  %9503 = vmatprep.mubr.msk.f32.mxu0 %vm153_vm0, %v17735_v47  ;;  %v17798_v46 = vld [vmem:[#allocation70_spill] sm:$0xff]  ;;  %v17799_v47 = vld [vmem:[#allocation71_spill] sm:$0xff] }
 0x170   :  { %10097 = vmatprep.mubr.msk.f32.mxu1 %vm153_vm0, %v17736_v48  ;;  %v17800_v48 = vld [vmem:[#allocation72_spill] sm:$0xff] }
 0x172   :  { %9504 = vmatmul.mubr.msk.f32.gmra.mrb[52].mxu0 %vm153_vm0, %v17737_v50  ;;  %v17801_v50 = vld [vmem:[#allocation73_spill] sm:$0xff] }
 0x173   :  { %10098 = vmatmul.mubr.msk.f32.gmra.mrb[52].mxu1 %vm153_vm0, %v17738_v51  ;;  %9506 = vmatprep.mubr.msk.f32.mxu0 %vm153_vm0, %v17739_v52  ;;  %v17802_v51 = vld [vmem:[#allocation74_spill] sm:$0xff]  ;;  %v17803_v52 = vld [vmem:[#allocation75_spill] sm:$0xff] }
 0x174   :  { %10100 = vmatprep.mubr.msk.f32.mxu1 %vm153_vm0, %v17740_v53  ;;  %v17804_v53 = vld [vmem:[#allocation76_spill] sm:$0xff] }
 0x176   :  { %9507 = vmatmul.mubr.msk.f32.gmra.mrb[54].mxu0 %vm153_vm0, %v17741_v54  ;;  %v17805_v54 = vld [vmem:[#allocation77_spill] sm:$0xff] }
 0x177   :  { %10101 = vmatmul.mubr.msk.f32.gmra.mrb[54].mxu1 %vm153_vm0, %v17742_v55  ;;  %9509 = vmatprep.mubr.msk.f32.mxu0 %vm153_vm0, %v17743_v56  ;;  %v17806_v55 = vld [vmem:[#allocation78_spill] sm:$0xff]  ;;  %v17807_v56 = vld [vmem:[#allocation79_spill] sm:$0xff] }
 0x178   :  { %10103 = vmatprep.mubr.msk.f32.mxu1 %vm153_vm0, %v17744_v57  ;;  %v17808_v57 = vld [vmem:[#allocation80_spill] sm:$0xff] }
 0x17a   :  { %9510 = vmatmul.mubr.msk.f32.gmra.mrb[56].mxu0 %vm153_vm0, %v17745_v58  ;;  %v17809_v58 = vld [vmem:[#allocation81_spill] sm:$0xff] }
 0x17b   :  { %10104 = vmatmul.mubr.msk.f32.gmra.mrb[56].mxu1 %vm153_vm0, %v17746_v59  ;;  %9512 = vmatprep.mubr.msk.f32.mxu0 %vm153_vm0, %v17747_v60  ;;  %v17810_v59 = vld [vmem:[#allocation82_spill] sm:$0xff]  ;;  %v17811_v60 = vld [vmem:[#allocation83_spill] sm:$0xff] }
 0x17c   :  { %10106 = vmatprep.mubr.msk.f32.mxu1 %vm153_vm0, %v17748_v61  ;;  %v17812_v61 = vld [vmem:[#allocation84_spill] sm:$0xff] }
 0x17e   :  { %9513 = vmatmul.mubr.msk.f32.gmra.mrb[58].mxu0 %vm153_vm0, %v17749_v62  ;;  %v17813_v62 = vld [vmem:[#allocation85_spill] sm:$0xff] }
 0x17f   :  { %10107 = vmatmul.mubr.msk.f32.gmra.mrb[58].mxu1 %vm153_vm0, %v17750_v63  ;;  %9515 = vmatprep.mubr.msk.f32.mxu0 %vm153_vm0, %v17751_v0  ;;  %v17814_v63 = vld [vmem:[#allocation86_spill] sm:$0xff]  ;;  %v17815_v0 = vld [vmem:[#allocation87_spill] sm:$0xff] }
 0x180   :  { %10109 = vmatprep.mubr.msk.f32.mxu1 %vm153_vm0, %v17752_v1  ;;  %v17816_v1 = vld [vmem:[#allocation88_spill] sm:$0xff] }
 0x182   :  { %9516 = vmatmul.mubr.msk.f32.gmra.mrb[60].mxu0 %vm153_vm0, %v17753_v2  ;;  %v17817_v2 = vld [vmem:[#allocation89_spill] sm:$0xff] }
 0x183   :  { %10110 = vmatmul.mubr.msk.f32.gmra.mrb[60].mxu1 %vm153_vm0, %v17754_v3  ;;  %9518 = vmatprep.mubr.msk.f32.mxu0 %vm153_vm0, %v17755_v4  ;;  %v17818_v3 = vld [vmem:[#allocation90_spill] sm:$0xff]  ;;  %v17819_v4 = vld [vmem:[#allocation91_spill] sm:$0xff] }
 0x184   :  { %10112 = vmatprep.mubr.msk.f32.mxu1 %vm153_vm0, %v17756_v5  ;;  %v17820_v5 = vld [vmem:[#allocation92_spill] sm:$0xff] }
 0x186   :  { %9519 = vmatmul.mubr.msk.f32.gmra.mrb[62].mxu0 %vm153_vm0, %v17757_v6  ;;  %v17821_v6 = vld [vmem:[#allocation93_spill] sm:$0xff] }
 0x187   :  { %10113 = vmatmul.mubr.msk.f32.gmra.mrb[62].mxu1 %vm153_vm0, %v17758_v7  ;;  %9521 = vmatprep.mubr.msk.f32.mxu0 %vm153_vm0, %v17759_v8  ;;  %v17822_v7 = vld [vmem:[#allocation94_spill] sm:$0xff]  ;;  %v17823_v8 = vld [vmem:[#allocation95_spill] sm:$0xff] }
 0x188   :  { %10115 = vmatprep.mubr.msk.f32.mxu1 %vm153_vm0, %v17760_v9  ;;  %v17824_v9 = vld [vmem:[#allocation96_spill] sm:$0xff] }
 0x18a   :  { %9522 = vmatmul.mubr.msk.f32.gmra.mrb[64].mxu0 %vm153_vm0, %v17761_v10  ;;  %v17825_v10 = vld [vmem:[#allocation97_spill] sm:$0xff] }
 0x18b   :  { %10116 = vmatmul.mubr.msk.f32.gmra.mrb[64].mxu1 %vm153_vm0, %v17762_v11  ;;  %9524 = vmatprep.mubr.msk.f32.mxu0 %vm153_vm0, %v17763_v12  ;;  %v17826_v11 = vld [vmem:[#allocation98_spill] sm:$0xff]  ;;  %v17827_v12 = vld [vmem:[#allocation99_spill] sm:$0xff] }
 0x18c   :  { %10118 = vmatprep.mubr.msk.f32.mxu1 %vm153_vm0, %v17764_v13  ;;  %v17828_v13 = vld [vmem:[#allocation100_spill] sm:$0xff] }
 0x18e   :  { %9525 = vmatmul.mubr.msk.f32.gmra.mrb[66].mxu0 %vm153_vm0, %v17765_v14  ;;  %v17829_v14 = vld [vmem:[#allocation101_spill] sm:$0xff] }
 0x18f   :  { %10119 = vmatmul.mubr.msk.f32.gmra.mrb[66].mxu1 %vm153_vm0, %v17766_v15  ;;  %9527 = vmatprep.mubr.msk.f32.mxu0 %vm153_vm0, %v17767_v16  ;;  %v17830_v15 = vld [vmem:[#allocation102_spill] sm:$0xff]  ;;  %v17831_v16 = vld [vmem:[#allocation103_spill] sm:$0xff] }
 0x190   :  { %10121 = vmatprep.mubr.msk.f32.mxu1 %vm153_vm0, %v17768_v17  ;;  %v17832_v17 = vld [vmem:[#allocation104_spill] sm:$0xff] }
 0x192   :  { %9528 = vmatmul.mubr.msk.f32.gmra.mrb[68].mxu0 %vm153_vm0, %v17769_v18  ;;  %v17833_v18 = vld [vmem:[#allocation105_spill] sm:$0xff] }
 0x193   :  { %10122 = vmatmul.mubr.msk.f32.gmra.mrb[68].mxu1 %vm153_vm0, %v17770_v19  ;;  %9530 = vmatprep.mubr.msk.f32.mxu0 %vm153_vm0, %v17771_v20  ;;  %v17834_v19 = vld [vmem:[#allocation106_spill] sm:$0xff]  ;;  %v17835_v20 = vld [vmem:[#allocation107_spill] sm:$0xff] }
 0x194   :  { %10124 = vmatprep.mubr.msk.f32.mxu1 %vm153_vm0, %v17772_v21  ;;  %v17836_v21 = vld [vmem:[#allocation108_spill] sm:$0xff] }
 0x196   :  { %9531 = vmatmul.mubr.msk.f32.gmra.mrb[70].mxu0 %vm153_vm0, %v17773_v22  ;;  %v17837_v22 = vld [vmem:[#allocation109_spill] sm:$0xff] }
 0x197   :  { %10125 = vmatmul.mubr.msk.f32.gmra.mrb[70].mxu1 %vm153_vm0, %v17774_v23  ;;  %9533 = vmatprep.mubr.msk.f32.mxu0 %vm153_vm0, %v17775_v24  ;;  %v17838_v23 = vld [vmem:[#allocation110_spill] sm:$0xff]  ;;  %v17839_v24 = vld [vmem:[#allocation111_spill] sm:$0xff] }
 0x198   :  { %10127 = vmatprep.mubr.msk.f32.mxu1 %vm153_vm0, %v17776_v25  ;;  %v17840_v25 = vld [vmem:[#allocation112_spill] sm:$0xff] }
 0x19a   :  { %9534 = vmatmul.mubr.msk.f32.gmra.mrb[72].mxu0 %vm153_vm0, %v17777_v26  ;;  %v17841_v26 = vld [vmem:[#allocation113_spill] sm:$0xff] }
 0x19b   :  { %10128 = vmatmul.mubr.msk.f32.gmra.mrb[72].mxu1 %vm153_vm0, %v17778_v27  ;;  %9536 = vmatprep.mubr.msk.f32.mxu0 %vm153_vm0, %v17779_v28  ;;  %v17842_v27 = vld [vmem:[#allocation114_spill] sm:$0xff]  ;;  %v17843_v28 = vld [vmem:[#allocation115_spill] sm:$0xff] }
 0x19c   :  { %10130 = vmatprep.mubr.msk.f32.mxu1 %vm153_vm0, %v17780_v29  ;;  %v17844_v29 = vld [vmem:[#allocation116_spill] sm:$0xff] }
 0x19e   :  { %9537 = vmatmul.mubr.msk.f32.gmra.mrb[74].mxu0 %vm153_vm0, %v17781_v30  ;;  %v17845_v30 = vld [vmem:[#allocation117_spill] sm:$0xff] }
 0x19f   :  { %10131 = vmatmul.mubr.msk.f32.gmra.mrb[74].mxu1 %vm153_vm0, %v17782_v31  ;;  %9539 = vmatprep.mubr.msk.f32.mxu0 %vm153_vm0, %v17783_v32  ;;  %v17846_v31 = vld [vmem:[#allocation118_spill] sm:$0xff]  ;;  %v17847_v32 = vld [vmem:[#allocation119_spill] sm:$0xff] }
 0x1a0   :  { %10133 = vmatprep.mubr.msk.f32.mxu1 %vm153_vm0, %v17784_v33  ;;  %v17848_v33 = vld [vmem:[#allocation120_spill] sm:$0xff] }
 0x1a2   :  { %9540 = vmatmul.mubr.msk.f32.gmra.mrb[76].mxu0 %vm153_vm0, %v17785_v34  ;;  %v17849_v34 = vld [vmem:[#allocation121_spill] sm:$0xff] }
 0x1a3   :  { %10134 = vmatmul.mubr.msk.f32.gmra.mrb[76].mxu1 %vm153_vm0, %v17786_v41  ;;  %9542 = vmatprep.mubr.msk.f32.mxu0 %vm153_vm0, %v17787_v35  ;;  %v17850_v41 = vld [vmem:[#allocation122_spill] sm:$0xff]  ;;  %v17851_v35 = vld [vmem:[#allocation123_spill] sm:$0xff] }
 0x1a4   :  { %10136 = vmatprep.mubr.msk.f32.mxu1 %vm153_vm0, %v17788_v36  ;;  %v17852_v36 = vld [vmem:[#allocation124_spill] sm:$0xff] }
 0x1a6   :  { %9543 = vmatmul.mubr.msk.f32.gmra.mrb[78].mxu0 %vm153_vm0, %v17789_v39  ;;  %v7116_v39 = vlaneseq }
 0x1a7   :  { %10137 = vmatmul.mubr.msk.f32.gmra.mrb[78].mxu1 %vm153_vm0, %v17790_v49  ;;  %9545 = vmatprep.mubr.msk.f32.mxu0 %vm153_vm0, %v17791_v37  ;;  %v17853_v49 = vld [vmem:[#allocation125_spill] sm:$0xff] }
 0x1a8   :  { %10139 = vmatprep.mubr.msk.f32.mxu1 %vm153_vm0, %v17792_v40  ;;  %v13234_v37 = vshrl.u32 %v7116_v39, 7  ;;  %v17854_v40 = vld [vmem:[#allocation126_spill] sm:$0xff] }
 0x1a9   :  { %v5394_v39 = vld [vmem:[%s17413_s0 + $0x4e0] sm:$0xff] }
 0x1aa   :  { %9546 = vmatmul.mubr.msk.f32.gmra.mrb[80].mxu0 %vm153_vm0, %v17793_v38  ;;  %v17855_v38 = vld [vmem:[#allocation127_spill] sm:$0xff] }
 0x1ab   :  { %10140 = vmatmul.mubr.msk.f32.gmra.mrb[80].mxu1 %vm153_vm0, %v17794_v42  ;;  %9548 = vmatprep.mubr.msk.f32.mxu0 %vm153_vm0, %v17795_v43  ;;  %v17856_v42 = vld [vmem:[#allocation128_spill] sm:$0xff]  ;;  %v7118_v43 = vsub.s32 0, %v13234_v37  ;;  %v2071_v37 = vld [vmem:[%s17413_s0 + $0x3b8] sm:$0xff] }
 0x1ac   :  { %10142 = vmatprep.mubr.msk.f32.mxu1 %vm153_vm0, %v17796_v44  ;;  %v13246_v44 = vld [vmem:[%s17414_s2] sm:$0x1]  ;;  %s10984_s2 = smov 8  }
 0x1ae   :  { %9549 = vmatmul.mubr.msk.f32.gmra.mrb[82].mxu0 %vm153_vm0, %v17797_v45  ;;  %v17857_v45 = vld [vmem:[#allocation129_spill] sm:$0xff] }
 0x1af   :  { %10143 = vmatmul.mubr.msk.f32.gmra.mrb[82].mxu1 %vm153_vm0, %v17798_v46  ;;  %9551 = vmatprep.mubr.msk.f32.mxu0 %vm153_vm0, %v17799_v47  ;;  %v7119_v46 = vrot.slane %v13246_v44, %v7118_v43  ;;  %v17858_v47 = vld [vmem:[#allocation130_spill] sm:$0xff] }
 0x1b0   :  { %10145 = vmatprep.mubr.msk.f32.mxu1 %vm153_vm0, %v17800_v48  ;;  %v17859_v48 = vld [vmem:[#allocation131_spill] sm:$0xff] }
 0x1b1   :  { %7120 = vrot.lane.b32.xlu0 %v7119_v46, %s10983_s6  ;;  %7126 = vrot.lane.b32.xlu1 %v7119_v46, %s10985_s7 }
 0x1b2   :  { %9552 = vmatmul.mubr.msk.f32.gmra.mrb[84].mxu0 %vm153_vm0, %v17801_v50  ;;  %v17860_v50 = vld [vmem:[#allocation132_spill] sm:$0xff] }
 0x1b3   :  { %10146 = vmatmul.mubr.msk.f32.gmra.mrb[84].mxu1 %vm153_vm0, %v17802_v51  ;;  %9554 = vmatprep.mubr.msk.f32.mxu0 %vm153_vm0, %v17803_v52  ;;  %v17861_v51 = vld [vmem:[#allocation133_spill] sm:$0xff]  ;;  %v17862_v52 = vld [vmem:[#allocation134_spill] sm:$0xff] }
 0x1b4   :  { %10148 = vmatprep.mubr.msk.f32.mxu1 %vm153_vm0, %v17804_v53  ;;  %v17863_v53 = vld [vmem:[#allocation135_spill] sm:$0xff] }
 0x1b5   :  { %7123 = vrot.lane.b32.xlu0 %v7119_v46, %s10984_s2  ;;  %v5397_v46 = vld [vmem:[%s17413_s0 + $0x4f8] sm:$0xff] }
 0x1b6   :  { %9555 = vmatmul.mubr.msk.f32.gmra.mrb[86].mxu0 %vm153_vm0, %v17805_v54  ;;  %v17864_v54 = vld [vmem:[#allocation136_spill] sm:$0xff] }
 0x1b7   :  { %10149 = vmatmul.mubr.msk.f32.gmra.mrb[86].mxu1 %vm153_vm0, %v17806_v55  ;;  %9557 = vmatprep.mubr.msk.f32.mxu0 %vm153_vm0, %v17807_v56  ;;  %v17865_v55 = vld [vmem:[#allocation137_spill] sm:$0xff]  ;;  %v17866_v56 = vld [vmem:[#allocation138_spill] sm:$0xff] }
 0x1b8   :  { %10151 = vmatprep.mubr.msk.f32.mxu1 %vm153_vm0, %v17808_v57  ;;  %v17867_v57 = vld [vmem:[#allocation139_spill] sm:$0xff] }
 0x1ba   :  { %9558 = vmatmul.mubr.msk.f32.gmra.mrb[88].mxu0 %vm153_vm0, %v17809_v58  ;;  %v17868_v58 = vld [vmem:[#allocation140_spill] sm:$0xff] }
 0x1bb   :  { %10152 = vmatmul.mubr.msk.f32.gmra.mrb[88].mxu1 %vm153_vm0, %v17810_v59  ;;  %9560 = vmatprep.mubr.msk.f32.mxu0 %vm153_vm0, %v17811_v60  ;;  %v17869_v59 = vld [vmem:[#allocation141_spill] sm:$0xff]  ;;  %v17870_v60 = vld [vmem:[#allocation142_spill] sm:$0xff] }
 0x1bc   :  { %10154 = vmatprep.mubr.msk.f32.mxu1 %vm153_vm0, %v17812_v61  ;;  %v17871_v61 = vld [vmem:[#allocation143_spill] sm:$0xff] }
 0x1be   :  { %9561 = vmatmul.mubr.msk.f32.gmra.mrb[90].mxu0 %vm153_vm0, %v17813_v62  ;;  %v17872_v62 = vld [vmem:[#allocation144_spill] sm:$0xff] }
 0x1bf   :  { %10155 = vmatmul.mubr.msk.f32.gmra.mrb[90].mxu1 %vm153_vm0, %v17814_v63  ;;  %9563 = vmatprep.mubr.msk.f32.mxu0 %vm153_vm0, %v17815_v0  ;;  %v17873_v63 = vld [vmem:[#allocation145_spill] sm:$0xff]  ;;  %v17874_v0 = vld [vmem:[#allocation146_spill] sm:$0xff] }
 0x1c0   :  { %10157 = vmatprep.mubr.msk.f32.mxu1 %vm153_vm0, %v17816_v1  ;;  %v17875_v1 = vld [vmem:[#allocation147_spill] sm:$0xff] }
 0x1c2   :  { %9564 = vmatmul.mubr.msk.f32.gmra.mrb[92].mxu0 %vm153_vm0, %v17817_v2  ;;  %v17876_v2 = vld [vmem:[#allocation148_spill] sm:$0xff] }
 0x1c3   :  { %10158 = vmatmul.mubr.msk.f32.gmra.mrb[92].mxu1 %vm153_vm0, %v17818_v3  ;;  %9566 = vmatprep.mubr.msk.f32.mxu0 %vm153_vm0, %v17819_v4  ;;  %v17877_v3 = vld [vmem:[#allocation149_spill] sm:$0xff]  ;;  %v17878_v4 = vld [vmem:[#allocation150_spill] sm:$0xff] }
 0x1c4   :  { %10160 = vmatprep.mubr.msk.f32.mxu1 %vm153_vm0, %v17820_v5  ;;  %v17879_v5 = vld [vmem:[#allocation151_spill] sm:$0xff] }
 0x1c6   :  { %9567 = vmatmul.mubr.msk.f32.gmra.mrb[94].mxu0 %vm153_vm0, %v17821_v6  ;;  %v17880_v6 = vld [vmem:[#allocation152_spill] sm:$0xff] }
 0x1c7   :  { %10161 = vmatmul.mubr.msk.f32.gmra.mrb[94].mxu1 %vm153_vm0, %v17822_v7  ;;  %9569 = vmatprep.mubr.msk.f32.mxu0 %vm153_vm0, %v17823_v8  ;;  %v17881_v7 = vld [vmem:[#allocation153_spill] sm:$0xff]  ;;  %v17882_v8 = vld [vmem:[#allocation154_spill] sm:$0xff] }
 0x1c8   :  { %10163 = vmatprep.mubr.msk.f32.mxu1 %vm153_vm0, %v17824_v9  ;;  %v17883_v9 = vld [vmem:[#allocation155_spill] sm:$0xff] }
 0x1ca   :  { %9570 = vmatmul.mubr.msk.f32.gmra.mrb[96].mxu0 %vm153_vm0, %v17825_v10  ;;  %v17884_v10 = vld [vmem:[#allocation156_spill] sm:$0xff] }
 0x1cb   :  { %10164 = vmatmul.mubr.msk.f32.gmra.mrb[96].mxu1 %vm153_vm0, %v17826_v11  ;;  %9572 = vmatprep.mubr.msk.f32.mxu0 %vm153_vm0, %v17827_v12  ;;  %v1960_v11 = vld [vmem:[%s17413_s0 + $0x40] sm:$0xff] }
 0x1cc   :  { %10166 = vmatprep.mubr.msk.f32.mxu1 %vm153_vm0, %v17828_v13  ;;  %v5382_v12 = vld [vmem:[%s17413_s0 + $0x480] sm:$0xff]  ;;  %v17885_v13 = vld [vmem:[#allocation157_spill] sm:$0xff] }
 0x1ce   :  { %9573 = vmatmul.mubr.msk.f32.gmra.mrb[98].mxu0 %vm153_vm0, %v17829_v14  ;;  %v17886_v14 = vld [vmem:[#allocation158_spill] sm:$0xff] }
 0x1cf   :  { %10167 = vmatmul.mubr.msk.f32.gmra.mrb[98].mxu1 %vm153_vm0, %v17830_v15  ;;  %9575 = vmatprep.mubr.msk.f32.mxu0 %vm153_vm0, %v17831_v16  ;;  %v1961_v15 = vld [vmem:[%s17413_s0 + $0x48] sm:$0xff] }
 0x1d0   :  { %10169 = vmatprep.mubr.msk.f32.mxu1 %vm153_vm0, %v17832_v17  ;;  %v5383_v16 = vld [vmem:[%s17413_s0 + $0x488] sm:$0xff]  ;;  %v1962_v17 = vld [vmem:[%s17413_s0 + $0x50] sm:$0xff] }
 0x1d2   :  { %9576 = vmatmul.mubr.msk.f32.gmra.mrb[100].mxu0 %vm153_vm0, %v17833_v18  ;;  %v5384_v18 = vld [vmem:[%s17413_s0 + $0x490] sm:$0xff] }
 0x1d3   :  { %10170 = vmatmul.mubr.msk.f32.gmra.mrb[100].mxu1 %vm153_vm0, %v17834_v19  ;;  %9578 = vmatprep.mubr.msk.f32.mxu0 %vm153_vm0, %v17835_v20  ;;  %v1963_v19 = vld [vmem:[%s17413_s0 + $0x58] sm:$0xff] }
 0x1d4   :  { %10172 = vmatprep.mubr.msk.f32.mxu1 %vm153_vm0, %v17836_v21  ;;  %v5385_v20 = vld [vmem:[%s17413_s0 + $0x498] sm:$0xff]  ;;  %v1964_v21 = vld [vmem:[%s17413_s0 + $0x60] sm:$0xff] }
 0x1d6   :  { %9579 = vmatmul.mubr.msk.f32.gmra.mrb[102].mxu0 %vm153_vm0, %v17837_v22  ;;  %v5386_v22 = vld [vmem:[%s17413_s0 + $0x4a0] sm:$0xff] }
 0x1d7   :  { %10173 = vmatmul.mubr.msk.f32.gmra.mrb[102].mxu1 %vm153_vm0, %v17838_v23  ;;  %9581 = vmatprep.mubr.msk.f32.mxu0 %vm153_vm0, %v17839_v24  ;;  %v1965_v23 = vld [vmem:[%s17413_s0 + $0x68] sm:$0xff] }
 0x1d8   :  { %10175 = vmatprep.mubr.msk.f32.mxu1 %vm153_vm0, %v17840_v25  ;;  %v5387_v24 = vld [vmem:[%s17413_s0 + $0x4a8] sm:$0xff]  ;;  %v1966_v25 = vld [vmem:[%s17413_s0 + $0x70] sm:$0xff] }
 0x1da   :  { %9582 = vmatmul.mubr.msk.f32.gmra.mrb[104].mxu0 %vm153_vm0, %v17841_v26  ;;  %v5388_v26 = vld [vmem:[%s17413_s0 + $0x4b0] sm:$0xff] }
 0x1db   :  { %10176 = vmatmul.mubr.msk.f32.gmra.mrb[104].mxu1 %vm153_vm0, %v17842_v27  ;;  %9584 = vmatprep.mubr.msk.f32.mxu0 %vm153_vm0, %v17843_v28  ;;  %v1967_v27 = vld [vmem:[%s17413_s0 + $0x78] sm:$0xff] }
 0x1dc   :  { %10178 = vmatprep.mubr.msk.f32.mxu1 %vm153_vm0, %v17844_v29  ;;  %v5389_v28 = vld [vmem:[%s17413_s0 + $0x4b8] sm:$0xff]  ;;  %v1968_v29 = vld [vmem:[%s17413_s0 + $0x80] sm:$0xff] }
 0x1de   :  { %9585 = vmatmul.mubr.msk.f32.gmra.mrb[106].mxu0 %vm153_vm0, %v17845_v30  ;;  %v5390_v30 = vld [vmem:[%s17413_s0 + $0x4c0] sm:$0xff] }
 0x1df   :  { %10179 = vmatmul.mubr.msk.f32.gmra.mrb[106].mxu1 %vm153_vm0, %v17846_v31  ;;  %9587 = vmatprep.mubr.msk.f32.mxu0 %vm153_vm0, %v17847_v32  ;;  %v1969_v31 = vld [vmem:[%s17413_s0 + $0x88] sm:$0xff] }
 0x1e0   :  { %10181 = vmatprep.mubr.msk.f32.mxu1 %vm153_vm0, %v17848_v33  ;;  %v5391_v32 = vld [vmem:[%s17413_s0 + $0x4c8] sm:$0xff]  ;;  %v1970_v33 = vld [vmem:[%s17413_s0 + $0x90] sm:$0xff] }
 0x1e2   :  { %9588 = vmatmul.mubr.msk.f32.gmra.mrb[108].mxu0 %vm153_vm0, %v17849_v34  ;;  %v5392_v34 = vld [vmem:[%s17413_s0 + $0x4d0] sm:$0xff] }
 0x1e3   :  { %10182 = vmatmul.mubr.msk.f32.gmra.mrb[108].mxu1 %vm153_vm0, %v17850_v41  ;;  %9590 = vmatprep.mubr.msk.f32.mxu0 %vm153_vm0, %v17851_v35  ;;  %v1971_v41 = vld [vmem:[%s17413_s0 + $0x98] sm:$0xff] }
 0x1e4   :  { %10184 = vmatprep.mubr.msk.f32.mxu1 %vm153_vm0, %v17852_v36  ;;  %v5393_v35 = vld [vmem:[%s17413_s0 + $0x4d8] sm:$0xff]  ;;  %v1972_v36 = vld [vmem:[%s17413_s0 + $0xa0] sm:$0xff] }
 0x1e6   :  { %9591 = vmatmul.mubr.msk.f32.gmra.mrb[110].mxu0 %vm153_vm0, %v17853_v49  ;;  %v1973_v49 = vld [vmem:[%s17413_s0 + $0xa8] sm:$0xff] }
 0x1e7   :  { %10185 = vmatmul.mubr.msk.f32.gmra.mrb[110].mxu1 %vm153_vm0, %v17854_v40  ;;  %9593 = vmatprep.mubr.msk.f32.mxu0 %vm153_vm0, %v17855_v38  ;;  %v5395_v40 = vld [vmem:[%s17413_s0 + $0x4e8] sm:$0xff]  ;;  %v1974_v38 = vld [vmem:[%s17413_s0 + $0xb0] sm:$0xff] }
 0x1e8   :  { %10187 = vmatprep.mubr.msk.f32.mxu1 %vm153_vm0, %v17856_v42  ;;  %v5396_v42 = vld [vmem:[%s17413_s0 + $0x4f0] sm:$0xff] }
 0x1ea   :  { %9594 = vmatmul.mubr.msk.f32.gmra.mrb[112].mxu0 %vm153_vm0, %v17857_v45  ;;  %v1975_v45 = vld [vmem:[%s17413_s0 + $0xb8] sm:$0xff] }
 0x1eb   :  { %10188 = vmatmul.mubr.msk.f32.gmra.mrb[112].mxu1 %vm153_vm0, %v17858_v47  ;;  %9596 = vmatprep.mubr.msk.f32.mxu0 %vm153_vm0, %v17859_v48  ;;  %v1976_v47 = vld [vmem:[%s17413_s0 + $0xc0] sm:$0xff] }
 0x1ec   :  { %10190 = vmatprep.mubr.msk.f32.mxu1 %vm153_vm0, %v17860_v50  ;;  %v5398_v48 = vld [vmem:[%s17413_s0 + $0x500] sm:$0xff]  ;;  %v1977_v50 = vld [vmem:[%s17413_s0 + $0xc8] sm:$0xff] }
 0x1ee   :  { %9597 = vmatmul.mubr.msk.f32.gmra.mrb[114].mxu0 %vm153_vm0, %v17861_v51  ;;  %v5399_v51 = vld [vmem:[%s17413_s0 + $0x508] sm:$0xff] }
 0x1ef   :  { %10191 = vmatmul.mubr.msk.f32.gmra.mrb[114].mxu1 %vm153_vm0, %v17862_v52  ;;  %9599 = vmatprep.mubr.msk.f32.mxu0 %vm153_vm0, %v17863_v53  ;;  %v1978_v52 = vld [vmem:[%s17413_s0 + $0xd0] sm:$0xff] }
 0x1f0   :  { %10193 = vmatprep.mubr.msk.f32.mxu1 %vm153_vm0, %v17864_v54  ;;  %v5400_v53 = vld [vmem:[%s17413_s0 + $0x510] sm:$0xff]  ;;  %v1979_v54 = vld [vmem:[%s17413_s0 + $0xd8] sm:$0xff] }
 0x1f2   :  { %9600 = vmatmul.mubr.msk.f32.gmra.mrb[116].mxu0 %vm153_vm0, %v17865_v55  ;;  %v5401_v55 = vld [vmem:[%s17413_s0 + $0x518] sm:$0xff] }
 0x1f3   :  { %10194 = vmatmul.mubr.msk.f32.gmra.mrb[116].mxu1 %vm153_vm0, %v17866_v56  ;;  %9602 = vmatprep.mubr.msk.f32.mxu0 %vm153_vm0, %v17867_v57  ;;  %v1980_v56 = vld [vmem:[%s17413_s0 + $0xe0] sm:$0xff] }
 0x1f4   :  { %10196 = vmatprep.mubr.msk.f32.mxu1 %vm153_vm0, %v17868_v58  ;;  %v5402_v57 = vld [vmem:[%s17413_s0 + $0x520] sm:$0xff]  ;;  %v1981_v58 = vld [vmem:[%s17413_s0 + $0xe8] sm:$0xff] }
 0x1f6   :  { %9603 = vmatmul.mubr.msk.f32.gmra.mrb[118].mxu0 %vm153_vm0, %v17869_v59  ;;  %v5403_v59 = vld [vmem:[%s17413_s0 + $0x528] sm:$0xff] }
 0x1f7   :  { %10197 = vmatmul.mubr.msk.f32.gmra.mrb[118].mxu1 %vm153_vm0, %v17870_v60  ;;  %9605 = vmatprep.mubr.msk.f32.mxu0 %vm153_vm0, %v17871_v61  ;;  %v1982_v60 = vld [vmem:[%s17413_s0 + $0xf0] sm:$0xff] }
 0x1f8   :  { %10199 = vmatprep.mubr.msk.f32.mxu1 %vm153_vm0, %v17872_v62  ;;  %v5404_v61 = vld [vmem:[%s17413_s0 + $0x530] sm:$0xff]  ;;  %v1983_v62 = vld [vmem:[%s17413_s0 + $0xf8] sm:$0xff] }
 0x1fa   :  { %9606 = vmatmul.mubr.msk.f32.gmra.mrb[120].mxu0 %vm153_vm0, %v17873_v63  ;;  %v5405_v63 = vld [vmem:[%s17413_s0 + $0x538] sm:$0xff] }
 0x1fb   :  { %10200 = vmatmul.mubr.msk.f32.gmra.mrb[120].mxu1 %vm153_vm0, %v17874_v0  ;;  %9608 = vmatprep.mubr.msk.f32.mxu0 %vm153_vm0, %v17875_v1  ;;  %v1984_v0 = vld [vmem:[%s17413_s0 + $0x100] sm:$0xff] }
 0x1fc   :  { %10202 = vmatprep.mubr.msk.f32.mxu1 %vm153_vm0, %v17876_v2  ;;  %v5406_v1 = vld [vmem:[%s17413_s0 + $0x540] sm:$0xff]  ;;  %v1985_v2 = vld [vmem:[%s17413_s0 + $0x108] sm:$0xff] }
 0x1fe   :  { %9609 = vmatmul.mubr.msk.f32.gmra.mrb[122].mxu0 %vm153_vm0, %v17877_v3  ;;  %v5407_v3 = vld [vmem:[%s17413_s0 + $0x548] sm:$0xff] }
 0x1ff   :  { %10203 = vmatmul.mubr.msk.f32.gmra.mrb[122].mxu1 %vm153_vm0, %v17878_v4  ;;  %9611 = vmatprep.mubr.msk.f32.mxu0 %vm153_vm0, %v17879_v5  ;;  %v1986_v4 = vld [vmem:[%s17413_s0 + $0x110] sm:$0xff] }
 0x200   :  { %10205 = vmatprep.mubr.msk.f32.mxu1 %vm153_vm0, %v17880_v6  ;;  %v5408_v5 = vld [vmem:[%s17413_s0 + $0x550] sm:$0xff]  ;;  %v1987_v6 = vld [vmem:[%s17413_s0 + $0x118] sm:$0xff] }
 0x202   :  { %9612 = vmatmul.mubr.msk.f32.gmra.mrb[124].mxu0 %vm153_vm0, %v17881_v7  ;;  %v5409_v7 = vld [vmem:[%s17413_s0 + $0x558] sm:$0xff] }
 0x203   :  { %10206 = vmatmul.mubr.msk.f32.gmra.mrb[124].mxu1 %vm153_vm0, %v17882_v8  ;;  %9614 = vmatprep.mubr.msk.f32.mxu0 %vm153_vm0, %v17883_v9  ;;  %v1988_v8 = vld [vmem:[%s17413_s0 + $0x120] sm:$0xff] }
 0x204   :  { %10208 = vmatprep.mubr.msk.f32.mxu1 %vm153_vm0, %v17884_v10  ;;  %v5410_v9 = vld [vmem:[%s17413_s0 + $0x560] sm:$0xff]  ;;  %v1989_v10 = vld [vmem:[%s17413_s0 + $0x128] sm:$0xff] }
 0x206   :  { %9615 = vmatmul.mubr.msk.f32.gmra.mrb[126].mxu0 %vm153_vm0, %v17885_v13  ;;  %v5412_v13 = vld [vmem:[%s17413_s0 + $0x570] sm:$0xff] }
 0x207   :  { %10209 = vmatmul.mubr.msk.f32.gmra.mrb[126].mxu1 %vm153_vm0, %v17886_v14  ;;  %9623 = vmatprep.mubr.msk.f32.mxu0 %vm153_vm0, %v1960_v11  ;;  %v5411_v11 = vld [vmem:[%s17413_s0 + $0x568] sm:$0xff]  ;;  %v1991_v14 = vld [vmem:[%s17413_s0 + $0x138] sm:$0xff] }
 0x208   :  { %10217 = vmatprep.mubr.msk.f32.mxu1 %vm153_vm0, %v5382_v12  ;;  %v1990_v12 = vld [vmem:[%s17413_s0 + $0x130] sm:$0xff] }
 0x20a   :  { %9624 = vmatmul.mubr.msk.f32.vlgmr.msra.gmra.mrb[0].mxu0 %vm153_vm0, %v1961_v15  ;;  %v5413_v15 = vld [vmem:[%s17413_s0 + $0x578] sm:$0xff] }
 0x20b   :  { %10218 = vmatmul.mubr.msk.f32.vlgmr.msra.gmra.mrb[0].mxu1 %vm153_vm0, %v5383_v16  ;;  %9626 = vmatprep.mubr.msk.f32.mxu0 %vm153_vm0, %v1962_v17  ;;  %v1992_v16 = vld [vmem:[%s17413_s0 + $0x140] sm:$0xff] }
 0x20c   :  { %10220 = vmatprep.mubr.msk.f32.mxu1 %vm153_vm0, %v5384_v18  ;;  %v5414_v17 = vld [vmem:[%s17413_s0 + $0x580] sm:$0xff]  ;;  %v1993_v18 = vld [vmem:[%s17413_s0 + $0x148] sm:$0xff] }
 0x20e   :  { %9627 = vmatmul.mubr.msk.f32.gmra.mrb[2].mxu0 %vm153_vm0, %v1963_v19  ;;  %v5415_v19 = vld [vmem:[%s17413_s0 + $0x588] sm:$0xff] }
 0x20f   :  { %10221 = vmatmul.mubr.msk.f32.gmra.mrb[2].mxu1 %vm153_vm0, %v5385_v20  ;;  %9629 = vmatprep.mubr.msk.f32.mxu0 %vm153_vm0, %v1964_v21  ;;  %v1994_v20 = vld [vmem:[%s17413_s0 + $0x150] sm:$0xff] }
 0x210   :  { %10223 = vmatprep.mubr.msk.f32.mxu1 %vm153_vm0, %v5386_v22  ;;  %v5416_v21 = vld [vmem:[%s17413_s0 + $0x590] sm:$0xff]  ;;  %v1995_v22 = vld [vmem:[%s17413_s0 + $0x158] sm:$0xff] }
 0x212   :  { %9630 = vmatmul.mubr.msk.f32.gmra.mrb[4].mxu0 %vm153_vm0, %v1965_v23  ;;  %v5417_v23 = vld [vmem:[%s17413_s0 + $0x598] sm:$0xff] }
 0x213   :  { %10224 = vmatmul.mubr.msk.f32.gmra.mrb[4].mxu1 %vm153_vm0, %v5387_v24  ;;  %9632 = vmatprep.mubr.msk.f32.mxu0 %vm153_vm0, %v1966_v25  ;;  %v1996_v24 = vld [vmem:[%s17413_s0 + $0x160] sm:$0xff] }
 0x214   :  { %10226 = vmatprep.mubr.msk.f32.mxu1 %vm153_vm0, %v5388_v26  ;;  %v5418_v25 = vld [vmem:[%s17413_s0 + $0x5a0] sm:$0xff]  ;;  %v1997_v26 = vld [vmem:[%s17413_s0 + $0x168] sm:$0xff] }
 0x216   :  { %9633 = vmatmul.mubr.msk.f32.gmra.mrb[6].mxu0 %vm153_vm0, %v1967_v27  ;;  %v5419_v27 = vld [vmem:[%s17413_s0 + $0x5a8] sm:$0xff] }
 0x217   :  { %10227 = vmatmul.mubr.msk.f32.gmra.mrb[6].mxu1 %vm153_vm0, %v5389_v28  ;;  %9635 = vmatprep.mubr.msk.f32.mxu0 %vm153_vm0, %v1968_v29  ;;  %v1998_v28 = vld [vmem:[%s17413_s0 + $0x170] sm:$0xff] }
 0x218   :  { %10229 = vmatprep.mubr.msk.f32.mxu1 %vm153_vm0, %v5390_v30  ;;  %v5420_v29 = vld [vmem:[%s17413_s0 + $0x5b0] sm:$0xff]  ;;  %v1999_v30 = vld [vmem:[%s17413_s0 + $0x178] sm:$0xff] }
 0x21a   :  { %9636 = vmatmul.mubr.msk.f32.gmra.mrb[8].mxu0 %vm153_vm0, %v1969_v31  ;;  %v5421_v31 = vld [vmem:[%s17413_s0 + $0x5b8] sm:$0xff] }
 0x21b   :  { %10230 = vmatmul.mubr.msk.f32.gmra.mrb[8].mxu1 %vm153_vm0, %v5391_v32  ;;  %9638 = vmatprep.mubr.msk.f32.mxu0 %vm153_vm0, %v1970_v33  ;;  %v2000_v32 = vld [vmem:[%s17413_s0 + $0x180] sm:$0xff] }
 0x21c   :  { %10232 = vmatprep.mubr.msk.f32.mxu1 %vm153_vm0, %v5392_v34  ;;  %v5422_v33 = vld [vmem:[%s17413_s0 + $0x5c0] sm:$0xff]  ;;  %v2001_v34 = vld [vmem:[%s17413_s0 + $0x188] sm:$0xff] }
 0x21e   :  { %9639 = vmatmul.mubr.msk.f32.gmra.mrb[10].mxu0 %vm153_vm0, %v1971_v41  ;;  %v5423_v41 = vld [vmem:[%s17413_s0 + $0x5c8] sm:$0xff] }
 0x21f   :  { %10233 = vmatmul.mubr.msk.f32.gmra.mrb[10].mxu1 %vm153_vm0, %v5393_v35  ;;  %9641 = vmatprep.mubr.msk.f32.mxu0 %vm153_vm0, %v1972_v36  ;;  %v2002_v35 = vld [vmem:[%s17413_s0 + $0x190] sm:$0xff] }
 0x220   :  { %10235 = vmatprep.mubr.msk.f32.mxu1 %vm153_vm0, %v5394_v39  ;;  %v5424_v36 = vld [vmem:[%s17413_s0 + $0x5d0] sm:$0xff]  ;;  %v2003_v39 = vld [vmem:[%s17413_s0 + $0x198] sm:$0xff] }
 0x222   :  { %9642 = vmatmul.mubr.msk.f32.gmra.mrb[12].mxu0 %vm153_vm0, %v1973_v49  ;;  %v5425_v49 = vld [vmem:[%s17413_s0 + $0x5d8] sm:$0xff] }
 0x223   :  { %10236 = vmatmul.mubr.msk.f32.gmra.mrb[12].mxu1 %vm153_vm0, %v5395_v40  ;;  %9644 = vmatprep.mubr.msk.f32.mxu0 %vm153_vm0, %v1974_v38  ;;  %v2004_v40 = vld [vmem:[%s17413_s0 + $0x1a0] sm:$0xff] }
 0x224   :  { %10238 = vmatprep.mubr.msk.f32.mxu1 %vm153_vm0, %v5396_v42  ;;  %v5426_v38 = vld [vmem:[%s17413_s0 + $0x5e0] sm:$0xff]  ;;  %v2005_v42 = vld [vmem:[%s17413_s0 + $0x1a8] sm:$0xff] }
 0x226   :  { %9645 = vmatmul.mubr.msk.f32.gmra.mrb[14].mxu0 %vm153_vm0, %v1975_v45  ;;  %v5427_v45 = vld [vmem:[%s17413_s0 + $0x5e8] sm:$0xff] }
 0x227   :  { %10239 = vmatmul.mubr.msk.f32.gmra.mrb[14].mxu1 %vm153_vm0, %v5397_v46  ;;  %9647 = vmatprep.mubr.msk.f32.mxu0 %vm153_vm0, %v1976_v47  ;;  %v2006_v46 = vld [vmem:[%s17413_s0 + $0x1b0] sm:$0xff] }
 0x228   :  { %10241 = vmatprep.mubr.msk.f32.mxu1 %vm153_vm0, %v5398_v48  ;;  %v5428_v47 = vld [vmem:[%s17413_s0 + $0x5f0] sm:$0xff]  ;;  %v2007_v48 = vld [vmem:[%s17413_s0 + $0x1b8] sm:$0xff] }
 0x22a   :  { %9648 = vmatmul.mubr.msk.f32.gmra.mrb[16].mxu0 %vm153_vm0, %v1977_v50  ;;  %v5429_v50 = vld [vmem:[%s17413_s0 + $0x5f8] sm:$0xff] }
 0x22b   :  { %10242 = vmatmul.mubr.msk.f32.gmra.mrb[16].mxu1 %vm153_vm0, %v5399_v51  ;;  %9650 = vmatprep.mubr.msk.f32.mxu0 %vm153_vm0, %v1978_v52  ;;  %v2008_v51 = vld [vmem:[%s17413_s0 + $0x1c0] sm:$0xff] }
 0x22c   :  { %10244 = vmatprep.mubr.msk.f32.mxu1 %vm153_vm0, %v5400_v53  ;;  %v5430_v52 = vld [vmem:[%s17413_s0 + $0x600] sm:$0xff]  ;;  %v2009_v53 = vld [vmem:[%s17413_s0 + $0x1c8] sm:$0xff] }
 0x22e   :  { %9651 = vmatmul.mubr.msk.f32.gmra.mrb[18].mxu0 %vm153_vm0, %v1979_v54  ;;  %v5431_v54 = vld [vmem:[%s17413_s0 + $0x608] sm:$0xff] }
 0x22f   :  { %10245 = vmatmul.mubr.msk.f32.gmra.mrb[18].mxu1 %vm153_vm0, %v5401_v55  ;;  %9653 = vmatprep.mubr.msk.f32.mxu0 %vm153_vm0, %v1980_v56  ;;  %v2010_v55 = vld [vmem:[%s17413_s0 + $0x1d0] sm:$0xff] }
 0x230   :  { %10247 = vmatprep.mubr.msk.f32.mxu1 %vm153_vm0, %v5402_v57  ;;  %v5432_v56 = vld [vmem:[%s17413_s0 + $0x610] sm:$0xff]  ;;  %v2011_v57 = vld [vmem:[%s17413_s0 + $0x1d8] sm:$0xff] }
 0x232   :  { %9654 = vmatmul.mubr.msk.f32.gmra.mrb[20].mxu0 %vm153_vm0, %v1981_v58  ;;  %v5433_v58 = vld [vmem:[%s17413_s0 + $0x618] sm:$0xff] }
 0x233   :  { %10248 = vmatmul.mubr.msk.f32.gmra.mrb[20].mxu1 %vm153_vm0, %v5403_v59  ;;  %9656 = vmatprep.mubr.msk.f32.mxu0 %vm153_vm0, %v1982_v60  ;;  %v2012_v59 = vld [vmem:[%s17413_s0 + $0x1e0] sm:$0xff] }
 0x234   :  { %10250 = vmatprep.mubr.msk.f32.mxu1 %vm153_vm0, %v5404_v61  ;;  %v5434_v60 = vld [vmem:[%s17413_s0 + $0x620] sm:$0xff]  ;;  %v2013_v61 = vld [vmem:[%s17413_s0 + $0x1e8] sm:$0xff] }
 0x236   :  { %9657 = vmatmul.mubr.msk.f32.gmra.mrb[22].mxu0 %vm153_vm0, %v1983_v62  ;;  %v5435_v62 = vld [vmem:[%s17413_s0 + $0x628] sm:$0xff] }
 0x237   :  { %10251 = vmatmul.mubr.msk.f32.gmra.mrb[22].mxu1 %vm153_vm0, %v5405_v63  ;;  %9659 = vmatprep.mubr.msk.f32.mxu0 %vm153_vm0, %v1984_v0  ;;  %v2014_v63 = vld [vmem:[%s17413_s0 + $0x1f0] sm:$0xff] }
 0x238   :  { %10253 = vmatprep.mubr.msk.f32.mxu1 %vm153_vm0, %v5406_v1  ;;  %v5436_v0 = vld [vmem:[%s17413_s0 + $0x630] sm:$0xff]  ;;  %v2015_v1 = vld [vmem:[%s17413_s0 + $0x1f8] sm:$0xff] }
 0x23a   :  { %9660 = vmatmul.mubr.msk.f32.gmra.mrb[24].mxu0 %vm153_vm0, %v1985_v2  ;;  %v5437_v2 = vld [vmem:[%s17413_s0 + $0x638] sm:$0xff] }
 0x23b   :  { %10254 = vmatmul.mubr.msk.f32.gmra.mrb[24].mxu1 %vm153_vm0, %v5407_v3  ;;  %9662 = vmatprep.mubr.msk.f32.mxu0 %vm153_vm0, %v1986_v4  ;;  %v2016_v3 = vld [vmem:[%s17413_s0 + $0x200] sm:$0xff] }
 0x23c   :  { %10256 = vmatprep.mubr.msk.f32.mxu1 %vm153_vm0, %v5408_v5  ;;  %v5438_v4 = vld [vmem:[%s17413_s0 + $0x640] sm:$0xff]  ;;  %v2017_v5 = vld [vmem:[%s17413_s0 + $0x208] sm:$0xff] }
 0x23e   :  { %9663 = vmatmul.mubr.msk.f32.gmra.mrb[26].mxu0 %vm153_vm0, %v1987_v6  ;;  %v5439_v6 = vld [vmem:[%s17413_s0 + $0x648] sm:$0xff] }
 0x23f   :  { %10257 = vmatmul.mubr.msk.f32.gmra.mrb[26].mxu1 %vm153_vm0, %v5409_v7  ;;  %9665 = vmatprep.mubr.msk.f32.mxu0 %vm153_vm0, %v1988_v8  ;;  %v2018_v7 = vld [vmem:[%s17413_s0 + $0x210] sm:$0xff] }
 0x240   :  { %10259 = vmatprep.mubr.msk.f32.mxu1 %vm153_vm0, %v5410_v9  ;;  %v5440_v8 = vld [vmem:[%s17413_s0 + $0x650] sm:$0xff]  ;;  %v2019_v9 = vld [vmem:[%s17413_s0 + $0x218] sm:$0xff] }
 0x242   :  { %9666 = vmatmul.mubr.msk.f32.gmra.mrb[28].mxu0 %vm153_vm0, %v1989_v10  ;;  %v5441_v10 = vld [vmem:[%s17413_s0 + $0x658] sm:$0xff] }
 0x243   :  { %10260 = vmatmul.mubr.msk.f32.gmra.mrb[28].mxu1 %vm153_vm0, %v5411_v11  ;;  %9668 = vmatprep.mubr.msk.f32.mxu0 %vm153_vm0, %v1990_v12  ;;  %v2020_v11 = vld [vmem:[%s17413_s0 + $0x220] sm:$0xff] }
 0x244   :  { %10262 = vmatprep.mubr.msk.f32.mxu1 %vm153_vm0, %v5412_v13  ;;  %v5442_v12 = vld [vmem:[%s17413_s0 + $0x660] sm:$0xff]  ;;  %v2021_v13 = vld [vmem:[%s17413_s0 + $0x228] sm:$0xff] }
 0x246   :  { %9669 = vmatmul.mubr.msk.f32.gmra.mrb[30].mxu0 %vm153_vm0, %v1991_v14  ;;  %v5443_v14 = vld [vmem:[%s17413_s0 + $0x668] sm:$0xff] }
 0x247   :  { %10263 = vmatmul.mubr.msk.f32.gmra.mrb[30].mxu1 %vm153_vm0, %v5413_v15  ;;  %9671 = vmatprep.mubr.msk.f32.mxu0 %vm153_vm0, %v1992_v16  ;;  %v2022_v15 = vld [vmem:[%s17413_s0 + $0x230] sm:$0xff] }
 0x248   :  { %10265 = vmatprep.mubr.msk.f32.mxu1 %vm153_vm0, %v5414_v17  ;;  %v5444_v16 = vld [vmem:[%s17413_s0 + $0x670] sm:$0xff]  ;;  %v2023_v17 = vld [vmem:[%s17413_s0 + $0x238] sm:$0xff] }
 0x24a   :  { %9672 = vmatmul.mubr.msk.f32.gmra.mrb[32].mxu0 %vm153_vm0, %v1993_v18  ;;  %v5445_v18 = vld [vmem:[%s17413_s0 + $0x678] sm:$0xff] }
 0x24b   :  { %10266 = vmatmul.mubr.msk.f32.gmra.mrb[32].mxu1 %vm153_vm0, %v5415_v19  ;;  %9674 = vmatprep.mubr.msk.f32.mxu0 %vm153_vm0, %v1994_v20  ;;  %v2024_v19 = vld [vmem:[%s17413_s0 + $0x240] sm:$0xff] }
 0x24c   :  { %10268 = vmatprep.mubr.msk.f32.mxu1 %vm153_vm0, %v5416_v21  ;;  %v5446_v20 = vld [vmem:[%s17413_s0 + $0x680] sm:$0xff]  ;;  %v2025_v21 = vld [vmem:[%s17413_s0 + $0x248] sm:$0xff] }
 0x24e   :  { %9675 = vmatmul.mubr.msk.f32.gmra.mrb[34].mxu0 %vm153_vm0, %v1995_v22  ;;  %v5447_v22 = vld [vmem:[%s17413_s0 + $0x688] sm:$0xff] }
 0x24f   :  { %10269 = vmatmul.mubr.msk.f32.gmra.mrb[34].mxu1 %vm153_vm0, %v5417_v23  ;;  %9677 = vmatprep.mubr.msk.f32.mxu0 %vm153_vm0, %v1996_v24  ;;  %v2026_v23 = vld [vmem:[%s17413_s0 + $0x250] sm:$0xff] }
 0x250   :  { %10271 = vmatprep.mubr.msk.f32.mxu1 %vm153_vm0, %v5418_v25  ;;  %v5448_v24 = vld [vmem:[%s17413_s0 + $0x690] sm:$0xff]  ;;  %v2027_v25 = vld [vmem:[%s17413_s0 + $0x258] sm:$0xff] }
 0x252   :  { %9678 = vmatmul.mubr.msk.f32.gmra.mrb[36].mxu0 %vm153_vm0, %v1997_v26  ;;  %v5449_v26 = vld [vmem:[%s17413_s0 + $0x698] sm:$0xff] }
 0x253   :  { %10272 = vmatmul.mubr.msk.f32.gmra.mrb[36].mxu1 %vm153_vm0, %v5419_v27  ;;  %9680 = vmatprep.mubr.msk.f32.mxu0 %vm153_vm0, %v1998_v28  ;;  %v2028_v27 = vld [vmem:[%s17413_s0 + $0x260] sm:$0xff] }
 0x254   :  { %10274 = vmatprep.mubr.msk.f32.mxu1 %vm153_vm0, %v5420_v29  ;;  %v5450_v28 = vld [vmem:[%s17413_s0 + $0x6a0] sm:$0xff]  ;;  %v2029_v29 = vld [vmem:[%s17413_s0 + $0x268] sm:$0xff] }
 0x256   :  { %9681 = vmatmul.mubr.msk.f32.gmra.mrb[38].mxu0 %vm153_vm0, %v1999_v30  ;;  %v5451_v30 = vld [vmem:[%s17413_s0 + $0x6a8] sm:$0xff] }
 0x257   :  { %10275 = vmatmul.mubr.msk.f32.gmra.mrb[38].mxu1 %vm153_vm0, %v5421_v31  ;;  %9683 = vmatprep.mubr.msk.f32.mxu0 %vm153_vm0, %v2000_v32  ;;  %v2030_v31 = vld [vmem:[%s17413_s0 + $0x270] sm:$0xff] }
 0x258   :  { %10277 = vmatprep.mubr.msk.f32.mxu1 %vm153_vm0, %v5422_v33  ;;  %v5452_v32 = vld [vmem:[%s17413_s0 + $0x6b0] sm:$0xff]  ;;  %v2031_v33 = vld [vmem:[%s17413_s0 + $0x278] sm:$0xff] }
 0x25a   :  { %9684 = vmatmul.mubr.msk.f32.gmra.mrb[40].mxu0 %vm153_vm0, %v2001_v34  ;;  %v5453_v34 = vld [vmem:[%s17413_s0 + $0x6b8] sm:$0xff] }
 0x25b   :  { %10278 = vmatmul.mubr.msk.f32.gmra.mrb[40].mxu1 %vm153_vm0, %v5423_v41  ;;  %9686 = vmatprep.mubr.msk.f32.mxu0 %vm153_vm0, %v2002_v35  ;;  %v2032_v41 = vld [vmem:[%s17413_s0 + $0x280] sm:$0xff] }
 0x25c   :  { %10280 = vmatprep.mubr.msk.f32.mxu1 %vm153_vm0, %v5424_v36  ;;  %v5454_v35 = vld [vmem:[%s17413_s0 + $0x6c0] sm:$0xff]  ;;  %v2033_v36 = vld [vmem:[%s17413_s0 + $0x288] sm:$0xff] }
 0x25e   :  { %9687 = vmatmul.mubr.msk.f32.gmra.mrb[42].mxu0 %vm153_vm0, %v2003_v39  ;;  %v5455_v39 = vld [vmem:[%s17413_s0 + $0x6c8] sm:$0xff] }
 0x25f   :  { %10281 = vmatmul.mubr.msk.f32.gmra.mrb[42].mxu1 %vm153_vm0, %v5425_v49  ;;  %9689 = vmatprep.mubr.msk.f32.mxu0 %vm153_vm0, %v2004_v40  ;;  %v2034_v49 = vld [vmem:[%s17413_s0 + $0x290] sm:$0xff] }
 0x260   :  { %10283 = vmatprep.mubr.msk.f32.mxu1 %vm153_vm0, %v5426_v38  ;;  %v5456_v40 = vld [vmem:[%s17413_s0 + $0x6d0] sm:$0xff]  ;;  %v2035_v38 = vld [vmem:[%s17413_s0 + $0x298] sm:$0xff] }
 0x262   :  { %9690 = vmatmul.mubr.msk.f32.gmra.mrb[44].mxu0 %vm153_vm0, %v2005_v42  ;;  %v5457_v42 = vld [vmem:[%s17413_s0 + $0x6d8] sm:$0xff] }
 0x263   :  { %10284 = vmatmul.mubr.msk.f32.gmra.mrb[44].mxu1 %vm153_vm0, %v5427_v45  ;;  %9692 = vmatprep.mubr.msk.f32.mxu0 %vm153_vm0, %v2006_v46  ;;  %v2036_v45 = vld [vmem:[%s17413_s0 + $0x2a0] sm:$0xff] }
 0x264   :  { %10286 = vmatprep.mubr.msk.f32.mxu1 %vm153_vm0, %v5428_v47  ;;  %v5458_v46 = vld [vmem:[%s17413_s0 + $0x6e0] sm:$0xff]  ;;  %v2037_v47 = vld [vmem:[%s17413_s0 + $0x2a8] sm:$0xff] }
 0x266   :  { %9693 = vmatmul.mubr.msk.f32.gmra.mrb[46].mxu0 %vm153_vm0, %v2007_v48  ;;  %v5459_v48 = vld [vmem:[%s17413_s0 + $0x6e8] sm:$0xff] }
 0x267   :  { %10287 = vmatmul.mubr.msk.f32.gmra.mrb[46].mxu1 %vm153_vm0, %v5429_v50  ;;  %9695 = vmatprep.mubr.msk.f32.mxu0 %vm153_vm0, %v2008_v51  ;;  %v2038_v50 = vld [vmem:[%s17413_s0 + $0x2b0] sm:$0xff] }
 0x268   :  { %10289 = vmatprep.mubr.msk.f32.mxu1 %vm153_vm0, %v5430_v52  ;;  %v5460_v51 = vld [vmem:[%s17413_s0 + $0x6f0] sm:$0xff]  ;;  %v2039_v52 = vld [vmem:[%s17413_s0 + $0x2b8] sm:$0xff] }
 0x26a   :  { %9696 = vmatmul.mubr.msk.f32.gmra.mrb[48].mxu0 %vm153_vm0, %v2009_v53  ;;  %v5461_v53 = vld [vmem:[%s17413_s0 + $0x6f8] sm:$0xff] }
 0x26b   :  { %10290 = vmatmul.mubr.msk.f32.gmra.mrb[48].mxu1 %vm153_vm0, %v5431_v54  ;;  %9698 = vmatprep.mubr.msk.f32.mxu0 %vm153_vm0, %v2010_v55  ;;  %v2040_v54 = vld [vmem:[%s17413_s0 + $0x2c0] sm:$0xff] }
 0x26c   :  { %10292 = vmatprep.mubr.msk.f32.mxu1 %vm153_vm0, %v5432_v56  ;;  %v5462_v55 = vld [vmem:[%s17413_s0 + $0x700] sm:$0xff]  ;;  %v2041_v56 = vld [vmem:[%s17413_s0 + $0x2c8] sm:$0xff] }
 0x26e   :  { %9699 = vmatmul.mubr.msk.f32.gmra.mrb[50].mxu0 %vm153_vm0, %v2011_v57  ;;  %v5463_v57 = vld [vmem:[%s17413_s0 + $0x708] sm:$0xff] }
 0x26f   :  { %10293 = vmatmul.mubr.msk.f32.gmra.mrb[50].mxu1 %vm153_vm0, %v5433_v58  ;;  %9701 = vmatprep.mubr.msk.f32.mxu0 %vm153_vm0, %v2012_v59  ;;  %v2042_v58 = vld [vmem:[%s17413_s0 + $0x2d0] sm:$0xff] }
 0x270   :  { %10295 = vmatprep.mubr.msk.f32.mxu1 %vm153_vm0, %v5434_v60  ;;  %v5464_v59 = vld [vmem:[%s17413_s0 + $0x710] sm:$0xff]  ;;  %v2043_v60 = vld [vmem:[%s17413_s0 + $0x2d8] sm:$0xff] }
 0x272   :  { %9702 = vmatmul.mubr.msk.f32.gmra.mrb[52].mxu0 %vm153_vm0, %v2013_v61  ;;  %v5465_v61 = vld [vmem:[%s17413_s0 + $0x718] sm:$0xff] }
 0x273   :  { %10296 = vmatmul.mubr.msk.f32.gmra.mrb[52].mxu1 %vm153_vm0, %v5435_v62  ;;  %9704 = vmatprep.mubr.msk.f32.mxu0 %vm153_vm0, %v2014_v63  ;;  %v2044_v62 = vld [vmem:[%s17413_s0 + $0x2e0] sm:$0xff] }
 0x274   :  { %10298 = vmatprep.mubr.msk.f32.mxu1 %vm153_vm0, %v5436_v0  ;;  %v5466_v63 = vld [vmem:[%s17413_s0 + $0x720] sm:$0xff]  ;;  %v2045_v0 = vld [vmem:[%s17413_s0 + $0x2e8] sm:$0xff] }
 0x276   :  { %9705 = vmatmul.mubr.msk.f32.gmra.mrb[54].mxu0 %vm153_vm0, %v2015_v1  ;;  %v5467_v1 = vld [vmem:[%s17413_s0 + $0x728] sm:$0xff] }
 0x277   :  { %10299 = vmatmul.mubr.msk.f32.gmra.mrb[54].mxu1 %vm153_vm0, %v5437_v2  ;;  %9707 = vmatprep.mubr.msk.f32.mxu0 %vm153_vm0, %v2016_v3  ;;  %v2046_v2 = vld [vmem:[%s17413_s0 + $0x2f0] sm:$0xff] }
 0x278   :  { %10301 = vmatprep.mubr.msk.f32.mxu1 %vm153_vm0, %v5438_v4  ;;  %v5468_v3 = vld [vmem:[%s17413_s0 + $0x730] sm:$0xff]  ;;  %v2047_v4 = vld [vmem:[%s17413_s0 + $0x2f8] sm:$0xff] }
 0x27a   :  { %9708 = vmatmul.mubr.msk.f32.gmra.mrb[56].mxu0 %vm153_vm0, %v2017_v5  ;;  %v5469_v5 = vld [vmem:[%s17413_s0 + $0x738] sm:$0xff] }
 0x27b   :  { %10302 = vmatmul.mubr.msk.f32.gmra.mrb[56].mxu1 %vm153_vm0, %v5439_v6  ;;  %9710 = vmatprep.mubr.msk.f32.mxu0 %vm153_vm0, %v2018_v7  ;;  %v2048_v6 = vld [vmem:[%s17413_s0 + $0x300] sm:$0xff] }
 0x27c   :  { %10304 = vmatprep.mubr.msk.f32.mxu1 %vm153_vm0, %v5440_v8  ;;  %v5470_v7 = vld [vmem:[%s17413_s0 + $0x740] sm:$0xff]  ;;  %v2049_v8 = vld [vmem:[%s17413_s0 + $0x308] sm:$0xff] }
 0x27e   :  { %9711 = vmatmul.mubr.msk.f32.gmra.mrb[58].mxu0 %vm153_vm0, %v2019_v9  ;;  %v5471_v9 = vld [vmem:[%s17413_s0 + $0x748] sm:$0xff] }
 0x27f   :  { %10305 = vmatmul.mubr.msk.f32.gmra.mrb[58].mxu1 %vm153_vm0, %v5441_v10  ;;  %9713 = vmatprep.mubr.msk.f32.mxu0 %vm153_vm0, %v2020_v11  ;;  %v2050_v10 = vld [vmem:[%s17413_s0 + $0x310] sm:$0xff] }
 0x280   :  { %10307 = vmatprep.mubr.msk.f32.mxu1 %vm153_vm0, %v5442_v12  ;;  %v5472_v11 = vld [vmem:[%s17413_s0 + $0x750] sm:$0xff]  ;;  %v2051_v12 = vld [vmem:[%s17413_s0 + $0x318] sm:$0xff] }
 0x282   :  { %9714 = vmatmul.mubr.msk.f32.gmra.mrb[60].mxu0 %vm153_vm0, %v2021_v13  ;;  %v5473_v13 = vld [vmem:[%s17413_s0 + $0x758] sm:$0xff] }
 0x283   :  { %10308 = vmatmul.mubr.msk.f32.gmra.mrb[60].mxu1 %vm153_vm0, %v5443_v14  ;;  %9716 = vmatprep.mubr.msk.f32.mxu0 %vm153_vm0, %v2022_v15  ;;  %v2052_v14 = vld [vmem:[%s17413_s0 + $0x320] sm:$0xff] }
 0x284   :  { %10310 = vmatprep.mubr.msk.f32.mxu1 %vm153_vm0, %v5444_v16  ;;  %v5474_v15 = vld [vmem:[%s17413_s0 + $0x760] sm:$0xff]  ;;  %v2053_v16 = vld [vmem:[%s17413_s0 + $0x328] sm:$0xff] }
 0x286   :  { %9717 = vmatmul.mubr.msk.f32.gmra.mrb[62].mxu0 %vm153_vm0, %v2023_v17  ;;  %v5475_v17 = vld [vmem:[%s17413_s0 + $0x768] sm:$0xff] }
 0x287   :  { %10311 = vmatmul.mubr.msk.f32.gmra.mrb[62].mxu1 %vm153_vm0, %v5445_v18  ;;  %9719 = vmatprep.mubr.msk.f32.mxu0 %vm153_vm0, %v2024_v19  ;;  %v2054_v18 = vld [vmem:[%s17413_s0 + $0x330] sm:$0xff] }
 0x288   :  { %10313 = vmatprep.mubr.msk.f32.mxu1 %vm153_vm0, %v5446_v20  ;;  %v5476_v19 = vld [vmem:[%s17413_s0 + $0x770] sm:$0xff]  ;;  %v2055_v20 = vld [vmem:[%s17413_s0 + $0x338] sm:$0xff] }
 0x28a   :  { %9720 = vmatmul.mubr.msk.f32.gmra.mrb[64].mxu0 %vm153_vm0, %v2025_v21  ;;  %v5477_v21 = vld [vmem:[%s17413_s0 + $0x778] sm:$0xff] }
 0x28b   :  { %10314 = vmatmul.mubr.msk.f32.gmra.mrb[64].mxu1 %vm153_vm0, %v5447_v22  ;;  %9722 = vmatprep.mubr.msk.f32.mxu0 %vm153_vm0, %v2026_v23  ;;  %v2056_v22 = vld [vmem:[%s17413_s0 + $0x340] sm:$0xff] }
 0x28c   :  { %10316 = vmatprep.mubr.msk.f32.mxu1 %vm153_vm0, %v5448_v24  ;;  %v5478_v23 = vld [vmem:[%s17413_s0 + $0x780] sm:$0xff]  ;;  %v2057_v24 = vld [vmem:[%s17413_s0 + $0x348] sm:$0xff] }
 0x28e   :  { %9723 = vmatmul.mubr.msk.f32.gmra.mrb[66].mxu0 %vm153_vm0, %v2027_v25  ;;  %v5479_v25 = vld [vmem:[%s17413_s0 + $0x788] sm:$0xff] }
 0x28f   :  { %10317 = vmatmul.mubr.msk.f32.gmra.mrb[66].mxu1 %vm153_vm0, %v5449_v26  ;;  %9725 = vmatprep.mubr.msk.f32.mxu0 %vm153_vm0, %v2028_v27  ;;  %v2058_v26 = vld [vmem:[%s17413_s0 + $0x350] sm:$0xff] }
 0x290   :  { %10319 = vmatprep.mubr.msk.f32.mxu1 %vm153_vm0, %v5450_v28  ;;  %v5480_v27 = vld [vmem:[%s17413_s0 + $0x790] sm:$0xff]  ;;  %v2059_v28 = vld [vmem:[%s17413_s0 + $0x358] sm:$0xff] }
 0x292   :  { %9726 = vmatmul.mubr.msk.f32.gmra.mrb[68].mxu0 %vm153_vm0, %v2029_v29  ;;  %v5481_v29 = vld [vmem:[%s17413_s0 + $0x798] sm:$0xff] }
 0x293   :  { %10320 = vmatmul.mubr.msk.f32.gmra.mrb[68].mxu1 %vm153_vm0, %v5451_v30  ;;  %9728 = vmatprep.mubr.msk.f32.mxu0 %vm153_vm0, %v2030_v31  ;;  %v2060_v30 = vld [vmem:[%s17413_s0 + $0x360] sm:$0xff] }
 0x294   :  { %10322 = vmatprep.mubr.msk.f32.mxu1 %vm153_vm0, %v5452_v32  ;;  %v5482_v31 = vld [vmem:[%s17413_s0 + $0x7a0] sm:$0xff]  ;;  %v2061_v32 = vld [vmem:[%s17413_s0 + $0x368] sm:$0xff] }
 0x296   :  { %9729 = vmatmul.mubr.msk.f32.gmra.mrb[70].mxu0 %vm153_vm0, %v2031_v33  ;;  %v5483_v33 = vld [vmem:[%s17413_s0 + $0x7a8] sm:$0xff] }
 0x297   :  { %10323 = vmatmul.mubr.msk.f32.gmra.mrb[70].mxu1 %vm153_vm0, %v5453_v34  ;;  %9731 = vmatprep.mubr.msk.f32.mxu0 %vm153_vm0, %v2032_v41  ;;  %v2062_v34 = vld [vmem:[%s17413_s0 + $0x370] sm:$0xff] }
 0x298   :  { %10325 = vmatprep.mubr.msk.f32.mxu1 %vm153_vm0, %v5454_v35  ;;  %v5484_v41 = vld [vmem:[%s17413_s0 + $0x7b0] sm:$0xff]  ;;  %v2063_v35 = vld [vmem:[%s17413_s0 + $0x378] sm:$0xff] }
 0x29a   :  { %9732 = vmatmul.mubr.msk.f32.gmra.mrb[72].mxu0 %vm153_vm0, %v2033_v36  ;;  %v7121_v36 = vpop.permute.xlu0 %7120 }
 0x29b   :  { %10326 = vmatmul.mubr.msk.f32.gmra.mrb[72].mxu1 %vm153_vm0, %v5455_v39  ;;  %9734 = vmatprep.mubr.msk.f32.mxu0 %vm153_vm0, %v2034_v49  ;;  %v5485_v39 = vld [vmem:[%s17413_s0 + $0x7b8] sm:$0xff]  ;;  %v2064_v49 = vld [vmem:[%s17413_s0 + $0x380] sm:$0xff] }
 0x29c   :  { %10328 = vmatprep.mubr.msk.f32.mxu1 %vm153_vm0, %v5456_v40  ;;  %v5486_v40 = vld [vmem:[%s17413_s0 + $0x7c0] sm:$0xff] }
 0x29e   :  { %9735 = vmatmul.mubr.msk.f32.gmra.mrb[74].mxu0 %vm153_vm0, %v2035_v38  ;;  %v2065_v38 = vld [vmem:[%s17413_s0 + $0x388] sm:$0xff] }
 0x29f   :  { %10329 = vmatmul.mubr.msk.f32.gmra.mrb[74].mxu1 %vm153_vm0, %v5457_v42  ;;  %9737 = vmatprep.mubr.msk.f32.mxu0 %vm153_vm0, %v2036_v45  ;;  %v5487_v42 = vld [vmem:[%s17413_s0 + $0x7c8] sm:$0xff]  ;;  %v2066_v45 = vld [vmem:[%s17413_s0 + $0x390] sm:$0xff] }
 0x2a0   :  { %10331 = vmatprep.mubr.msk.f32.mxu1 %vm153_vm0, %v5458_v46  ;;  %v7130_v46 = vsel %vm7129_vm1, %v13246_v44, %v7121_v36  ;;  %v5489_v44 = vld [vmem:[%s17413_s0 + $0x7d8] sm:$0xff]  ;;  %v2076_v36 = vld [vmem:[%s17413_s0 + $0x3e0] sm:$0xff] }
 0x2a2   :  { %9738 = vmatmul.mubr.msk.f32.gmra.mrb[76].mxu0 %vm153_vm0, %v2037_v47  ;;  %v5488_v47 = vld [vmem:[%s17413_s0 + $0x7d0] sm:$0xff] }
 0x2a3   :  { %10332 = vmatmul.mubr.msk.f32.gmra.mrb[76].mxu1 %vm153_vm0, %v5459_v48  ;;  %9740 = vmatprep.mubr.msk.f32.mxu0 %vm153_vm0, %v2038_v50  ;;  %v7124_v48 = vpop.permute.xlu0 %7123  ;;  %v2067_v50 = vld [vmem:[%s17413_s0 + $0x398] sm:$0xff] }
 0x2a4   :  { %10334 = vmatprep.mubr.msk.f32.mxu1 %vm153_vm0, %v5460_v51  ;;  %v7132_v51 = vsel %vm7131_vm2, %v7130_v46, %v7124_v48 }
 0x2a6   :  { %9741 = vmatmul.mubr.msk.f32.gmra.mrb[78].mxu0 %vm153_vm0, %v2039_v52  ;;  %v2068_v52 = vld [vmem:[%s17413_s0 + $0x3a0] sm:$0xff] }
 0x2a7   :  { %10335 = vmatmul.mubr.msk.f32.gmra.mrb[78].mxu1 %vm153_vm0, %v5461_v53  ;;  %9743 = vmatprep.mubr.msk.f32.mxu0 %vm153_vm0, %v2040_v54  ;;  %v7127_v53 = vpop.permute.xlu1 %7126 }
 0x2a8   :  { %10337 = vmatprep.mubr.msk.f32.mxu1 %vm153_vm0, %v5462_v55  ;;  %v5490_v55 = vld [vmem:[%s17413_s0 + $0x7e0] sm:$0xff] }
 0x2aa   :  { %9744 = vmatmul.mubr.msk.f32.gmra.mrb[80].mxu0 %vm153_vm0, %v2041_v56 }
 0x2ab   :  { %10338 = vmatmul.mubr.msk.f32.gmra.mrb[80].mxu1 %vm153_vm0, %v5463_v57  ;;  %9746 = vmatprep.mubr.msk.f32.mxu0 %vm153_vm0, %v2042_v58 }
 0x2ac   :  { %10340 = vmatprep.mubr.msk.f32.mxu1 %vm153_vm0, %v5464_v59  ;;  %v7134_v59 = vsel %vm7133_vm4, %v7132_v51, %v7127_v53 }
 0x2ae   :  { %9747 = vmatmul.mubr.msk.f32.gmra.mrb[82].mxu0 %vm153_vm0, %v2043_v60  ;;  %v2069_v60 = vld [vmem:[%s17413_s0 + $0x3a8] sm:$0xff] }
 0x2af   :  { %10341 = vmatmul.mubr.msk.f32.gmra.mrb[82].mxu1 %vm153_vm0, %v5465_v61  ;;  %9749 = vmatprep.mubr.msk.f32.mxu0 %vm153_vm0, %v2044_v62  ;;  %v5491_v61 = vld [vmem:[%s17413_s0 + $0x7e8] sm:$0xff]  ;;  %v2070_v62 = vld [vmem:[%s17413_s0 + $0x3b0] sm:$0xff] }
 0x2b0   :  { %10343 = vmatprep.mubr.msk.f32.mxu1 %vm153_vm0, %v5466_v63 }
 0x2b2   :  { %9750 = vmatmul.mubr.msk.f32.gmra.mrb[84].mxu0 %vm153_vm0, %v2045_v0  ;;  %v5492_v0 = vld [vmem:[%s17413_s0 + $0x7f0] sm:$0xff] }
 0x2b3   :  { %10344 = vmatmul.mubr.msk.f32.gmra.mrb[84].mxu1 %vm153_vm0, %v5467_v1  ;;  %9752 = vmatprep.mubr.msk.f32.mxu0 %vm153_vm0, %v2046_v2  ;;  %v14218_v2 = vrot.slane %v7134_v59, %v7118_v43  ;;  %v5493_v43 = vld [vmem:[%s17413_s0 + $0x7f8] sm:$0xff] }
 0x2b4   :  { %10346 = vmatprep.mubr.msk.f32.mxu1 %vm153_vm0, %v5468_v3 }
 0x2b6   :  { %9753 = vmatmul.mubr.msk.f32.gmra.mrb[86].mxu0 %vm153_vm0, %v2047_v4 }
 0x2b7   :  { %10347 = vmatmul.mubr.msk.f32.gmra.mrb[86].mxu1 %vm153_vm0, %v5469_v5  ;;  %9755 = vmatprep.mubr.msk.f32.mxu0 %vm153_vm0, %v2048_v6  ;;  %v2072_v5 = vld [vmem:[%s17413_s0 + $0x3c0] sm:$0xff] }
 0x2b8   :  { %10349 = vmatprep.mubr.msk.f32.mxu1 %vm153_vm0, %v5470_v7 }
 0x2ba   :  { %9756 = vmatmul.mubr.msk.f32.gmra.mrb[88].mxu0 %vm153_vm0, %v2049_v8  ;;  %v5494_v8 = vld [vmem:[%s17413_s0 + $0x800] sm:$0xff] }
 0x2bb   :  { %10350 = vmatmul.mubr.msk.f32.gmra.mrb[88].mxu1 %vm153_vm0, %v5471_v9  ;;  %9758 = vmatprep.mubr.msk.f32.mxu0 %vm153_vm0, %v2050_v10 }
 0x2bc   :  { %10352 = vmatprep.mubr.msk.f32.mxu1 %vm153_vm0, %v5472_v11 }
 0x2be   :  { %9759 = vmatmul.mubr.msk.f32.gmra.mrb[90].mxu0 %vm153_vm0, %v2051_v12 }
 0x2bf   :  { %10353 = vmatmul.mubr.msk.f32.gmra.mrb[90].mxu1 %vm153_vm0, %v5473_v13  ;;  %9761 = vmatprep.mubr.msk.f32.mxu0 %vm153_vm0, %v2052_v14 }
 0x2c0   :  { %10355 = vmatprep.mubr.msk.f32.mxu1 %vm153_vm0, %v5474_v15 }
 0x2c2   :  { %9762 = vmatmul.mubr.msk.f32.gmra.mrb[92].mxu0 %vm153_vm0, %v2053_v16 }
 0x2c3   :  { %10356 = vmatmul.mubr.msk.f32.gmra.mrb[92].mxu1 %vm153_vm0, %v5475_v17  ;;  %9764 = vmatprep.mubr.msk.f32.mxu0 %vm153_vm0, %v2054_v18  ;;  %v2073_v18 = vld [vmem:[%s17413_s0 + $0x3c8] sm:$0xff] }
 0x2c4   :  { %10358 = vmatprep.mubr.msk.f32.mxu1 %vm153_vm0, %v5476_v19 }
 0x2c6   :  { %9765 = vmatmul.mubr.msk.f32.gmra.mrb[94].mxu0 %vm153_vm0, %v2055_v20  ;;  %v5495_v20 = vld [vmem:[%s17413_s0 + $0x808] sm:$0xff] }
 0x2c7   :  { %10359 = vmatmul.mubr.msk.f32.gmra.mrb[94].mxu1 %vm153_vm0, %v5477_v21  ;;  %9767 = vmatprep.mubr.msk.f32.mxu0 %vm153_vm0, %v2056_v22  ;;  %v2074_v21 = vld [vmem:[%s17413_s0 + $0x3d0] sm:$0xff] }
 0x2c8   :  { %10361 = vmatprep.mubr.msk.f32.mxu1 %vm153_vm0, %v5478_v23 }
 0x2ca   :  { %9768 = vmatmul.mubr.msk.f32.gmra.mrb[96].mxu0 %vm153_vm0, %v2057_v24  ;;  %v5496_v24 = vld [vmem:[%s17413_s0 + $0x810] sm:$0xff] }
 0x2cb   :  { %10362 = vmatmul.mubr.msk.f32.gmra.mrb[96].mxu1 %vm153_vm0, %v5479_v25  ;;  %9770 = vmatprep.mubr.msk.f32.mxu0 %vm153_vm0, %v2058_v26 }
 0x2cc   :  { %10364 = vmatprep.mubr.msk.f32.mxu1 %vm153_vm0, %v5480_v27 }
 0x2ce   :  { %9771 = vmatmul.mubr.msk.f32.gmra.mrb[98].mxu0 %vm153_vm0, %v2059_v28 }
 0x2cf   :  { %10365 = vmatmul.mubr.msk.f32.gmra.mrb[98].mxu1 %vm153_vm0, %v5481_v29  ;;  %9773 = vmatprep.mubr.msk.f32.mxu0 %vm153_vm0, %v2060_v30 }
 0x2d0   :  { %10367 = vmatprep.mubr.msk.f32.mxu1 %vm153_vm0, %v5482_v31 }
 0x2d2   :  { %9774 = vmatmul.mubr.msk.f32.gmra.mrb[100].mxu0 %vm153_vm0, %v2061_v32 }
 0x2d3   :  { %10368 = vmatmul.mubr.msk.f32.gmra.mrb[100].mxu1 %vm153_vm0, %v5483_v33  ;;  %9776 = vmatprep.mubr.msk.f32.mxu0 %vm153_vm0, %v2062_v34  ;;  %v2075_v34 = vld [vmem:[%s17413_s0 + $0x3d8] sm:$0xff] }
 0x2d4   :  { %10370 = vmatprep.mubr.msk.f32.mxu1 %vm153_vm0, %v5484_v41 }
 0x2d6   :  { %9777 = vmatmul.mubr.msk.f32.gmra.mrb[102].mxu0 %vm153_vm0, %v2063_v35  ;;  %v5497_v35 = vld [vmem:[%s17413_s0 + $0x818] sm:$0xff] }
 0x2d7   :  { %10371 = vmatmul.mubr.msk.f32.gmra.mrb[102].mxu1 %vm153_vm0, %v5485_v39  ;;  %9779 = vmatprep.mubr.msk.f32.mxu0 %vm153_vm0, %v2064_v49 }
 0x2d8   :  { %10373 = vmatprep.mubr.msk.f32.mxu1 %vm153_vm0, %v5486_v40  ;;  %v5498_v40 = vld [vmem:[%s17413_s0 + $0x820] sm:$0xff] }
 0x2da   :  { %9780 = vmatmul.mubr.msk.f32.gmra.mrb[104].mxu0 %vm153_vm0, %v2065_v38 }
 0x2db   :  { %10374 = vmatmul.mubr.msk.f32.gmra.mrb[104].mxu1 %vm153_vm0, %v5487_v42  ;;  %9782 = vmatprep.mubr.msk.f32.mxu0 %vm153_vm0, %v2066_v45 }
 0x2dc   :  { %10376 = vmatprep.mubr.msk.f32.mxu1 %vm153_vm0, %v5488_v47 }
 0x2dd   :  { %v9625_v54 = vpop.f32.mrb[0].mxu0 }
 0x2de   :  { %3311 = vst.msk [vmem:[%s17415_s3 + $0x8] sm:$0xff] %vm3309_vm3, %v9625_v54  ;;  %v10219_v56 = vpop.f32.mrb[0].mxu1  ;;  %v2542_v57 = vpop.f32.mrb[1].mxu0  ;;  %9783 = vmatmul.mubr.msk.f32.gmra.mrb[106].mxu0 %vm153_vm0, %v2067_v50  ;;  %v5499_v54 = vld [vmem:[%s17413_s0 + $0x828] sm:$0xff] }
 0x2df   :  { %6731 = vst.msk [vmem:[%s17415_s3 + $0x408] sm:$0xff] %vm3309_vm3, %v10219_v56  ;;  %3310 = vst.msk [vmem:[%s17415_s3] sm:$0xff] %vm3309_vm3, %v2542_v57  ;;  %v5963_v58 = vpop.f32.mrb[1].mxu1  ;;  %10377 = vmatmul.mubr.msk.f32.gmra.mrb[106].mxu1 %vm153_vm0, %v5489_v44  ;;  %9785 = vmatprep.mubr.msk.f32.mxu0 %vm153_vm0, %v2068_v52  ;;  %v2077_v52 = vld [vmem:[%s17413_s0 + $0x3e8] sm:$0xff] }
 0x2e0   :  { %6730 = vst.msk [vmem:[%s17415_s3 + $0x400] sm:$0xff] %vm3309_vm3, %v5963_v58  ;;  %10379 = vmatprep.mubr.msk.f32.mxu1 %vm153_vm0, %v5490_v55  ;;  %v2078_v55 = vld [vmem:[%s17413_s0 + $0x3f0] sm:$0xff] }
 0x2e1   :  { %v9628_v63 = vpop.f32.mrb[2].mxu0  ;;  %v5500_v58 = vld [vmem:[%s17413_s0 + $0x830] sm:$0xff] }
 0x2e2   :  { %3313 = vst.msk [vmem:[%s17415_s3 + $0x18] sm:$0xff] %vm3309_vm3, %v9628_v63  ;;  %v10222_v1 = vpop.f32.mrb[2].mxu1  ;;  %v2552_v3 = vpop.f32.mrb[3].mxu0  ;;  %9786 = vmatmul.mubr.msk.f32.gmra.mrb[108].mxu0 %vm153_vm0, %v2069_v60 }
 0x2e3   :  { %6733 = vst.msk [vmem:[%s17415_s3 + $0x418] sm:$0xff] %vm3309_vm3, %v10222_v1  ;;  %3312 = vst.msk [vmem:[%s17415_s3 + $0x10] sm:$0xff] %vm3309_vm3, %v2552_v3  ;;  %v5973_v4 = vpop.f32.mrb[3].mxu1  ;;  %10380 = vmatmul.mubr.msk.f32.gmra.mrb[108].mxu1 %vm153_vm0, %v5491_v61  ;;  %9788 = vmatprep.mubr.msk.f32.mxu0 %vm153_vm0, %v2070_v62 }
 0x2e4   :  { %6732 = vst.msk [vmem:[%s17415_s3 + $0x410] sm:$0xff] %vm3309_vm3, %v5973_v4  ;;  %10382 = vmatprep.mubr.msk.f32.mxu1 %vm153_vm0, %v5492_v0 }
 0x2e5   :  { %v6859_v6 = vld [vmem:[%s17415_s3 + $0x8] sm:$0xff]  ;;  %v9631_v7 = vpop.f32.mrb[4].mxu0 }
 0x2e6   :  { %v6987_v9 = vld [vmem:[%s17415_s3 + $0x408] sm:$0xff]  ;;  %v6858_v10 = vld [vmem:[%s17415_s3] sm:$0xff]  ;;  %v7140_v11 = vadd.f32 %v14218_v2, %v6859_v6  ;;  %3315 = vst.msk [vmem:[%s17415_s3 + $0x28] sm:$0xff] %vm3309_vm3, %v9631_v7  ;;  %v10225_v12 = vpop.f32.mrb[4].mxu1  ;;  %v2562_v13 = vpop.f32.mrb[5].mxu0  ;;  %9789 = vmatmul.mubr.msk.f32.gmra.mrb[110].mxu0 %vm153_vm0, %v2071_v37  ;;  %v2079_v37 = vld [vmem:[%s17413_s0 + $0x3f8] sm:$0xff] }
 0x2e7   :  { %v6986_v14 = vld [vmem:[%s17415_s3 + $0x400] sm:$0xff]  ;;  %v7139_v15 = vadd.f32 %v14218_v2, %v6858_v10  ;;  %v7268_v16 = vadd.f32 %v14218_v2, %v6987_v9  ;;  %6735 = vst.msk [vmem:[%s17415_s3 + $0x428] sm:$0xff] %vm3309_vm3, %v10225_v12  ;;  %3314 = vst.msk [vmem:[%s17415_s3 + $0x20] sm:$0xff] %vm3309_vm3, %v2562_v13  ;;  %v5983_v17 = vpop.f32.mrb[5].mxu1  ;;  %10383 = vmatmul.mubr.msk.f32.gmra.mrb[110].mxu1 %vm153_vm0, %v5493_v43  ;;  %9791 = vmatprep.mubr.msk.f32.mxu0 %vm153_vm0, %v2072_v5  ;;  %v5501_v5 = vld [vmem:[%s17413_s0 + $0x838] sm:$0xff] }
 0x2e8   :  { %v7267_v19 = vadd.f32 %v14218_v2, %v6986_v14  ;;  %7396 = vst.msk [vmem:[%s17415_s3 + $0x8] sm:$0xff] %vm3309_vm3, %v7140_v11  ;;  %6734 = vst.msk [vmem:[%s17415_s3 + $0x420] sm:$0xff] %vm3309_vm3, %v5983_v17  ;;  %10385 = vmatprep.mubr.msk.f32.mxu1 %vm153_vm0, %v5494_v8  ;;  %v2080_v6 = vld [vmem:[%s17413_s0 + $0x400] sm:$0xff] }
 0x2e9   :  { %v6861_v22 = vld [vmem:[%s17415_s3 + $0x18] sm:$0xff]  ;;  %7395 = vst.msk [vmem:[%s17415_s3] sm:$0xff] %vm3309_vm3, %v7139_v15  ;;  %7524 = vst.msk [vmem:[%s17415_s3 + $0x408] sm:$0xff] %vm3309_vm3, %v7268_v16  ;;  %v9634_v23 = vpop.f32.mrb[6].mxu0  ;;  %v5502_v9 = vld [vmem:[%s17413_s0 + $0x840] sm:$0xff] }
 0x2ea   :  { %v6989_v25 = vld [vmem:[%s17415_s3 + $0x418] sm:$0xff]  ;;  %v7142_v26 = vadd.f32 %v14218_v2, %v6861_v22  ;;  %7523 = vst.msk [vmem:[%s17415_s3 + $0x400] sm:$0xff] %vm3309_vm3, %v7267_v19  ;;  %v6860_v27 = vld [vmem:[%s17415_s3 + $0x10] sm:$0xff]  ;;  %3317 = vst.msk [vmem:[%s17415_s3 + $0x38] sm:$0xff] %vm3309_vm3, %v9634_v23  ;;  %v10228_v28 = vpop.f32.mrb[6].mxu1  ;;  %v2572_v29 = vpop.f32.mrb[7].mxu0  ;;  %9792 = vmatmul.mubr.msk.f32.gmra.mrb[112].mxu0 %vm153_vm0, %v2073_v18 }
 0x2eb   :  { %v7270_v30 = vadd.f32 %v14218_v2, %v6989_v25  ;;  %v7141_v31 = vadd.f32 %v14218_v2, %v6860_v27  ;;  %v6988_v32 = vld [vmem:[%s17415_s3 + $0x410] sm:$0xff]  ;;  %6737 = vst.msk [vmem:[%s17415_s3 + $0x438] sm:$0xff] %vm3309_vm3, %v10228_v28  ;;  %3316 = vst.msk [vmem:[%s17415_s3 + $0x30] sm:$0xff] %vm3309_vm3, %v2572_v29  ;;  %v5993_v33 = vpop.f32.mrb[7].mxu1  ;;  %10386 = vmatmul.mubr.msk.f32.gmra.mrb[112].mxu1 %vm153_vm0, %v5495_v20  ;;  %9794 = vmatprep.mubr.msk.f32.mxu0 %vm153_vm0, %v2074_v21  ;;  %v2081_v19 = vld [vmem:[%s17413_s0 + $0x408] sm:$0xff] }
 0x2ec   :  { %7398 = vst.msk [vmem:[%s17415_s3 + $0x18] sm:$0xff] %vm3309_vm3, %v7142_v26  ;;  %v7269_v41 = vadd.f32 %v14218_v2, %v6988_v32  ;;  %6736 = vst.msk [vmem:[%s17415_s3 + $0x430] sm:$0xff] %vm3309_vm3, %v5993_v33  ;;  %10388 = vmatprep.mubr.msk.f32.mxu1 %vm153_vm0, %v5496_v24  ;;  %v5503_v21 = vld [vmem:[%s17413_s0 + $0x848] sm:$0xff]  ;;  %v2082_v22 = vld [vmem:[%s17413_s0 + $0x410] sm:$0xff] }
 0x2ed   :  { %7526 = vst.msk [vmem:[%s17415_s3 + $0x418] sm:$0xff] %vm3309_vm3, %v7270_v30  ;;  %7397 = vst.msk [vmem:[%s17415_s3 + $0x10] sm:$0xff] %vm3309_vm3, %v7141_v31  ;;  %v6863_v39 = vld [vmem:[%s17415_s3 + $0x28] sm:$0xff]  ;;  %v9637_v49 = vpop.f32.mrb[8].mxu0  ;;  %v5504_v25 = vld [vmem:[%s17413_s0 + $0x850] sm:$0xff] }
 0x2ee   :  { %7525 = vst.msk [vmem:[%s17415_s3 + $0x410] sm:$0xff] %vm3309_vm3, %v7269_v41  ;;  %v7144_v38 = vadd.f32 %v14218_v2, %v6863_v39  ;;  %v6991_v42 = vld [vmem:[%s17415_s3 + $0x428] sm:$0xff]  ;;  %v6862_v45 = vld [vmem:[%s17415_s3 + $0x20] sm:$0xff]  ;;  %3319 = vst.msk [vmem:[%s17415_s3 + $0x48] sm:$0xff] %vm3309_vm3, %v9637_v49  ;;  %v10231_v46 = vpop.f32.mrb[8].mxu1  ;;  %v2582_v47 = vpop.f32.mrb[9].mxu0  ;;  %9795 = vmatmul.mubr.msk.f32.gmra.mrb[114].mxu0 %vm153_vm0, %v2075_v34 }
 0x2ef   :  { %v7272_v48 = vadd.f32 %v14218_v2, %v6991_v42  ;;  %v7143_v50 = vadd.f32 %v14218_v2, %v6862_v45  ;;  %v6990_v44 = vld [vmem:[%s17415_s3 + $0x420] sm:$0xff]  ;;  %6739 = vst.msk [vmem:[%s17415_s3 + $0x448] sm:$0xff] %vm3309_vm3, %v10231_v46  ;;  %3318 = vst.msk [vmem:[%s17415_s3 + $0x40] sm:$0xff] %vm3309_vm3, %v2582_v47  ;;  %v6003_v51 = vpop.f32.mrb[9].mxu1  ;;  %10389 = vmatmul.mubr.msk.f32.gmra.mrb[114].mxu1 %vm153_vm0, %v5497_v35  ;;  %9797 = vmatprep.mubr.msk.f32.mxu0 %vm153_vm0, %v2076_v36  ;;  %v2083_v41 = vld [vmem:[%s17413_s0 + $0x418] sm:$0xff] }
 0x2f0   :  { %7400 = vst.msk [vmem:[%s17415_s3 + $0x28] sm:$0xff] %vm3309_vm3, %v7144_v38  ;;  %v7271_v53 = vadd.f32 %v14218_v2, %v6990_v44  ;;  %6738 = vst.msk [vmem:[%s17415_s3 + $0x440] sm:$0xff] %vm3309_vm3, %v6003_v51  ;;  %10391 = vmatprep.mubr.msk.f32.mxu1 %vm153_vm0, %v5498_v40  ;;  %v5505_v36 = vld [vmem:[%s17413_s0 + $0x858] sm:$0xff]  ;;  %v2084_v39 = vld [vmem:[%s17413_s0 + $0x420] sm:$0xff] }
 0x2f1   :  { %7528 = vst.msk [vmem:[%s17415_s3 + $0x428] sm:$0xff] %vm3309_vm3, %v7272_v48  ;;  %7399 = vst.msk [vmem:[%s17415_s3 + $0x20] sm:$0xff] %vm3309_vm3, %v7143_v50  ;;  %v6865_v56 = vld [vmem:[%s17415_s3 + $0x38] sm:$0xff]  ;;  %v9640_v57 = vpop.f32.mrb[10].mxu0  ;;  %v5506_v38 = vld [vmem:[%s17413_s0 + $0x860] sm:$0xff] }
 0x2f2   :  { %7527 = vst.msk [vmem:[%s17415_s3 + $0x420] sm:$0xff] %vm3309_vm3, %v7271_v53  ;;  %v7146_v59 = vadd.f32 %v14218_v2, %v6865_v56  ;;  %v6993_v60 = vld [vmem:[%s17415_s3 + $0x438] sm:$0xff]  ;;  %v6864_v61 = vld [vmem:[%s17415_s3 + $0x30] sm:$0xff]  ;;  %3321 = vst.msk [vmem:[%s17415_s3 + $0x58] sm:$0xff] %vm3309_vm3, %v9640_v57  ;;  %v10234_v62 = vpop.f32.mrb[10].mxu1  ;;  %v2592_v63 = vpop.f32.mrb[11].mxu0  ;;  %9798 = vmatmul.mubr.msk.f32.gmra.mrb[116].mxu0 %vm153_vm0, %v2077_v52 }
 0x2f3   :  { %v7274_v0 = vadd.f32 %v14218_v2, %v6993_v60  ;;  %v7145_v1 = vadd.f32 %v14218_v2, %v6864_v61  ;;  %v6992_v3 = vld [vmem:[%s17415_s3 + $0x430] sm:$0xff]  ;;  %6741 = vst.msk [vmem:[%s17415_s3 + $0x458] sm:$0xff] %vm3309_vm3, %v10234_v62  ;;  %3320 = vst.msk [vmem:[%s17415_s3 + $0x50] sm:$0xff] %vm3309_vm3, %v2592_v63  ;;  %v6013_v4 = vpop.f32.mrb[11].mxu1  ;;  %10392 = vmatmul.mubr.msk.f32.gmra.mrb[116].mxu1 %vm153_vm0, %v5499_v54  ;;  %9800 = vmatprep.mubr.msk.f32.mxu0 %vm153_vm0, %v2078_v55  ;;  %v2085_v53 = vld [vmem:[%s17413_s0 + $0x428] sm:$0xff] }
 0x2f4   :  { %7402 = vst.msk [vmem:[%s17415_s3 + $0x38] sm:$0xff] %vm3309_vm3, %v7146_v59  ;;  %v7273_v43 = vadd.f32 %v14218_v2, %v6992_v3  ;;  %6740 = vst.msk [vmem:[%s17415_s3 + $0x450] sm:$0xff] %vm3309_vm3, %v6013_v4  ;;  %10394 = vmatprep.mubr.msk.f32.mxu1 %vm153_vm0, %v5500_v58  ;;  %v5507_v55 = vld [vmem:[%s17413_s0 + $0x868] sm:$0xff]  ;;  %v2086_v56 = vld [vmem:[%s17413_s0 + $0x430] sm:$0xff] }
 0x2f5   :  { %7530 = vst.msk [vmem:[%s17415_s3 + $0x438] sm:$0xff] %vm3309_vm3, %v7274_v0  ;;  %7401 = vst.msk [vmem:[%s17415_s3 + $0x30] sm:$0xff] %vm3309_vm3, %v7145_v1  ;;  %v6867_v7 = vld [vmem:[%s17415_s3 + $0x48] sm:$0xff]  ;;  %v9643_v8 = vpop.f32.mrb[12].mxu0  ;;  %v5508_v59 = vld [vmem:[%s17413_s0 + $0x870] sm:$0xff] }
 0x2f6   :  { %7529 = vst.msk [vmem:[%s17415_s3 + $0x430] sm:$0xff] %vm3309_vm3, %v7273_v43  ;;  %v7148_v10 = vadd.f32 %v14218_v2, %v6867_v7  ;;  %v6995_v11 = vld [vmem:[%s17415_s3 + $0x448] sm:$0xff]  ;;  %v6866_v12 = vld [vmem:[%s17415_s3 + $0x40] sm:$0xff]  ;;  %3323 = vst.msk [vmem:[%s17415_s3 + $0x68] sm:$0xff] %vm3309_vm3, %v9643_v8  ;;  %v10237_v13 = vpop.f32.mrb[12].mxu1  ;;  %v2602_v14 = vpop.f32.mrb[13].mxu0  ;;  %9801 = vmatmul.mubr.msk.f32.gmra.mrb[118].mxu0 %vm153_vm0, %v2079_v37 }
 0x2f7   :  { %v7276_v15 = vadd.f32 %v14218_v2, %v6995_v11  ;;  %v7147_v16 = vadd.f32 %v14218_v2, %v6866_v12  ;;  %v6994_v17 = vld [vmem:[%s17415_s3 + $0x440] sm:$0xff]  ;;  %6743 = vst.msk [vmem:[%s17415_s3 + $0x468] sm:$0xff] %vm3309_vm3, %v10237_v13  ;;  %3322 = vst.msk [vmem:[%s17415_s3 + $0x60] sm:$0xff] %vm3309_vm3, %v2602_v14  ;;  %v6023_v18 = vpop.f32.mrb[13].mxu1  ;;  %10395 = vmatmul.mubr.msk.f32.gmra.mrb[118].mxu1 %vm153_vm0, %v5501_v5  ;;  %9803 = vmatprep.mubr.msk.f32.mxu0 %vm153_vm0, %v2080_v6  ;;  %v2087_v43 = vld [vmem:[%s17413_s0 + $0x438] sm:$0xff] }
 0x2f8   :  { %7404 = vst.msk [vmem:[%s17415_s3 + $0x48] sm:$0xff] %vm3309_vm3, %v7148_v10  ;;  %v7275_v20 = vadd.f32 %v14218_v2, %v6994_v17  ;;  %6742 = vst.msk [vmem:[%s17415_s3 + $0x460] sm:$0xff] %vm3309_vm3, %v6023_v18  ;;  %10397 = vmatprep.mubr.msk.f32.mxu1 %vm153_vm0, %v5502_v9  ;;  %v5509_v6 = vld [vmem:[%s17413_s0 + $0x878] sm:$0xff] }
 0x2f9   :  { %7532 = vst.msk [vmem:[%s17415_s3 + $0x448] sm:$0xff] %vm3309_vm3, %v7276_v15  ;;  %7403 = vst.msk [vmem:[%s17415_s3 + $0x40] sm:$0xff] %vm3309_vm3, %v7147_v16  ;;  %v6869_v23 = vld [vmem:[%s17415_s3 + $0x58] sm:$0xff]  ;;  %v9646_v24 = vpop.f32.mrb[14].mxu0 }
 0x2fa   :  { %7531 = vst.msk [vmem:[%s17415_s3 + $0x440] sm:$0xff] %vm3309_vm3, %v7275_v20  ;;  %v7150_v26 = vadd.f32 %v14218_v2, %v6869_v23  ;;  %v6997_v27 = vld [vmem:[%s17415_s3 + $0x458] sm:$0xff]  ;;  %v6868_v28 = vld [vmem:[%s17415_s3 + $0x50] sm:$0xff]  ;;  %3325 = vst.msk [vmem:[%s17415_s3 + $0x78] sm:$0xff] %vm3309_vm3, %v9646_v24  ;;  %v10240_v29 = vpop.f32.mrb[14].mxu1  ;;  %v2612_v30 = vpop.f32.mrb[15].mxu0  ;;  %9804 = vmatmul.mubr.msk.f32.gmra.mrb[120].mxu0 %vm153_vm0, %v2081_v19 }
 0x2fb   :  { %v7278_v31 = vadd.f32 %v14218_v2, %v6997_v27  ;;  %v7149_v32 = vadd.f32 %v14218_v2, %v6868_v28  ;;  %v6996_v33 = vld [vmem:[%s17415_s3 + $0x450] sm:$0xff]  ;;  %6745 = vst.msk [vmem:[%s17415_s3 + $0x478] sm:$0xff] %vm3309_vm3, %v10240_v29  ;;  %3324 = vst.msk [vmem:[%s17415_s3 + $0x70] sm:$0xff] %vm3309_vm3, %v2612_v30  ;;  %v6033_v34 = vpop.f32.mrb[15].mxu1  ;;  %10398 = vmatmul.mubr.msk.f32.gmra.mrb[120].mxu1 %vm153_vm0, %v5503_v21  ;;  %9806 = vmatprep.mubr.msk.f32.mxu0 %vm153_vm0, %v2082_v22 }
 0x2fc   :  { %7406 = vst.msk [vmem:[%s17415_s3 + $0x58] sm:$0xff] %vm3309_vm3, %v7150_v26  ;;  %v7277_v35 = vadd.f32 %v14218_v2, %v6996_v33  ;;  %6744 = vst.msk [vmem:[%s17415_s3 + $0x470] sm:$0xff] %vm3309_vm3, %v6033_v34  ;;  %10400 = vmatprep.mubr.msk.f32.mxu1 %vm153_vm0, %v5504_v25 }
 0x2fd   :  { %7534 = vst.msk [vmem:[%s17415_s3 + $0x458] sm:$0xff] %vm3309_vm3, %v7278_v31  ;;  %7405 = vst.msk [vmem:[%s17415_s3 + $0x50] sm:$0xff] %vm3309_vm3, %v7149_v32  ;;  %v6871_v49 = vld [vmem:[%s17415_s3 + $0x68] sm:$0xff]  ;;  %v9649_v40 = vpop.f32.mrb[16].mxu0 }
 0x2fe   :  { %7533 = vst.msk [vmem:[%s17415_s3 + $0x450] sm:$0xff] %vm3309_vm3, %v7277_v35  ;;  %v7152_v42 = vadd.f32 %v14218_v2, %v6871_v49  ;;  %v6999_v45 = vld [vmem:[%s17415_s3 + $0x468] sm:$0xff]  ;;  %v6870_v46 = vld [vmem:[%s17415_s3 + $0x60] sm:$0xff]  ;;  %3327 = vst.msk [vmem:[%s17415_s3 + $0x88] sm:$0xff] %vm3309_vm3, %v9649_v40  ;;  %v10243_v47 = vpop.f32.mrb[16].mxu1  ;;  %v2622_v48 = vpop.f32.mrb[17].mxu0  ;;  %9807 = vmatmul.mubr.msk.f32.gmra.mrb[122].mxu0 %vm153_vm0, %v2083_v41 }
 0x2ff   :  { %v7280_v50 = vadd.f32 %v14218_v2, %v6999_v45  ;;  %v7151_v44 = vadd.f32 %v14218_v2, %v6870_v46  ;;  %v6998_v51 = vld [vmem:[%s17415_s3 + $0x460] sm:$0xff]  ;;  %6747 = vst.msk [vmem:[%s17415_s3 + $0x488] sm:$0xff] %vm3309_vm3, %v10243_v47  ;;  %3326 = vst.msk [vmem:[%s17415_s3 + $0x80] sm:$0xff] %vm3309_vm3, %v2622_v48  ;;  %v6043_v52 = vpop.f32.mrb[17].mxu1  ;;  %10401 = vmatmul.mubr.msk.f32.gmra.mrb[122].mxu1 %vm153_vm0, %v5505_v36  ;;  %9809 = vmatprep.mubr.msk.f32.mxu0 %vm153_vm0, %v2084_v39 }
 0x300   :  { %7408 = vst.msk [vmem:[%s17415_s3 + $0x68] sm:$0xff] %vm3309_vm3, %v7152_v42  ;;  %v7279_v54 = vadd.f32 %v14218_v2, %v6998_v51  ;;  %6746 = vst.msk [vmem:[%s17415_s3 + $0x480] sm:$0xff] %vm3309_vm3, %v6043_v52  ;;  %10403 = vmatprep.mubr.msk.f32.mxu1 %vm153_vm0, %v5506_v38 }
 0x301   :  { %7536 = vst.msk [vmem:[%s17415_s3 + $0x468] sm:$0xff] %vm3309_vm3, %v7280_v50  ;;  %7407 = vst.msk [vmem:[%s17415_s3 + $0x60] sm:$0xff] %vm3309_vm3, %v7151_v44  ;;  %v6873_v57 = vld [vmem:[%s17415_s3 + $0x78] sm:$0xff]  ;;  %v9652_v58 = vpop.f32.mrb[18].mxu0 }
 0x302   :  { %7535 = vst.msk [vmem:[%s17415_s3 + $0x460] sm:$0xff] %vm3309_vm3, %v7279_v54  ;;  %v7154_v60 = vadd.f32 %v14218_v2, %v6873_v57  ;;  %v7001_v61 = vld [vmem:[%s17415_s3 + $0x478] sm:$0xff]  ;;  %v6872_v62 = vld [vmem:[%s17415_s3 + $0x70] sm:$0xff]  ;;  %3329 = vst.msk [vmem:[%s17415_s3 + $0x98] sm:$0xff] %vm3309_vm3, %v9652_v58  ;;  %v10246_v63 = vpop.f32.mrb[18].mxu1  ;;  %v2632_v0 = vpop.f32.mrb[19].mxu0  ;;  %9810 = vmatmul.mubr.msk.f32.gmra.mrb[124].mxu0 %vm153_vm0, %v2085_v53 }
 0x303   :  { %v7282_v1 = vadd.f32 %v14218_v2, %v7001_v61  ;;  %v7153_v3 = vadd.f32 %v14218_v2, %v6872_v62  ;;  %v7000_v4 = vld [vmem:[%s17415_s3 + $0x470] sm:$0xff]  ;;  %6749 = vst.msk [vmem:[%s17415_s3 + $0x498] sm:$0xff] %vm3309_vm3, %v10246_v63  ;;  %3328 = vst.msk [vmem:[%s17415_s3 + $0x90] sm:$0xff] %vm3309_vm3, %v2632_v0  ;;  %v6053_v37 = vpop.f32.mrb[19].mxu1  ;;  %10404 = vmatmul.mubr.msk.f32.gmra.mrb[124].mxu1 %vm153_vm0, %v5507_v55  ;;  %9812 = vmatprep.mubr.msk.f32.mxu0 %vm153_vm0, %v2086_v56 }
 0x304   :  { %7410 = vst.msk [vmem:[%s17415_s3 + $0x78] sm:$0xff] %vm3309_vm3, %v7154_v60  ;;  %v7281_v5 = vadd.f32 %v14218_v2, %v7000_v4  ;;  %6748 = vst.msk [vmem:[%s17415_s3 + $0x490] sm:$0xff] %vm3309_vm3, %v6053_v37  ;;  %10406 = vmatprep.mubr.msk.f32.mxu1 %vm153_vm0, %v5508_v59 }
 0x305   :  { %7538 = vst.msk [vmem:[%s17415_s3 + $0x478] sm:$0xff] %vm3309_vm3, %v7282_v1  ;;  %7409 = vst.msk [vmem:[%s17415_s3 + $0x70] sm:$0xff] %vm3309_vm3, %v7153_v3  ;;  %v6875_v7 = vld [vmem:[%s17415_s3 + $0x88] sm:$0xff]  ;;  %v9655_v8 = vpop.f32.mrb[20].mxu0 }
 0x306   :  { %7537 = vst.msk [vmem:[%s17415_s3 + $0x470] sm:$0xff] %vm3309_vm3, %v7281_v5  ;;  %v7156_v9 = vadd.f32 %v14218_v2, %v6875_v7  ;;  %v7003_v10 = vld [vmem:[%s17415_s3 + $0x488] sm:$0xff]  ;;  %v6874_v11 = vld [vmem:[%s17415_s3 + $0x80] sm:$0xff]  ;;  %3331 = vst.msk [vmem:[%s17415_s3 + $0xa8] sm:$0xff] %vm3309_vm3, %v9655_v8  ;;  %v10249_v12 = vpop.f32.mrb[20].mxu1  ;;  %v2642_v13 = vpop.f32.mrb[21].mxu0  ;;  %9813 = vmatmul.mubr.msk.f32.gmra.mrb[126].mxu0 %vm153_vm0, %v2087_v43 }
 0x307   :  { %v7284_v14 = vadd.f32 %v14218_v2, %v7003_v10  ;;  %v7155_v15 = vadd.f32 %v14218_v2, %v6874_v11  ;;  %v7002_v16 = vld [vmem:[%s17415_s3 + $0x480] sm:$0xff]  ;;  %6751 = vst.msk [vmem:[%s17415_s3 + $0x4a8] sm:$0xff] %vm3309_vm3, %v10249_v12  ;;  %3330 = vst.msk [vmem:[%s17415_s3 + $0xa0] sm:$0xff] %vm3309_vm3, %v2642_v13  ;;  %v6063_v17 = vpop.f32.mrb[21].mxu1  ;;  %10407 = vmatmul.mubr.msk.f32.gmra.mrb[126].mxu1 %vm153_vm0, %v5509_v6 }
 0x308   :  { %7412 = vst.msk [vmem:[%s17415_s3 + $0x88] sm:$0xff] %vm3309_vm3, %v7156_v9  ;;  %v7283_v18 = vadd.f32 %v14218_v2, %v7002_v16  ;;  %6750 = vst.msk [vmem:[%s17415_s3 + $0x4a0] sm:$0xff] %vm3309_vm3, %v6063_v17 }
 0x309   :  { %7540 = vst.msk [vmem:[%s17415_s3 + $0x488] sm:$0xff] %vm3309_vm3, %v7284_v14  ;;  %7411 = vst.msk [vmem:[%s17415_s3 + $0x80] sm:$0xff] %vm3309_vm3, %v7155_v15  ;;  %v6877_v19 = vld [vmem:[%s17415_s3 + $0x98] sm:$0xff]  ;;  %v9658_v20 = vpop.f32.mrb[22].mxu0 }
 0x30a   :  { %7539 = vst.msk [vmem:[%s17415_s3 + $0x480] sm:$0xff] %vm3309_vm3, %v7283_v18  ;;  %v7158_v21 = vadd.f32 %v14218_v2, %v6877_v19  ;;  %v7005_v22 = vld [vmem:[%s17415_s3 + $0x498] sm:$0xff]  ;;  %v6876_v23 = vld [vmem:[%s17415_s3 + $0x90] sm:$0xff]  ;;  %3333 = vst.msk [vmem:[%s17415_s3 + $0xb8] sm:$0xff] %vm3309_vm3, %v9658_v20  ;;  %v10252_v24 = vpop.f32.mrb[22].mxu1  ;;  %v2652_v25 = vpop.f32.mrb[23].mxu0 }
 0x30b   :  { %v7286_v26 = vadd.f32 %v14218_v2, %v7005_v22  ;;  %v7157_v27 = vadd.f32 %v14218_v2, %v6876_v23  ;;  %v7004_v28 = vld [vmem:[%s17415_s3 + $0x490] sm:$0xff]  ;;  %6753 = vst.msk [vmem:[%s17415_s3 + $0x4b8] sm:$0xff] %vm3309_vm3, %v10252_v24  ;;  %3332 = vst.msk [vmem:[%s17415_s3 + $0xb0] sm:$0xff] %vm3309_vm3, %v2652_v25  ;;  %v6073_v29 = vpop.f32.mrb[23].mxu1 }
 0x30c   :  { %7414 = vst.msk [vmem:[%s17415_s3 + $0x98] sm:$0xff] %vm3309_vm3, %v7158_v21  ;;  %v7285_v30 = vadd.f32 %v14218_v2, %v7004_v28  ;;  %6752 = vst.msk [vmem:[%s17415_s3 + $0x4b0] sm:$0xff] %vm3309_vm3, %v6073_v29 }
 0x30d   :  { %7542 = vst.msk [vmem:[%s17415_s3 + $0x498] sm:$0xff] %vm3309_vm3, %v7286_v26  ;;  %7413 = vst.msk [vmem:[%s17415_s3 + $0x90] sm:$0xff] %vm3309_vm3, %v7157_v27  ;;  %v6879_v31 = vld [vmem:[%s17415_s3 + $0xa8] sm:$0xff]  ;;  %v9661_v32 = vpop.f32.mrb[24].mxu0 }
 0x30e   :  { %7541 = vst.msk [vmem:[%s17415_s3 + $0x490] sm:$0xff] %vm3309_vm3, %v7285_v30  ;;  %v7160_v33 = vadd.f32 %v14218_v2, %v6879_v31  ;;  %v7007_v34 = vld [vmem:[%s17415_s3 + $0x4a8] sm:$0xff]  ;;  %v6878_v41 = vld [vmem:[%s17415_s3 + $0xa0] sm:$0xff]  ;;  %3335 = vst.msk [vmem:[%s17415_s3 + $0xc8] sm:$0xff] %vm3309_vm3, %v9661_v32  ;;  %v10255_v35 = vpop.f32.mrb[24].mxu1  ;;  %v2662_v36 = vpop.f32.mrb[25].mxu0 }
 0x30f   :  { %v7288_v39 = vadd.f32 %v14218_v2, %v7007_v34  ;;  %v7159_v49 = vadd.f32 %v14218_v2, %v6878_v41  ;;  %v7006_v40 = vld [vmem:[%s17415_s3 + $0x4a0] sm:$0xff]  ;;  %6755 = vst.msk [vmem:[%s17415_s3 + $0x4c8] sm:$0xff] %vm3309_vm3, %v10255_v35  ;;  %3334 = vst.msk [vmem:[%s17415_s3 + $0xc0] sm:$0xff] %vm3309_vm3, %v2662_v36  ;;  %v6083_v38 = vpop.f32.mrb[25].mxu1 }
 0x310   :  { %7416 = vst.msk [vmem:[%s17415_s3 + $0xa8] sm:$0xff] %vm3309_vm3, %v7160_v33  ;;  %v7287_v42 = vadd.f32 %v14218_v2, %v7006_v40  ;;  %6754 = vst.msk [vmem:[%s17415_s3 + $0x4c0] sm:$0xff] %vm3309_vm3, %v6083_v38 }
 0x311   :  { %7544 = vst.msk [vmem:[%s17415_s3 + $0x4a8] sm:$0xff] %vm3309_vm3, %v7288_v39  ;;  %7415 = vst.msk [vmem:[%s17415_s3 + $0xa0] sm:$0xff] %vm3309_vm3, %v7159_v49  ;;  %v6881_v45 = vld [vmem:[%s17415_s3 + $0xb8] sm:$0xff]  ;;  %v9664_v46 = vpop.f32.mrb[26].mxu0 }
 0x312   :  { %7543 = vst.msk [vmem:[%s17415_s3 + $0x4a0] sm:$0xff] %vm3309_vm3, %v7287_v42  ;;  %v7162_v47 = vadd.f32 %v14218_v2, %v6881_v45  ;;  %v7009_v48 = vld [vmem:[%s17415_s3 + $0x4b8] sm:$0xff]  ;;  %v6880_v50 = vld [vmem:[%s17415_s3 + $0xb0] sm:$0xff]  ;;  %3337 = vst.msk [vmem:[%s17415_s3 + $0xd8] sm:$0xff] %vm3309_vm3, %v9664_v46  ;;  %v10258_v44 = vpop.f32.mrb[26].mxu1  ;;  %v2672_v51 = vpop.f32.mrb[27].mxu0 }
 0x313   :  { %v7290_v52 = vadd.f32 %v14218_v2, %v7009_v48  ;;  %v7161_v53 = vadd.f32 %v14218_v2, %v6880_v50  ;;  %v7008_v54 = vld [vmem:[%s17415_s3 + $0x4b0] sm:$0xff]  ;;  %6757 = vst.msk [vmem:[%s17415_s3 + $0x4d8] sm:$0xff] %vm3309_vm3, %v10258_v44  ;;  %3336 = vst.msk [vmem:[%s17415_s3 + $0xd0] sm:$0xff] %vm3309_vm3, %v2672_v51  ;;  %v6093_v55 = vpop.f32.mrb[27].mxu1 }
 0x314   :  { %7418 = vst.msk [vmem:[%s17415_s3 + $0xb8] sm:$0xff] %vm3309_vm3, %v7162_v47  ;;  %v7289_v56 = vadd.f32 %v14218_v2, %v7008_v54  ;;  %6756 = vst.msk [vmem:[%s17415_s3 + $0x4d0] sm:$0xff] %vm3309_vm3, %v6093_v55 }
 0x315   :  { %7546 = vst.msk [vmem:[%s17415_s3 + $0x4b8] sm:$0xff] %vm3309_vm3, %v7290_v52  ;;  %7417 = vst.msk [vmem:[%s17415_s3 + $0xb0] sm:$0xff] %vm3309_vm3, %v7161_v53  ;;  %v6883_v57 = vld [vmem:[%s17415_s3 + $0xc8] sm:$0xff]  ;;  %v9667_v58 = vpop.f32.mrb[28].mxu0 }
 0x316   :  { %7545 = vst.msk [vmem:[%s17415_s3 + $0x4b0] sm:$0xff] %vm3309_vm3, %v7289_v56  ;;  %v7164_v59 = vadd.f32 %v14218_v2, %v6883_v57  ;;  %v7011_v60 = vld [vmem:[%s17415_s3 + $0x4c8] sm:$0xff]  ;;  %v6882_v61 = vld [vmem:[%s17415_s3 + $0xc0] sm:$0xff]  ;;  %3339 = vst.msk [vmem:[%s17415_s3 + $0xe8] sm:$0xff] %vm3309_vm3, %v9667_v58  ;;  %v10261_v62 = vpop.f32.mrb[28].mxu1  ;;  %v2682_v63 = vpop.f32.mrb[29].mxu0 }
 0x317   :  { %v7292_v0 = vadd.f32 %v14218_v2, %v7011_v60  ;;  %v7163_v1 = vadd.f32 %v14218_v2, %v6882_v61  ;;  %v7010_v3 = vld [vmem:[%s17415_s3 + $0x4c0] sm:$0xff]  ;;  %6759 = vst.msk [vmem:[%s17415_s3 + $0x4e8] sm:$0xff] %vm3309_vm3, %v10261_v62  ;;  %3338 = vst.msk [vmem:[%s17415_s3 + $0xe0] sm:$0xff] %vm3309_vm3, %v2682_v63  ;;  %v6103_v4 = vpop.f32.mrb[29].mxu1 }
 0x318   :  { %7420 = vst.msk [vmem:[%s17415_s3 + $0xc8] sm:$0xff] %vm3309_vm3, %v7164_v59  ;;  %v7291_v37 = vadd.f32 %v14218_v2, %v7010_v3  ;;  %6758 = vst.msk [vmem:[%s17415_s3 + $0x4e0] sm:$0xff] %vm3309_vm3, %v6103_v4 }
 0x319   :  { %7548 = vst.msk [vmem:[%s17415_s3 + $0x4c8] sm:$0xff] %vm3309_vm3, %v7292_v0  ;;  %7419 = vst.msk [vmem:[%s17415_s3 + $0xc0] sm:$0xff] %vm3309_vm3, %v7163_v1  ;;  %v6885_v43 = vld [vmem:[%s17415_s3 + $0xd8] sm:$0xff]  ;;  %v9670_v5 = vpop.f32.mrb[30].mxu0 }
 0x31a   :  { %7547 = vst.msk [vmem:[%s17415_s3 + $0x4c0] sm:$0xff] %vm3309_vm3, %v7291_v37  ;;  %v7166_v6 = vadd.f32 %v14218_v2, %v6885_v43  ;;  %v7013_v7 = vld [vmem:[%s17415_s3 + $0x4d8] sm:$0xff]  ;;  %v6884_v8 = vld [vmem:[%s17415_s3 + $0xd0] sm:$0xff]  ;;  %3341 = vst.msk [vmem:[%s17415_s3 + $0xf8] sm:$0xff] %vm3309_vm3, %v9670_v5  ;;  %v10264_v9 = vpop.f32.mrb[30].mxu1  ;;  %v2692_v10 = vpop.f32.mrb[31].mxu0 }
 0x31b   :  { %v7294_v11 = vadd.f32 %v14218_v2, %v7013_v7  ;;  %v7165_v12 = vadd.f32 %v14218_v2, %v6884_v8  ;;  %v7012_v13 = vld [vmem:[%s17415_s3 + $0x4d0] sm:$0xff]  ;;  %6761 = vst.msk [vmem:[%s17415_s3 + $0x4f8] sm:$0xff] %vm3309_vm3, %v10264_v9  ;;  %3340 = vst.msk [vmem:[%s17415_s3 + $0xf0] sm:$0xff] %vm3309_vm3, %v2692_v10  ;;  %v6113_v14 = vpop.f32.mrb[31].mxu1 }
 0x31c   :  { %7422 = vst.msk [vmem:[%s17415_s3 + $0xd8] sm:$0xff] %vm3309_vm3, %v7166_v6  ;;  %v7293_v15 = vadd.f32 %v14218_v2, %v7012_v13  ;;  %6760 = vst.msk [vmem:[%s17415_s3 + $0x4f0] sm:$0xff] %vm3309_vm3, %v6113_v14 }
 0x31d   :  { %7550 = vst.msk [vmem:[%s17415_s3 + $0x4d8] sm:$0xff] %vm3309_vm3, %v7294_v11  ;;  %7421 = vst.msk [vmem:[%s17415_s3 + $0xd0] sm:$0xff] %vm3309_vm3, %v7165_v12  ;;  %v6887_v16 = vld [vmem:[%s17415_s3 + $0xe8] sm:$0xff]  ;;  %v9673_v17 = vpop.f32.mrb[32].mxu0 }
 0x31e   :  { %7549 = vst.msk [vmem:[%s17415_s3 + $0x4d0] sm:$0xff] %vm3309_vm3, %v7293_v15  ;;  %v7168_v18 = vadd.f32 %v14218_v2, %v6887_v16  ;;  %v7015_v19 = vld [vmem:[%s17415_s3 + $0x4e8] sm:$0xff]  ;;  %v6886_v20 = vld [vmem:[%s17415_s3 + $0xe0] sm:$0xff]  ;;  %3343 = vst.msk [vmem:[%s17415_s3 + $0x108] sm:$0xff] %vm3309_vm3, %v9673_v17  ;;  %v10267_v21 = vpop.f32.mrb[32].mxu1  ;;  %v2702_v22 = vpop.f32.mrb[33].mxu0 }
 0x31f   :  { %v7296_v23 = vadd.f32 %v14218_v2, %v7015_v19  ;;  %v7167_v24 = vadd.f32 %v14218_v2, %v6886_v20  ;;  %v7014_v25 = vld [vmem:[%s17415_s3 + $0x4e0] sm:$0xff]  ;;  %6763 = vst.msk [vmem:[%s17415_s3 + $0x508] sm:$0xff] %vm3309_vm3, %v10267_v21  ;;  %3342 = vst.msk [vmem:[%s17415_s3 + $0x100] sm:$0xff] %vm3309_vm3, %v2702_v22  ;;  %v6123_v26 = vpop.f32.mrb[33].mxu1 }
 0x320   :  { %7424 = vst.msk [vmem:[%s17415_s3 + $0xe8] sm:$0xff] %vm3309_vm3, %v7168_v18  ;;  %v7295_v27 = vadd.f32 %v14218_v2, %v7014_v25  ;;  %6762 = vst.msk [vmem:[%s17415_s3 + $0x500] sm:$0xff] %vm3309_vm3, %v6123_v26 }
 0x321   :  { %7552 = vst.msk [vmem:[%s17415_s3 + $0x4e8] sm:$0xff] %vm3309_vm3, %v7296_v23  ;;  %7423 = vst.msk [vmem:[%s17415_s3 + $0xe0] sm:$0xff] %vm3309_vm3, %v7167_v24  ;;  %v6889_v28 = vld [vmem:[%s17415_s3 + $0xf8] sm:$0xff]  ;;  %v9676_v29 = vpop.f32.mrb[34].mxu0 }
 0x322   :  { %7551 = vst.msk [vmem:[%s17415_s3 + $0x4e0] sm:$0xff] %vm3309_vm3, %v7295_v27  ;;  %v7170_v30 = vadd.f32 %v14218_v2, %v6889_v28  ;;  %v7017_v31 = vld [vmem:[%s17415_s3 + $0x4f8] sm:$0xff]  ;;  %v6888_v32 = vld [vmem:[%s17415_s3 + $0xf0] sm:$0xff]  ;;  %3345 = vst.msk [vmem:[%s17415_s3 + $0x118] sm:$0xff] %vm3309_vm3, %v9676_v29  ;;  %v10270_v33 = vpop.f32.mrb[34].mxu1  ;;  %v2712_v34 = vpop.f32.mrb[35].mxu0 }
 0x323   :  { %v7298_v41 = vadd.f32 %v14218_v2, %v7017_v31  ;;  %v7169_v35 = vadd.f32 %v14218_v2, %v6888_v32  ;;  %v7016_v36 = vld [vmem:[%s17415_s3 + $0x4f0] sm:$0xff]  ;;  %6765 = vst.msk [vmem:[%s17415_s3 + $0x518] sm:$0xff] %vm3309_vm3, %v10270_v33  ;;  %3344 = vst.msk [vmem:[%s17415_s3 + $0x110] sm:$0xff] %vm3309_vm3, %v2712_v34  ;;  %v6133_v39 = vpop.f32.mrb[35].mxu1 }
 0x324   :  { %7426 = vst.msk [vmem:[%s17415_s3 + $0xf8] sm:$0xff] %vm3309_vm3, %v7170_v30  ;;  %v7297_v49 = vadd.f32 %v14218_v2, %v7016_v36  ;;  %6764 = vst.msk [vmem:[%s17415_s3 + $0x510] sm:$0xff] %vm3309_vm3, %v6133_v39 }
 0x325   :  { %7554 = vst.msk [vmem:[%s17415_s3 + $0x4f8] sm:$0xff] %vm3309_vm3, %v7298_v41  ;;  %7425 = vst.msk [vmem:[%s17415_s3 + $0xf0] sm:$0xff] %vm3309_vm3, %v7169_v35  ;;  %v6891_v40 = vld [vmem:[%s17415_s3 + $0x108] sm:$0xff]  ;;  %v9679_v38 = vpop.f32.mrb[36].mxu0 }
 0x326   :  { %7553 = vst.msk [vmem:[%s17415_s3 + $0x4f0] sm:$0xff] %vm3309_vm3, %v7297_v49  ;;  %v7172_v42 = vadd.f32 %v14218_v2, %v6891_v40  ;;  %v7019_v45 = vld [vmem:[%s17415_s3 + $0x508] sm:$0xff]  ;;  %v6890_v46 = vld [vmem:[%s17415_s3 + $0x100] sm:$0xff]  ;;  %3347 = vst.msk [vmem:[%s17415_s3 + $0x128] sm:$0xff] %vm3309_vm3, %v9679_v38  ;;  %v10273_v47 = vpop.f32.mrb[36].mxu1  ;;  %v2722_v48 = vpop.f32.mrb[37].mxu0 }
 0x327   :  { %v7300_v50 = vadd.f32 %v14218_v2, %v7019_v45  ;;  %v7171_v44 = vadd.f32 %v14218_v2, %v6890_v46  ;;  %v7018_v51 = vld [vmem:[%s17415_s3 + $0x500] sm:$0xff]  ;;  %6767 = vst.msk [vmem:[%s17415_s3 + $0x528] sm:$0xff] %vm3309_vm3, %v10273_v47  ;;  %3346 = vst.msk [vmem:[%s17415_s3 + $0x120] sm:$0xff] %vm3309_vm3, %v2722_v48  ;;  %v6143_v52 = vpop.f32.mrb[37].mxu1 }
 0x328   :  { %7428 = vst.msk [vmem:[%s17415_s3 + $0x108] sm:$0xff] %vm3309_vm3, %v7172_v42  ;;  %v7299_v53 = vadd.f32 %v14218_v2, %v7018_v51  ;;  %6766 = vst.msk [vmem:[%s17415_s3 + $0x520] sm:$0xff] %vm3309_vm3, %v6143_v52 }
 0x329   :  { %7556 = vst.msk [vmem:[%s17415_s3 + $0x508] sm:$0xff] %vm3309_vm3, %v7300_v50  ;;  %7427 = vst.msk [vmem:[%s17415_s3 + $0x100] sm:$0xff] %vm3309_vm3, %v7171_v44  ;;  %v6893_v54 = vld [vmem:[%s17415_s3 + $0x118] sm:$0xff]  ;;  %v9682_v55 = vpop.f32.mrb[38].mxu0 }
 0x32a   :  { %7555 = vst.msk [vmem:[%s17415_s3 + $0x500] sm:$0xff] %vm3309_vm3, %v7299_v53  ;;  %v7174_v56 = vadd.f32 %v14218_v2, %v6893_v54  ;;  %v7021_v57 = vld [vmem:[%s17415_s3 + $0x518] sm:$0xff]  ;;  %v6892_v58 = vld [vmem:[%s17415_s3 + $0x110] sm:$0xff]  ;;  %3349 = vst.msk [vmem:[%s17415_s3 + $0x138] sm:$0xff] %vm3309_vm3, %v9682_v55  ;;  %v10276_v59 = vpop.f32.mrb[38].mxu1  ;;  %v2732_v60 = vpop.f32.mrb[39].mxu0 }
 0x32b   :  { %v7302_v61 = vadd.f32 %v14218_v2, %v7021_v57  ;;  %v7173_v62 = vadd.f32 %v14218_v2, %v6892_v58  ;;  %v7020_v63 = vld [vmem:[%s17415_s3 + $0x510] sm:$0xff]  ;;  %6769 = vst.msk [vmem:[%s17415_s3 + $0x538] sm:$0xff] %vm3309_vm3, %v10276_v59  ;;  %3348 = vst.msk [vmem:[%s17415_s3 + $0x130] sm:$0xff] %vm3309_vm3, %v2732_v60  ;;  %v6153_v0 = vpop.f32.mrb[39].mxu1 }
 0x32c   :  { %7430 = vst.msk [vmem:[%s17415_s3 + $0x118] sm:$0xff] %vm3309_vm3, %v7174_v56  ;;  %v7301_v1 = vadd.f32 %v14218_v2, %v7020_v63  ;;  %6768 = vst.msk [vmem:[%s17415_s3 + $0x530] sm:$0xff] %vm3309_vm3, %v6153_v0 }
 0x32d   :  { %7558 = vst.msk [vmem:[%s17415_s3 + $0x518] sm:$0xff] %vm3309_vm3, %v7302_v61  ;;  %7429 = vst.msk [vmem:[%s17415_s3 + $0x110] sm:$0xff] %vm3309_vm3, %v7173_v62  ;;  %v6895_v3 = vld [vmem:[%s17415_s3 + $0x128] sm:$0xff]  ;;  %v9685_v4 = vpop.f32.mrb[40].mxu0 }
 0x32e   :  { %7557 = vst.msk [vmem:[%s17415_s3 + $0x510] sm:$0xff] %vm3309_vm3, %v7301_v1  ;;  %v7176_v37 = vadd.f32 %v14218_v2, %v6895_v3  ;;  %v7023_v43 = vld [vmem:[%s17415_s3 + $0x528] sm:$0xff]  ;;  %v6894_v5 = vld [vmem:[%s17415_s3 + $0x120] sm:$0xff]  ;;  %3351 = vst.msk [vmem:[%s17415_s3 + $0x148] sm:$0xff] %vm3309_vm3, %v9685_v4  ;;  %v10279_v6 = vpop.f32.mrb[40].mxu1  ;;  %v2742_v7 = vpop.f32.mrb[41].mxu0 }
 0x32f   :  { %v7304_v8 = vadd.f32 %v14218_v2, %v7023_v43  ;;  %v7175_v9 = vadd.f32 %v14218_v2, %v6894_v5  ;;  %v7022_v10 = vld [vmem:[%s17415_s3 + $0x520] sm:$0xff]  ;;  %6771 = vst.msk [vmem:[%s17415_s3 + $0x548] sm:$0xff] %vm3309_vm3, %v10279_v6  ;;  %3350 = vst.msk [vmem:[%s17415_s3 + $0x140] sm:$0xff] %vm3309_vm3, %v2742_v7  ;;  %v6163_v11 = vpop.f32.mrb[41].mxu1 }
 0x330   :  { %7432 = vst.msk [vmem:[%s17415_s3 + $0x128] sm:$0xff] %vm3309_vm3, %v7176_v37  ;;  %v7303_v12 = vadd.f32 %v14218_v2, %v7022_v10  ;;  %6770 = vst.msk [vmem:[%s17415_s3 + $0x540] sm:$0xff] %vm3309_vm3, %v6163_v11 }
 0x331   :  { %7560 = vst.msk [vmem:[%s17415_s3 + $0x528] sm:$0xff] %vm3309_vm3, %v7304_v8  ;;  %7431 = vst.msk [vmem:[%s17415_s3 + $0x120] sm:$0xff] %vm3309_vm3, %v7175_v9  ;;  %v6897_v13 = vld [vmem:[%s17415_s3 + $0x138] sm:$0xff]  ;;  %v9688_v14 = vpop.f32.mrb[42].mxu0 }
 0x332   :  { %7559 = vst.msk [vmem:[%s17415_s3 + $0x520] sm:$0xff] %vm3309_vm3, %v7303_v12  ;;  %v7178_v15 = vadd.f32 %v14218_v2, %v6897_v13  ;;  %v7025_v16 = vld [vmem:[%s17415_s3 + $0x538] sm:$0xff]  ;;  %v6896_v17 = vld [vmem:[%s17415_s3 + $0x130] sm:$0xff]  ;;  %3353 = vst.msk [vmem:[%s17415_s3 + $0x158] sm:$0xff] %vm3309_vm3, %v9688_v14  ;;  %v10282_v18 = vpop.f32.mrb[42].mxu1  ;;  %v2752_v19 = vpop.f32.mrb[43].mxu0 }
 0x333   :  { %v7306_v20 = vadd.f32 %v14218_v2, %v7025_v16  ;;  %v7177_v21 = vadd.f32 %v14218_v2, %v6896_v17  ;;  %v7024_v22 = vld [vmem:[%s17415_s3 + $0x530] sm:$0xff]  ;;  %6773 = vst.msk [vmem:[%s17415_s3 + $0x558] sm:$0xff] %vm3309_vm3, %v10282_v18  ;;  %3352 = vst.msk [vmem:[%s17415_s3 + $0x150] sm:$0xff] %vm3309_vm3, %v2752_v19  ;;  %v6173_v23 = vpop.f32.mrb[43].mxu1 }
 0x334   :  { %7434 = vst.msk [vmem:[%s17415_s3 + $0x138] sm:$0xff] %vm3309_vm3, %v7178_v15  ;;  %v7305_v24 = vadd.f32 %v14218_v2, %v7024_v22  ;;  %6772 = vst.msk [vmem:[%s17415_s3 + $0x550] sm:$0xff] %vm3309_vm3, %v6173_v23 }
 0x335   :  { %7562 = vst.msk [vmem:[%s17415_s3 + $0x538] sm:$0xff] %vm3309_vm3, %v7306_v20  ;;  %7433 = vst.msk [vmem:[%s17415_s3 + $0x130] sm:$0xff] %vm3309_vm3, %v7177_v21  ;;  %v6899_v25 = vld [vmem:[%s17415_s3 + $0x148] sm:$0xff]  ;;  %v9691_v26 = vpop.f32.mrb[44].mxu0 }
 0x336   :  { %7561 = vst.msk [vmem:[%s17415_s3 + $0x530] sm:$0xff] %vm3309_vm3, %v7305_v24  ;;  %v7180_v27 = vadd.f32 %v14218_v2, %v6899_v25  ;;  %v7027_v28 = vld [vmem:[%s17415_s3 + $0x548] sm:$0xff]  ;;  %v6898_v29 = vld [vmem:[%s17415_s3 + $0x140] sm:$0xff]  ;;  %3355 = vst.msk [vmem:[%s17415_s3 + $0x168] sm:$0xff] %vm3309_vm3, %v9691_v26  ;;  %v10285_v30 = vpop.f32.mrb[44].mxu1  ;;  %v2762_v31 = vpop.f32.mrb[45].mxu0 }
 0x337   :  { %v7308_v32 = vadd.f32 %v14218_v2, %v7027_v28  ;;  %v7179_v33 = vadd.f32 %v14218_v2, %v6898_v29  ;;  %v7026_v34 = vld [vmem:[%s17415_s3 + $0x540] sm:$0xff]  ;;  %6775 = vst.msk [vmem:[%s17415_s3 + $0x568] sm:$0xff] %vm3309_vm3, %v10285_v30  ;;  %3354 = vst.msk [vmem:[%s17415_s3 + $0x160] sm:$0xff] %vm3309_vm3, %v2762_v31  ;;  %v6183_v41 = vpop.f32.mrb[45].mxu1 }
 0x338   :  { %7436 = vst.msk [vmem:[%s17415_s3 + $0x148] sm:$0xff] %vm3309_vm3, %v7180_v27  ;;  %v7307_v35 = vadd.f32 %v14218_v2, %v7026_v34  ;;  %6774 = vst.msk [vmem:[%s17415_s3 + $0x560] sm:$0xff] %vm3309_vm3, %v6183_v41 }
 0x339   :  { %7564 = vst.msk [vmem:[%s17415_s3 + $0x548] sm:$0xff] %vm3309_vm3, %v7308_v32  ;;  %7435 = vst.msk [vmem:[%s17415_s3 + $0x140] sm:$0xff] %vm3309_vm3, %v7179_v33  ;;  %v6901_v36 = vld [vmem:[%s17415_s3 + $0x158] sm:$0xff]  ;;  %v9694_v39 = vpop.f32.mrb[46].mxu0 }
 0x33a   :  { %7563 = vst.msk [vmem:[%s17415_s3 + $0x540] sm:$0xff] %vm3309_vm3, %v7307_v35  ;;  %v7182_v49 = vadd.f32 %v14218_v2, %v6901_v36  ;;  %v7029_v40 = vld [vmem:[%s17415_s3 + $0x558] sm:$0xff]  ;;  %v6900_v38 = vld [vmem:[%s17415_s3 + $0x150] sm:$0xff]  ;;  %3357 = vst.msk [vmem:[%s17415_s3 + $0x178] sm:$0xff] %vm3309_vm3, %v9694_v39  ;;  %v10288_v42 = vpop.f32.mrb[46].mxu1  ;;  %v2772_v45 = vpop.f32.mrb[47].mxu0 }
 0x33b   :  { %v7310_v46 = vadd.f32 %v14218_v2, %v7029_v40  ;;  %v7181_v47 = vadd.f32 %v14218_v2, %v6900_v38  ;;  %v7028_v48 = vld [vmem:[%s17415_s3 + $0x550] sm:$0xff]  ;;  %6777 = vst.msk [vmem:[%s17415_s3 + $0x578] sm:$0xff] %vm3309_vm3, %v10288_v42  ;;  %3356 = vst.msk [vmem:[%s17415_s3 + $0x170] sm:$0xff] %vm3309_vm3, %v2772_v45  ;;  %v6193_v50 = vpop.f32.mrb[47].mxu1 }
 0x33c   :  { %7438 = vst.msk [vmem:[%s17415_s3 + $0x158] sm:$0xff] %vm3309_vm3, %v7182_v49  ;;  %v7309_v44 = vadd.f32 %v14218_v2, %v7028_v48  ;;  %6776 = vst.msk [vmem:[%s17415_s3 + $0x570] sm:$0xff] %vm3309_vm3, %v6193_v50 }
 0x33d   :  { %7566 = vst.msk [vmem:[%s17415_s3 + $0x558] sm:$0xff] %vm3309_vm3, %v7310_v46  ;;  %7437 = vst.msk [vmem:[%s17415_s3 + $0x150] sm:$0xff] %vm3309_vm3, %v7181_v47  ;;  %v6903_v51 = vld [vmem:[%s17415_s3 + $0x168] sm:$0xff]  ;;  %v9697_v52 = vpop.f32.mrb[48].mxu0 }
 0x33e   :  { %7565 = vst.msk [vmem:[%s17415_s3 + $0x550] sm:$0xff] %vm3309_vm3, %v7309_v44  ;;  %v7184_v53 = vadd.f32 %v14218_v2, %v6903_v51  ;;  %v7031_v54 = vld [vmem:[%s17415_s3 + $0x568] sm:$0xff]  ;;  %v6902_v55 = vld [vmem:[%s17415_s3 + $0x160] sm:$0xff]  ;;  %3359 = vst.msk [vmem:[%s17415_s3 + $0x188] sm:$0xff] %vm3309_vm3, %v9697_v52  ;;  %v10291_v56 = vpop.f32.mrb[48].mxu1  ;;  %v2782_v57 = vpop.f32.mrb[49].mxu0 }
 0x33f   :  { %v7312_v58 = vadd.f32 %v14218_v2, %v7031_v54  ;;  %v7183_v59 = vadd.f32 %v14218_v2, %v6902_v55  ;;  %v7030_v60 = vld [vmem:[%s17415_s3 + $0x560] sm:$0xff]  ;;  %6779 = vst.msk [vmem:[%s17415_s3 + $0x588] sm:$0xff] %vm3309_vm3, %v10291_v56  ;;  %3358 = vst.msk [vmem:[%s17415_s3 + $0x180] sm:$0xff] %vm3309_vm3, %v2782_v57  ;;  %v6203_v61 = vpop.f32.mrb[49].mxu1 }
 0x340   :  { %7440 = vst.msk [vmem:[%s17415_s3 + $0x168] sm:$0xff] %vm3309_vm3, %v7184_v53  ;;  %v7311_v62 = vadd.f32 %v14218_v2, %v7030_v60  ;;  %6778 = vst.msk [vmem:[%s17415_s3 + $0x580] sm:$0xff] %vm3309_vm3, %v6203_v61 }
 0x341   :  { %7568 = vst.msk [vmem:[%s17415_s3 + $0x568] sm:$0xff] %vm3309_vm3, %v7312_v58  ;;  %7439 = vst.msk [vmem:[%s17415_s3 + $0x160] sm:$0xff] %vm3309_vm3, %v7183_v59  ;;  %v6905_v63 = vld [vmem:[%s17415_s3 + $0x178] sm:$0xff]  ;;  %v9700_v0 = vpop.f32.mrb[50].mxu0 }
 0x342   :  { %7567 = vst.msk [vmem:[%s17415_s3 + $0x560] sm:$0xff] %vm3309_vm3, %v7311_v62  ;;  %v7186_v1 = vadd.f32 %v14218_v2, %v6905_v63  ;;  %v7033_v3 = vld [vmem:[%s17415_s3 + $0x578] sm:$0xff]  ;;  %v6904_v4 = vld [vmem:[%s17415_s3 + $0x170] sm:$0xff]  ;;  %3361 = vst.msk [vmem:[%s17415_s3 + $0x198] sm:$0xff] %vm3309_vm3, %v9700_v0  ;;  %v10294_v37 = vpop.f32.mrb[50].mxu1  ;;  %v2792_v43 = vpop.f32.mrb[51].mxu0 }
 0x343   :  { %v7314_v5 = vadd.f32 %v14218_v2, %v7033_v3  ;;  %v7185_v6 = vadd.f32 %v14218_v2, %v6904_v4  ;;  %v7032_v7 = vld [vmem:[%s17415_s3 + $0x570] sm:$0xff]  ;;  %6781 = vst.msk [vmem:[%s17415_s3 + $0x598] sm:$0xff] %vm3309_vm3, %v10294_v37  ;;  %3360 = vst.msk [vmem:[%s17415_s3 + $0x190] sm:$0xff] %vm3309_vm3, %v2792_v43  ;;  %v6213_v8 = vpop.f32.mrb[51].mxu1 }
 0x344   :  { %7442 = vst.msk [vmem:[%s17415_s3 + $0x178] sm:$0xff] %vm3309_vm3, %v7186_v1  ;;  %v7313_v9 = vadd.f32 %v14218_v2, %v7032_v7  ;;  %6780 = vst.msk [vmem:[%s17415_s3 + $0x590] sm:$0xff] %vm3309_vm3, %v6213_v8 }
 0x345   :  { %7570 = vst.msk [vmem:[%s17415_s3 + $0x578] sm:$0xff] %vm3309_vm3, %v7314_v5  ;;  %7441 = vst.msk [vmem:[%s17415_s3 + $0x170] sm:$0xff] %vm3309_vm3, %v7185_v6  ;;  %v6907_v10 = vld [vmem:[%s17415_s3 + $0x188] sm:$0xff]  ;;  %v9703_v11 = vpop.f32.mrb[52].mxu0 }
 0x346   :  { %7569 = vst.msk [vmem:[%s17415_s3 + $0x570] sm:$0xff] %vm3309_vm3, %v7313_v9  ;;  %v7188_v12 = vadd.f32 %v14218_v2, %v6907_v10  ;;  %v7035_v13 = vld [vmem:[%s17415_s3 + $0x588] sm:$0xff]  ;;  %v6906_v14 = vld [vmem:[%s17415_s3 + $0x180] sm:$0xff]  ;;  %3363 = vst.msk [vmem:[%s17415_s3 + $0x1a8] sm:$0xff] %vm3309_vm3, %v9703_v11  ;;  %v10297_v15 = vpop.f32.mrb[52].mxu1  ;;  %v2802_v16 = vpop.f32.mrb[53].mxu0 }
 0x347   :  { %v7316_v17 = vadd.f32 %v14218_v2, %v7035_v13  ;;  %v7187_v18 = vadd.f32 %v14218_v2, %v6906_v14  ;;  %v7034_v19 = vld [vmem:[%s17415_s3 + $0x580] sm:$0xff]  ;;  %6783 = vst.msk [vmem:[%s17415_s3 + $0x5a8] sm:$0xff] %vm3309_vm3, %v10297_v15  ;;  %3362 = vst.msk [vmem:[%s17415_s3 + $0x1a0] sm:$0xff] %vm3309_vm3, %v2802_v16  ;;  %v6223_v20 = vpop.f32.mrb[53].mxu1 }
 0x348   :  { %7444 = vst.msk [vmem:[%s17415_s3 + $0x188] sm:$0xff] %vm3309_vm3, %v7188_v12  ;;  %v7315_v21 = vadd.f32 %v14218_v2, %v7034_v19  ;;  %6782 = vst.msk [vmem:[%s17415_s3 + $0x5a0] sm:$0xff] %vm3309_vm3, %v6223_v20 }
 0x349   :  { %7572 = vst.msk [vmem:[%s17415_s3 + $0x588] sm:$0xff] %vm3309_vm3, %v7316_v17  ;;  %7443 = vst.msk [vmem:[%s17415_s3 + $0x180] sm:$0xff] %vm3309_vm3, %v7187_v18  ;;  %v6909_v22 = vld [vmem:[%s17415_s3 + $0x198] sm:$0xff]  ;;  %v9706_v23 = vpop.f32.mrb[54].mxu0 }
 0x34a   :  { %7571 = vst.msk [vmem:[%s17415_s3 + $0x580] sm:$0xff] %vm3309_vm3, %v7315_v21  ;;  %v7190_v24 = vadd.f32 %v14218_v2, %v6909_v22  ;;  %v7037_v25 = vld [vmem:[%s17415_s3 + $0x598] sm:$0xff]  ;;  %v6908_v26 = vld [vmem:[%s17415_s3 + $0x190] sm:$0xff]  ;;  %3365 = vst.msk [vmem:[%s17415_s3 + $0x1b8] sm:$0xff] %vm3309_vm3, %v9706_v23  ;;  %v10300_v27 = vpop.f32.mrb[54].mxu1  ;;  %v2812_v28 = vpop.f32.mrb[55].mxu0 }
 0x34b   :  { %v7318_v29 = vadd.f32 %v14218_v2, %v7037_v25  ;;  %v7189_v30 = vadd.f32 %v14218_v2, %v6908_v26  ;;  %v7036_v31 = vld [vmem:[%s17415_s3 + $0x590] sm:$0xff]  ;;  %6785 = vst.msk [vmem:[%s17415_s3 + $0x5b8] sm:$0xff] %vm3309_vm3, %v10300_v27  ;;  %3364 = vst.msk [vmem:[%s17415_s3 + $0x1b0] sm:$0xff] %vm3309_vm3, %v2812_v28  ;;  %v6233_v32 = vpop.f32.mrb[55].mxu1 }
 0x34c   :  { %7446 = vst.msk [vmem:[%s17415_s3 + $0x198] sm:$0xff] %vm3309_vm3, %v7190_v24  ;;  %v7317_v33 = vadd.f32 %v14218_v2, %v7036_v31  ;;  %6784 = vst.msk [vmem:[%s17415_s3 + $0x5b0] sm:$0xff] %vm3309_vm3, %v6233_v32 }
 0x34d   :  { %7574 = vst.msk [vmem:[%s17415_s3 + $0x598] sm:$0xff] %vm3309_vm3, %v7318_v29  ;;  %7445 = vst.msk [vmem:[%s17415_s3 + $0x190] sm:$0xff] %vm3309_vm3, %v7189_v30  ;;  %v6911_v34 = vld [vmem:[%s17415_s3 + $0x1a8] sm:$0xff]  ;;  %v9709_v41 = vpop.f32.mrb[56].mxu0 }
 0x34e   :  { %7573 = vst.msk [vmem:[%s17415_s3 + $0x590] sm:$0xff] %vm3309_vm3, %v7317_v33  ;;  %v7192_v35 = vadd.f32 %v14218_v2, %v6911_v34  ;;  %v7039_v36 = vld [vmem:[%s17415_s3 + $0x5a8] sm:$0xff]  ;;  %v6910_v39 = vld [vmem:[%s17415_s3 + $0x1a0] sm:$0xff]  ;;  %3367 = vst.msk [vmem:[%s17415_s3 + $0x1c8] sm:$0xff] %vm3309_vm3, %v9709_v41  ;;  %v10303_v49 = vpop.f32.mrb[56].mxu1  ;;  %v2822_v40 = vpop.f32.mrb[57].mxu0 }
 0x34f   :  { %v7320_v38 = vadd.f32 %v14218_v2, %v7039_v36  ;;  %v7191_v42 = vadd.f32 %v14218_v2, %v6910_v39  ;;  %v7038_v45 = vld [vmem:[%s17415_s3 + $0x5a0] sm:$0xff]  ;;  %6787 = vst.msk [vmem:[%s17415_s3 + $0x5c8] sm:$0xff] %vm3309_vm3, %v10303_v49  ;;  %3366 = vst.msk [vmem:[%s17415_s3 + $0x1c0] sm:$0xff] %vm3309_vm3, %v2822_v40  ;;  %v6243_v46 = vpop.f32.mrb[57].mxu1 }
 0x350   :  { %7448 = vst.msk [vmem:[%s17415_s3 + $0x1a8] sm:$0xff] %vm3309_vm3, %v7192_v35  ;;  %v7319_v47 = vadd.f32 %v14218_v2, %v7038_v45  ;;  %6786 = vst.msk [vmem:[%s17415_s3 + $0x5c0] sm:$0xff] %vm3309_vm3, %v6243_v46 }
 0x351   :  { %7576 = vst.msk [vmem:[%s17415_s3 + $0x5a8] sm:$0xff] %vm3309_vm3, %v7320_v38  ;;  %7447 = vst.msk [vmem:[%s17415_s3 + $0x1a0] sm:$0xff] %vm3309_vm3, %v7191_v42  ;;  %v6913_v48 = vld [vmem:[%s17415_s3 + $0x1b8] sm:$0xff]  ;;  %v9712_v50 = vpop.f32.mrb[58].mxu0 }
 0x352   :  { %7575 = vst.msk [vmem:[%s17415_s3 + $0x5a0] sm:$0xff] %vm3309_vm3, %v7319_v47  ;;  %v7194_v44 = vadd.f32 %v14218_v2, %v6913_v48  ;;  %v7041_v51 = vld [vmem:[%s17415_s3 + $0x5b8] sm:$0xff]  ;;  %v6912_v52 = vld [vmem:[%s17415_s3 + $0x1b0] sm:$0xff]  ;;  %3369 = vst.msk [vmem:[%s17415_s3 + $0x1d8] sm:$0xff] %vm3309_vm3, %v9712_v50  ;;  %v10306_v53 = vpop.f32.mrb[58].mxu1  ;;  %v2832_v54 = vpop.f32.mrb[59].mxu0 }
 0x353   :  { %v7322_v55 = vadd.f32 %v14218_v2, %v7041_v51  ;;  %v7193_v56 = vadd.f32 %v14218_v2, %v6912_v52  ;;  %v7040_v57 = vld [vmem:[%s17415_s3 + $0x5b0] sm:$0xff]  ;;  %6789 = vst.msk [vmem:[%s17415_s3 + $0x5d8] sm:$0xff] %vm3309_vm3, %v10306_v53  ;;  %3368 = vst.msk [vmem:[%s17415_s3 + $0x1d0] sm:$0xff] %vm3309_vm3, %v2832_v54  ;;  %v6253_v58 = vpop.f32.mrb[59].mxu1 }
 0x354   :  { %7450 = vst.msk [vmem:[%s17415_s3 + $0x1b8] sm:$0xff] %vm3309_vm3, %v7194_v44  ;;  %v7321_v59 = vadd.f32 %v14218_v2, %v7040_v57  ;;  %6788 = vst.msk [vmem:[%s17415_s3 + $0x5d0] sm:$0xff] %vm3309_vm3, %v6253_v58 }
 0x355   :  { %7578 = vst.msk [vmem:[%s17415_s3 + $0x5b8] sm:$0xff] %vm3309_vm3, %v7322_v55  ;;  %7449 = vst.msk [vmem:[%s17415_s3 + $0x1b0] sm:$0xff] %vm3309_vm3, %v7193_v56  ;;  %v6915_v60 = vld [vmem:[%s17415_s3 + $0x1c8] sm:$0xff]  ;;  %v9715_v61 = vpop.f32.mrb[60].mxu0 }
 0x356   :  { %7577 = vst.msk [vmem:[%s17415_s3 + $0x5b0] sm:$0xff] %vm3309_vm3, %v7321_v59  ;;  %v7196_v62 = vadd.f32 %v14218_v2, %v6915_v60  ;;  %v7043_v63 = vld [vmem:[%s17415_s3 + $0x5c8] sm:$0xff]  ;;  %v6914_v0 = vld [vmem:[%s17415_s3 + $0x1c0] sm:$0xff]  ;;  %3371 = vst.msk [vmem:[%s17415_s3 + $0x1e8] sm:$0xff] %vm3309_vm3, %v9715_v61  ;;  %v10309_v1 = vpop.f32.mrb[60].mxu1  ;;  %v2842_v3 = vpop.f32.mrb[61].mxu0 }
 0x357   :  { %v7324_v4 = vadd.f32 %v14218_v2, %v7043_v63  ;;  %v7195_v37 = vadd.f32 %v14218_v2, %v6914_v0  ;;  %v7042_v43 = vld [vmem:[%s17415_s3 + $0x5c0] sm:$0xff]  ;;  %6791 = vst.msk [vmem:[%s17415_s3 + $0x5e8] sm:$0xff] %vm3309_vm3, %v10309_v1  ;;  %3370 = vst.msk [vmem:[%s17415_s3 + $0x1e0] sm:$0xff] %vm3309_vm3, %v2842_v3  ;;  %v6263_v5 = vpop.f32.mrb[61].mxu1 }
 0x358   :  { %7452 = vst.msk [vmem:[%s17415_s3 + $0x1c8] sm:$0xff] %vm3309_vm3, %v7196_v62  ;;  %v7323_v6 = vadd.f32 %v14218_v2, %v7042_v43  ;;  %6790 = vst.msk [vmem:[%s17415_s3 + $0x5e0] sm:$0xff] %vm3309_vm3, %v6263_v5 }
 0x359   :  { %7580 = vst.msk [vmem:[%s17415_s3 + $0x5c8] sm:$0xff] %vm3309_vm3, %v7324_v4  ;;  %7451 = vst.msk [vmem:[%s17415_s3 + $0x1c0] sm:$0xff] %vm3309_vm3, %v7195_v37  ;;  %v6917_v7 = vld [vmem:[%s17415_s3 + $0x1d8] sm:$0xff]  ;;  %v9718_v8 = vpop.f32.mrb[62].mxu0 }
 0x35a   :  { %7579 = vst.msk [vmem:[%s17415_s3 + $0x5c0] sm:$0xff] %vm3309_vm3, %v7323_v6  ;;  %v7198_v9 = vadd.f32 %v14218_v2, %v6917_v7  ;;  %v7045_v10 = vld [vmem:[%s17415_s3 + $0x5d8] sm:$0xff]  ;;  %v6916_v11 = vld [vmem:[%s17415_s3 + $0x1d0] sm:$0xff]  ;;  %3373 = vst.msk [vmem:[%s17415_s3 + $0x1f8] sm:$0xff] %vm3309_vm3, %v9718_v8  ;;  %v10312_v12 = vpop.f32.mrb[62].mxu1  ;;  %v2852_v13 = vpop.f32.mrb[63].mxu0 }
 0x35b   :  { %v7326_v14 = vadd.f32 %v14218_v2, %v7045_v10  ;;  %v7197_v15 = vadd.f32 %v14218_v2, %v6916_v11  ;;  %v7044_v16 = vld [vmem:[%s17415_s3 + $0x5d0] sm:$0xff]  ;;  %6793 = vst.msk [vmem:[%s17415_s3 + $0x5f8] sm:$0xff] %vm3309_vm3, %v10312_v12  ;;  %3372 = vst.msk [vmem:[%s17415_s3 + $0x1f0] sm:$0xff] %vm3309_vm3, %v2852_v13  ;;  %v6273_v17 = vpop.f32.mrb[63].mxu1 }
 0x35c   :  { %7454 = vst.msk [vmem:[%s17415_s3 + $0x1d8] sm:$0xff] %vm3309_vm3, %v7198_v9  ;;  %v7325_v18 = vadd.f32 %v14218_v2, %v7044_v16  ;;  %6792 = vst.msk [vmem:[%s17415_s3 + $0x5f0] sm:$0xff] %vm3309_vm3, %v6273_v17 }
 0x35d   :  { %7582 = vst.msk [vmem:[%s17415_s3 + $0x5d8] sm:$0xff] %vm3309_vm3, %v7326_v14  ;;  %7453 = vst.msk [vmem:[%s17415_s3 + $0x1d0] sm:$0xff] %vm3309_vm3, %v7197_v15  ;;  %v6919_v19 = vld [vmem:[%s17415_s3 + $0x1e8] sm:$0xff]  ;;  %v9721_v20 = vpop.f32.mrb[64].mxu0 }
 0x35e   :  { %7581 = vst.msk [vmem:[%s17415_s3 + $0x5d0] sm:$0xff] %vm3309_vm3, %v7325_v18  ;;  %v7200_v21 = vadd.f32 %v14218_v2, %v6919_v19  ;;  %v7047_v22 = vld [vmem:[%s17415_s3 + $0x5e8] sm:$0xff]  ;;  %v6918_v23 = vld [vmem:[%s17415_s3 + $0x1e0] sm:$0xff]  ;;  %3375 = vst.msk [vmem:[%s17415_s3 + $0x208] sm:$0xff] %vm3309_vm3, %v9721_v20  ;;  %v10315_v24 = vpop.f32.mrb[64].mxu1  ;;  %v2862_v25 = vpop.f32.mrb[65].mxu0 }
 0x35f   :  { %v7328_v26 = vadd.f32 %v14218_v2, %v7047_v22  ;;  %v7199_v27 = vadd.f32 %v14218_v2, %v6918_v23  ;;  %v7046_v28 = vld [vmem:[%s17415_s3 + $0x5e0] sm:$0xff]  ;;  %6795 = vst.msk [vmem:[%s17415_s3 + $0x608] sm:$0xff] %vm3309_vm3, %v10315_v24  ;;  %3374 = vst.msk [vmem:[%s17415_s3 + $0x200] sm:$0xff] %vm3309_vm3, %v2862_v25  ;;  %v6283_v29 = vpop.f32.mrb[65].mxu1 }
 0x360   :  { %7456 = vst.msk [vmem:[%s17415_s3 + $0x1e8] sm:$0xff] %vm3309_vm3, %v7200_v21  ;;  %v7327_v30 = vadd.f32 %v14218_v2, %v7046_v28  ;;  %6794 = vst.msk [vmem:[%s17415_s3 + $0x600] sm:$0xff] %vm3309_vm3, %v6283_v29 }
 0x361   :  { %7584 = vst.msk [vmem:[%s17415_s3 + $0x5e8] sm:$0xff] %vm3309_vm3, %v7328_v26  ;;  %7455 = vst.msk [vmem:[%s17415_s3 + $0x1e0] sm:$0xff] %vm3309_vm3, %v7199_v27  ;;  %v6921_v31 = vld [vmem:[%s17415_s3 + $0x1f8] sm:$0xff]  ;;  %v9724_v32 = vpop.f32.mrb[66].mxu0 }
 0x362   :  { %7583 = vst.msk [vmem:[%s17415_s3 + $0x5e0] sm:$0xff] %vm3309_vm3, %v7327_v30  ;;  %v7202_v33 = vadd.f32 %v14218_v2, %v6921_v31  ;;  %v7049_v34 = vld [vmem:[%s17415_s3 + $0x5f8] sm:$0xff]  ;;  %v6920_v41 = vld [vmem:[%s17415_s3 + $0x1f0] sm:$0xff]  ;;  %3377 = vst.msk [vmem:[%s17415_s3 + $0x218] sm:$0xff] %vm3309_vm3, %v9724_v32  ;;  %v10318_v35 = vpop.f32.mrb[66].mxu1  ;;  %v2872_v36 = vpop.f32.mrb[67].mxu0 }
 0x363   :  { %v7330_v39 = vadd.f32 %v14218_v2, %v7049_v34  ;;  %v7201_v49 = vadd.f32 %v14218_v2, %v6920_v41  ;;  %v7048_v40 = vld [vmem:[%s17415_s3 + $0x5f0] sm:$0xff]  ;;  %6797 = vst.msk [vmem:[%s17415_s3 + $0x618] sm:$0xff] %vm3309_vm3, %v10318_v35  ;;  %3376 = vst.msk [vmem:[%s17415_s3 + $0x210] sm:$0xff] %vm3309_vm3, %v2872_v36  ;;  %v6293_v38 = vpop.f32.mrb[67].mxu1 }
 0x364   :  { %7458 = vst.msk [vmem:[%s17415_s3 + $0x1f8] sm:$0xff] %vm3309_vm3, %v7202_v33  ;;  %v7329_v42 = vadd.f32 %v14218_v2, %v7048_v40  ;;  %6796 = vst.msk [vmem:[%s17415_s3 + $0x610] sm:$0xff] %vm3309_vm3, %v6293_v38 }
 0x365   :  { %7586 = vst.msk [vmem:[%s17415_s3 + $0x5f8] sm:$0xff] %vm3309_vm3, %v7330_v39  ;;  %7457 = vst.msk [vmem:[%s17415_s3 + $0x1f0] sm:$0xff] %vm3309_vm3, %v7201_v49  ;;  %v6923_v45 = vld [vmem:[%s17415_s3 + $0x208] sm:$0xff]  ;;  %v9727_v46 = vpop.f32.mrb[68].mxu0 }
 0x366   :  { %7585 = vst.msk [vmem:[%s17415_s3 + $0x5f0] sm:$0xff] %vm3309_vm3, %v7329_v42  ;;  %v7204_v47 = vadd.f32 %v14218_v2, %v6923_v45  ;;  %v7051_v48 = vld [vmem:[%s17415_s3 + $0x608] sm:$0xff]  ;;  %v6922_v50 = vld [vmem:[%s17415_s3 + $0x200] sm:$0xff]  ;;  %3379 = vst.msk [vmem:[%s17415_s3 + $0x228] sm:$0xff] %vm3309_vm3, %v9727_v46  ;;  %v10321_v44 = vpop.f32.mrb[68].mxu1  ;;  %v2882_v51 = vpop.f32.mrb[69].mxu0 }
 0x367   :  { %v7332_v52 = vadd.f32 %v14218_v2, %v7051_v48  ;;  %v7203_v53 = vadd.f32 %v14218_v2, %v6922_v50  ;;  %v7050_v54 = vld [vmem:[%s17415_s3 + $0x600] sm:$0xff]  ;;  %6799 = vst.msk [vmem:[%s17415_s3 + $0x628] sm:$0xff] %vm3309_vm3, %v10321_v44  ;;  %3378 = vst.msk [vmem:[%s17415_s3 + $0x220] sm:$0xff] %vm3309_vm3, %v2882_v51  ;;  %v6303_v55 = vpop.f32.mrb[69].mxu1 }
 0x368   :  { %7460 = vst.msk [vmem:[%s17415_s3 + $0x208] sm:$0xff] %vm3309_vm3, %v7204_v47  ;;  %v7331_v56 = vadd.f32 %v14218_v2, %v7050_v54  ;;  %6798 = vst.msk [vmem:[%s17415_s3 + $0x620] sm:$0xff] %vm3309_vm3, %v6303_v55 }
 0x369   :  { %7588 = vst.msk [vmem:[%s17415_s3 + $0x608] sm:$0xff] %vm3309_vm3, %v7332_v52  ;;  %7459 = vst.msk [vmem:[%s17415_s3 + $0x200] sm:$0xff] %vm3309_vm3, %v7203_v53  ;;  %v6925_v57 = vld [vmem:[%s17415_s3 + $0x218] sm:$0xff]  ;;  %v9730_v58 = vpop.f32.mrb[70].mxu0 }
 0x36a   :  { %7587 = vst.msk [vmem:[%s17415_s3 + $0x600] sm:$0xff] %vm3309_vm3, %v7331_v56  ;;  %v7206_v59 = vadd.f32 %v14218_v2, %v6925_v57  ;;  %v7053_v60 = vld [vmem:[%s17415_s3 + $0x618] sm:$0xff]  ;;  %v6924_v61 = vld [vmem:[%s17415_s3 + $0x210] sm:$0xff]  ;;  %3381 = vst.msk [vmem:[%s17415_s3 + $0x238] sm:$0xff] %vm3309_vm3, %v9730_v58  ;;  %v10324_v62 = vpop.f32.mrb[70].mxu1  ;;  %v2892_v63 = vpop.f32.mrb[71].mxu0 }
 0x36b   :  { %v7334_v0 = vadd.f32 %v14218_v2, %v7053_v60  ;;  %v7205_v1 = vadd.f32 %v14218_v2, %v6924_v61  ;;  %v7052_v3 = vld [vmem:[%s17415_s3 + $0x610] sm:$0xff]  ;;  %6801 = vst.msk [vmem:[%s17415_s3 + $0x638] sm:$0xff] %vm3309_vm3, %v10324_v62  ;;  %3380 = vst.msk [vmem:[%s17415_s3 + $0x230] sm:$0xff] %vm3309_vm3, %v2892_v63  ;;  %v6313_v4 = vpop.f32.mrb[71].mxu1 }
 0x36c   :  { %7462 = vst.msk [vmem:[%s17415_s3 + $0x218] sm:$0xff] %vm3309_vm3, %v7206_v59  ;;  %v7333_v37 = vadd.f32 %v14218_v2, %v7052_v3  ;;  %6800 = vst.msk [vmem:[%s17415_s3 + $0x630] sm:$0xff] %vm3309_vm3, %v6313_v4 }
 0x36d   :  { %7590 = vst.msk [vmem:[%s17415_s3 + $0x618] sm:$0xff] %vm3309_vm3, %v7334_v0  ;;  %7461 = vst.msk [vmem:[%s17415_s3 + $0x210] sm:$0xff] %vm3309_vm3, %v7205_v1  ;;  %v6927_v43 = vld [vmem:[%s17415_s3 + $0x228] sm:$0xff]  ;;  %v9733_v5 = vpop.f32.mrb[72].mxu0 }
 0x36e   :  { %7589 = vst.msk [vmem:[%s17415_s3 + $0x610] sm:$0xff] %vm3309_vm3, %v7333_v37  ;;  %v7208_v6 = vadd.f32 %v14218_v2, %v6927_v43  ;;  %v7055_v7 = vld [vmem:[%s17415_s3 + $0x628] sm:$0xff]  ;;  %v6926_v8 = vld [vmem:[%s17415_s3 + $0x220] sm:$0xff]  ;;  %3383 = vst.msk [vmem:[%s17415_s3 + $0x248] sm:$0xff] %vm3309_vm3, %v9733_v5  ;;  %v10327_v9 = vpop.f32.mrb[72].mxu1  ;;  %v2902_v10 = vpop.f32.mrb[73].mxu0 }
 0x36f   :  { %v7336_v11 = vadd.f32 %v14218_v2, %v7055_v7  ;;  %v7207_v12 = vadd.f32 %v14218_v2, %v6926_v8  ;;  %v7054_v13 = vld [vmem:[%s17415_s3 + $0x620] sm:$0xff]  ;;  %6803 = vst.msk [vmem:[%s17415_s3 + $0x648] sm:$0xff] %vm3309_vm3, %v10327_v9  ;;  %3382 = vst.msk [vmem:[%s17415_s3 + $0x240] sm:$0xff] %vm3309_vm3, %v2902_v10  ;;  %v6323_v14 = vpop.f32.mrb[73].mxu1 }
 0x370   :  { %7464 = vst.msk [vmem:[%s17415_s3 + $0x228] sm:$0xff] %vm3309_vm3, %v7208_v6  ;;  %v7335_v15 = vadd.f32 %v14218_v2, %v7054_v13  ;;  %6802 = vst.msk [vmem:[%s17415_s3 + $0x640] sm:$0xff] %vm3309_vm3, %v6323_v14 }
 0x371   :  { %7592 = vst.msk [vmem:[%s17415_s3 + $0x628] sm:$0xff] %vm3309_vm3, %v7336_v11  ;;  %7463 = vst.msk [vmem:[%s17415_s3 + $0x220] sm:$0xff] %vm3309_vm3, %v7207_v12  ;;  %v6929_v16 = vld [vmem:[%s17415_s3 + $0x238] sm:$0xff]  ;;  %v9736_v17 = vpop.f32.mrb[74].mxu0 }
 0x372   :  { %7591 = vst.msk [vmem:[%s17415_s3 + $0x620] sm:$0xff] %vm3309_vm3, %v7335_v15  ;;  %v7210_v18 = vadd.f32 %v14218_v2, %v6929_v16  ;;  %v7057_v19 = vld [vmem:[%s17415_s3 + $0x638] sm:$0xff]  ;;  %v6928_v20 = vld [vmem:[%s17415_s3 + $0x230] sm:$0xff]  ;;  %3385 = vst.msk [vmem:[%s17415_s3 + $0x258] sm:$0xff] %vm3309_vm3, %v9736_v17  ;;  %v10330_v21 = vpop.f32.mrb[74].mxu1  ;;  %v2912_v22 = vpop.f32.mrb[75].mxu0 }
 0x373   :  { %v7338_v23 = vadd.f32 %v14218_v2, %v7057_v19  ;;  %v7209_v24 = vadd.f32 %v14218_v2, %v6928_v20  ;;  %v7056_v25 = vld [vmem:[%s17415_s3 + $0x630] sm:$0xff]  ;;  %6805 = vst.msk [vmem:[%s17415_s3 + $0x658] sm:$0xff] %vm3309_vm3, %v10330_v21  ;;  %3384 = vst.msk [vmem:[%s17415_s3 + $0x250] sm:$0xff] %vm3309_vm3, %v2912_v22  ;;  %v6333_v26 = vpop.f32.mrb[75].mxu1 }
 0x374   :  { %7466 = vst.msk [vmem:[%s17415_s3 + $0x238] sm:$0xff] %vm3309_vm3, %v7210_v18  ;;  %v7337_v27 = vadd.f32 %v14218_v2, %v7056_v25  ;;  %6804 = vst.msk [vmem:[%s17415_s3 + $0x650] sm:$0xff] %vm3309_vm3, %v6333_v26 }
 0x375   :  { %7594 = vst.msk [vmem:[%s17415_s3 + $0x638] sm:$0xff] %vm3309_vm3, %v7338_v23  ;;  %7465 = vst.msk [vmem:[%s17415_s3 + $0x230] sm:$0xff] %vm3309_vm3, %v7209_v24  ;;  %v6931_v28 = vld [vmem:[%s17415_s3 + $0x248] sm:$0xff]  ;;  %v9739_v29 = vpop.f32.mrb[76].mxu0 }
 0x376   :  { %7593 = vst.msk [vmem:[%s17415_s3 + $0x630] sm:$0xff] %vm3309_vm3, %v7337_v27  ;;  %v7212_v30 = vadd.f32 %v14218_v2, %v6931_v28  ;;  %v7059_v31 = vld [vmem:[%s17415_s3 + $0x648] sm:$0xff]  ;;  %v6930_v32 = vld [vmem:[%s17415_s3 + $0x240] sm:$0xff]  ;;  %3387 = vst.msk [vmem:[%s17415_s3 + $0x268] sm:$0xff] %vm3309_vm3, %v9739_v29  ;;  %v10333_v33 = vpop.f32.mrb[76].mxu1  ;;  %v2922_v34 = vpop.f32.mrb[77].mxu0 }
 0x377   :  { %v7340_v41 = vadd.f32 %v14218_v2, %v7059_v31  ;;  %v7211_v35 = vadd.f32 %v14218_v2, %v6930_v32  ;;  %v7058_v36 = vld [vmem:[%s17415_s3 + $0x640] sm:$0xff]  ;;  %6807 = vst.msk [vmem:[%s17415_s3 + $0x668] sm:$0xff] %vm3309_vm3, %v10333_v33  ;;  %3386 = vst.msk [vmem:[%s17415_s3 + $0x260] sm:$0xff] %vm3309_vm3, %v2922_v34  ;;  %v6343_v39 = vpop.f32.mrb[77].mxu1 }
 0x378   :  { %7468 = vst.msk [vmem:[%s17415_s3 + $0x248] sm:$0xff] %vm3309_vm3, %v7212_v30  ;;  %v7339_v49 = vadd.f32 %v14218_v2, %v7058_v36  ;;  %6806 = vst.msk [vmem:[%s17415_s3 + $0x660] sm:$0xff] %vm3309_vm3, %v6343_v39 }
 0x379   :  { %7596 = vst.msk [vmem:[%s17415_s3 + $0x648] sm:$0xff] %vm3309_vm3, %v7340_v41  ;;  %7467 = vst.msk [vmem:[%s17415_s3 + $0x240] sm:$0xff] %vm3309_vm3, %v7211_v35  ;;  %v6933_v40 = vld [vmem:[%s17415_s3 + $0x258] sm:$0xff]  ;;  %v9742_v38 = vpop.f32.mrb[78].mxu0 }
 0x37a   :  { %7595 = vst.msk [vmem:[%s17415_s3 + $0x640] sm:$0xff] %vm3309_vm3, %v7339_v49  ;;  %v7214_v42 = vadd.f32 %v14218_v2, %v6933_v40  ;;  %v7061_v45 = vld [vmem:[%s17415_s3 + $0x658] sm:$0xff]  ;;  %v6932_v46 = vld [vmem:[%s17415_s3 + $0x250] sm:$0xff]  ;;  %3389 = vst.msk [vmem:[%s17415_s3 + $0x278] sm:$0xff] %vm3309_vm3, %v9742_v38  ;;  %v10336_v47 = vpop.f32.mrb[78].mxu1  ;;  %v2932_v48 = vpop.f32.mrb[79].mxu0 }
 0x37b   :  { %v7342_v50 = vadd.f32 %v14218_v2, %v7061_v45  ;;  %v7213_v44 = vadd.f32 %v14218_v2, %v6932_v46  ;;  %v7060_v51 = vld [vmem:[%s17415_s3 + $0x650] sm:$0xff]  ;;  %6809 = vst.msk [vmem:[%s17415_s3 + $0x678] sm:$0xff] %vm3309_vm3, %v10336_v47  ;;  %3388 = vst.msk [vmem:[%s17415_s3 + $0x270] sm:$0xff] %vm3309_vm3, %v2932_v48  ;;  %v6353_v52 = vpop.f32.mrb[79].mxu1 }
 0x37c   :  { %7470 = vst.msk [vmem:[%s17415_s3 + $0x258] sm:$0xff] %vm3309_vm3, %v7214_v42  ;;  %v7341_v53 = vadd.f32 %v14218_v2, %v7060_v51  ;;  %6808 = vst.msk [vmem:[%s17415_s3 + $0x670] sm:$0xff] %vm3309_vm3, %v6353_v52 }
 0x37d   :  { %7598 = vst.msk [vmem:[%s17415_s3 + $0x658] sm:$0xff] %vm3309_vm3, %v7342_v50  ;;  %7469 = vst.msk [vmem:[%s17415_s3 + $0x250] sm:$0xff] %vm3309_vm3, %v7213_v44  ;;  %v6935_v54 = vld [vmem:[%s17415_s3 + $0x268] sm:$0xff]  ;;  %v9745_v55 = vpop.f32.mrb[80].mxu0 }
 0x37e   :  { %7597 = vst.msk [vmem:[%s17415_s3 + $0x650] sm:$0xff] %vm3309_vm3, %v7341_v53  ;;  %v7216_v56 = vadd.f32 %v14218_v2, %v6935_v54  ;;  %v7063_v57 = vld [vmem:[%s17415_s3 + $0x668] sm:$0xff]  ;;  %v6934_v58 = vld [vmem:[%s17415_s3 + $0x260] sm:$0xff]  ;;  %3391 = vst.msk [vmem:[%s17415_s3 + $0x288] sm:$0xff] %vm3309_vm3, %v9745_v55  ;;  %v10339_v59 = vpop.f32.mrb[80].mxu1  ;;  %v2942_v60 = vpop.f32.mrb[81].mxu0 }
 0x37f   :  { %v7344_v61 = vadd.f32 %v14218_v2, %v7063_v57  ;;  %v7215_v62 = vadd.f32 %v14218_v2, %v6934_v58  ;;  %v7062_v63 = vld [vmem:[%s17415_s3 + $0x660] sm:$0xff]  ;;  %6811 = vst.msk [vmem:[%s17415_s3 + $0x688] sm:$0xff] %vm3309_vm3, %v10339_v59  ;;  %3390 = vst.msk [vmem:[%s17415_s3 + $0x280] sm:$0xff] %vm3309_vm3, %v2942_v60  ;;  %v6363_v0 = vpop.f32.mrb[81].mxu1 }
 0x380   :  { %7472 = vst.msk [vmem:[%s17415_s3 + $0x268] sm:$0xff] %vm3309_vm3, %v7216_v56  ;;  %v7343_v1 = vadd.f32 %v14218_v2, %v7062_v63  ;;  %6810 = vst.msk [vmem:[%s17415_s3 + $0x680] sm:$0xff] %vm3309_vm3, %v6363_v0 }
 0x381   :  { %7600 = vst.msk [vmem:[%s17415_s3 + $0x668] sm:$0xff] %vm3309_vm3, %v7344_v61  ;;  %7471 = vst.msk [vmem:[%s17415_s3 + $0x260] sm:$0xff] %vm3309_vm3, %v7215_v62  ;;  %v6937_v3 = vld [vmem:[%s17415_s3 + $0x278] sm:$0xff]  ;;  %v9748_v4 = vpop.f32.mrb[82].mxu0 }
 0x382   :  { %7599 = vst.msk [vmem:[%s17415_s3 + $0x660] sm:$0xff] %vm3309_vm3, %v7343_v1  ;;  %v7218_v37 = vadd.f32 %v14218_v2, %v6937_v3  ;;  %v7065_v43 = vld [vmem:[%s17415_s3 + $0x678] sm:$0xff]  ;;  %v6936_v5 = vld [vmem:[%s17415_s3 + $0x270] sm:$0xff]  ;;  %3393 = vst.msk [vmem:[%s17415_s3 + $0x298] sm:$0xff] %vm3309_vm3, %v9748_v4  ;;  %v10342_v6 = vpop.f32.mrb[82].mxu1  ;;  %v2952_v7 = vpop.f32.mrb[83].mxu0 }
 0x383   :  { %v7346_v8 = vadd.f32 %v14218_v2, %v7065_v43  ;;  %v7217_v9 = vadd.f32 %v14218_v2, %v6936_v5  ;;  %v7064_v10 = vld [vmem:[%s17415_s3 + $0x670] sm:$0xff]  ;;  %6813 = vst.msk [vmem:[%s17415_s3 + $0x698] sm:$0xff] %vm3309_vm3, %v10342_v6  ;;  %3392 = vst.msk [vmem:[%s17415_s3 + $0x290] sm:$0xff] %vm3309_vm3, %v2952_v7  ;;  %v6373_v11 = vpop.f32.mrb[83].mxu1 }
 0x384   :  { %7474 = vst.msk [vmem:[%s17415_s3 + $0x278] sm:$0xff] %vm3309_vm3, %v7218_v37  ;;  %v7345_v12 = vadd.f32 %v14218_v2, %v7064_v10  ;;  %6812 = vst.msk [vmem:[%s17415_s3 + $0x690] sm:$0xff] %vm3309_vm3, %v6373_v11 }
 0x385   :  { %7602 = vst.msk [vmem:[%s17415_s3 + $0x678] sm:$0xff] %vm3309_vm3, %v7346_v8  ;;  %7473 = vst.msk [vmem:[%s17415_s3 + $0x270] sm:$0xff] %vm3309_vm3, %v7217_v9  ;;  %v6939_v13 = vld [vmem:[%s17415_s3 + $0x288] sm:$0xff]  ;;  %v9751_v14 = vpop.f32.mrb[84].mxu0 }
 0x386   :  { %7601 = vst.msk [vmem:[%s17415_s3 + $0x670] sm:$0xff] %vm3309_vm3, %v7345_v12  ;;  %v7220_v15 = vadd.f32 %v14218_v2, %v6939_v13  ;;  %v7067_v16 = vld [vmem:[%s17415_s3 + $0x688] sm:$0xff]  ;;  %v6938_v17 = vld [vmem:[%s17415_s3 + $0x280] sm:$0xff]  ;;  %3395 = vst.msk [vmem:[%s17415_s3 + $0x2a8] sm:$0xff] %vm3309_vm3, %v9751_v14  ;;  %v10345_v18 = vpop.f32.mrb[84].mxu1  ;;  %v2962_v19 = vpop.f32.mrb[85].mxu0 }
 0x387   :  { %v7348_v20 = vadd.f32 %v14218_v2, %v7067_v16  ;;  %v7219_v21 = vadd.f32 %v14218_v2, %v6938_v17  ;;  %v7066_v22 = vld [vmem:[%s17415_s3 + $0x680] sm:$0xff]  ;;  %6815 = vst.msk [vmem:[%s17415_s3 + $0x6a8] sm:$0xff] %vm3309_vm3, %v10345_v18  ;;  %3394 = vst.msk [vmem:[%s17415_s3 + $0x2a0] sm:$0xff] %vm3309_vm3, %v2962_v19  ;;  %v6383_v23 = vpop.f32.mrb[85].mxu1 }
 0x388   :  { %7476 = vst.msk [vmem:[%s17415_s3 + $0x288] sm:$0xff] %vm3309_vm3, %v7220_v15  ;;  %v7347_v24 = vadd.f32 %v14218_v2, %v7066_v22  ;;  %6814 = vst.msk [vmem:[%s17415_s3 + $0x6a0] sm:$0xff] %vm3309_vm3, %v6383_v23 }
 0x389   :  { %7604 = vst.msk [vmem:[%s17415_s3 + $0x688] sm:$0xff] %vm3309_vm3, %v7348_v20  ;;  %7475 = vst.msk [vmem:[%s17415_s3 + $0x280] sm:$0xff] %vm3309_vm3, %v7219_v21  ;;  %v6941_v25 = vld [vmem:[%s17415_s3 + $0x298] sm:$0xff]  ;;  %v9754_v26 = vpop.f32.mrb[86].mxu0 }
 0x38a   :  { %7603 = vst.msk [vmem:[%s17415_s3 + $0x680] sm:$0xff] %vm3309_vm3, %v7347_v24  ;;  %v7222_v27 = vadd.f32 %v14218_v2, %v6941_v25  ;;  %v7069_v28 = vld [vmem:[%s17415_s3 + $0x698] sm:$0xff]  ;;  %v6940_v29 = vld [vmem:[%s17415_s3 + $0x290] sm:$0xff]  ;;  %3397 = vst.msk [vmem:[%s17415_s3 + $0x2b8] sm:$0xff] %vm3309_vm3, %v9754_v26  ;;  %v10348_v30 = vpop.f32.mrb[86].mxu1  ;;  %v2972_v31 = vpop.f32.mrb[87].mxu0 }
 0x38b   :  { %v7350_v32 = vadd.f32 %v14218_v2, %v7069_v28  ;;  %v7221_v33 = vadd.f32 %v14218_v2, %v6940_v29  ;;  %v7068_v34 = vld [vmem:[%s17415_s3 + $0x690] sm:$0xff]  ;;  %6817 = vst.msk [vmem:[%s17415_s3 + $0x6b8] sm:$0xff] %vm3309_vm3, %v10348_v30  ;;  %3396 = vst.msk [vmem:[%s17415_s3 + $0x2b0] sm:$0xff] %vm3309_vm3, %v2972_v31  ;;  %v6393_v41 = vpop.f32.mrb[87].mxu1 }
 0x38c   :  { %7478 = vst.msk [vmem:[%s17415_s3 + $0x298] sm:$0xff] %vm3309_vm3, %v7222_v27  ;;  %v7349_v35 = vadd.f32 %v14218_v2, %v7068_v34  ;;  %6816 = vst.msk [vmem:[%s17415_s3 + $0x6b0] sm:$0xff] %vm3309_vm3, %v6393_v41 }
 0x38d   :  { %7606 = vst.msk [vmem:[%s17415_s3 + $0x698] sm:$0xff] %vm3309_vm3, %v7350_v32  ;;  %7477 = vst.msk [vmem:[%s17415_s3 + $0x290] sm:$0xff] %vm3309_vm3, %v7221_v33  ;;  %v6943_v36 = vld [vmem:[%s17415_s3 + $0x2a8] sm:$0xff]  ;;  %v9757_v39 = vpop.f32.mrb[88].mxu0 }
 0x38e   :  { %7605 = vst.msk [vmem:[%s17415_s3 + $0x690] sm:$0xff] %vm3309_vm3, %v7349_v35  ;;  %v7224_v49 = vadd.f32 %v14218_v2, %v6943_v36  ;;  %v7071_v40 = vld [vmem:[%s17415_s3 + $0x6a8] sm:$0xff]  ;;  %v6942_v38 = vld [vmem:[%s17415_s3 + $0x2a0] sm:$0xff]  ;;  %3399 = vst.msk [vmem:[%s17415_s3 + $0x2c8] sm:$0xff] %vm3309_vm3, %v9757_v39  ;;  %v10351_v42 = vpop.f32.mrb[88].mxu1  ;;  %v2982_v45 = vpop.f32.mrb[89].mxu0 }
 0x38f   :  { %v7352_v46 = vadd.f32 %v14218_v2, %v7071_v40  ;;  %v7223_v47 = vadd.f32 %v14218_v2, %v6942_v38  ;;  %v7070_v48 = vld [vmem:[%s17415_s3 + $0x6a0] sm:$0xff]  ;;  %6819 = vst.msk [vmem:[%s17415_s3 + $0x6c8] sm:$0xff] %vm3309_vm3, %v10351_v42  ;;  %3398 = vst.msk [vmem:[%s17415_s3 + $0x2c0] sm:$0xff] %vm3309_vm3, %v2982_v45  ;;  %v6403_v50 = vpop.f32.mrb[89].mxu1 }
 0x390   :  { %7480 = vst.msk [vmem:[%s17415_s3 + $0x2a8] sm:$0xff] %vm3309_vm3, %v7224_v49  ;;  %v7351_v44 = vadd.f32 %v14218_v2, %v7070_v48  ;;  %6818 = vst.msk [vmem:[%s17415_s3 + $0x6c0] sm:$0xff] %vm3309_vm3, %v6403_v50 }
 0x391   :  { %7608 = vst.msk [vmem:[%s17415_s3 + $0x6a8] sm:$0xff] %vm3309_vm3, %v7352_v46  ;;  %7479 = vst.msk [vmem:[%s17415_s3 + $0x2a0] sm:$0xff] %vm3309_vm3, %v7223_v47  ;;  %v6945_v51 = vld [vmem:[%s17415_s3 + $0x2b8] sm:$0xff]  ;;  %v9760_v52 = vpop.f32.mrb[90].mxu0 }
 0x392   :  { %7607 = vst.msk [vmem:[%s17415_s3 + $0x6a0] sm:$0xff] %vm3309_vm3, %v7351_v44  ;;  %v7226_v53 = vadd.f32 %v14218_v2, %v6945_v51  ;;  %v7073_v54 = vld [vmem:[%s17415_s3 + $0x6b8] sm:$0xff]  ;;  %v6944_v55 = vld [vmem:[%s17415_s3 + $0x2b0] sm:$0xff]  ;;  %3401 = vst.msk [vmem:[%s17415_s3 + $0x2d8] sm:$0xff] %vm3309_vm3, %v9760_v52  ;;  %v10354_v56 = vpop.f32.mrb[90].mxu1  ;;  %v2992_v57 = vpop.f32.mrb[91].mxu0 }
 0x393   :  { %v7354_v58 = vadd.f32 %v14218_v2, %v7073_v54  ;;  %v7225_v59 = vadd.f32 %v14218_v2, %v6944_v55  ;;  %v7072_v60 = vld [vmem:[%s17415_s3 + $0x6b0] sm:$0xff]  ;;  %6821 = vst.msk [vmem:[%s17415_s3 + $0x6d8] sm:$0xff] %vm3309_vm3, %v10354_v56  ;;  %3400 = vst.msk [vmem:[%s17415_s3 + $0x2d0] sm:$0xff] %vm3309_vm3, %v2992_v57  ;;  %v6413_v61 = vpop.f32.mrb[91].mxu1 }
 0x394   :  { %7482 = vst.msk [vmem:[%s17415_s3 + $0x2b8] sm:$0xff] %vm3309_vm3, %v7226_v53  ;;  %v7353_v62 = vadd.f32 %v14218_v2, %v7072_v60  ;;  %6820 = vst.msk [vmem:[%s17415_s3 + $0x6d0] sm:$0xff] %vm3309_vm3, %v6413_v61 }
 0x395   :  { %7610 = vst.msk [vmem:[%s17415_s3 + $0x6b8] sm:$0xff] %vm3309_vm3, %v7354_v58  ;;  %7481 = vst.msk [vmem:[%s17415_s3 + $0x2b0] sm:$0xff] %vm3309_vm3, %v7225_v59  ;;  %v6947_v63 = vld [vmem:[%s17415_s3 + $0x2c8] sm:$0xff]  ;;  %v9763_v0 = vpop.f32.mrb[92].mxu0 }
 0x396   :  { %7609 = vst.msk [vmem:[%s17415_s3 + $0x6b0] sm:$0xff] %vm3309_vm3, %v7353_v62  ;;  %v7228_v1 = vadd.f32 %v14218_v2, %v6947_v63  ;;  %v7075_v3 = vld [vmem:[%s17415_s3 + $0x6c8] sm:$0xff]  ;;  %v6946_v4 = vld [vmem:[%s17415_s3 + $0x2c0] sm:$0xff]  ;;  %3403 = vst.msk [vmem:[%s17415_s3 + $0x2e8] sm:$0xff] %vm3309_vm3, %v9763_v0  ;;  %v10357_v37 = vpop.f32.mrb[92].mxu1  ;;  %v3002_v43 = vpop.f32.mrb[93].mxu0 }
 0x397   :  { %v7356_v5 = vadd.f32 %v14218_v2, %v7075_v3  ;;  %v7227_v6 = vadd.f32 %v14218_v2, %v6946_v4  ;;  %v7074_v7 = vld [vmem:[%s17415_s3 + $0x6c0] sm:$0xff]  ;;  %6823 = vst.msk [vmem:[%s17415_s3 + $0x6e8] sm:$0xff] %vm3309_vm3, %v10357_v37  ;;  %3402 = vst.msk [vmem:[%s17415_s3 + $0x2e0] sm:$0xff] %vm3309_vm3, %v3002_v43  ;;  %v6423_v8 = vpop.f32.mrb[93].mxu1 }
 0x398   :  { %7484 = vst.msk [vmem:[%s17415_s3 + $0x2c8] sm:$0xff] %vm3309_vm3, %v7228_v1  ;;  %v7355_v9 = vadd.f32 %v14218_v2, %v7074_v7  ;;  %6822 = vst.msk [vmem:[%s17415_s3 + $0x6e0] sm:$0xff] %vm3309_vm3, %v6423_v8 }
 0x399   :  { %7612 = vst.msk [vmem:[%s17415_s3 + $0x6c8] sm:$0xff] %vm3309_vm3, %v7356_v5  ;;  %7483 = vst.msk [vmem:[%s17415_s3 + $0x2c0] sm:$0xff] %vm3309_vm3, %v7227_v6  ;;  %v6949_v10 = vld [vmem:[%s17415_s3 + $0x2d8] sm:$0xff]  ;;  %v9766_v11 = vpop.f32.mrb[94].mxu0 }
 0x39a   :  { %7611 = vst.msk [vmem:[%s17415_s3 + $0x6c0] sm:$0xff] %vm3309_vm3, %v7355_v9  ;;  %v7230_v12 = vadd.f32 %v14218_v2, %v6949_v10  ;;  %v7077_v13 = vld [vmem:[%s17415_s3 + $0x6d8] sm:$0xff]  ;;  %v6948_v14 = vld [vmem:[%s17415_s3 + $0x2d0] sm:$0xff]  ;;  %3405 = vst.msk [vmem:[%s17415_s3 + $0x2f8] sm:$0xff] %vm3309_vm3, %v9766_v11  ;;  %v10360_v15 = vpop.f32.mrb[94].mxu1  ;;  %v3012_v16 = vpop.f32.mrb[95].mxu0 }
 0x39b   :  { %v7358_v17 = vadd.f32 %v14218_v2, %v7077_v13  ;;  %v7229_v18 = vadd.f32 %v14218_v2, %v6948_v14  ;;  %v7076_v19 = vld [vmem:[%s17415_s3 + $0x6d0] sm:$0xff]  ;;  %6825 = vst.msk [vmem:[%s17415_s3 + $0x6f8] sm:$0xff] %vm3309_vm3, %v10360_v15  ;;  %3404 = vst.msk [vmem:[%s17415_s3 + $0x2f0] sm:$0xff] %vm3309_vm3, %v3012_v16  ;;  %v6433_v20 = vpop.f32.mrb[95].mxu1 }
 0x39c   :  { %7486 = vst.msk [vmem:[%s17415_s3 + $0x2d8] sm:$0xff] %vm3309_vm3, %v7230_v12  ;;  %v7357_v21 = vadd.f32 %v14218_v2, %v7076_v19  ;;  %6824 = vst.msk [vmem:[%s17415_s3 + $0x6f0] sm:$0xff] %vm3309_vm3, %v6433_v20 }
 0x39d   :  { %7614 = vst.msk [vmem:[%s17415_s3 + $0x6d8] sm:$0xff] %vm3309_vm3, %v7358_v17  ;;  %7485 = vst.msk [vmem:[%s17415_s3 + $0x2d0] sm:$0xff] %vm3309_vm3, %v7229_v18  ;;  %v6951_v22 = vld [vmem:[%s17415_s3 + $0x2e8] sm:$0xff]  ;;  %v9769_v23 = vpop.f32.mrb[96].mxu0 }
 0x39e   :  { %7613 = vst.msk [vmem:[%s17415_s3 + $0x6d0] sm:$0xff] %vm3309_vm3, %v7357_v21  ;;  %v7232_v24 = vadd.f32 %v14218_v2, %v6951_v22  ;;  %v7079_v25 = vld [vmem:[%s17415_s3 + $0x6e8] sm:$0xff]  ;;  %v6950_v26 = vld [vmem:[%s17415_s3 + $0x2e0] sm:$0xff]  ;;  %3407 = vst.msk [vmem:[%s17415_s3 + $0x308] sm:$0xff] %vm3309_vm3, %v9769_v23  ;;  %v10363_v27 = vpop.f32.mrb[96].mxu1  ;;  %v3022_v28 = vpop.f32.mrb[97].mxu0 }
 0x39f   :  { %v7360_v29 = vadd.f32 %v14218_v2, %v7079_v25  ;;  %v7231_v30 = vadd.f32 %v14218_v2, %v6950_v26  ;;  %v7078_v31 = vld [vmem:[%s17415_s3 + $0x6e0] sm:$0xff]  ;;  %6827 = vst.msk [vmem:[%s17415_s3 + $0x708] sm:$0xff] %vm3309_vm3, %v10363_v27  ;;  %3406 = vst.msk [vmem:[%s17415_s3 + $0x300] sm:$0xff] %vm3309_vm3, %v3022_v28  ;;  %v6443_v32 = vpop.f32.mrb[97].mxu1 }
 0x3a0   :  { %7488 = vst.msk [vmem:[%s17415_s3 + $0x2e8] sm:$0xff] %vm3309_vm3, %v7232_v24  ;;  %v7359_v33 = vadd.f32 %v14218_v2, %v7078_v31  ;;  %6826 = vst.msk [vmem:[%s17415_s3 + $0x700] sm:$0xff] %vm3309_vm3, %v6443_v32 }
 0x3a1   :  { %7616 = vst.msk [vmem:[%s17415_s3 + $0x6e8] sm:$0xff] %vm3309_vm3, %v7360_v29  ;;  %7487 = vst.msk [vmem:[%s17415_s3 + $0x2e0] sm:$0xff] %vm3309_vm3, %v7231_v30  ;;  %v6953_v34 = vld [vmem:[%s17415_s3 + $0x2f8] sm:$0xff]  ;;  %v9772_v41 = vpop.f32.mrb[98].mxu0 }
 0x3a2   :  { %7615 = vst.msk [vmem:[%s17415_s3 + $0x6e0] sm:$0xff] %vm3309_vm3, %v7359_v33  ;;  %v7234_v35 = vadd.f32 %v14218_v2, %v6953_v34  ;;  %v7081_v36 = vld [vmem:[%s17415_s3 + $0x6f8] sm:$0xff]  ;;  %v6952_v39 = vld [vmem:[%s17415_s3 + $0x2f0] sm:$0xff]  ;;  %3409 = vst.msk [vmem:[%s17415_s3 + $0x318] sm:$0xff] %vm3309_vm3, %v9772_v41  ;;  %v10366_v49 = vpop.f32.mrb[98].mxu1  ;;  %v3032_v40 = vpop.f32.mrb[99].mxu0 }
 0x3a3   :  { %v7362_v38 = vadd.f32 %v14218_v2, %v7081_v36  ;;  %v7233_v42 = vadd.f32 %v14218_v2, %v6952_v39  ;;  %v7080_v45 = vld [vmem:[%s17415_s3 + $0x6f0] sm:$0xff]  ;;  %6829 = vst.msk [vmem:[%s17415_s3 + $0x718] sm:$0xff] %vm3309_vm3, %v10366_v49  ;;  %3408 = vst.msk [vmem:[%s17415_s3 + $0x310] sm:$0xff] %vm3309_vm3, %v3032_v40  ;;  %v6453_v46 = vpop.f32.mrb[99].mxu1 }
 0x3a4   :  { %7490 = vst.msk [vmem:[%s17415_s3 + $0x2f8] sm:$0xff] %vm3309_vm3, %v7234_v35  ;;  %v7361_v47 = vadd.f32 %v14218_v2, %v7080_v45  ;;  %6828 = vst.msk [vmem:[%s17415_s3 + $0x710] sm:$0xff] %vm3309_vm3, %v6453_v46 }
 0x3a5   :  { %7618 = vst.msk [vmem:[%s17415_s3 + $0x6f8] sm:$0xff] %vm3309_vm3, %v7362_v38  ;;  %7489 = vst.msk [vmem:[%s17415_s3 + $0x2f0] sm:$0xff] %vm3309_vm3, %v7233_v42  ;;  %v6955_v48 = vld [vmem:[%s17415_s3 + $0x308] sm:$0xff]  ;;  %v9775_v50 = vpop.f32.mrb[100].mxu0 }
 0x3a6   :  { %7617 = vst.msk [vmem:[%s17415_s3 + $0x6f0] sm:$0xff] %vm3309_vm3, %v7361_v47  ;;  %v7236_v44 = vadd.f32 %v14218_v2, %v6955_v48  ;;  %v7083_v51 = vld [vmem:[%s17415_s3 + $0x708] sm:$0xff]  ;;  %v6954_v52 = vld [vmem:[%s17415_s3 + $0x300] sm:$0xff]  ;;  %3411 = vst.msk [vmem:[%s17415_s3 + $0x328] sm:$0xff] %vm3309_vm3, %v9775_v50  ;;  %v10369_v53 = vpop.f32.mrb[100].mxu1  ;;  %v3042_v54 = vpop.f32.mrb[101].mxu0 }
 0x3a7   :  { %v7364_v55 = vadd.f32 %v14218_v2, %v7083_v51  ;;  %v7235_v56 = vadd.f32 %v14218_v2, %v6954_v52  ;;  %v7082_v57 = vld [vmem:[%s17415_s3 + $0x700] sm:$0xff]  ;;  %6831 = vst.msk [vmem:[%s17415_s3 + $0x728] sm:$0xff] %vm3309_vm3, %v10369_v53  ;;  %3410 = vst.msk [vmem:[%s17415_s3 + $0x320] sm:$0xff] %vm3309_vm3, %v3042_v54  ;;  %v6463_v58 = vpop.f32.mrb[101].mxu1 }
 0x3a8   :  { %7492 = vst.msk [vmem:[%s17415_s3 + $0x308] sm:$0xff] %vm3309_vm3, %v7236_v44  ;;  %v7363_v59 = vadd.f32 %v14218_v2, %v7082_v57  ;;  %6830 = vst.msk [vmem:[%s17415_s3 + $0x720] sm:$0xff] %vm3309_vm3, %v6463_v58 }
 0x3a9   :  { %7620 = vst.msk [vmem:[%s17415_s3 + $0x708] sm:$0xff] %vm3309_vm3, %v7364_v55  ;;  %7491 = vst.msk [vmem:[%s17415_s3 + $0x300] sm:$0xff] %vm3309_vm3, %v7235_v56  ;;  %v6957_v60 = vld [vmem:[%s17415_s3 + $0x318] sm:$0xff]  ;;  %v9778_v61 = vpop.f32.mrb[102].mxu0 }
 0x3aa   :  { %7619 = vst.msk [vmem:[%s17415_s3 + $0x700] sm:$0xff] %vm3309_vm3, %v7363_v59  ;;  %v7238_v62 = vadd.f32 %v14218_v2, %v6957_v60  ;;  %v7085_v63 = vld [vmem:[%s17415_s3 + $0x718] sm:$0xff]  ;;  %v6956_v0 = vld [vmem:[%s17415_s3 + $0x310] sm:$0xff]  ;;  %3413 = vst.msk [vmem:[%s17415_s3 + $0x338] sm:$0xff] %vm3309_vm3, %v9778_v61  ;;  %v10372_v1 = vpop.f32.mrb[102].mxu1  ;;  %v3052_v3 = vpop.f32.mrb[103].mxu0 }
 0x3ab   :  { %v7366_v4 = vadd.f32 %v14218_v2, %v7085_v63  ;;  %v7237_v37 = vadd.f32 %v14218_v2, %v6956_v0  ;;  %v7084_v43 = vld [vmem:[%s17415_s3 + $0x710] sm:$0xff]  ;;  %6833 = vst.msk [vmem:[%s17415_s3 + $0x738] sm:$0xff] %vm3309_vm3, %v10372_v1  ;;  %3412 = vst.msk [vmem:[%s17415_s3 + $0x330] sm:$0xff] %vm3309_vm3, %v3052_v3  ;;  %v6473_v5 = vpop.f32.mrb[103].mxu1 }
 0x3ac   :  { %7494 = vst.msk [vmem:[%s17415_s3 + $0x318] sm:$0xff] %vm3309_vm3, %v7238_v62  ;;  %v7365_v6 = vadd.f32 %v14218_v2, %v7084_v43  ;;  %6832 = vst.msk [vmem:[%s17415_s3 + $0x730] sm:$0xff] %vm3309_vm3, %v6473_v5 }
 0x3ad   :  { %7622 = vst.msk [vmem:[%s17415_s3 + $0x718] sm:$0xff] %vm3309_vm3, %v7366_v4  ;;  %7493 = vst.msk [vmem:[%s17415_s3 + $0x310] sm:$0xff] %vm3309_vm3, %v7237_v37  ;;  %v6959_v7 = vld [vmem:[%s17415_s3 + $0x328] sm:$0xff]  ;;  %v9781_v8 = vpop.f32.mrb[104].mxu0 }
 0x3ae   :  { %7621 = vst.msk [vmem:[%s17415_s3 + $0x710] sm:$0xff] %vm3309_vm3, %v7365_v6  ;;  %v7240_v9 = vadd.f32 %v14218_v2, %v6959_v7  ;;  %v7087_v10 = vld [vmem:[%s17415_s3 + $0x728] sm:$0xff]  ;;  %v6958_v11 = vld [vmem:[%s17415_s3 + $0x320] sm:$0xff]  ;;  %3415 = vst.msk [vmem:[%s17415_s3 + $0x348] sm:$0xff] %vm3309_vm3, %v9781_v8  ;;  %v10375_v12 = vpop.f32.mrb[104].mxu1  ;;  %v3062_v13 = vpop.f32.mrb[105].mxu0 }
 0x3af   :  { %v7368_v14 = vadd.f32 %v14218_v2, %v7087_v10  ;;  %v7239_v15 = vadd.f32 %v14218_v2, %v6958_v11  ;;  %v7086_v16 = vld [vmem:[%s17415_s3 + $0x720] sm:$0xff]  ;;  %6835 = vst.msk [vmem:[%s17415_s3 + $0x748] sm:$0xff] %vm3309_vm3, %v10375_v12  ;;  %3414 = vst.msk [vmem:[%s17415_s3 + $0x340] sm:$0xff] %vm3309_vm3, %v3062_v13  ;;  %v6483_v17 = vpop.f32.mrb[105].mxu1 }
 0x3b0   :  { %7496 = vst.msk [vmem:[%s17415_s3 + $0x328] sm:$0xff] %vm3309_vm3, %v7240_v9  ;;  %v7367_v18 = vadd.f32 %v14218_v2, %v7086_v16  ;;  %6834 = vst.msk [vmem:[%s17415_s3 + $0x740] sm:$0xff] %vm3309_vm3, %v6483_v17 }
 0x3b1   :  { %7624 = vst.msk [vmem:[%s17415_s3 + $0x728] sm:$0xff] %vm3309_vm3, %v7368_v14  ;;  %7495 = vst.msk [vmem:[%s17415_s3 + $0x320] sm:$0xff] %vm3309_vm3, %v7239_v15  ;;  %v6961_v19 = vld [vmem:[%s17415_s3 + $0x338] sm:$0xff]  ;;  %v9784_v20 = vpop.f32.mrb[106].mxu0 }
 0x3b2   :  { %7623 = vst.msk [vmem:[%s17415_s3 + $0x720] sm:$0xff] %vm3309_vm3, %v7367_v18  ;;  %v7242_v21 = vadd.f32 %v14218_v2, %v6961_v19  ;;  %v7089_v22 = vld [vmem:[%s17415_s3 + $0x738] sm:$0xff]  ;;  %v6960_v23 = vld [vmem:[%s17415_s3 + $0x330] sm:$0xff]  ;;  %3417 = vst.msk [vmem:[%s17415_s3 + $0x358] sm:$0xff] %vm3309_vm3, %v9784_v20  ;;  %v10378_v24 = vpop.f32.mrb[106].mxu1  ;;  %v3072_v25 = vpop.f32.mrb[107].mxu0 }
 0x3b3   :  { %v7370_v26 = vadd.f32 %v14218_v2, %v7089_v22  ;;  %v7241_v27 = vadd.f32 %v14218_v2, %v6960_v23  ;;  %v7088_v28 = vld [vmem:[%s17415_s3 + $0x730] sm:$0xff]  ;;  %6837 = vst.msk [vmem:[%s17415_s3 + $0x758] sm:$0xff] %vm3309_vm3, %v10378_v24  ;;  %3416 = vst.msk [vmem:[%s17415_s3 + $0x350] sm:$0xff] %vm3309_vm3, %v3072_v25  ;;  %v6493_v29 = vpop.f32.mrb[107].mxu1 }
 0x3b4   :  { %7498 = vst.msk [vmem:[%s17415_s3 + $0x338] sm:$0xff] %vm3309_vm3, %v7242_v21  ;;  %v7369_v30 = vadd.f32 %v14218_v2, %v7088_v28  ;;  %6836 = vst.msk [vmem:[%s17415_s3 + $0x750] sm:$0xff] %vm3309_vm3, %v6493_v29 }
 0x3b5   :  { %7626 = vst.msk [vmem:[%s17415_s3 + $0x738] sm:$0xff] %vm3309_vm3, %v7370_v26  ;;  %7497 = vst.msk [vmem:[%s17415_s3 + $0x330] sm:$0xff] %vm3309_vm3, %v7241_v27  ;;  %v6963_v31 = vld [vmem:[%s17415_s3 + $0x348] sm:$0xff]  ;;  %v9787_v32 = vpop.f32.mrb[108].mxu0 }
 0x3b6   :  { %7625 = vst.msk [vmem:[%s17415_s3 + $0x730] sm:$0xff] %vm3309_vm3, %v7369_v30  ;;  %v7244_v33 = vadd.f32 %v14218_v2, %v6963_v31  ;;  %v7091_v34 = vld [vmem:[%s17415_s3 + $0x748] sm:$0xff]  ;;  %v6962_v41 = vld [vmem:[%s17415_s3 + $0x340] sm:$0xff]  ;;  %3419 = vst.msk [vmem:[%s17415_s3 + $0x368] sm:$0xff] %vm3309_vm3, %v9787_v32  ;;  %v10381_v35 = vpop.f32.mrb[108].mxu1  ;;  %v3082_v36 = vpop.f32.mrb[109].mxu0 }
 0x3b7   :  { %v7372_v39 = vadd.f32 %v14218_v2, %v7091_v34  ;;  %v7243_v49 = vadd.f32 %v14218_v2, %v6962_v41  ;;  %v7090_v40 = vld [vmem:[%s17415_s3 + $0x740] sm:$0xff]  ;;  %6839 = vst.msk [vmem:[%s17415_s3 + $0x768] sm:$0xff] %vm3309_vm3, %v10381_v35  ;;  %3418 = vst.msk [vmem:[%s17415_s3 + $0x360] sm:$0xff] %vm3309_vm3, %v3082_v36  ;;  %v6503_v38 = vpop.f32.mrb[109].mxu1 }
 0x3b8   :  { %7500 = vst.msk [vmem:[%s17415_s3 + $0x348] sm:$0xff] %vm3309_vm3, %v7244_v33  ;;  %v7371_v42 = vadd.f32 %v14218_v2, %v7090_v40  ;;  %6838 = vst.msk [vmem:[%s17415_s3 + $0x760] sm:$0xff] %vm3309_vm3, %v6503_v38 }
 0x3b9   :  { %7628 = vst.msk [vmem:[%s17415_s3 + $0x748] sm:$0xff] %vm3309_vm3, %v7372_v39  ;;  %7499 = vst.msk [vmem:[%s17415_s3 + $0x340] sm:$0xff] %vm3309_vm3, %v7243_v49  ;;  %v6965_v45 = vld [vmem:[%s17415_s3 + $0x358] sm:$0xff]  ;;  %v9790_v46 = vpop.f32.mrb[110].mxu0 }
 0x3ba   :  { %7627 = vst.msk [vmem:[%s17415_s3 + $0x740] sm:$0xff] %vm3309_vm3, %v7371_v42  ;;  %v7246_v47 = vadd.f32 %v14218_v2, %v6965_v45  ;;  %v7093_v48 = vld [vmem:[%s17415_s3 + $0x758] sm:$0xff]  ;;  %v6964_v50 = vld [vmem:[%s17415_s3 + $0x350] sm:$0xff]  ;;  %3421 = vst.msk [vmem:[%s17415_s3 + $0x378] sm:$0xff] %vm3309_vm3, %v9790_v46  ;;  %v10384_v44 = vpop.f32.mrb[110].mxu1  ;;  %v3092_v51 = vpop.f32.mrb[111].mxu0 }
 0x3bb   :  { %v7374_v52 = vadd.f32 %v14218_v2, %v7093_v48  ;;  %v7245_v53 = vadd.f32 %v14218_v2, %v6964_v50  ;;  %v7092_v54 = vld [vmem:[%s17415_s3 + $0x750] sm:$0xff]  ;;  %6841 = vst.msk [vmem:[%s17415_s3 + $0x778] sm:$0xff] %vm3309_vm3, %v10384_v44  ;;  %3420 = vst.msk [vmem:[%s17415_s3 + $0x370] sm:$0xff] %vm3309_vm3, %v3092_v51  ;;  %v6513_v55 = vpop.f32.mrb[111].mxu1 }
 0x3bc   :  { %7502 = vst.msk [vmem:[%s17415_s3 + $0x358] sm:$0xff] %vm3309_vm3, %v7246_v47  ;;  %v7373_v56 = vadd.f32 %v14218_v2, %v7092_v54  ;;  %6840 = vst.msk [vmem:[%s17415_s3 + $0x770] sm:$0xff] %vm3309_vm3, %v6513_v55 }
 0x3bd   :  { %7630 = vst.msk [vmem:[%s17415_s3 + $0x758] sm:$0xff] %vm3309_vm3, %v7374_v52  ;;  %7501 = vst.msk [vmem:[%s17415_s3 + $0x350] sm:$0xff] %vm3309_vm3, %v7245_v53  ;;  %v6967_v57 = vld [vmem:[%s17415_s3 + $0x368] sm:$0xff]  ;;  %v9793_v58 = vpop.f32.mrb[112].mxu0 }
 0x3be   :  { %7629 = vst.msk [vmem:[%s17415_s3 + $0x750] sm:$0xff] %vm3309_vm3, %v7373_v56  ;;  %v7248_v59 = vadd.f32 %v14218_v2, %v6967_v57  ;;  %v7095_v60 = vld [vmem:[%s17415_s3 + $0x768] sm:$0xff]  ;;  %v6966_v61 = vld [vmem:[%s17415_s3 + $0x360] sm:$0xff]  ;;  %3423 = vst.msk [vmem:[%s17415_s3 + $0x388] sm:$0xff] %vm3309_vm3, %v9793_v58  ;;  %v10387_v62 = vpop.f32.mrb[112].mxu1  ;;  %v3102_v63 = vpop.f32.mrb[113].mxu0 }
 0x3bf   :  { %v7376_v0 = vadd.f32 %v14218_v2, %v7095_v60  ;;  %v7247_v1 = vadd.f32 %v14218_v2, %v6966_v61  ;;  %v7094_v3 = vld [vmem:[%s17415_s3 + $0x760] sm:$0xff]  ;;  %6843 = vst.msk [vmem:[%s17415_s3 + $0x788] sm:$0xff] %vm3309_vm3, %v10387_v62  ;;  %3422 = vst.msk [vmem:[%s17415_s3 + $0x380] sm:$0xff] %vm3309_vm3, %v3102_v63  ;;  %v6523_v4 = vpop.f32.mrb[113].mxu1 }
 0x3c0   :  { %7504 = vst.msk [vmem:[%s17415_s3 + $0x368] sm:$0xff] %vm3309_vm3, %v7248_v59  ;;  %v7375_v37 = vadd.f32 %v14218_v2, %v7094_v3  ;;  %6842 = vst.msk [vmem:[%s17415_s3 + $0x780] sm:$0xff] %vm3309_vm3, %v6523_v4 }
 0x3c1   :  { %7632 = vst.msk [vmem:[%s17415_s3 + $0x768] sm:$0xff] %vm3309_vm3, %v7376_v0  ;;  %7503 = vst.msk [vmem:[%s17415_s3 + $0x360] sm:$0xff] %vm3309_vm3, %v7247_v1  ;;  %v6969_v43 = vld [vmem:[%s17415_s3 + $0x378] sm:$0xff]  ;;  %v9796_v5 = vpop.f32.mrb[114].mxu0 }
 0x3c2   :  { %7631 = vst.msk [vmem:[%s17415_s3 + $0x760] sm:$0xff] %vm3309_vm3, %v7375_v37  ;;  %v7250_v6 = vadd.f32 %v14218_v2, %v6969_v43  ;;  %v7097_v7 = vld [vmem:[%s17415_s3 + $0x778] sm:$0xff]  ;;  %v6968_v8 = vld [vmem:[%s17415_s3 + $0x370] sm:$0xff]  ;;  %3425 = vst.msk [vmem:[%s17415_s3 + $0x398] sm:$0xff] %vm3309_vm3, %v9796_v5  ;;  %v10390_v9 = vpop.f32.mrb[114].mxu1  ;;  %v3112_v10 = vpop.f32.mrb[115].mxu0 }
 0x3c3   :  { %v7378_v11 = vadd.f32 %v14218_v2, %v7097_v7  ;;  %v7249_v12 = vadd.f32 %v14218_v2, %v6968_v8  ;;  %v7096_v13 = vld [vmem:[%s17415_s3 + $0x770] sm:$0xff]  ;;  %6845 = vst.msk [vmem:[%s17415_s3 + $0x798] sm:$0xff] %vm3309_vm3, %v10390_v9  ;;  %3424 = vst.msk [vmem:[%s17415_s3 + $0x390] sm:$0xff] %vm3309_vm3, %v3112_v10  ;;  %v6533_v14 = vpop.f32.mrb[115].mxu1 }
 0x3c4   :  { %7506 = vst.msk [vmem:[%s17415_s3 + $0x378] sm:$0xff] %vm3309_vm3, %v7250_v6  ;;  %v7377_v15 = vadd.f32 %v14218_v2, %v7096_v13  ;;  %6844 = vst.msk [vmem:[%s17415_s3 + $0x790] sm:$0xff] %vm3309_vm3, %v6533_v14 }
 0x3c5   :  { %7634 = vst.msk [vmem:[%s17415_s3 + $0x778] sm:$0xff] %vm3309_vm3, %v7378_v11  ;;  %7505 = vst.msk [vmem:[%s17415_s3 + $0x370] sm:$0xff] %vm3309_vm3, %v7249_v12  ;;  %v6971_v16 = vld [vmem:[%s17415_s3 + $0x388] sm:$0xff]  ;;  %v9799_v17 = vpop.f32.mrb[116].mxu0 }
 0x3c6   :  { %7633 = vst.msk [vmem:[%s17415_s3 + $0x770] sm:$0xff] %vm3309_vm3, %v7377_v15  ;;  %v7252_v18 = vadd.f32 %v14218_v2, %v6971_v16  ;;  %v7099_v19 = vld [vmem:[%s17415_s3 + $0x788] sm:$0xff]  ;;  %v6970_v20 = vld [vmem:[%s17415_s3 + $0x380] sm:$0xff]  ;;  %3427 = vst.msk [vmem:[%s17415_s3 + $0x3a8] sm:$0xff] %vm3309_vm3, %v9799_v17  ;;  %v10393_v21 = vpop.f32.mrb[116].mxu1  ;;  %v3122_v22 = vpop.f32.mrb[117].mxu0 }
 0x3c7   :  { %v7380_v23 = vadd.f32 %v14218_v2, %v7099_v19  ;;  %v7251_v24 = vadd.f32 %v14218_v2, %v6970_v20  ;;  %v7098_v25 = vld [vmem:[%s17415_s3 + $0x780] sm:$0xff]  ;;  %6847 = vst.msk [vmem:[%s17415_s3 + $0x7a8] sm:$0xff] %vm3309_vm3, %v10393_v21  ;;  %3426 = vst.msk [vmem:[%s17415_s3 + $0x3a0] sm:$0xff] %vm3309_vm3, %v3122_v22  ;;  %v6543_v26 = vpop.f32.mrb[117].mxu1 }
 0x3c8   :  { %7508 = vst.msk [vmem:[%s17415_s3 + $0x388] sm:$0xff] %vm3309_vm3, %v7252_v18  ;;  %v7379_v27 = vadd.f32 %v14218_v2, %v7098_v25  ;;  %6846 = vst.msk [vmem:[%s17415_s3 + $0x7a0] sm:$0xff] %vm3309_vm3, %v6543_v26 }
 0x3c9   :  { %7636 = vst.msk [vmem:[%s17415_s3 + $0x788] sm:$0xff] %vm3309_vm3, %v7380_v23  ;;  %7507 = vst.msk [vmem:[%s17415_s3 + $0x380] sm:$0xff] %vm3309_vm3, %v7251_v24  ;;  %v6973_v28 = vld [vmem:[%s17415_s3 + $0x398] sm:$0xff]  ;;  %v9802_v29 = vpop.f32.mrb[118].mxu0 }
 0x3ca   :  { %7635 = vst.msk [vmem:[%s17415_s3 + $0x780] sm:$0xff] %vm3309_vm3, %v7379_v27  ;;  %v7254_v30 = vadd.f32 %v14218_v2, %v6973_v28  ;;  %v7101_v31 = vld [vmem:[%s17415_s3 + $0x798] sm:$0xff]  ;;  %v6972_v32 = vld [vmem:[%s17415_s3 + $0x390] sm:$0xff]  ;;  %3429 = vst.msk [vmem:[%s17415_s3 + $0x3b8] sm:$0xff] %vm3309_vm3, %v9802_v29  ;;  %v10396_v33 = vpop.f32.mrb[118].mxu1  ;;  %v3132_v34 = vpop.f32.mrb[119].mxu0 }
 0x3cb   :  { %v7382_v41 = vadd.f32 %v14218_v2, %v7101_v31  ;;  %v7253_v35 = vadd.f32 %v14218_v2, %v6972_v32  ;;  %v7100_v36 = vld [vmem:[%s17415_s3 + $0x790] sm:$0xff]  ;;  %6849 = vst.msk [vmem:[%s17415_s3 + $0x7b8] sm:$0xff] %vm3309_vm3, %v10396_v33  ;;  %3428 = vst.msk [vmem:[%s17415_s3 + $0x3b0] sm:$0xff] %vm3309_vm3, %v3132_v34  ;;  %v6553_v39 = vpop.f32.mrb[119].mxu1 }
 0x3cc   :  { %7510 = vst.msk [vmem:[%s17415_s3 + $0x398] sm:$0xff] %vm3309_vm3, %v7254_v30  ;;  %v7381_v49 = vadd.f32 %v14218_v2, %v7100_v36  ;;  %6848 = vst.msk [vmem:[%s17415_s3 + $0x7b0] sm:$0xff] %vm3309_vm3, %v6553_v39 }
 0x3cd   :  { %7638 = vst.msk [vmem:[%s17415_s3 + $0x798] sm:$0xff] %vm3309_vm3, %v7382_v41  ;;  %7509 = vst.msk [vmem:[%s17415_s3 + $0x390] sm:$0xff] %vm3309_vm3, %v7253_v35  ;;  %v6975_v40 = vld [vmem:[%s17415_s3 + $0x3a8] sm:$0xff]  ;;  %v9805_v38 = vpop.f32.mrb[120].mxu0 }
 0x3ce   :  { %7637 = vst.msk [vmem:[%s17415_s3 + $0x790] sm:$0xff] %vm3309_vm3, %v7381_v49  ;;  %v7256_v42 = vadd.f32 %v14218_v2, %v6975_v40  ;;  %v7103_v45 = vld [vmem:[%s17415_s3 + $0x7a8] sm:$0xff]  ;;  %v6974_v46 = vld [vmem:[%s17415_s3 + $0x3a0] sm:$0xff]  ;;  %3431 = vst.msk [vmem:[%s17415_s3 + $0x3c8] sm:$0xff] %vm3309_vm3, %v9805_v38  ;;  %v10399_v47 = vpop.f32.mrb[120].mxu1  ;;  %v3142_v48 = vpop.f32.mrb[121].mxu0 }
 0x3cf   :  { %v7384_v50 = vadd.f32 %v14218_v2, %v7103_v45  ;;  %v7255_v44 = vadd.f32 %v14218_v2, %v6974_v46  ;;  %v7102_v51 = vld [vmem:[%s17415_s3 + $0x7a0] sm:$0xff]  ;;  %6851 = vst.msk [vmem:[%s17415_s3 + $0x7c8] sm:$0xff] %vm3309_vm3, %v10399_v47  ;;  %3430 = vst.msk [vmem:[%s17415_s3 + $0x3c0] sm:$0xff] %vm3309_vm3, %v3142_v48  ;;  %v6563_v52 = vpop.f32.mrb[121].mxu1 }
 0x3d0   :  { %7512 = vst.msk [vmem:[%s17415_s3 + $0x3a8] sm:$0xff] %vm3309_vm3, %v7256_v42  ;;  %v7383_v53 = vadd.f32 %v14218_v2, %v7102_v51  ;;  %6850 = vst.msk [vmem:[%s17415_s3 + $0x7c0] sm:$0xff] %vm3309_vm3, %v6563_v52 }
 0x3d1   :  { %7640 = vst.msk [vmem:[%s17415_s3 + $0x7a8] sm:$0xff] %vm3309_vm3, %v7384_v50  ;;  %7511 = vst.msk [vmem:[%s17415_s3 + $0x3a0] sm:$0xff] %vm3309_vm3, %v7255_v44  ;;  %v6977_v54 = vld [vmem:[%s17415_s3 + $0x3b8] sm:$0xff]  ;;  %v9808_v55 = vpop.f32.mrb[122].mxu0 }
 0x3d2   :  { %7639 = vst.msk [vmem:[%s17415_s3 + $0x7a0] sm:$0xff] %vm3309_vm3, %v7383_v53  ;;  %v7258_v56 = vadd.f32 %v14218_v2, %v6977_v54  ;;  %v7105_v57 = vld [vmem:[%s17415_s3 + $0x7b8] sm:$0xff]  ;;  %v6976_v58 = vld [vmem:[%s17415_s3 + $0x3b0] sm:$0xff]  ;;  %3433 = vst.msk [vmem:[%s17415_s3 + $0x3d8] sm:$0xff] %vm3309_vm3, %v9808_v55  ;;  %v10402_v59 = vpop.f32.mrb[122].mxu1  ;;  %v3152_v60 = vpop.f32.mrb[123].mxu0 }
 0x3d3   :  { %v7386_v61 = vadd.f32 %v14218_v2, %v7105_v57  ;;  %v7257_v62 = vadd.f32 %v14218_v2, %v6976_v58  ;;  %v7104_v63 = vld [vmem:[%s17415_s3 + $0x7b0] sm:$0xff]  ;;  %6853 = vst.msk [vmem:[%s17415_s3 + $0x7d8] sm:$0xff] %vm3309_vm3, %v10402_v59  ;;  %3432 = vst.msk [vmem:[%s17415_s3 + $0x3d0] sm:$0xff] %vm3309_vm3, %v3152_v60  ;;  %v6573_v0 = vpop.f32.mrb[123].mxu1 }
 0x3d4   :  { %7514 = vst.msk [vmem:[%s17415_s3 + $0x3b8] sm:$0xff] %vm3309_vm3, %v7258_v56  ;;  %v7385_v1 = vadd.f32 %v14218_v2, %v7104_v63  ;;  %6852 = vst.msk [vmem:[%s17415_s3 + $0x7d0] sm:$0xff] %vm3309_vm3, %v6573_v0 }
 0x3d5   :  { %7642 = vst.msk [vmem:[%s17415_s3 + $0x7b8] sm:$0xff] %vm3309_vm3, %v7386_v61  ;;  %7513 = vst.msk [vmem:[%s17415_s3 + $0x3b0] sm:$0xff] %vm3309_vm3, %v7257_v62  ;;  %v6979_v3 = vld [vmem:[%s17415_s3 + $0x3c8] sm:$0xff]  ;;  %v9811_v4 = vpop.f32.mrb[124].mxu0 }
 0x3d6   :  { %7641 = vst.msk [vmem:[%s17415_s3 + $0x7b0] sm:$0xff] %vm3309_vm3, %v7385_v1  ;;  %v7260_v37 = vadd.f32 %v14218_v2, %v6979_v3  ;;  %v7107_v43 = vld [vmem:[%s17415_s3 + $0x7c8] sm:$0xff]  ;;  %v6978_v5 = vld [vmem:[%s17415_s3 + $0x3c0] sm:$0xff]  ;;  %3435 = vst.msk [vmem:[%s17415_s3 + $0x3e8] sm:$0xff] %vm3309_vm3, %v9811_v4  ;;  %v10405_v6 = vpop.f32.mrb[124].mxu1  ;;  %v3162_v7 = vpop.f32.mrb[125].mxu0 }
 0x3d7   :  { %v7388_v8 = vadd.f32 %v14218_v2, %v7107_v43  ;;  %v7259_v9 = vadd.f32 %v14218_v2, %v6978_v5  ;;  %v7106_v10 = vld [vmem:[%s17415_s3 + $0x7c0] sm:$0xff]  ;;  %6855 = vst.msk [vmem:[%s17415_s3 + $0x7e8] sm:$0xff] %vm3309_vm3, %v10405_v6  ;;  %3434 = vst.msk [vmem:[%s17415_s3 + $0x3e0] sm:$0xff] %vm3309_vm3, %v3162_v7  ;;  %v6583_v11 = vpop.f32.mrb[125].mxu1 }
 0x3d8   :  { %7516 = vst.msk [vmem:[%s17415_s3 + $0x3c8] sm:$0xff] %vm3309_vm3, %v7260_v37  ;;  %v7387_v12 = vadd.f32 %v14218_v2, %v7106_v10  ;;  %6854 = vst.msk [vmem:[%s17415_s3 + $0x7e0] sm:$0xff] %vm3309_vm3, %v6583_v11 }
 0x3d9   :  { %7644 = vst.msk [vmem:[%s17415_s3 + $0x7c8] sm:$0xff] %vm3309_vm3, %v7388_v8  ;;  %7515 = vst.msk [vmem:[%s17415_s3 + $0x3c0] sm:$0xff] %vm3309_vm3, %v7259_v9  ;;  %v6981_v13 = vld [vmem:[%s17415_s3 + $0x3d8] sm:$0xff]  ;;  %v9814_v14 = vpop.f32.mrb[126].mxu0 }
 0x3da   :  { %7643 = vst.msk [vmem:[%s17415_s3 + $0x7c0] sm:$0xff] %vm3309_vm3, %v7387_v12  ;;  %v7262_v15 = vadd.f32 %v14218_v2, %v6981_v13  ;;  %v7109_v16 = vld [vmem:[%s17415_s3 + $0x7d8] sm:$0xff]  ;;  %v6980_v17 = vld [vmem:[%s17415_s3 + $0x3d0] sm:$0xff]  ;;  %3437 = vst.msk [vmem:[%s17415_s3 + $0x3f8] sm:$0xff] %vm3309_vm3, %v9814_v14  ;;  %v10408_v18 = vpop.f32.mrb[126].mxu1  ;;  %v3172_v19 = vpop.f32.mrb[127].mxu0 }
 0x3db   :  { %v7390_v20 = vadd.f32 %v14218_v2, %v7109_v16  ;;  %v7261_v21 = vadd.f32 %v14218_v2, %v6980_v17  ;;  %v7108_v22 = vld [vmem:[%s17415_s3 + $0x7d0] sm:$0xff]  ;;  %6857 = vst.msk [vmem:[%s17415_s3 + $0x7f8] sm:$0xff] %vm3309_vm3, %v10408_v18  ;;  %3436 = vst.msk [vmem:[%s17415_s3 + $0x3f0] sm:$0xff] %vm3309_vm3, %v3172_v19  ;;  %v6593_v23 = vpop.f32.mrb[127].mxu1 }
 0x3dc   :  { %7518 = vst.msk [vmem:[%s17415_s3 + $0x3d8] sm:$0xff] %vm3309_vm3, %v7262_v15  ;;  %v7389_v24 = vadd.f32 %v14218_v2, %v7108_v22  ;;  %6856 = vst.msk [vmem:[%s17415_s3 + $0x7f0] sm:$0xff] %vm3309_vm3, %v6593_v23 }
 0x3dd   :  { %7646 = vst.msk [vmem:[%s17415_s3 + $0x7d8] sm:$0xff] %vm3309_vm3, %v7390_v20  ;;  %7517 = vst.msk [vmem:[%s17415_s3 + $0x3d0] sm:$0xff] %vm3309_vm3, %v7261_v21  ;;  %v6983_v25 = vld [vmem:[%s17415_s3 + $0x3e8] sm:$0xff] }
 0x3de   :  { %7645 = vst.msk [vmem:[%s17415_s3 + $0x7d0] sm:$0xff] %vm3309_vm3, %v7389_v24  ;;  %v7264_v26 = vadd.f32 %v14218_v2, %v6983_v25  ;;  %v7111_v27 = vld [vmem:[%s17415_s3 + $0x7e8] sm:$0xff]  ;;  %v6982_v28 = vld [vmem:[%s17415_s3 + $0x3e0] sm:$0xff] }
 0x3df   :  { %v7392_v29 = vadd.f32 %v14218_v2, %v7111_v27  ;;  %v7263_v30 = vadd.f32 %v14218_v2, %v6982_v28  ;;  %v7110_v31 = vld [vmem:[%s17415_s3 + $0x7e0] sm:$0xff] }
 0x3e0   :  { %7520 = vst.msk [vmem:[%s17415_s3 + $0x3e8] sm:$0xff] %vm3309_vm3, %v7264_v26  ;;  %v7391_v32 = vadd.f32 %v14218_v2, %v7110_v31 }
 0x3e1   :  { %7648 = vst.msk [vmem:[%s17415_s3 + $0x7e8] sm:$0xff] %vm3309_vm3, %v7392_v29  ;;  %7519 = vst.msk [vmem:[%s17415_s3 + $0x3e0] sm:$0xff] %vm3309_vm3, %v7263_v30  ;;  %v6985_v33 = vld [vmem:[%s17415_s3 + $0x3f8] sm:$0xff] }
 0x3e2   :  { %7647 = vst.msk [vmem:[%s17415_s3 + $0x7e0] sm:$0xff] %vm3309_vm3, %v7391_v32  ;;  %v7266_v34 = vadd.f32 %v14218_v2, %v6985_v33  ;;  %v7113_v41 = vld [vmem:[%s17415_s3 + $0x7f8] sm:$0xff]  ;;  %v6984_v35 = vld [vmem:[%s17415_s3 + $0x3f0] sm:$0xff] }
 0x3e3   :  { %v7394_v36 = vadd.f32 %v14218_v2, %v7113_v41  ;;  %v7265_v39 = vadd.f32 %v14218_v2, %v6984_v35  ;;  %v7112_v49 = vld [vmem:[%s17415_s3 + $0x7f0] sm:$0xff] }
 0x3e4   :  { %7522 = vst.msk [vmem:[%s17415_s3 + $0x3f8] sm:$0xff] %vm3309_vm3, %v7266_v34  ;;  %v7393_v40 = vadd.f32 %v14218_v2, %v7112_v49 }
 0x3e5   :  { %7650 = vst.msk [vmem:[%s17415_s3 + $0x7f8] sm:$0xff] %vm3309_vm3, %v7394_v36  ;;  %7521 = vst.msk [vmem:[%s17415_s3 + $0x3f0] sm:$0xff] %vm3309_vm3, %v7265_v39 }
 0x3e6   :  { %7649 = vst.msk [vmem:[%s17415_s3 + $0x7f0] sm:$0xff] %vm3309_vm3, %v7393_v40 }

</bundles_post_ra>
